<compile_context>
chip_gen: v7x
topology: tpu7x:2x2x1
jax: 0.10.0
libtpu: 0.0.40
codegen_flags: <defaults>
</compile_context>

<pallas_src>
import functools

import jax
import jax.numpy as jnp
from jax import lax
from jax.experimental import pallas as pl
from jax.experimental.pallas import tpu as pltpu

CPAD = 128          # every channel dimension is zero-padded to one lane register
EPS = 1e-5          # PyTorch BatchNorm1d default


# ----------------------------------------------------------------------------
# Fused kernel
# ----------------------------------------------------------------------------

def _pool_relu_bn(y, gamma, beta):
    """MaxPool1d(2,2) + ReLU + training-mode BatchNorm1d on a (B*L, 128) slab.

    Rows are batch-major / length-minor and channels-last, so pooling pairs
    adjacent rows and never crosses a batch boundary (L is even everywhere).
    The BN affine is folded into one per-channel scale/shift.
    """
    rows = y.shape[0]
    y3 = y.reshape(rows // 2, 2, CPAD)                 # minor dim unchanged
    z = jnp.maximum(y3[:, 0, :], y3[:, 1, :])          # MaxPool1d(2, 2)
    z = jnp.maximum(z, 0.0)                            # ReLU
    # one-pass batch statistics (biased variance, torch training mode)
    inv_n = 1.0 / float(rows // 2)
    mean = jnp.sum(z, axis=0, keepdims=True) * inv_n
    var = jnp.sum(z * z, axis=0, keepdims=True) * inv_n - mean * mean
    scale = gamma * lax.rsqrt(var + EPS)               # (1, 128), per channel
    shift = beta - mean * scale                        # (1, 128)
    return z * scale + shift                           # (rows//2, 128)


def wdcnn_kernel(xcol_ref, w1_ref, bgb1_ref,
                 w2_ref, bgb2_ref, w3_ref, bgb3_ref,
                 w4_ref, bgb4_ref, w5_ref, bgb5_ref,
                 fc1w_ref, fc1b_ref, fc2w_ref, fc2b_ref,
                 out_ref, xpad_ref):
    B = xcol_ref.shape[0]
    L1 = xcol_ref.shape[1]              # conv1 output length (128 for L_in=2048)

    # ---- block 1: Conv1d(1, 16, k=64, s=16, p=24) ----------------------------
    # im2col slab (built in the wrapper, zero-padded to 128 lanes) makes the
    # whole conv one lane-dense (B*L1,128)x(128,128) MXU matmul.
    y = jnp.dot(xcol_ref[...].reshape(B * L1, CPAD), w1_ref[...],
                preferred_element_type=jnp.float32) + bgb1_ref[0:1, :]
    h = _pool_relu_bn(y, bgb1_ref[1:2, :], bgb1_ref[2:3, :])      # (B*64, 128)

    # ---- blocks 2..5: Conv1d(k=3, s=1) ---------------------------------------
    def conv3_block(h, w_ref, bgb_ref, pad):
        L_in = h.shape[0] // B
        L_out = L_in if pad == 1 else L_in - 2
        # stage the (zero-bordered) input in VMEM scratch so the 3 shifted
        # reads are plain static slices
        if pad == 1:
            zrow = jnp.zeros((B, 1, CPAD), jnp.float32)
            xpad_ref[:, 0:1, :] = zrow
            xpad_ref[:, L_in + 1:L_in + 2, :] = zrow
            xpad_ref[:, 1:L_in + 1, :] = h.reshape(B, L_in, CPAD)
        else:
            xpad_ref[:, 0:L_in, :] = h.reshape(B, L_in, CPAD)
        y = jnp.dot(xpad_ref[:, 0:L_out, :].reshape(B * L_out, CPAD), w_ref[0],
                    preferred_element_type=jnp.float32)
        for t in (1, 2):
            xs = xpad_ref[:, t:t + L_out, :].reshape(B * L_out, CPAD)
            y = y + jnp.dot(xs, w_ref[t], preferred_element_type=jnp.float32)
        y = y + bgb_ref[0:1, :]
        return _pool_relu_bn(y, bgb_ref[1:2, :], bgb_ref[2:3, :])

    h = conv3_block(h, w2_ref, bgb2_ref, pad=1)        # (B*32, 128)
    h = conv3_block(h, w3_ref, bgb3_ref, pad=1)        # (B*16, 128)
    h = conv3_block(h, w4_ref, bgb4_ref, pad=1)        # (B*8,  128)
    h = conv3_block(h, w5_ref, bgb5_ref, pad=0)        # (B*3,  128)

    # ---- fc head: Flatten + Linear(192,100) + Linear(100,out_class) ----------
    # flatten is expressed as 3 per-position matmuls against the pre-permuted,
    # 128-padded FC1 weight (torch (B, C, L) -> (B, C*L) order baked into it).
    h5 = h.reshape(B, 3, CPAD)
    hid = fc1b_ref[...]                                 # (1, 128) broadcasts
    for l in range(3):
        hid = hid + jnp.dot(h5[:, l, :], fc1w_ref[l],
                            preferred_element_type=jnp.float32)
    out_ref[...] = (jnp.dot(hid, fc2w_ref[...],
                            preferred_element_type=jnp.float32) + fc2b_ref[...])


# ----------------------------------------------------------------------------
# Parameter preparation (torch-layout -> kernel-ready, done once)
# ----------------------------------------------------------------------------

def _pad_vec(v, n=CPAD):
    return jnp.zeros((n,), jnp.float32).at[:v.shape[0]].set(v)


def _prep_bgb(bias, gamma, beta):
    # rows: conv bias / BN gamma / BN beta, padded to 128 lanes
    return jnp.stack([_pad_vec(bias), _pad_vec(gamma), _pad_vec(beta)], axis=0)


def prepare_params(p):
    """Torch-layout params -> tuple of padded / permuted kernel arguments."""
    (w1, b1, g1, be1) = p["convs"][0]                # w1: (16, 1, 64)
    # rows = kernel tap j (0..63, zero-padded to 128), cols = out channel:
    # w1m[j, c] = w1[c, 0, j]
    w1m = jnp.zeros((CPAD, CPAD), jnp.float32).at[:64, :16].set(w1[:, 0, :].T)
    args = [w1m, _prep_bgb(b1, g1, be1)]

    for (w, b, g, be) in p["convs"][1:]:             # w: (Cout, Cin, 3)
        cout, cin, _ = w.shape
        wt = jnp.transpose(w, (2, 1, 0))             # (3, Cin, Cout)
        wpad = jnp.zeros((3, CPAD, CPAD), jnp.float32).at[:, :cin, :cout].set(wt)
        args += [wpad, _prep_bgb(b, g, be)]

    # fc1: torch flattens (B, C=64, L=3) -> feature c*3+l; the kernel flattens
    # channels-last (feature l*128+c), so permute + pad the weight accordingly.
    fc1_w, fc1_b = p["fc1_w"], p["fc1_b"]            # (100, 192), (100,)
    w1r = fc1_w.reshape(100, 64, 3)                  # [h, c, l]
    w1p = jnp.transpose(w1r, (2, 1, 0))              # [l, c, h]
    fc1w = jnp.zeros((3, CPAD, CPAD), jnp.float32).at[:, :64, :100].set(w1p)
    fc1b = _pad_vec(fc1_b).reshape(1, CPAD)

    fc2_w, fc2_b = p["fc2_w"], p["fc2_b"]            # (out_class, 100)
    out_class = fc2_w.shape[0]
    fc2w = jnp.zeros((CPAD, CPAD), jnp.float32).at[:100, :out_class].set(fc2_w.T)
    fc2b = _pad_vec(fc2_b).reshape(1, CPAD)

    args += [fc1w, fc1b, fc2w, fc2b]
    return tuple(args), out_class


# ----------------------------------------------------------------------------
# Forward pass wrapper
# ----------------------------------------------------------------------------

@functools.partial(jax.jit, static_argnames=("out_class",))
def wdcnn_forward(x_ncl, kernel_args, *, out_class):
    """x_ncl: (B, 1, 2048) in PyTorch NCL layout.  Returns (B, out_class)."""
    B, _, L = x_ncl.shape
    # conv1 input prep (pure layout plumbing, done once in XLA):
    #  pad 24 zeros each side, fold the stride-16 grid -> (B, 131, 16), then
    #  im2col the k=64 window as 4 lane-concatenated shifted slices and pad to
    #  128 lanes so the in-kernel conv1 matmul LHS is fully lane-dense.
    xpad = jnp.pad(x_ncl.reshape(B, L), ((0, 0), (24, 24)))
    x1 = xpad.reshape(B, (L + 48) // 16, 16)
    L1 = x1.shape[1] - 3                              # conv1 output length (128)
    xcol = jnp.concatenate([x1[:, t:t + L1, :] for t in range(4)], axis=-1)
    xcol = jnp.pad(xcol, ((0, 0), (0, 0), (0, CPAD - 64)))       # (B, L1, 128)

    out_pad = pl.pallas_call(
        wdcnn_kernel,
        out_shape=jax.ShapeDtypeStruct((B, CPAD), jnp.float32),
        in_specs=[pl.BlockSpec(memory_space=pltpu.MemorySpace.VMEM)
                  for _ in range(15)],
        out_specs=pl.BlockSpec(memory_space=pltpu.MemorySpace.VMEM),
        scratch_shapes=[pltpu.VMEM((B, L1 // 2 + 2, CPAD), jnp.float32)],
    )(xcol, *kernel_args)
    return out_pad[:, :out_class]


# ----------------------------------------------------------------------------
# Deterministic synthetic parameters (matches the module's __init__ shapes)
# ----------------------------------------------------------------------------

def make_params(key, out_class=4):
    convs_cfg = [
        # (C_in, C_out, k, stride, pad)
        (1, 16, 64, 16, 24),
        (16, 32, 3, 1, 1),
        (32, 64, 3, 1, 1),
        (64, 64, 3, 1, 1),
        (64, 64, 3, 1, 0),
    ]
    params = {"convs": []}
    for (cin, cout, k, s, p) in convs_cfg:
        key, kw, kb = jax.random.split(key, 3)
        fan_in = cin * k
        w = jax.random.normal(kw, (cout, cin, k), jnp.float32) / jnp.sqrt(fan_in)
        b = jax.random.normal(kb, (cout,), jnp.float32) * 0.01
        gamma = jnp.ones((cout,), jnp.float32)   # PyTorch BatchNorm1d defaults
        beta = jnp.zeros((cout,), jnp.float32)
        params["convs"].append((w, b, gamma, beta))

    key, k1, k2, k3, k4 = jax.random.split(key, 5)
    params["fc1_w"] = jax.random.normal(k1, (100, 64 * 3), jnp.float32) / jnp.sqrt(64 * 3)
    params["fc1_b"] = jax.random.normal(k2, (100,), jnp.float32) * 0.01
    params["fc2_w"] = jax.random.normal(k3, (out_class, 100), jnp.float32) / jnp.sqrt(100)
    params["fc2_b"] = jax.random.normal(k4, (out_class,), jnp.float32) * 0.01
    return params


if __name__ == "__main__":
    key = jax.random.PRNGKey(0)
    key_x, key_p = jax.random.split(key)

    # The fc layer requires 64*3 features after conv5, which fixes the input
    # length to 2048 (the canonical WDCNN input).  Small batch of 2.
    x = jax.random.normal(key_x, (2, 1, 2048), jnp.float32)
    raw_params = make_params(key_p, out_class=4)
    kernel_args, out_class = prepare_params(raw_params)

    out = wdcnn_forward(x, kernel_args, out_class=out_class)
    out = jax.block_until_ready(out)
    assert out.shape == (2, 4), out.shape
    assert bool(jnp.all(jnp.isfinite(out)))
    print("KERNEL_OK")
</pallas_src>

<mosaic_0001>
module attributes {stable_mosaic.version = 11 : i64} {
  func.func @wdcnn_kernel(%arg0: memref<2x128x128xf32, #tpu.memory_space<vmem>>, %arg1: memref<128x128xf32, #tpu.memory_space<vmem>>, %arg2: memref<3x128xf32, #tpu.memory_space<vmem>>, %arg3: memref<3x128x128xf32, #tpu.memory_space<vmem>>, %arg4: memref<3x128xf32, #tpu.memory_space<vmem>>, %arg5: memref<3x128x128xf32, #tpu.memory_space<vmem>>, %arg6: memref<3x128xf32, #tpu.memory_space<vmem>>, %arg7: memref<3x128x128xf32, #tpu.memory_space<vmem>>, %arg8: memref<3x128xf32, #tpu.memory_space<vmem>>, %arg9: memref<3x128x128xf32, #tpu.memory_space<vmem>>, %arg10: memref<3x128xf32, #tpu.memory_space<vmem>>, %arg11: memref<3x128x128xf32, #tpu.memory_space<vmem>>, %arg12: memref<1x128xf32, #tpu.memory_space<vmem>>, %arg13: memref<128x128xf32, #tpu.memory_space<vmem>>, %arg14: memref<1x128xf32, #tpu.memory_space<vmem>>, %arg15: memref<2x128xf32, #tpu.memory_space<vmem>>, %arg16: memref<2x66x128xf32, #tpu.memory_space<vmem>>) attributes {dimension_semantics = [], scalar_prefetch = 0 : i64, scratch_operands = 1 : i64, tpu.core_type = #tpu.core_type<tc>} {
    %c0 = arith.constant 0 : index
    %c0_0 = arith.constant 0 : index
    %c0_1 = arith.constant 0 : index
    %0 = vector.load %arg0[%c0, %c0_0, %c0_1] : memref<2x128x128xf32, #tpu.memory_space<vmem>>, vector<2x128x128xf32>
    %1 = vector.shape_cast %0 : vector<2x128x128xf32> to vector<256x128xf32>
    %c0_2 = arith.constant 0 : index
    %c0_3 = arith.constant 0 : index
    %2 = vector.load %arg1[%c0_2, %c0_3] : memref<128x128xf32, #tpu.memory_space<vmem>>, vector<128x128xf32>
    %cst = arith.constant dense<0.000000e+00> : vector<256x128xf32>
    %3 = tpu.matmul %1, %2, %cst {dimension_numbers = #tpu.dot_dimension_numbers<[1], [0], [0], [1], [0, 0, 1, 1], [], []>} : vector<256x128xf32>, vector<128x128xf32>, vector<256x128xf32> -> vector<256x128xf32>
    %c0_4 = arith.constant 0 : index
    %c0_5 = arith.constant 0 : index
    %4 = vector.load %arg2[%c0_4, %c0_5] : memref<3x128xf32, #tpu.memory_space<vmem>>, vector<1x128xf32>
    %5 = vector.broadcast %4 : vector<1x128xf32> to vector<256x128xf32>
    %6 = arith.addf %3, %5 : vector<256x128xf32>
    %c1 = arith.constant 1 : index
    %c0_6 = arith.constant 0 : index
    %7 = vector.load %arg2[%c1, %c0_6] : memref<3x128xf32, #tpu.memory_space<vmem>>, vector<1x128xf32>
    %c2 = arith.constant 2 : index
    %c0_7 = arith.constant 0 : index
    %8 = vector.load %arg2[%c2, %c0_7] : memref<3x128xf32, #tpu.memory_space<vmem>>, vector<1x128xf32>
    %9 = vector.shape_cast %6 : vector<256x128xf32> to vector<128x2x128xf32>
    %10 = vector.extract_strided_slice %9 {offsets = [0, 0, 0], sizes = [128, 1, 128], strides = [1, 1, 1]} : vector<128x2x128xf32> to vector<128x1x128xf32>
    %11 = vector.shape_cast %10 : vector<128x1x128xf32> to vector<128x128xf32>
    %12 = vector.extract_strided_slice %9 {offsets = [0, 1, 0], sizes = [128, 1, 128], strides = [1, 1, 1]} : vector<128x2x128xf32> to vector<128x1x128xf32>
    %13 = vector.shape_cast %12 : vector<128x1x128xf32> to vector<128x128xf32>
    %14 = arith.maximumf %11, %13 : vector<128x128xf32>
    %cst_8 = arith.constant 0.000000e+00 : f32
    %15 = vector.broadcast %cst_8 : f32 to vector<128x128xf32>
    %16 = arith.maximumf %14, %15 : vector<128x128xf32>
    %cst_9 = arith.constant dense<0.000000e+00> : vector<128xf32>
    %17 = vector.multi_reduction <add>, %16, %cst_9 [0] : vector<128x128xf32> to vector<128xf32>
    %18 = vector.shape_cast %17 : vector<128xf32> to vector<1x128xf32>
    %cst_10 = arith.constant 7.812500e-03 : f32
    %19 = vector.broadcast %cst_10 : f32 to vector<1x128xf32>
    %20 = arith.mulf %18, %19 : vector<1x128xf32>
    %21 = arith.mulf %16, %16 : vector<128x128xf32>
    %cst_11 = arith.constant dense<0.000000e+00> : vector<128xf32>
    %22 = vector.multi_reduction <add>, %21, %cst_11 [0] : vector<128x128xf32> to vector<128xf32>
    %23 = vector.shape_cast %22 : vector<128xf32> to vector<1x128xf32>
    %cst_12 = arith.constant 7.812500e-03 : f32
    %24 = vector.broadcast %cst_12 : f32 to vector<1x128xf32>
    %25 = arith.mulf %23, %24 : vector<1x128xf32>
    %26 = arith.mulf %20, %20 : vector<1x128xf32>
    %27 = arith.subf %25, %26 : vector<1x128xf32>
    %cst_13 = arith.constant 9.99999974E-6 : f32
    %28 = vector.broadcast %cst_13 : f32 to vector<1x128xf32>
    %29 = arith.addf %27, %28 : vector<1x128xf32>
    %30 = math.rsqrt %29 : vector<1x128xf32>
    %31 = arith.mulf %7, %30 : vector<1x128xf32>
    %32 = arith.mulf %20, %31 : vector<1x128xf32>
    %33 = arith.subf %8, %32 : vector<1x128xf32>
    %34 = vector.broadcast %31 : vector<1x128xf32> to vector<128x128xf32>
    %35 = arith.mulf %16, %34 : vector<128x128xf32>
    %36 = vector.broadcast %33 : vector<1x128xf32> to vector<128x128xf32>
    %37 = arith.addf %35, %36 : vector<128x128xf32>
    %cst_14 = arith.constant 0.000000e+00 : f32
    %38 = vector.broadcast %cst_14 : f32 to vector<2x1x128xf32>
    %c0_15 = arith.constant 0 : index
    %c0_16 = arith.constant 0 : index
    %c0_17 = arith.constant 0 : index
    %39 = vector.load %arg16[%c0_15, %c0_16, %c0_17] : memref<2x66x128xf32, #tpu.memory_space<vmem>>, vector<2x1x128xf32>
    tpu.vector_store %arg16[%c0_15, %c0_16, %c0_17], %38 {strides = array<i32>} : memref<2x66x128xf32, #tpu.memory_space<vmem>>, vector<2x1x128xf32>,
    %c0_18 = arith.constant 0 : index
    %c65 = arith.constant 65 : index
    %c0_19 = arith.constant 0 : index
    %40 = vector.load %arg16[%c0_18, %c65, %c0_19] : memref<2x66x128xf32, #tpu.memory_space<vmem>>, vector<2x1x128xf32>
    tpu.vector_store %arg16[%c0_18, %c65, %c0_19], %38 {strides = array<i32>} : memref<2x66x128xf32, #tpu.memory_space<vmem>>, vector<2x1x128xf32>,
    %41 = vector.shape_cast %37 : vector<128x128xf32> to vector<2x64x128xf32>
    %c0_20 = arith.constant 0 : index
    %c1_21 = arith.constant 1 : index
    %c0_22 = arith.constant 0 : index
    %42 = vector.load %arg16[%c0_20, %c1_21, %c0_22] : memref<2x66x128xf32, #tpu.memory_space<vmem>>, vector<2x64x128xf32>
    tpu.vector_store %arg16[%c0_20, %c1_21, %c0_22], %41 {strides = array<i32>} : memref<2x66x128xf32, #tpu.memory_space<vmem>>, vector<2x64x128xf32>,
    %c0_23 = arith.constant 0 : index
    %c0_24 = arith.constant 0 : index
    %c0_25 = arith.constant 0 : index
    %43 = vector.load %arg16[%c0_23, %c0_24, %c0_25] : memref<2x66x128xf32, #tpu.memory_space<vmem>>, vector<2x64x128xf32>
    %44 = vector.shape_cast %43 : vector<2x64x128xf32> to vector<128x128xf32>
    %c0_26 = arith.constant 0 : index
    %c0_27 = arith.constant 0 : index
    %c0_28 = arith.constant 0 : index
    %45 = vector.load %arg3[%c0_26, %c0_27, %c0_28] : memref<3x128x128xf32, #tpu.memory_space<vmem>>, vector<1x128x128xf32>
    %46 = vector.shape_cast %45 : vector<1x128x128xf32> to vector<128x128xf32>
    %cst_29 = arith.constant dense<0.000000e+00> : vector<128x128xf32>
    %47 = tpu.matmul %44, %46, %cst_29 {dimension_numbers = #tpu.dot_dimension_numbers<[1], [0], [0], [1], [0, 0, 1, 1], [], []>} : vector<128x128xf32>, vector<128x128xf32>, vector<128x128xf32> -> vector<128x128xf32>
    %c0_30 = arith.constant 0 : index
    %c1_31 = arith.constant 1 : index
    %c0_32 = arith.constant 0 : index
    %48 = vector.load %arg16[%c0_30, %c1_31, %c0_32] : memref<2x66x128xf32, #tpu.memory_space<vmem>>, vector<2x64x128xf32>
    %49 = vector.shape_cast %48 : vector<2x64x128xf32> to vector<128x128xf32>
    %c1_33 = arith.constant 1 : index
    %c0_34 = arith.constant 0 : index
    %c0_35 = arith.constant 0 : index
    %50 = vector.load %arg3[%c1_33, %c0_34, %c0_35] : memref<3x128x128xf32, #tpu.memory_space<vmem>>, vector<1x128x128xf32>
    %51 = vector.shape_cast %50 : vector<1x128x128xf32> to vector<128x128xf32>
    %cst_36 = arith.constant dense<0.000000e+00> : vector<128x128xf32>
    %52 = tpu.matmul %49, %51, %cst_36 {dimension_numbers = #tpu.dot_dimension_numbers<[1], [0], [0], [1], [0, 0, 1, 1], [], []>} : vector<128x128xf32>, vector<128x128xf32>, vector<128x128xf32> -> vector<128x128xf32>
    %53 = arith.addf %47, %52 : vector<128x128xf32>
    %c0_37 = arith.constant 0 : index
    %c2_38 = arith.constant 2 : index
    %c0_39 = arith.constant 0 : index
    %54 = vector.load %arg16[%c0_37, %c2_38, %c0_39] : memref<2x66x128xf32, #tpu.memory_space<vmem>>, vector<2x64x128xf32>
    %55 = vector.shape_cast %54 : vector<2x64x128xf32> to vector<128x128xf32>
    %c2_40 = arith.constant 2 : index
    %c0_41 = arith.constant 0 : index
    %c0_42 = arith.constant 0 : index
    %56 = vector.load %arg3[%c2_40, %c0_41, %c0_42] : memref<3x128x128xf32, #tpu.memory_space<vmem>>, vector<1x128x128xf32>
    %57 = vector.shape_cast %56 : vector<1x128x128xf32> to vector<128x128xf32>
    %cst_43 = arith.constant dense<0.000000e+00> : vector<128x128xf32>
    %58 = tpu.matmul %55, %57, %cst_43 {dimension_numbers = #tpu.dot_dimension_numbers<[1], [0], [0], [1], [0, 0, 1, 1], [], []>} : vector<128x128xf32>, vector<128x128xf32>, vector<128x128xf32> -> vector<128x128xf32>
    %59 = arith.addf %53, %58 : vector<128x128xf32>
    %c0_44 = arith.constant 0 : index
    %c0_45 = arith.constant 0 : index
    %60 = vector.load %arg4[%c0_44, %c0_45] : memref<3x128xf32, #tpu.memory_space<vmem>>, vector<1x128xf32>
    %61 = vector.broadcast %60 : vector<1x128xf32> to vector<128x128xf32>
    %62 = arith.addf %59, %61 : vector<128x128xf32>
    %c1_46 = arith.constant 1 : index
    %c0_47 = arith.constant 0 : index
    %63 = vector.load %arg4[%c1_46, %c0_47] : memref<3x128xf32, #tpu.memory_space<vmem>>, vector<1x128xf32>
    %c2_48 = arith.constant 2 : index
    %c0_49 = arith.constant 0 : index
    %64 = vector.load %arg4[%c2_48, %c0_49] : memref<3x128xf32, #tpu.memory_space<vmem>>, vector<1x128xf32>
    %65 = vector.shape_cast %62 : vector<128x128xf32> to vector<64x2x128xf32>
    %66 = vector.extract_strided_slice %65 {offsets = [0, 0, 0], sizes = [64, 1, 128], strides = [1, 1, 1]} : vector<64x2x128xf32> to vector<64x1x128xf32>
    %67 = vector.shape_cast %66 : vector<64x1x128xf32> to vector<64x128xf32>
    %68 = vector.extract_strided_slice %65 {offsets = [0, 1, 0], sizes = [64, 1, 128], strides = [1, 1, 1]} : vector<64x2x128xf32> to vector<64x1x128xf32>
    %69 = vector.shape_cast %68 : vector<64x1x128xf32> to vector<64x128xf32>
    %70 = arith.maximumf %67, %69 : vector<64x128xf32>
    %cst_50 = arith.constant 0.000000e+00 : f32
    %71 = vector.broadcast %cst_50 : f32 to vector<64x128xf32>
    %72 = arith.maximumf %70, %71 : vector<64x128xf32>
    %cst_51 = arith.constant dense<0.000000e+00> : vector<128xf32>
    %73 = vector.multi_reduction <add>, %72, %cst_51 [0] : vector<64x128xf32> to vector<128xf32>
    %74 = vector.shape_cast %73 : vector<128xf32> to vector<1x128xf32>
    %cst_52 = arith.constant 1.562500e-02 : f32
    %75 = vector.broadcast %cst_52 : f32 to vector<1x128xf32>
    %76 = arith.mulf %74, %75 : vector<1x128xf32>
    %77 = arith.mulf %72, %72 : vector<64x128xf32>
    %cst_53 = arith.constant dense<0.000000e+00> : vector<128xf32>
    %78 = vector.multi_reduction <add>, %77, %cst_53 [0] : vector<64x128xf32> to vector<128xf32>
    %79 = vector.shape_cast %78 : vector<128xf32> to vector<1x128xf32>
    %cst_54 = arith.constant 1.562500e-02 : f32
    %80 = vector.broadcast %cst_54 : f32 to vector<1x128xf32>
    %81 = arith.mulf %79, %80 : vector<1x128xf32>
    %82 = arith.mulf %76, %76 : vector<1x128xf32>
    %83 = arith.subf %81, %82 : vector<1x128xf32>
    %cst_55 = arith.constant 9.99999974E-6 : f32
    %84 = vector.broadcast %cst_55 : f32 to vector<1x128xf32>
    %85 = arith.addf %83, %84 : vector<1x128xf32>
    %86 = math.rsqrt %85 : vector<1x128xf32>
    %87 = arith.mulf %63, %86 : vector<1x128xf32>
    %88 = arith.mulf %76, %87 : vector<1x128xf32>
    %89 = arith.subf %64, %88 : vector<1x128xf32>
    %90 = vector.broadcast %87 : vector<1x128xf32> to vector<64x128xf32>
    %91 = arith.mulf %72, %90 : vector<64x128xf32>
    %92 = vector.broadcast %89 : vector<1x128xf32> to vector<64x128xf32>
    %93 = arith.addf %91, %92 : vector<64x128xf32>
    %cst_56 = arith.constant 0.000000e+00 : f32
    %94 = vector.broadcast %cst_56 : f32 to vector<2x1x128xf32>
    %c0_57 = arith.constant 0 : index
    %c0_58 = arith.constant 0 : index
    %c0_59 = arith.constant 0 : index
    %95 = vector.load %arg16[%c0_57, %c0_58, %c0_59] : memref<2x66x128xf32, #tpu.memory_space<vmem>>, vector<2x1x128xf32>
    tpu.vector_store %arg16[%c0_57, %c0_58, %c0_59], %94 {strides = array<i32>} : memref<2x66x128xf32, #tpu.memory_space<vmem>>, vector<2x1x128xf32>,
    %c0_60 = arith.constant 0 : index
    %c33 = arith.constant 33 : index
    %c0_61 = arith.constant 0 : index
    %96 = vector.load %arg16[%c0_60, %c33, %c0_61] : memref<2x66x128xf32, #tpu.memory_space<vmem>>, vector<2x1x128xf32>
    tpu.vector_store %arg16[%c0_60, %c33, %c0_61], %94 {strides = array<i32>} : memref<2x66x128xf32, #tpu.memory_space<vmem>>, vector<2x1x128xf32>,
    %97 = vector.shape_cast %93 : vector<64x128xf32> to vector<2x32x128xf32>
    %c0_62 = arith.constant 0 : index
    %c1_63 = arith.constant 1 : index
    %c0_64 = arith.constant 0 : index
    %98 = vector.load %arg16[%c0_62, %c1_63, %c0_64] : memref<2x66x128xf32, #tpu.memory_space<vmem>>, vector<2x32x128xf32>
    tpu.vector_store %arg16[%c0_62, %c1_63, %c0_64], %97 {strides = array<i32>} : memref<2x66x128xf32, #tpu.memory_space<vmem>>, vector<2x32x128xf32>,
    %c0_65 = arith.constant 0 : index
    %c0_66 = arith.constant 0 : index
    %c0_67 = arith.constant 0 : index
    %99 = vector.load %arg16[%c0_65, %c0_66, %c0_67] : memref<2x66x128xf32, #tpu.memory_space<vmem>>, vector<2x32x128xf32>
    %100 = vector.shape_cast %99 : vector<2x32x128xf32> to vector<64x128xf32>
    %c0_68 = arith.constant 0 : index
    %c0_69 = arith.constant 0 : index
    %c0_70 = arith.constant 0 : index
    %101 = vector.load %arg5[%c0_68, %c0_69, %c0_70] : memref<3x128x128xf32, #tpu.memory_space<vmem>>, vector<1x128x128xf32>
    %102 = vector.shape_cast %101 : vector<1x128x128xf32> to vector<128x128xf32>
    %cst_71 = arith.constant dense<0.000000e+00> : vector<64x128xf32>
    %103 = tpu.matmul %100, %102, %cst_71 {dimension_numbers = #tpu.dot_dimension_numbers<[1], [0], [0], [1], [0, 0, 1, 1], [], []>} : vector<64x128xf32>, vector<128x128xf32>, vector<64x128xf32> -> vector<64x128xf32>
    %c0_72 = arith.constant 0 : index
    %c1_73 = arith.constant 1 : index
    %c0_74 = arith.constant 0 : index
    %104 = vector.load %arg16[%c0_72, %c1_73, %c0_74] : memref<2x66x128xf32, #tpu.memory_space<vmem>>, vector<2x32x128xf32>
    %105 = vector.shape_cast %104 : vector<2x32x128xf32> to vector<64x128xf32>
    %c1_75 = arith.constant 1 : index
    %c0_76 = arith.constant 0 : index
    %c0_77 = arith.constant 0 : index
    %106 = vector.load %arg5[%c1_75, %c0_76, %c0_77] : memref<3x128x128xf32, #tpu.memory_space<vmem>>, vector<1x128x128xf32>
    %107 = vector.shape_cast %106 : vector<1x128x128xf32> to vector<128x128xf32>
    %cst_78 = arith.constant dense<0.000000e+00> : vector<64x128xf32>
    %108 = tpu.matmul %105, %107, %cst_78 {dimension_numbers = #tpu.dot_dimension_numbers<[1], [0], [0], [1], [0, 0, 1, 1], [], []>} : vector<64x128xf32>, vector<128x128xf32>, vector<64x128xf32> -> vector<64x128xf32>
    %109 = arith.addf %103, %108 : vector<64x128xf32>
    %c0_79 = arith.constant 0 : index
    %c2_80 = arith.constant 2 : index
    %c0_81 = arith.constant 0 : index
    %110 = vector.load %arg16[%c0_79, %c2_80, %c0_81] : memref<2x66x128xf32, #tpu.memory_space<vmem>>, vector<2x32x128xf32>
    %111 = vector.shape_cast %110 : vector<2x32x128xf32> to vector<64x128xf32>
    %c2_82 = arith.constant 2 : index
    %c0_83 = arith.constant 0 : index
    %c0_84 = arith.constant 0 : index
    %112 = vector.load %arg5[%c2_82, %c0_83, %c0_84] : memref<3x128x128xf32, #tpu.memory_space<vmem>>, vector<1x128x128xf32>
    %113 = vector.shape_cast %112 : vector<1x128x128xf32> to vector<128x128xf32>
    %cst_85 = arith.constant dense<0.000000e+00> : vector<64x128xf32>
    %114 = tpu.matmul %111, %113, %cst_85 {dimension_numbers = #tpu.dot_dimension_numbers<[1], [0], [0], [1], [0, 0, 1, 1], [], []>} : vector<64x128xf32>, vector<128x128xf32>, vector<64x128xf32> -> vector<64x128xf32>
    %115 = arith.addf %109, %114 : vector<64x128xf32>
    %c0_86 = arith.constant 0 : index
    %c0_87 = arith.constant 0 : index
    %116 = vector.load %arg6[%c0_86, %c0_87] : memref<3x128xf32, #tpu.memory_space<vmem>>, vector<1x128xf32>
    %117 = vector.broadcast %116 : vector<1x128xf32> to vector<64x128xf32>
    %118 = arith.addf %115, %117 : vector<64x128xf32>
    %c1_88 = arith.constant 1 : index
    %c0_89 = arith.constant 0 : index
    %119 = vector.load %arg6[%c1_88, %c0_89] : memref<3x128xf32, #tpu.memory_space<vmem>>, vector<1x128xf32>
    %c2_90 = arith.constant 2 : index
    %c0_91 = arith.constant 0 : index
    %120 = vector.load %arg6[%c2_90, %c0_91] : memref<3x128xf32, #tpu.memory_space<vmem>>, vector<1x128xf32>
    %121 = vector.shape_cast %118 : vector<64x128xf32> to vector<32x2x128xf32>
    %122 = vector.extract_strided_slice %121 {offsets = [0, 0, 0], sizes = [32, 1, 128], strides = [1, 1, 1]} : vector<32x2x128xf32> to vector<32x1x128xf32>
    %123 = vector.shape_cast %122 : vector<32x1x128xf32> to vector<32x128xf32>
    %124 = vector.extract_strided_slice %121 {offsets = [0, 1, 0], sizes = [32, 1, 128], strides = [1, 1, 1]} : vector<32x2x128xf32> to vector<32x1x128xf32>
    %125 = vector.shape_cast %124 : vector<32x1x128xf32> to vector<32x128xf32>
    %126 = arith.maximumf %123, %125 : vector<32x128xf32>
    %cst_92 = arith.constant 0.000000e+00 : f32
    %127 = vector.broadcast %cst_92 : f32 to vector<32x128xf32>
    %128 = arith.maximumf %126, %127 : vector<32x128xf32>
    %cst_93 = arith.constant dense<0.000000e+00> : vector<128xf32>
    %129 = vector.multi_reduction <add>, %128, %cst_93 [0] : vector<32x128xf32> to vector<128xf32>
    %130 = vector.shape_cast %129 : vector<128xf32> to vector<1x128xf32>
    %cst_94 = arith.constant 3.125000e-02 : f32
    %131 = vector.broadcast %cst_94 : f32 to vector<1x128xf32>
    %132 = arith.mulf %130, %131 : vector<1x128xf32>
    %133 = arith.mulf %128, %128 : vector<32x128xf32>
    %cst_95 = arith.constant dense<0.000000e+00> : vector<128xf32>
    %134 = vector.multi_reduction <add>, %133, %cst_95 [0] : vector<32x128xf32> to vector<128xf32>
    %135 = vector.shape_cast %134 : vector<128xf32> to vector<1x128xf32>
    %cst_96 = arith.constant 3.125000e-02 : f32
    %136 = vector.broadcast %cst_96 : f32 to vector<1x128xf32>
    %137 = arith.mulf %135, %136 : vector<1x128xf32>
    %138 = arith.mulf %132, %132 : vector<1x128xf32>
    %139 = arith.subf %137, %138 : vector<1x128xf32>
    %cst_97 = arith.constant 9.99999974E-6 : f32
    %140 = vector.broadcast %cst_97 : f32 to vector<1x128xf32>
    %141 = arith.addf %139, %140 : vector<1x128xf32>
    %142 = math.rsqrt %141 : vector<1x128xf32>
    %143 = arith.mulf %119, %142 : vector<1x128xf32>
    %144 = arith.mulf %132, %143 : vector<1x128xf32>
    %145 = arith.subf %120, %144 : vector<1x128xf32>
    %146 = vector.broadcast %143 : vector<1x128xf32> to vector<32x128xf32>
    %147 = arith.mulf %128, %146 : vector<32x128xf32>
    %148 = vector.broadcast %145 : vector<1x128xf32> to vector<32x128xf32>
    %149 = arith.addf %147, %148 : vector<32x128xf32>
    %cst_98 = arith.constant 0.000000e+00 : f32
    %150 = vector.broadcast %cst_98 : f32 to vector<2x1x128xf32>
    %c0_99 = arith.constant 0 : index
    %c0_100 = arith.constant 0 : index
    %c0_101 = arith.constant 0 : index
    %151 = vector.load %arg16[%c0_99, %c0_100, %c0_101] : memref<2x66x128xf32, #tpu.memory_space<vmem>>, vector<2x1x128xf32>
    tpu.vector_store %arg16[%c0_99, %c0_100, %c0_101], %150 {strides = array<i32>} : memref<2x66x128xf32, #tpu.memory_space<vmem>>, vector<2x1x128xf32>,
    %c0_102 = arith.constant 0 : index
    %c17 = arith.constant 17 : index
    %c0_103 = arith.constant 0 : index
    %152 = vector.load %arg16[%c0_102, %c17, %c0_103] : memref<2x66x128xf32, #tpu.memory_space<vmem>>, vector<2x1x128xf32>
    tpu.vector_store %arg16[%c0_102, %c17, %c0_103], %150 {strides = array<i32>} : memref<2x66x128xf32, #tpu.memory_space<vmem>>, vector<2x1x128xf32>,
    %153 = vector.shape_cast %149 : vector<32x128xf32> to vector<2x16x128xf32>
    %c0_104 = arith.constant 0 : index
    %c1_105 = arith.constant 1 : index
    %c0_106 = arith.constant 0 : index
    %154 = vector.load %arg16[%c0_104, %c1_105, %c0_106] : memref<2x66x128xf32, #tpu.memory_space<vmem>>, vector<2x16x128xf32>
    tpu.vector_store %arg16[%c0_104, %c1_105, %c0_106], %153 {strides = array<i32>} : memref<2x66x128xf32, #tpu.memory_space<vmem>>, vector<2x16x128xf32>,
    %c0_107 = arith.constant 0 : index
    %c0_108 = arith.constant 0 : index
    %c0_109 = arith.constant 0 : index
    %155 = vector.load %arg16[%c0_107, %c0_108, %c0_109] : memref<2x66x128xf32, #tpu.memory_space<vmem>>, vector<2x16x128xf32>
    %156 = vector.shape_cast %155 : vector<2x16x128xf32> to vector<32x128xf32>
    %c0_110 = arith.constant 0 : index
    %c0_111 = arith.constant 0 : index
    %c0_112 = arith.constant 0 : index
    %157 = vector.load %arg7[%c0_110, %c0_111, %c0_112] : memref<3x128x128xf32, #tpu.memory_space<vmem>>, vector<1x128x128xf32>
    %158 = vector.shape_cast %157 : vector<1x128x128xf32> to vector<128x128xf32>
    %cst_113 = arith.constant dense<0.000000e+00> : vector<32x128xf32>
    %159 = tpu.matmul %156, %158, %cst_113 {dimension_numbers = #tpu.dot_dimension_numbers<[1], [0], [0], [1], [0, 0, 1, 1], [], []>} : vector<32x128xf32>, vector<128x128xf32>, vector<32x128xf32> -> vector<32x128xf32>
    %c0_114 = arith.constant 0 : index
    %c1_115 = arith.constant 1 : index
    %c0_116 = arith.constant 0 : index
    %160 = vector.load %arg16[%c0_114, %c1_115, %c0_116] : memref<2x66x128xf32, #tpu.memory_space<vmem>>, vector<2x16x128xf32>
    %161 = vector.shape_cast %160 : vector<2x16x128xf32> to vector<32x128xf32>
    %c1_117 = arith.constant 1 : index
    %c0_118 = arith.constant 0 : index
    %c0_119 = arith.constant 0 : index
    %162 = vector.load %arg7[%c1_117, %c0_118, %c0_119] : memref<3x128x128xf32, #tpu.memory_space<vmem>>, vector<1x128x128xf32>
    %163 = vector.shape_cast %162 : vector<1x128x128xf32> to vector<128x128xf32>
    %cst_120 = arith.constant dense<0.000000e+00> : vector<32x128xf32>
    %164 = tpu.matmul %161, %163, %cst_120 {dimension_numbers = #tpu.dot_dimension_numbers<[1], [0], [0], [1], [0, 0, 1, 1], [], []>} : vector<32x128xf32>, vector<128x128xf32>, vector<32x128xf32> -> vector<32x128xf32>
    %165 = arith.addf %159, %164 : vector<32x128xf32>
    %c0_121 = arith.constant 0 : index
    %c2_122 = arith.constant 2 : index
    %c0_123 = arith.constant 0 : index
    %166 = vector.load %arg16[%c0_121, %c2_122, %c0_123] : memref<2x66x128xf32, #tpu.memory_space<vmem>>, vector<2x16x128xf32>
    %167 = vector.shape_cast %166 : vector<2x16x128xf32> to vector<32x128xf32>
    %c2_124 = arith.constant 2 : index
    %c0_125 = arith.constant 0 : index
    %c0_126 = arith.constant 0 : index
    %168 = vector.load %arg7[%c2_124, %c0_125, %c0_126] : memref<3x128x128xf32, #tpu.memory_space<vmem>>, vector<1x128x128xf32>
    %169 = vector.shape_cast %168 : vector<1x128x128xf32> to vector<128x128xf32>
    %cst_127 = arith.constant dense<0.000000e+00> : vector<32x128xf32>
    %170 = tpu.matmul %167, %169, %cst_127 {dimension_numbers = #tpu.dot_dimension_numbers<[1], [0], [0], [1], [0, 0, 1, 1], [], []>} : vector<32x128xf32>, vector<128x128xf32>, vector<32x128xf32> -> vector<32x128xf32>
    %171 = arith.addf %165, %170 : vector<32x128xf32>
    %c0_128 = arith.constant 0 : index
    %c0_129 = arith.constant 0 : index
    %172 = vector.load %arg8[%c0_128, %c0_129] : memref<3x128xf32, #tpu.memory_space<vmem>>, vector<1x128xf32>
    %173 = vector.broadcast %172 : vector<1x128xf32> to vector<32x128xf32>
    %174 = arith.addf %171, %173 : vector<32x128xf32>
    %c1_130 = arith.constant 1 : index
    %c0_131 = arith.constant 0 : index
    %175 = vector.load %arg8[%c1_130, %c0_131] : memref<3x128xf32, #tpu.memory_space<vmem>>, vector<1x128xf32>
    %c2_132 = arith.constant 2 : index
    %c0_133 = arith.constant 0 : index
    %176 = vector.load %arg8[%c2_132, %c0_133] : memref<3x128xf32, #tpu.memory_space<vmem>>, vector<1x128xf32>
    %177 = vector.shape_cast %174 : vector<32x128xf32> to vector<16x2x128xf32>
    %178 = vector.extract_strided_slice %177 {offsets = [0, 0, 0], sizes = [16, 1, 128], strides = [1, 1, 1]} : vector<16x2x128xf32> to vector<16x1x128xf32>
    %179 = vector.shape_cast %178 : vector<16x1x128xf32> to vector<16x128xf32>
    %180 = vector.extract_strided_slice %177 {offsets = [0, 1, 0], sizes = [16, 1, 128], strides = [1, 1, 1]} : vector<16x2x128xf32> to vector<16x1x128xf32>
    %181 = vector.shape_cast %180 : vector<16x1x128xf32> to vector<16x128xf32>
    %182 = arith.maximumf %179, %181 : vector<16x128xf32>
    %cst_134 = arith.constant 0.000000e+00 : f32
    %183 = vector.broadcast %cst_134 : f32 to vector<16x128xf32>
    %184 = arith.maximumf %182, %183 : vector<16x128xf32>
    %cst_135 = arith.constant dense<0.000000e+00> : vector<128xf32>
    %185 = vector.multi_reduction <add>, %184, %cst_135 [0] : vector<16x128xf32> to vector<128xf32>
    %186 = vector.shape_cast %185 : vector<128xf32> to vector<1x128xf32>
    %cst_136 = arith.constant 6.250000e-02 : f32
    %187 = vector.broadcast %cst_136 : f32 to vector<1x128xf32>
    %188 = arith.mulf %186, %187 : vector<1x128xf32>
    %189 = arith.mulf %184, %184 : vector<16x128xf32>
    %cst_137 = arith.constant dense<0.000000e+00> : vector<128xf32>
    %190 = vector.multi_reduction <add>, %189, %cst_137 [0] : vector<16x128xf32> to vector<128xf32>
    %191 = vector.shape_cast %190 : vector<128xf32> to vector<1x128xf32>
    %cst_138 = arith.constant 6.250000e-02 : f32
    %192 = vector.broadcast %cst_138 : f32 to vector<1x128xf32>
    %193 = arith.mulf %191, %192 : vector<1x128xf32>
    %194 = arith.mulf %188, %188 : vector<1x128xf32>
    %195 = arith.subf %193, %194 : vector<1x128xf32>
    %cst_139 = arith.constant 9.99999974E-6 : f32
    %196 = vector.broadcast %cst_139 : f32 to vector<1x128xf32>
    %197 = arith.addf %195, %196 : vector<1x128xf32>
    %198 = math.rsqrt %197 : vector<1x128xf32>
    %199 = arith.mulf %175, %198 : vector<1x128xf32>
    %200 = arith.mulf %188, %199 : vector<1x128xf32>
    %201 = arith.subf %176, %200 : vector<1x128xf32>
    %202 = vector.broadcast %199 : vector<1x128xf32> to vector<16x128xf32>
    %203 = arith.mulf %184, %202 : vector<16x128xf32>
    %204 = vector.broadcast %201 : vector<1x128xf32> to vector<16x128xf32>
    %205 = arith.addf %203, %204 : vector<16x128xf32>
    %206 = vector.shape_cast %205 : vector<16x128xf32> to vector<2x8x128xf32>
    %c0_140 = arith.constant 0 : index
    %c0_141 = arith.constant 0 : index
    %c0_142 = arith.constant 0 : index
    %207 = vector.load %arg16[%c0_140, %c0_141, %c0_142] : memref<2x66x128xf32, #tpu.memory_space<vmem>>, vector<2x8x128xf32>
    tpu.vector_store %arg16[%c0_140, %c0_141, %c0_142], %206 {strides = array<i32>} : memref<2x66x128xf32, #tpu.memory_space<vmem>>, vector<2x8x128xf32>,
    %c0_143 = arith.constant 0 : index
    %c0_144 = arith.constant 0 : index
    %c0_145 = arith.constant 0 : index
    %208 = vector.load %arg16[%c0_143, %c0_144, %c0_145] : memref<2x66x128xf32, #tpu.memory_space<vmem>>, vector<2x6x128xf32>
    %209 = vector.shape_cast %208 : vector<2x6x128xf32> to vector<12x128xf32>
    %c0_146 = arith.constant 0 : index
    %c0_147 = arith.constant 0 : index
    %c0_148 = arith.constant 0 : index
    %210 = vector.load %arg9[%c0_146, %c0_147, %c0_148] : memref<3x128x128xf32, #tpu.memory_space<vmem>>, vector<1x128x128xf32>
    %211 = vector.shape_cast %210 : vector<1x128x128xf32> to vector<128x128xf32>
    %cst_149 = arith.constant dense<0.000000e+00> : vector<12x128xf32>
    %212 = tpu.matmul %209, %211, %cst_149 {dimension_numbers = #tpu.dot_dimension_numbers<[1], [0], [0], [1], [0, 0, 1, 1], [], []>} : vector<12x128xf32>, vector<128x128xf32>, vector<12x128xf32> -> vector<12x128xf32>
    %c0_150 = arith.constant 0 : index
    %c1_151 = arith.constant 1 : index
    %c0_152 = arith.constant 0 : index
    %213 = vector.load %arg16[%c0_150, %c1_151, %c0_152] : memref<2x66x128xf32, #tpu.memory_space<vmem>>, vector<2x6x128xf32>
    %214 = vector.shape_cast %213 : vector<2x6x128xf32> to vector<12x128xf32>
    %c1_153 = arith.constant 1 : index
    %c0_154 = arith.constant 0 : index
    %c0_155 = arith.constant 0 : index
    %215 = vector.load %arg9[%c1_153, %c0_154, %c0_155] : memref<3x128x128xf32, #tpu.memory_space<vmem>>, vector<1x128x128xf32>
    %216 = vector.shape_cast %215 : vector<1x128x128xf32> to vector<128x128xf32>
    %cst_156 = arith.constant dense<0.000000e+00> : vector<12x128xf32>
    %217 = tpu.matmul %214, %216, %cst_156 {dimension_numbers = #tpu.dot_dimension_numbers<[1], [0], [0], [1], [0, 0, 1, 1], [], []>} : vector<12x128xf32>, vector<128x128xf32>, vector<12x128xf32> -> vector<12x128xf32>
    %218 = arith.addf %212, %217 : vector<12x128xf32>
    %c0_157 = arith.constant 0 : index
    %c2_158 = arith.constant 2 : index
    %c0_159 = arith.constant 0 : index
    %219 = vector.load %arg16[%c0_157, %c2_158, %c0_159] : memref<2x66x128xf32, #tpu.memory_space<vmem>>, vector<2x6x128xf32>
    %220 = vector.shape_cast %219 : vector<2x6x128xf32> to vector<12x128xf32>
    %c2_160 = arith.constant 2 : index
    %c0_161 = arith.constant 0 : index
    %c0_162 = arith.constant 0 : index
    %221 = vector.load %arg9[%c2_160, %c0_161, %c0_162] : memref<3x128x128xf32, #tpu.memory_space<vmem>>, vector<1x128x128xf32>
    %222 = vector.shape_cast %221 : vector<1x128x128xf32> to vector<128x128xf32>
    %cst_163 = arith.constant dense<0.000000e+00> : vector<12x128xf32>
    %223 = tpu.matmul %220, %222, %cst_163 {dimension_numbers = #tpu.dot_dimension_numbers<[1], [0], [0], [1], [0, 0, 1, 1], [], []>} : vector<12x128xf32>, vector<128x128xf32>, vector<12x128xf32> -> vector<12x128xf32>
    %224 = arith.addf %218, %223 : vector<12x128xf32>
    %c0_164 = arith.constant 0 : index
    %c0_165 = arith.constant 0 : index
    %225 = vector.load %arg10[%c0_164, %c0_165] : memref<3x128xf32, #tpu.memory_space<vmem>>, vector<1x128xf32>
    %226 = vector.broadcast %225 : vector<1x128xf32> to vector<12x128xf32>
    %227 = arith.addf %224, %226 : vector<12x128xf32>
    %c1_166 = arith.constant 1 : index
    %c0_167 = arith.constant 0 : index
    %228 = vector.load %arg10[%c1_166, %c0_167] : memref<3x128xf32, #tpu.memory_space<vmem>>, vector<1x128xf32>
    %c2_168 = arith.constant 2 : index
    %c0_169 = arith.constant 0 : index
    %229 = vector.load %arg10[%c2_168, %c0_169] : memref<3x128xf32, #tpu.memory_space<vmem>>, vector<1x128xf32>
    %230 = vector.shape_cast %227 : vector<12x128xf32> to vector<6x2x128xf32>
    %231 = vector.extract_strided_slice %230 {offsets = [0, 0, 0], sizes = [6, 1, 128], strides = [1, 1, 1]} : vector<6x2x128xf32> to vector<6x1x128xf32>
    %232 = vector.shape_cast %231 : vector<6x1x128xf32> to vector<6x128xf32>
    %233 = vector.extract_strided_slice %230 {offsets = [0, 1, 0], sizes = [6, 1, 128], strides = [1, 1, 1]} : vector<6x2x128xf32> to vector<6x1x128xf32>
    %234 = vector.shape_cast %233 : vector<6x1x128xf32> to vector<6x128xf32>
    %235 = arith.maximumf %232, %234 : vector<6x128xf32>
    %cst_170 = arith.constant 0.000000e+00 : f32
    %236 = vector.broadcast %cst_170 : f32 to vector<6x128xf32>
    %237 = arith.maximumf %235, %236 : vector<6x128xf32>
    %cst_171 = arith.constant dense<0.000000e+00> : vector<128xf32>
    %238 = vector.multi_reduction <add>, %237, %cst_171 [0] : vector<6x128xf32> to vector<128xf32>
    %239 = vector.shape_cast %238 : vector<128xf32> to vector<1x128xf32>
    %cst_172 = arith.constant 0.166666672 : f32
    %240 = vector.broadcast %cst_172 : f32 to vector<1x128xf32>
    %241 = arith.mulf %239, %240 : vector<1x128xf32>
    %242 = arith.mulf %237, %237 : vector<6x128xf32>
    %cst_173 = arith.constant dense<0.000000e+00> : vector<128xf32>
    %243 = vector.multi_reduction <add>, %242, %cst_173 [0] : vector<6x128xf32> to vector<128xf32>
    %244 = vector.shape_cast %243 : vector<128xf32> to vector<1x128xf32>
    %cst_174 = arith.constant 0.166666672 : f32
    %245 = vector.broadcast %cst_174 : f32 to vector<1x128xf32>
    %246 = arith.mulf %244, %245 : vector<1x128xf32>
    %247 = arith.mulf %241, %241 : vector<1x128xf32>
    %248 = arith.subf %246, %247 : vector<1x128xf32>
    %cst_175 = arith.constant 9.99999974E-6 : f32
    %249 = vector.broadcast %cst_175 : f32 to vector<1x128xf32>
    %250 = arith.addf %248, %249 : vector<1x128xf32>
    %251 = math.rsqrt %250 : vector<1x128xf32>
    %252 = arith.mulf %228, %251 : vector<1x128xf32>
    %253 = arith.mulf %241, %252 : vector<1x128xf32>
    %254 = arith.subf %229, %253 : vector<1x128xf32>
    %255 = vector.broadcast %252 : vector<1x128xf32> to vector<6x128xf32>
    %256 = arith.mulf %237, %255 : vector<6x128xf32>
    %257 = vector.broadcast %254 : vector<1x128xf32> to vector<6x128xf32>
    %258 = arith.addf %256, %257 : vector<6x128xf32>
    %259 = vector.shape_cast %258 : vector<6x128xf32> to vector<2x3x128xf32>
    %c0_176 = arith.constant 0 : index
    %c0_177 = arith.constant 0 : index
    %260 = vector.load %arg12[%c0_176, %c0_177] : memref<1x128xf32, #tpu.memory_space<vmem>>, vector<1x128xf32>
    %261 = vector.extract_strided_slice %259 {offsets = [0, 0, 0], sizes = [2, 1, 128], strides = [1, 1, 1]} : vector<2x3x128xf32> to vector<2x1x128xf32>
    %262 = vector.shape_cast %261 : vector<2x1x128xf32> to vector<2x128xf32>
    %c0_178 = arith.constant 0 : index
    %c0_179 = arith.constant 0 : index
    %c0_180 = arith.constant 0 : index
    %263 = vector.load %arg11[%c0_178, %c0_179, %c0_180] : memref<3x128x128xf32, #tpu.memory_space<vmem>>, vector<1x128x128xf32>
    %264 = vector.shape_cast %263 : vector<1x128x128xf32> to vector<128x128xf32>
    %cst_181 = arith.constant dense<0.000000e+00> : vector<2x128xf32>
    %265 = tpu.matmul %262, %264, %cst_181 {dimension_numbers = #tpu.dot_dimension_numbers<[1], [0], [0], [1], [0, 0, 1, 1], [], []>} : vector<2x128xf32>, vector<128x128xf32>, vector<2x128xf32> -> vector<2x128xf32>
    %266 = vector.broadcast %260 : vector<1x128xf32> to vector<2x128xf32>
    %267 = arith.addf %266, %265 : vector<2x128xf32>
    %268 = vector.extract_strided_slice %259 {offsets = [0, 1, 0], sizes = [2, 1, 128], strides = [1, 1, 1]} : vector<2x3x128xf32> to vector<2x1x128xf32>
    %269 = vector.shape_cast %268 : vector<2x1x128xf32> to vector<2x128xf32>
    %c1_182 = arith.constant 1 : index
    %c0_183 = arith.constant 0 : index
    %c0_184 = arith.constant 0 : index
    %270 = vector.load %arg11[%c1_182, %c0_183, %c0_184] : memref<3x128x128xf32, #tpu.memory_space<vmem>>, vector<1x128x128xf32>
    %271 = vector.shape_cast %270 : vector<1x128x128xf32> to vector<128x128xf32>
    %cst_185 = arith.constant dense<0.000000e+00> : vector<2x128xf32>
    %272 = tpu.matmul %269, %271, %cst_185 {dimension_numbers = #tpu.dot_dimension_numbers<[1], [0], [0], [1], [0, 0, 1, 1], [], []>} : vector<2x128xf32>, vector<128x128xf32>, vector<2x128xf32> -> vector<2x128xf32>
    %273 = arith.addf %267, %272 : vector<2x128xf32>
    %274 = vector.extract_strided_slice %259 {offsets = [0, 2, 0], sizes = [2, 1, 128], strides = [1, 1, 1]} : vector<2x3x128xf32> to vector<2x1x128xf32>
    %275 = vector.shape_cast %274 : vector<2x1x128xf32> to vector<2x128xf32>
    %c2_186 = arith.constant 2 : index
    %c0_187 = arith.constant 0 : index
    %c0_188 = arith.constant 0 : index
    %276 = vector.load %arg11[%c2_186, %c0_187, %c0_188] : memref<3x128x128xf32, #tpu.memory_space<vmem>>, vector<1x128x128xf32>
    %277 = vector.shape_cast %276 : vector<1x128x128xf32> to vector<128x128xf32>
    %cst_189 = arith.constant dense<0.000000e+00> : vector<2x128xf32>
    %278 = tpu.matmul %275, %277, %cst_189 {dimension_numbers = #tpu.dot_dimension_numbers<[1], [0], [0], [1], [0, 0, 1, 1], [], []>} : vector<2x128xf32>, vector<128x128xf32>, vector<2x128xf32> -> vector<2x128xf32>
    %279 = arith.addf %273, %278 : vector<2x128xf32>
    %c0_190 = arith.constant 0 : index
    %c0_191 = arith.constant 0 : index
    %280 = vector.load %arg13[%c0_190, %c0_191] : memref<128x128xf32, #tpu.memory_space<vmem>>, vector<128x128xf32>
    %cst_192 = arith.constant dense<0.000000e+00> : vector<2x128xf32>
    %281 = tpu.matmul %279, %280, %cst_192 {dimension_numbers = #tpu.dot_dimension_numbers<[1], [0], [0], [1], [0, 0, 1, 1], [], []>} : vector<2x128xf32>, vector<128x128xf32>, vector<2x128xf32> -> vector<2x128xf32>
    %c0_193 = arith.constant 0 : index
    %c0_194 = arith.constant 0 : index
    %282 = vector.load %arg14[%c0_193, %c0_194] : memref<1x128xf32, #tpu.memory_space<vmem>>, vector<1x128xf32>
    %283 = vector.broadcast %282 : vector<1x128xf32> to vector<2x128xf32>
    %284 = arith.addf %281, %283 : vector<2x128xf32>
    %c0_195 = arith.constant 0 : index
    %c0_196 = arith.constant 0 : index
    %285 = vector.load %arg15[%c0_195, %c0_196] : memref<2x128xf32, #tpu.memory_space<vmem>>, vector<2x128xf32>
    tpu.vector_store %arg15[%c0_195, %c0_196], %284 {strides = array<i32>} : memref<2x128xf32, #tpu.memory_space<vmem>>, vector<2x128xf32>,
    return
  }
}

</mosaic_0001>

<bundles_post_ra>
// kernel: wdcnn_forward.1
= control target key start
LH: loop header
LB: loop body
LE: loop exit
PB: predicated region body
PF: predicated region fallthrough
CT: control target
= control target key end

     0   :  { %s18379_s0 = inlined_call_operand.vmem [shape: f32[2,128,128], index: 0, kind: input, shape index: {}]   ;;  %s18380_s1 = inlined_call_operand.vmem [shape: f32[128,128], index: 1, kind: input, shape index: {}]   ;;  %s18381_s2 = inlined_call_operand.vmem [shape: f32[3,128], index: 2, kind: input, shape index: {}]   ;;  %s18382_s3 = inlined_call_operand.vmem [shape: f32[3,128,128], index: 3, kind: input, shape index: {}]   ;;  %s18383_s4 = inlined_call_operand.vmem [shape: f32[3,128], index: 4, kind: input, shape index: {}]   ;;  %s18384_s5 = inlined_call_operand.vmem [shape: f32[3,128,128], index: 5, kind: input, shape index: {}]   ;;  %s18385_s6 = inlined_call_operand.vmem [shape: f32[3,128], index: 6, kind: input, shape index: {}]   ;;  %s18386_s7 = inlined_call_operand.vmem [shape: f32[3,128,128], index: 7, kind: input, shape index: {}]   ;;  %s18387_s8 = inlined_call_operand.vmem [shape: f32[3,128], index: 8, kind: input, shape index: {}]   ;;  %s18388_s9 = inlined_call_operand.vmem [shape: f32[3,128,128], index: 9, kind: input, shape index: {}]   ;;  %s18389_s10 = inlined_call_operand.vmem [shape: f32[3,128], index: 10, kind: input, shape index: {}]   ;;  %s18390_s11 = inlined_call_operand.vmem [shape: f32[3,128,128], index: 11, kind: input, shape index: {}]   ;;  %s18391_s12 = inlined_call_operand.vmem [shape: f32[1,128], index: 12, kind: input, shape index: {}]   ;;  %s18392_s13 = inlined_call_operand.vmem [shape: f32[128,128], index: 13, kind: input, shape index: {}]   ;;  %s18393_s14 = inlined_call_operand.vmem [shape: f32[1,128], index: 14, kind: input, shape index: {}]   ;;  %s18394_s15 = inlined_call_operand.hbm [shape: f32[2,128], index: 15, kind: output, shape index: {}]  }
   0x1   :  { %v83_v0 = vld [vmem:[%s18380_s1] sm:$0xff]  ;;  %v84_v1 = vld [vmem:[%s18380_s1 + $0x8] sm:$0xff]  ;;  %v85_v2 = vld [vmem:[%s18380_s1 + $0x10] sm:$0xff] }
   0x2   :  { %v12340_v3 = vpack.c.bf16 %v84_v1, %v83_v0  ;;  %v86_v4 = vld [vmem:[%s18380_s1 + $0x18] sm:$0xff]  ;;  %v87_v6 = vld [vmem:[%s18380_s1 + $0x20] sm:$0xff]  ;;  %v88_v7 = vld [vmem:[%s18380_s1 + $0x28] sm:$0xff] }
   0x3   :  { %v12344_v5 = vpack.c.bf16 %v86_v4, %v85_v2  ;;  %v12348_v8 = vpack.c.bf16 %v88_v7, %v87_v6  ;;  %v51_v9 = vld [vmem:[%s18379_s0] sm:$0xff]  ;;  %v89_v10 = vld [vmem:[%s18380_s1 + $0x30] sm:$0xff]  ;;  %v90_v11 = vld [vmem:[%s18380_s1 + $0x38] sm:$0xff] }
   0x4   :  { %12341 = vmatprep.subr.bf16.mxu0 %v12340_v3  ;;  %11633 = vmatprep.mubr.f32.mxu0 %v51_v9  ;;  %v12352_v12 = vpack.c.bf16 %v90_v11, %v89_v10  ;;  %v91_v13 = vld [vmem:[%s18380_s1 + $0x40] sm:$0xff]  ;;  %v92_v14 = vld [vmem:[%s18380_s1 + $0x48] sm:$0xff]  ;;  %v93_v16 = vld [vmem:[%s18380_s1 + $0x50] sm:$0xff] }
   0x5   :  { %12343 = vmatpush3.bf16.msra.mxu0 %v12340_v3  ;;  %v12356_v15 = vpack.c.bf16 %v92_v14, %v91_v13  ;;  %v94_v17 = vld [vmem:[%s18380_s1 + $0x58] sm:$0xff] }
   0x6   :  { %12345 = vmatprep.subr.bf16.mxu0 %v12344_v5 }
   0x9   :  { %12347 = vmatpush3.bf16.msra.mxu0 %v12344_v5 }
   0xa   :  { %12349 = vmatprep.subr.bf16.mxu0 %v12348_v8 }
   0xd   :  { %12351 = vmatpush3.bf16.msra.mxu0 %v12348_v8 }
   0xe   :  { %12353 = vmatprep.subr.bf16.mxu0 %v12352_v12 }
  0x11   :  { %12355 = vmatpush3.bf16.msra.mxu0 %v12352_v12 }
  0x12   :  { %20 = vsyncpa [#allocation4], 0  ;;  %12357 = vmatprep.subr.bf16.mxu0 %v12356_v15  ;;  %v12360_v18 = vpack.c.bf16 %v94_v17, %v93_v16  ;;  %v95_v19 = vld [vmem:[%s18380_s1 + $0x60] sm:$0xff]  ;;  %v96_v20 = vld [vmem:[%s18380_s1 + $0x68] sm:$0xff]  ;;  %v12964_v56 = vmov 1983009808   ;;  %v367_v58 = vlaneseq }
  0x13   :  { %v12364_v21 = vpack.c.bf16 %v96_v20, %v95_v19  ;;  %v97_v22 = vld [vmem:[%s18380_s1 + $0x70] sm:$0xff]  ;;  %v98_v23 = vld [vmem:[%s18380_s1 + $0x78] sm:$0xff]  ;;  %v52_v25 = vld [vmem:[%s18379_s0 + $0x8] sm:$0xff]  ;;  %v365_v57 = vunpack.c.l.s4 %v12964_v56  ;;  %vm2315_vm0 = vcmask 1041409   ;;  %vm2317_vm1 = vcmask 1042434   ;;  %s12968_s1 = smov [#allocation3]  }
  0x14   :  { %v12368_v24 = vpack.c.bf16 %v98_v23, %v97_v22  ;;  %v53_v26 = vld [vmem:[%s18379_s0 + $0x10] sm:$0xff]  ;;  %v54_v27 = vld [vmem:[%s18379_s0 + $0x18] sm:$0xff]  ;;  %v55_v28 = vld [vmem:[%s18379_s0 + $0x20] sm:$0xff]  ;;  %v368_v60 = vshrl.u32 %v367_v58, 7  ;;  %vm2319_vm2 = vcmask 1043459   ;;  %vm2321_vm3 = vcmask 1044484  }
  0x15   :  { %12359 = vmatpush3.bf16.msra.mxu0 %v12356_v15  ;;  %v56_v29 = vld [vmem:[%s18379_s0 + $0x28] sm:$0xff]  ;;  %v57_v30 = vld [vmem:[%s18379_s0 + $0x30] sm:$0xff]  ;;  %v58_v31 = vld [vmem:[%s18379_s0 + $0x38] sm:$0xff]  ;;  %v366_v59 = vunpack.c.0.s8 %v365_v57  ;;  %vm2323_vm4 = vcmask 1045509   ;;  %vm2325_vm5 = vcmask 1046534   ;;  %vm2327_vm6 = vcmask 1047559  }
  0x16   :  { %12361 = vmatprep.subr.bf16.mxu0 %v12360_v18  ;;  %v59_v32 = vld [vmem:[%s18379_s0 + $0x40] sm:$0xff]  ;;  %v60_v33 = vld [vmem:[%s18379_s0 + $0x48] sm:$0xff]  ;;  %v61_v34 = vld [vmem:[%s18379_s0 + $0x50] sm:$0xff]  ;;  %vm12967_vm7 = vmmov 0   ;;  %vm10238_vm8 = vcmask 1045504   ;;  %s10782_s28 = sshll.u32 %s12968_s1, 4  ;;  %s10783_s28 = int_to_ptr.vmem [resolvable:$true] %s10782_s28 }
  0x17   :  { %v62_v35 = vld [vmem:[%s18379_s0 + $0x58] sm:$0xff]  ;;  %v63_v36 = vld [vmem:[%s18379_s0 + $0x60] sm:$0xff]  ;;  %v64_v37 = vld [vmem:[%s18379_s0 + $0x68] sm:$0xff]  ;;  %v13198_v62 = vsub.s32 %v366_v59, %v368_v60  ;;  %p12945_p1 = scmp.lt.s32.totalorder %s10783_s28, %s10783_s28 }
  0x18   :  { %v65_v38 = vld [vmem:[%s18379_s0 + $0x70] sm:$0xff]  ;;  %v66_v39 = vld [vmem:[%s18379_s0 + $0x78] sm:$0xff]  ;;  %v67_v40 = vld [vmem:[%s18379_s0 + $0x80] sm:$0xff] }
  0x19   :  { %12363 = vmatpush3.bf16.msra.mxu0 %v12360_v18  ;;  %v68_v41 = vld [vmem:[%s18379_s0 + $0x88] sm:$0xff]  ;;  %v69_v42 = vld [vmem:[%s18379_s0 + $0x90] sm:$0xff]  ;;  %v70_v43 = vld [vmem:[%s18379_s0 + $0x98] sm:$0xff]  ;;  %18535 = vst [vmem:[#allocation6_spill] sm:$0xff] %v13198_v62 }
  0x1a   :  { %12365 = vmatprep.subr.bf16.mxu0 %v12364_v21  ;;  %v71_v44 = vld [vmem:[%s18379_s0 + $0xa0] sm:$0xff]  ;;  %v72_v45 = vld [vmem:[%s18379_s0 + $0xa8] sm:$0xff]  ;;  %v73_v46 = vld [vmem:[%s18379_s0 + $0xb0] sm:$0xff] }
  0x1b   :  { %v74_v47 = vld [vmem:[%s18379_s0 + $0xb8] sm:$0xff]  ;;  %v75_v48 = vld [vmem:[%s18379_s0 + $0xc0] sm:$0xff]  ;;  %v76_v49 = vld [vmem:[%s18379_s0 + $0xc8] sm:$0xff] }
  0x1c   :  { %v77_v50 = vld [vmem:[%s18379_s0 + $0xd0] sm:$0xff]  ;;  %v78_v51 = vld [vmem:[%s18379_s0 + $0xd8] sm:$0xff]  ;;  %v79_v52 = vld [vmem:[%s18379_s0 + $0xe0] sm:$0xff] }
  0x1d   :  { %12367 = vmatpush3.bf16.msra.mxu0 %v12364_v21  ;;  %v80_v53 = vld [vmem:[%s18379_s0 + $0xe8] sm:$0xff]  ;;  %v81_v54 = vld [vmem:[%s18379_s0 + $0xf0] sm:$0xff]  ;;  %v82_v55 = vld [vmem:[%s18379_s0 + $0xf8] sm:$0xff] }
  0x1e   :  { %12369 = vmatprep.subr.bf16.mxu0 %v12368_v24  ;;  %v13196_v61 = vld [vmem:[%s18381_s2] ss:$0 sm:$0xff] }
  0x21   :  { %12371 = vmatpush3.bf16.msra.mxu0 %v12368_v24 }
  0x24   :  { %11634 = vmatmul.mubr.f32.vlgmr.msra.gmra.mrb[0].mxu0 %v52_v25 }
  0x25   :  { %11636 = vmatprep.mubr.f32.mxu0 %v53_v26  ;;  %v13210_v26 = vsub.s32 0, %v368_v60 }
  0x28   :  { %11637 = vmatmul.mubr.f32.gmra.mrb[2].mxu0 %v54_v27 }
  0x29   :  { %11639 = vmatprep.mubr.f32.mxu0 %v55_v28 }
  0x2c   :  { %11640 = vmatmul.mubr.f32.gmra.mrb[4].mxu0 %v56_v29 }
  0x2d   :  { %11642 = vmatprep.mubr.f32.mxu0 %v57_v30 }
  0x30   :  { %11643 = vmatmul.mubr.f32.gmra.mrb[6].mxu0 %v58_v31 }
  0x31   :  { %11645 = vmatprep.mubr.f32.mxu0 %v59_v32 }
  0x34   :  { %11646 = vmatmul.mubr.f32.gmra.mrb[8].mxu0 %v60_v33 }
  0x35   :  { %11648 = vmatprep.mubr.f32.mxu0 %v61_v34 }
  0x38   :  { %11649 = vmatmul.mubr.f32.gmra.mrb[10].mxu0 %v62_v35 }
  0x39   :  { %11651 = vmatprep.mubr.f32.mxu0 %v63_v36 }
  0x3c   :  { %11652 = vmatmul.mubr.f32.gmra.mrb[12].mxu0 %v64_v37 }
  0x3d   :  { %11654 = vmatprep.mubr.f32.mxu0 %v65_v38 }
  0x40   :  { %11655 = vmatmul.mubr.f32.gmra.mrb[14].mxu0 %v66_v39 }
  0x41   :  { %11657 = vmatprep.mubr.f32.mxu0 %v67_v40 }
  0x44   :  { %11658 = vmatmul.mubr.f32.gmra.mrb[16].mxu0 %v68_v41 }
  0x45   :  { %11660 = vmatprep.mubr.f32.mxu0 %v69_v42 }
  0x48   :  { %11661 = vmatmul.mubr.f32.gmra.mrb[18].mxu0 %v70_v43 }
  0x49   :  { %11663 = vmatprep.mubr.f32.mxu0 %v71_v44 }
  0x4c   :  { %11664 = vmatmul.mubr.f32.gmra.mrb[20].mxu0 %v72_v45 }
  0x4d   :  { %11666 = vmatprep.mubr.f32.mxu0 %v73_v46 }
  0x50   :  { %11667 = vmatmul.mubr.f32.gmra.mrb[22].mxu0 %v74_v47 }
  0x51   :  { %11669 = vmatprep.mubr.f32.mxu0 %v75_v48 }
  0x54   :  { %11670 = vmatmul.mubr.f32.gmra.mrb[24].mxu0 %v76_v49 }
  0x55   :  { %11672 = vmatprep.mubr.f32.mxu0 %v77_v50 }
  0x58   :  { %11673 = vmatmul.mubr.f32.gmra.mrb[26].mxu0 %v78_v51 }
  0x59   :  { %11675 = vmatprep.mubr.f32.mxu0 %v79_v52 }
  0x5c   :  { %11676 = vmatmul.mubr.f32.gmra.mrb[28].mxu0 %v80_v53 }
  0x5d   :  { %11678 = vmatprep.mubr.f32.mxu0 %v81_v54 }
  0x60   :  { %11679 = vmatmul.mubr.f32.gmra.mrb[30].mxu0 %v82_v55 }
  0xf7   :  { %v11635_v63 = vpop.f32.mrb[0].mxu0 }
  0xf8   :  { %v176_v0 = vadd.f32 %v11635_v63, %v13196_v61  ;;  %v170_v1 = vpop.f32.mrb[1].mxu0 }
  0xf9   :  { %v171_v2 = vadd.f32 %v13196_v61, %v170_v1 }
  0xfa   :  { %v380_v3 = vcombine.high %v176_v0, %v176_v0  ;;  %v387_v4 = vrot.slane %v176_v0, %v13198_v62 }
  0xfb   :  { %v363_v5 = vcombine.high %v171_v2, %v171_v2  ;;  %v370_v6 = vrot.slane %v171_v2, %v13198_v62  ;;  %v11638_v7 = vpop.f32.mrb[2].mxu0 }
  0xfc   :  { %v394_v8 = vrot.slane %v380_v3, %v13198_v62  ;;  %v180_v9 = vpop.f32.mrb[3].mxu0  ;;  %v395_v13 = vcombine.high %v387_v4, %v387_v4  ;;  %v10795_v21 = vrot.slane %v387_v4, 9  ;;  %v186_v37 = vadd.f32 %v11638_v7, %v13196_v61 }
  0xfd   :  { %v377_v10 = vrot.slane %v363_v5, %v13198_v62  ;;  %v378_v11 = vcombine.high %v370_v6, %v370_v6  ;;  %v10791_v12 = vrot.slane %v370_v6, 9  ;;  %v181_v40 = vadd.f32 %v13196_v61, %v180_v9 }
  0xfe   :  { %v396_v19 = vcombine.high %v394_v8, %v394_v8  ;;  %v10796_v25 = vrot.slane %v395_v13, 9  ;;  %v10797_v28 = vrot.slane %v394_v8, 9  ;;  %v1423_v35 = vmax.f32 %v387_v4, %v10795_v21 }
  0xff   :  { %v379_v14 = vcombine.high %v377_v10, %v377_v10  ;;  %v10792_v15 = vrot.slane %v378_v11, 9  ;;  %v10793_v16 = vrot.slane %v377_v10, 9  ;;  %v1419_v17 = vmax.f32 %v370_v6, %v10791_v12  ;;  %v13206_v18 = vpop.f32.mrb[4].mxu0 }
 0x100   :  { %v13208_v20 = vpop.f32.mrb[5].mxu0  ;;  %v10798_v33 = vrot.slane %v396_v19, 9  ;;  %v1424_v41 = vmax.f32 %v395_v13, %v10796_v25  ;;  %v1425_v42 = vmax.f32 %v394_v8, %v10797_v28  ;;  %v13243_v51 = vmax.f32 %v1423_v35, 0.0 }
 0x101   :  { %v10794_v22 = vrot.slane %v379_v14, 9  ;;  %v1420_v23 = vmax.f32 %v378_v11, %v10792_v15  ;;  %v1421_v24 = vmax.f32 %v377_v10, %v10793_v16  ;;  %v13212_v27 = vmax.f32 %v1419_v17, 0.0 }
 0x102   :  { %v1426_v46 = vmax.f32 %v396_v19, %v10798_v33  ;;  %v414_v54 = vcombine.high %v186_v37, %v186_v37  ;;  %v13253_v59 = vmax.f32 %v1424_v41, 0.0  ;;  %v13255_v60 = vmax.f32 %v1425_v42, 0.0 }
 0x103   :  { %v1422_v29 = vmax.f32 %v379_v14, %v10794_v22  ;;  %v13214_v30 = vmax.f32 %v1420_v23, 0.0  ;;  %v13216_v31 = vmax.f32 %v1421_v24, 0.0  ;;  %v13218_v32 = vpop.f32.mrb[6].mxu0  ;;  %v1806_v38 = vrot.slane %v13212_v27, %v13210_v26 }
 0x104   :  { %v13220_v34 = vpop.f32.mrb[7].mxu0  ;;  %v2472_v44 = vmul.f32 %v13212_v27, %v13212_v27  ;;  %18536 = vst [vmem:[#allocation7_spill] sm:$0xff] %v13255_v60  ;;  %v13259_v0 = vmax.f32 %v1426_v46, 0.0  ;;  %v421_v2 = vrot.slane %v186_v37, %v13198_v62  ;;  %v397_v3 = vcombine.high %v181_v40, %v181_v40 }
 0x105   :  { %v13222_v36 = vmax.f32 %v1422_v29, 0.0  ;;  %v1810_v39 = vrot.slane %v13214_v30, %v13210_v26  ;;  %v1814_v43 = vrot.slane %v13216_v31, %v13210_v26  ;;  %v2473_v48 = vmul.f32 %v13214_v30, %v13214_v30 }
 0x106   :  { %v2474_v49 = vmul.f32 %v13216_v31, %v13216_v31  ;;  %v2731_v56 = vrot.slane %v2472_v44, %v13210_v26  ;;  %18537 = vst [vmem:[#allocation8_spill] sm:$0xff] %v13259_v0  ;;  %v428_v7 = vrot.slane %v414_v54, %v13198_v62  ;;  %v1822_v8 = vrot.slane %v13243_v51, %v13210_v26 }
 0x107   :  { %v13234_v45 = vpop.f32.mrb[8].mxu0  ;;  %v2316_v47 = vsel %vm2315_vm0, %v1810_v39, %v1806_v38  ;;  %v1818_v52 = vrot.slane %v13222_v36, %v13210_v26  ;;  %v2475_v53 = vmul.f32 %v13222_v36, %v13222_v36  ;;  %v2735_v57 = vrot.slane %v2473_v48, %v13210_v26 }
 0x108   :  { %v13241_v50 = vpop.f32.mrb[9].mxu0  ;;  %v2318_v55 = vsel %vm2317_vm1, %v1814_v43, %v2316_v47  ;;  %v2739_v58 = vrot.slane %v2474_v49, %v13210_v26  ;;  %v2476_v9 = vmul.f32 %v13243_v51, %v13243_v51  ;;  %v1826_v11 = vrot.slane %v13253_v59, %v13210_v26 }
 0x109   :  { %v3240_v1 = vsel %vm2315_vm0, %v2735_v57, %v2731_v56  ;;  %v2320_v5 = vsel %vm2319_vm2, %v1818_v52, %v2318_v55  ;;  %v2743_v6 = vrot.slane %v2475_v53, %v13210_v26  ;;  %v2477_v12 = vmul.f32 %v13253_v59, %v13253_v59 }
 0x10a   :  { %v3241_v10 = vsel %vm2317_vm1, %v2739_v58, %v3240_v1  ;;  %v13279_v13 = vmul.f32 %v13255_v60, %v13255_v60  ;;  %v404_v14 = vrot.slane %v181_v40, %v13198_v62  ;;  %v13286_v16 = vmul.f32 %v13259_v0, %v13259_v0 }
 0x10b   :  { %v13257_v63 = vpop.f32.mrb[10].mxu0  ;;  %v2322_v17 = vsel %vm2321_vm3, %v1822_v8, %v2320_v5  ;;  %v429_v19 = vcombine.high %v421_v2, %v421_v2  ;;  %v411_v21 = vrot.slane %v397_v3, %v13198_v62  ;;  %v3242_v23 = vsel %vm2319_vm2, %v2743_v6, %v3241_v10 }
 0x10c   :  { %v13263_v4 = vpop.f32.mrb[11].mxu0  ;;  %v430_v24 = vcombine.high %v428_v7, %v428_v7  ;;  %v10803_v25 = vrot.slane %v421_v2, 9  ;;  %v412_v28 = vcombine.high %v404_v14, %v404_v14  ;;  %v1830_v29 = vrot.slane %v13255_v60, %v13210_v26 }
 0x10d   :  { %v1834_v33 = vrot.slane %v13259_v0, %v13210_v26  ;;  %v2747_v35 = vrot.slane %v2476_v9, %v13210_v26  ;;  %v2751_v37 = vrot.slane %v2477_v12, %v13210_v26  ;;  %v2324_v38 = vsel %vm2323_vm4, %v1826_v11, %v2322_v17 }
 0x10e   :  { %v10805_v39 = vrot.slane %v428_v7, 9  ;;  %v413_v40 = vcombine.high %v411_v21, %v411_v21  ;;  %v2755_v42 = vrot.slane %v13279_v13, %v13210_v26  ;;  %v10804_v44 = vrot.slane %v429_v19, 9 }
 0x10f   :  { %v13282_v15 = vpop.f32.mrb[12].mxu0  ;;  %v3243_v43 = vsel %vm2321_vm3, %v2747_v35, %v3242_v23  ;;  %v10799_v46 = vrot.slane %v404_v14, 9  ;;  %v2759_v48 = vrot.slane %v13286_v16, %v13210_v26  ;;  %v10806_v49 = vrot.slane %v430_v24, 9 }
 0x110   :  { %v13290_v22 = vpop.f32.mrb[13].mxu0  ;;  %v1431_v52 = vmax.f32 %v421_v2, %v10803_v25  ;;  %v10800_v53 = vrot.slane %v412_v28, 9  ;;  %v2326_v54 = vsel %vm2325_vm5, %v1830_v29, %v2324_v38  ;;  %v10801_v55 = vrot.slane %v411_v21, 9 }
 0x111   :  { %v10802_v56 = vrot.slane %v413_v40, 9  ;;  %v1427_v57 = vmax.f32 %v404_v14, %v10799_v46  ;;  %v3244_v58 = vsel %vm2323_vm4, %v2751_v37, %v3243_v43  ;;  %v1433_v1 = vmax.f32 %v428_v7, %v10805_v39 }
 0x112   :  { %v1428_v3 = vmax.f32 %v412_v28, %v10800_v53  ;;  %v196_v5 = vadd.f32 %v13206_v18, %v13196_v61  ;;  %v1432_v8 = vmax.f32 %v429_v19, %v10804_v44  ;;  %v1429_v9 = vmax.f32 %v411_v21, %v10801_v55 }
 0x113   :  { %v13300_v41 = vpop.f32.mrb[14].mxu0  ;;  %v1430_v10 = vmax.f32 %v413_v40, %v10802_v56  ;;  %v13315_v2 = vmax.f32 %v1427_v57, 0.0  ;;  %v1434_v12 = vmax.f32 %v430_v24, %v10806_v49  ;;  %v13319_v13 = vmax.f32 %v1431_v52, 0.0 }
 0x114   :  { %v13305_v47 = vpop.f32.mrb[15].mxu0  ;;  %v13321_v14 = vmax.f32 %v1428_v3, 0.0  ;;  %v448_v7 = vcombine.high %v196_v5, %v196_v5  ;;  %v13323_v17 = vmax.f32 %v1429_v9, 0.0  ;;  %v455_v19 = vrot.slane %v196_v5, %v13198_v62 }
 0x115   :  { %18538 = vst [vmem:[#allocation9_spill] sm:$0xff] %v13319_v13  ;;  %v13325_v23 = vmax.f32 %v1430_v10, 0.0  ;;  %v2480_v18 = vmul.f32 %v13315_v2, %v13315_v2  ;;  %v1838_v21 = vrot.slane %v13315_v2, %v13210_v26  ;;  %v13347_v40 = vmax.f32 %v1433_v1, 0.0 }
 0x116   :  { %18539 = vst [vmem:[#allocation10_spill] sm:$0xff] %v13321_v14  ;;  %18540 = vst [vmem:[#allocation11_spill] sm:$0xff] %v13323_v17  ;;  %v1842_v24 = vrot.slane %v13321_v14, %v13210_v26  ;;  %v2481_v25 = vmul.f32 %v13321_v14, %v13321_v14  ;;  %v462_v28 = vrot.slane %v448_v7, %v13198_v62  ;;  %v13352_v49 = vmax.f32 %v1432_v8, 0.0 }
 0x117   :  { %v13313_v6 = vpop.f32.mrb[16].mxu0  ;;  %18541 = vst [vmem:[#allocation12_spill] sm:$0xff] %v13325_v23  ;;  %v1846_v35 = vrot.slane %v13323_v17, %v13210_v26  ;;  %v1850_v37 = vrot.slane %v13325_v23, %v13210_v26  ;;  %v2482_v38 = vmul.f32 %v13323_v17, %v13323_v17  ;;  %v2483_v39 = vmul.f32 %v13325_v23, %v13325_v23 }
 0x118   :  { %v13317_v11 = vpop.f32.mrb[17].mxu0  ;;  %18542 = vst [vmem:[#allocation13_spill] sm:$0xff] %v13347_v40  ;;  %v2329_v43 = vsel %vm2315_vm0, %v1842_v24, %v1838_v21  ;;  %v2763_v44 = vrot.slane %v2480_v18, %v13210_v26  ;;  %v2767_v46 = vrot.slane %v2481_v25, %v13210_v26  ;;  %18543 = vst [vmem:[#allocation14_spill] sm:$0xff] %v13352_v49  ;;  %v13366_v7 = vmax.f32 %v1434_v12, 0.0 }
 0x119   :  { %v2330_v52 = vsel %vm2317_vm1, %v1846_v35, %v2329_v43  ;;  %v2771_v53 = vrot.slane %v2482_v38, %v13210_v26  ;;  %v463_v55 = vcombine.high %v455_v19, %v455_v19  ;;  %v1854_v56 = vrot.slane %v13319_v13, %v13210_v26 }
 0x11a   :  { %v2331_v57 = vsel %vm2319_vm2, %v1850_v37, %v2330_v52  ;;  %v3247_v1 = vsel %vm2315_vm0, %v2767_v46, %v2763_v44  ;;  %v191_v3 = vadd.f32 %v13196_v61, %v13208_v20  ;;  %v3245_v5 = vsel %vm2325_vm5, %v2755_v42, %v3244_v58  ;;  %18544 = vst [vmem:[#allocation15_spill] sm:$0xff] %v13366_v7 }
 0x11b   :  { %v13337_v29 = vpop.f32.mrb[18].mxu0  ;;  %v2484_v8 = vmul.f32 %v13319_v13, %v13319_v13  ;;  %v2775_v9 = vrot.slane %v2483_v39, %v13210_v26  ;;  %v464_v10 = vcombine.high %v462_v28, %v462_v28  ;;  %v2332_v18 = vsel %vm2321_vm3, %v1854_v56, %v2331_v57 }
 0x11c   :  { %v3248_v21 = vsel %vm2317_vm1, %v2771_v53, %v3247_v1  ;;  %v10811_v24 = vrot.slane %v455_v19, 9  ;;  %v13370_v25 = vpop.f32.mrb[19].mxu0  ;;  %v1858_v20 = vrot.slane %v13352_v49, %v13210_v26  ;;  %v2485_v42 = vmul.f32 %v13352_v49, %v13352_v49 }
 0x11d   :  { %v2486_v58 = vmul.f32 %v13347_v40, %v13347_v40  ;;  %v10812_v35 = vrot.slane %v463_v55, 9  ;;  %v2328_v12 = vsel %vm2327_vm6, %v1834_v33, %v2326_v54  ;;  %v13386_v37 = vsel %vm2327_vm6, %v2759_v48, %v3245_v5 }
 0x11e   :  { %v431_v38 = vcombine.high %v191_v3, %v191_v3  ;;  %v206_v39 = vadd.f32 %v13218_v32, %v13196_v61  ;;  %v2333_v43 = vsel %vm2323_vm4, %v1858_v20, %v2332_v18  ;;  %v3249_v44 = vsel %vm2319_vm2, %v2775_v9, %v3248_v21 }
 0x11f   :  { %v10813_v46 = vrot.slane %v462_v28, 9  ;;  %v10814_v52 = vrot.slane %v464_v10, 9  ;;  %v1862_v53 = vrot.slane %v13347_v40, %v13210_v26  ;;  %v1866_v33 = vrot.slane %v13366_v7, %v13210_v26 }
 0x120   :  { %v2779_v16 = vrot.slane %v2484_v8, %v13210_v26  ;;  %v1439_v48 = vmax.f32 %v455_v19, %v10811_v24  ;;  %v2487_v54 = vmul.f32 %v13366_v7, %v13366_v7  ;;  %v2783_v32 = vrot.slane %v2485_v42, %v13210_v26 }
 0x121   :  { %v2787_v56 = vrot.slane %v2486_v58, %v13210_v26  ;;  %v1440_v57 = vmax.f32 %v463_v55, %v10812_v35  ;;  %v2334_v1 = vsel %vm2325_vm5, %v1862_v53, %v2333_v43  ;;  %v438_v9 = vrot.slane %v191_v3, %v13198_v62 }
 0x122   :  { %v3250_v5 = vsel %vm2321_vm3, %v2779_v16, %v3249_v44  ;;  %v445_v18 = vrot.slane %v431_v38, %v13198_v62  ;;  %v1441_v21 = vmax.f32 %v462_v28, %v10813_v46  ;;  %v1442_v20 = vmax.f32 %v464_v10, %v10814_v52  ;;  %v13411_v10 = vpop.f32.mrb[20].mxu0 }
 0x123   :  { %v482_v8 = vcombine.high %v206_v39, %v206_v39  ;;  %v489_v19 = vrot.slane %v206_v39, %v13198_v62  ;;  %v13406_v24 = vmax.f32 %v1439_v48, 0.0  ;;  %v446_v7 = vcombine.high %v438_v9, %v438_v9 }
 0x124   :  { %v447_v42 = vcombine.high %v445_v18, %v445_v18  ;;  %v10807_v40 = vrot.slane %v438_v9, 9  ;;  %v2335_v55 = vsel %vm2327_vm6, %v1866_v33, %v2334_v1  ;;  %v3251_v58 = vsel %vm2323_vm4, %v2783_v32, %v3250_v5 }
 0x125   :  { %18545 = vst [vmem:[#allocation16_spill] sm:$0xff] %v13406_v24  ;;  %v10809_v35 = vrot.slane %v445_v18, 9  ;;  %v496_v43 = vrot.slane %v482_v8, %v13198_v62  ;;  %v10808_v3 = vrot.slane %v446_v7, 9  ;;  %v497_v28 = vcombine.high %v489_v19, %v489_v19 }
 0x126   :  { %v10810_v44 = vrot.slane %v447_v42, 9  ;;  %v1435_v38 = vmax.f32 %v438_v9, %v10807_v40  ;;  %v2791_v39 = vrot.slane %v2487_v54, %v13210_v26  ;;  %v13414_v46 = vmax.f32 %v1440_v57, 0.0 }
 0x127   :  { %v13416_v52 = vmax.f32 %v1441_v21, 0.0  ;;  %v1437_v53 = vmax.f32 %v445_v18, %v10809_v35  ;;  %v3252_v33 = vsel %vm2325_vm5, %v2787_v56, %v3251_v58  ;;  %v1436_v16 = vmax.f32 %v446_v7, %v10808_v3 }
 0x128   :  { %18546 = vst [vmem:[#allocation17_spill] sm:$0xff] %v13414_v46  ;;  %v1438_v48 = vmax.f32 %v447_v42, %v10810_v44  ;;  %v13419_v32 = vmax.f32 %v1435_v38, 0.0  ;;  %v13421_v1 = vadd.f32 %v2335_v55, %v2328_v12  ;;  %v13423_v5 = vmax.f32 %v1442_v20, 0.0 }
 0x129   :  { %18547 = vst [vmem:[#allocation18_spill] sm:$0xff] %v13416_v52  ;;  %v13425_v40 = vmax.f32 %v1437_v53, 0.0  ;;  %v10819_v9 = vrot.slane %v489_v19, 9  ;;  %v1886_v54 = vrot.slane %v13406_v24, %v13210_v26  ;;  %v13429_v57 = vmax.f32 %v1436_v16, 0.0 }
 0x12a   :  { %18548 = vst [vmem:[#allocation19_spill] sm:$0xff] %v13423_v5  ;;  %v498_v21 = vcombine.high %v496_v43, %v496_v43  ;;  %v10820_v18 = vrot.slane %v497_v28, 9  ;;  %v3253_v56 = vsel %vm2327_vm6, %v2791_v39, %v3252_v33  ;;  %v13434_v8 = vmax.f32 %v1438_v48, 0.0 }
 0x12b   :  { %18549 = vst [vmem:[#allocation20_spill] sm:$0xff] %v13425_v40  ;;  %18550 = vst [vmem:[#allocation21_spill] sm:$0xff] %v13429_v57  ;;  %v2488_v12 = vmul.f32 %v13419_v32, %v13419_v32  ;;  %v1874_v42 = vrot.slane %v13429_v57, %v13210_v26  ;;  %v2489_v55 = vmul.f32 %v13429_v57, %v13429_v57  ;;  %v10821_v44 = vrot.slane %v496_v43, 9  ;;  %v13459_v57 = vpop.f32.mrb[21].mxu0 }
 0x12c   :  { %18551 = vst [vmem:[#allocation22_spill] sm:$0xff] %v13434_v8  ;;  %v2490_v58 = vmul.f32 %v13425_v40, %v13425_v40  ;;  %v2492_v35 = vmul.f32 %v13406_v24, %v13406_v24  ;;  %v1870_v3 = vrot.slane %v13419_v32, %v13210_v26  ;;  %v1447_v38 = vmax.f32 %v489_v19, %v10819_v9 }
 0x12d   :  { %v1878_v39 = vrot.slane %v13425_v40, %v13210_v26  ;;  %v2799_v53 = vrot.slane %v2489_v55, %v13210_v26  ;;  %v10822_v33 = vrot.slane %v498_v21, 9  ;;  %v1448_v16 = vmax.f32 %v497_v28, %v10820_v18 }
 0x12e   :  { %v2493_v48 = vmul.f32 %v13414_v46, %v13414_v46  ;;  %v2336_v20 = vsel %vm2315_vm0, %v1874_v42, %v1870_v3  ;;  %v2491_v7 = vmul.f32 %v13434_v8, %v13434_v8  ;;  %v2795_v24 = vrot.slane %v2488_v12, %v13210_v26 }
 0x12f   :  { %v13463_v19 = vmul.f32 %v13416_v52, %v13416_v52  ;;  %v13467_v9 = vmul.f32 %v13423_v5, %v13423_v5  ;;  %v2803_v28 = vrot.slane %v2490_v58, %v13210_v26  ;;  %v201_v18 = vadd.f32 %v13196_v61, %v13220_v34 }
 0x130   :  { %v13473_v42 = vadd.f32 %v3253_v56, %v13386_v37  ;;  %v1882_v12 = vrot.slane %v13434_v8, %v13210_v26  ;;  %v3254_v55 = vsel %vm2315_vm0, %v2799_v53, %v2795_v24  ;;  %v1449_v3 = vmax.f32 %v496_v43, %v10821_v44 }
 0x131   :  { %v2337_v40 = vsel %vm2317_vm1, %v1878_v39, %v2336_v20  ;;  %v1450_v49 = vmax.f32 %v498_v21, %v10822_v33  ;;  %v13479_v13 = vmax.f32 %v1447_v38, 0.0  ;;  %v13481_v23 = vmax.f32 %v1448_v16, 0.0 }
 0x132   :  { %v2811_v34 = vrot.slane %v2492_v35, %v13210_v26  ;;  %v2815_v37 = vrot.slane %v2493_v48, %v13210_v26  ;;  %v2807_v56 = vrot.slane %v2491_v7, %v13210_v26  ;;  %v2819_v24 = vrot.slane %v13463_v19, %v13210_v26  ;;  %v13512_v7 = vpop.f32.mrb[22].mxu0 }
 0x133   :  { %18552 = vst [vmem:[#allocation23_spill] sm:$0xff] %v13479_v13  ;;  %18553 = vst [vmem:[#allocation24_spill] sm:$0xff] %v13481_v23  ;;  %v2823_v43 = vrot.slane %v13467_v9, %v13210_v26  ;;  %v3255_v21 = vsel %vm2317_vm1, %v2803_v28, %v3254_v55  ;;  %v465_v20 = vcombine.high %v201_v18, %v201_v18  ;;  %v13494_v38 = vmax.f32 %v1449_v3, 0.0 }
 0x134   :  { %v2338_v44 = vsel %vm2319_vm2, %v1882_v12, %v2337_v40  ;;  %v472_v39 = vrot.slane %v201_v18, %v13198_v62  ;;  %v216_v35 = vadd.f32 %v13234_v45, %v13196_v61  ;;  %v13499_v53 = vmax.f32 %v1450_v49, 0.0 }
 0x135   :  { %18554 = vst [vmem:[#allocation25_spill] sm:$0xff] %v13494_v38  ;;  %v479_v16 = vrot.slane %v465_v20, %v13198_v62  ;;  %v3256_v48 = vsel %vm2319_vm2, %v2807_v56, %v3255_v21  ;;  %v2339_v28 = vsel %vm2321_vm3, %v1886_v54, %v2338_v44  ;;  %v18556_v54 = vrot.slane %v13414_v46, %v13210_v26 }
 0x136   :  { %18555 = vst [vmem:[#allocation26_spill] sm:$0xff] %v13499_v53  ;;  %v480_v40 = vcombine.high %v472_v39, %v472_v39  ;;  %v10815_v19 = vrot.slane %v472_v39, 9  ;;  %v516_v9 = vcombine.high %v216_v35, %v216_v35  ;;  %v523_v45 = vrot.slane %v216_v35, %v13198_v62 }
 0x137   :  { %v481_v18 = vcombine.high %v479_v16, %v479_v16  ;;  %v10817_v12 = vrot.slane %v479_v16, 9  ;;  %v3257_v56 = vsel %vm2321_vm3, %v2811_v34, %v3256_v48  ;;  %v2340_v44 = vsel %vm2323_vm4, %v18556_v54, %v2339_v28 }
 0x138   :  { %v10816_v55 = vrot.slane %v480_v40, 9  ;;  %v1443_v3 = vmax.f32 %v472_v39, %v10815_v19  ;;  %v530_v33 = vrot.slane %v516_v9, %v13198_v62  ;;  %v531_v58 = vcombine.high %v523_v45, %v523_v45 }
 0x139   :  { %v10818_v21 = vrot.slane %v481_v18, 9  ;;  %v1445_v20 = vmax.f32 %v479_v16, %v10817_v12  ;;  %v13525_v39 = vmul.f32 %v13479_v13, %v13479_v13  ;;  %v3258_v48 = vsel %vm2323_vm4, %v2815_v37, %v3257_v56 }
 0x13a   :  { %v1444_v49 = vmax.f32 %v480_v40, %v10816_v55  ;;  %v13521_v8 = vmax.f32 %v1443_v3, 0.0  ;;  %v532_v16 = vcombine.high %v530_v33, %v530_v33  ;;  %v13532_v9 = vmul.f32 %v13481_v23, %v13481_v23 }
 0x13b   :  { %v1446_v19 = vmax.f32 %v481_v18, %v10818_v21  ;;  %v13527_v34 = vmax.f32 %v1445_v20, 0.0  ;;  %v13536_v28 = vmul.f32 %v13494_v38, %v13494_v38  ;;  %v18560_v12 = vrot.slane %v13416_v52, %v13210_v26 }
 0x13c   :  { %18557 = vst [vmem:[#allocation27_spill] sm:$0xff] %v13521_v8  ;;  %v13538_v40 = vmax.f32 %v1444_v49, 0.0  ;;  %v1902_v55 = vrot.slane %v13521_v8, %v13210_v26  ;;  %v10827_v3 = vrot.slane %v523_v45, 9  ;;  %v10828_v37 = vrot.slane %v531_v58, 9 }
 0x13d   :  { %18558 = vst [vmem:[#allocation28_spill] sm:$0xff] %v13527_v34  ;;  %v2341_v18 = vsel %vm2325_vm5, %v18560_v12, %v2340_v44  ;;  %v13546_v56 = vmax.f32 %v1446_v19, 0.0  ;;  %v2496_v20 = vmul.f32 %v13521_v8, %v13521_v8  ;;  %v3259_v54 = vsel %vm2325_vm5, %v2819_v24, %v3258_v48 }
 0x13e   :  { %18559 = vst [vmem:[#allocation29_spill] sm:$0xff] %v13538_v40  ;;  %v1906_v21 = vrot.slane %v13538_v40, %v13210_v26  ;;  %v2497_v49 = vmul.f32 %v13538_v40, %v13538_v40  ;;  %v1910_v44 = vrot.slane %v13527_v34, %v13210_v26  ;;  %v10829_v12 = vrot.slane %v530_v33, 9  ;;  %v13566_v40 = vpop.f32.mrb[23].mxu0 }
 0x13f   :  { %18561 = vst [vmem:[#allocation30_spill] sm:$0xff] %v13546_v56  ;;  %v10830_v35 = vrot.slane %v532_v16, 9  ;;  %v13559_v19 = vmul.f32 %v13499_v53, %v13499_v53  ;;  %v2498_v46 = vmul.f32 %v13527_v34, %v13527_v34  ;;  %v211_v8 = vadd.f32 %v13196_v61, %v13241_v50 }
 0x140   :  { %v2343_v52 = vsel %vm2315_vm0, %v1906_v21, %v1902_v55  ;;  %v18562_v24 = vrot.slane %v13423_v5, %v13210_v26  ;;  %v2843_v17 = vrot.slane %v13525_v39, %v13210_v26  ;;  %v2831_v14 = vrot.slane %v2497_v49, %v13210_v26 }
 0x141   :  { %v1455_v0 = vmax.f32 %v523_v45, %v10827_v3  ;;  %v3260_v55 = vsel %vm2327_vm6, %v2823_v43, %v3259_v54  ;;  %v1914_v21 = vrot.slane %v13546_v56, %v13210_v26  ;;  %v2827_v50 = vrot.slane %v2496_v20, %v13210_v26 }
 0x142   :  { %v2342_v48 = vsel %vm2327_vm6, %v18562_v24, %v2341_v18  ;;  %v1456_v34 = vmax.f32 %v531_v58, %v10828_v37  ;;  %v2344_v60 = vsel %vm2317_vm1, %v1910_v44, %v2343_v52  ;;  %v2499_v5 = vmul.f32 %v13546_v56, %v13546_v56 }
 0x143   :  { %v1457_v18 = vmax.f32 %v530_v33, %v10829_v12  ;;  %v1458_v24 = vmax.f32 %v532_v16, %v10830_v35  ;;  %v2847_v39 = vrot.slane %v13532_v9, %v13210_v26  ;;  %v2835_v45 = vrot.slane %v2498_v46, %v13210_v26 }
 0x144   :  { %v499_v3 = vcombine.high %v211_v8, %v211_v8  ;;  %v506_v43 = vrot.slane %v211_v8, %v13198_v62  ;;  %v2851_v49 = vrot.slane %v13536_v28, %v13210_v26  ;;  %v3261_v58 = vsel %vm2315_vm0, %v2831_v14, %v2827_v50 }
 0x145   :  { %v13589_v37 = vmax.f32 %v1455_v0, 0.0  ;;  %v226_v52 = vadd.f32 %v13257_v63, %v13196_v61  ;;  %v13594_v33 = vadd.f32 %v13421_v1, %v2342_v48  ;;  %v13597_v35 = vadd.f32 %v13473_v42, %v3260_v55 }
 0x146   :  { %v2345_v8 = vsel %vm2319_vm2, %v1914_v21, %v2344_v60  ;;  %v2839_v16 = vrot.slane %v2499_v5, %v13210_v26  ;;  %v13603_v9 = vmax.f32 %v1456_v34, 0.0  ;;  %v13605_v0 = vmax.f32 %v1457_v18, 0.0 }
 0x147   :  { %18563 = vst [vmem:[#allocation31_spill] sm:$0xff] %v13589_v37  ;;  %v13607_v14 = vmax.f32 %v1458_v24, 0.0  ;;  %v3262_v63 = vsel %vm2317_vm1, %v2835_v45, %v3261_v58  ;;  %v513_v1 = vrot.slane %v499_v3, %v13198_v62  ;;  %v514_v28 = vcombine.high %v506_v43, %v506_v43 }
 0x148   :  { %18564 = vst [vmem:[#allocation32_spill] sm:$0xff] %v13603_v9  ;;  %18565 = vst [vmem:[#allocation33_spill] sm:$0xff] %v13605_v0  ;;  %v10823_v42 = vrot.slane %v506_v43, 9  ;;  %v18567_v20 = vrot.slane %v13479_v13, %v13210_v26  ;;  %v550_v5 = vcombine.high %v226_v52, %v226_v52  ;;  %v557_v34 = vrot.slane %v226_v52, %v13198_v62  ;;  %v13626_v52 = vpop.f32.mrb[24].mxu0 }
 0x149   :  { %18566 = vst [vmem:[#allocation34_spill] sm:$0xff] %v13607_v14  ;;  %v515_v44 = vcombine.high %v513_v1, %v513_v1  ;;  %v10824_v12 = vrot.slane %v514_v28, 9  ;;  %v10825_v48 = vrot.slane %v513_v1, 9  ;;  %v3263_v21 = vsel %vm2319_vm2, %v2839_v16, %v3262_v63 }
 0x14a   :  { %v2346_v54 = vsel %vm2321_vm3, %v18567_v20, %v2345_v8  ;;  %v1451_v55 = vmax.f32 %v506_v43, %v10823_v42  ;;  %v564_v24 = vrot.slane %v550_v5, %v13198_v62  ;;  %v18569_v43 = vrot.slane %v13481_v23, %v13210_v26 }
 0x14b   :  { %v10826_v45 = vrot.slane %v515_v44, 9  ;;  %v1452_v3 = vmax.f32 %v514_v28, %v10824_v12  ;;  %v1453_v58 = vmax.f32 %v513_v1, %v10825_v48  ;;  %v13636_v42 = vmul.f32 %v13589_v37, %v13589_v37 }
 0x14c   :  { %v13624_v8 = vmax.f32 %v1451_v55, 0.0  ;;  %v2347_v16 = vsel %vm2323_vm4, %v18569_v43, %v2346_v54  ;;  %v565_v20 = vcombine.high %v557_v34, %v557_v34  ;;  %v3264_v28 = vsel %vm2321_vm3, %v2843_v17, %v3263_v21 }
 0x14d   :  { %v1454_v1 = vmax.f32 %v515_v44, %v10826_v45  ;;  %v13639_v5 = vmax.f32 %v1452_v3, 0.0  ;;  %v13641_v12 = vmax.f32 %v1453_v58, 0.0  ;;  %v566_v55 = vcombine.high %v564_v24, %v564_v24 }
 0x14e   :  { %18568 = vst [vmem:[#allocation35_spill] sm:$0xff] %v13624_v8  ;;  %v1934_v48 = vrot.slane %v13624_v8, %v13210_v26  ;;  %v2504_v54 = vmul.f32 %v13624_v8, %v13624_v8  ;;  %v10835_v43 = vrot.slane %v557_v34, 9  ;;  %v3265_v21 = vsel %vm2323_vm4, %v2847_v39, %v3264_v28 }
 0x14f   :  { %18570 = vst [vmem:[#allocation36_spill] sm:$0xff] %v13639_v5  ;;  %18571 = vst [vmem:[#allocation37_spill] sm:$0xff] %v13641_v12  ;;  %v13647_v63 = vmax.f32 %v1454_v1, 0.0  ;;  %v1938_v18 = vrot.slane %v13639_v5, %v13210_v26  ;;  %v1942_v17 = vrot.slane %v13641_v12, %v13210_v26  ;;  %v2505_v44 = vmul.f32 %v13639_v5, %v13639_v5 }
 0x150   :  { %v13658_v45 = vmul.f32 %v13603_v9, %v13603_v9  ;;  %v2506_v3 = vmul.f32 %v13641_v12, %v13641_v12  ;;  %v10836_v58 = vrot.slane %v565_v20, 9  ;;  %v10837_v46 = vrot.slane %v564_v24, 9 }
 0x151   :  { %18572 = vst [vmem:[#allocation38_spill] sm:$0xff] %v13647_v63  ;;  %v1946_v1 = vrot.slane %v13647_v63, %v13210_v26  ;;  %v2350_v50 = vsel %vm2315_vm0, %v1938_v18, %v1934_v48  ;;  %v2863_v60 = vrot.slane %v2505_v44, %v13210_v26  ;;  %v18573_v5 = vrot.slane %v13494_v38, %v13210_v26  ;;  %v13677_v44 = vpop.f32.mrb[25].mxu0 }
 0x152   :  { %v2351_v28 = vsel %vm2317_vm1, %v1942_v17, %v2350_v50  ;;  %v10838_v8 = vrot.slane %v566_v55, 9  ;;  %v221_v12 = vadd.f32 %v13196_v61, %v13263_v4  ;;  %v3266_v23 = vsel %vm2325_vm5, %v2851_v49, %v3265_v21 }
 0x153   :  { %v2348_v39 = vsel %vm2325_vm5, %v18573_v5, %v2347_v16  ;;  %v2507_v13 = vmul.f32 %v13647_v63, %v13647_v63  ;;  %v2859_v18 = vrot.slane %v2504_v54, %v13210_v26  ;;  %v1463_v48 = vmax.f32 %v557_v34, %v10835_v43 }
 0x154   :  { %v13681_v38 = vmul.f32 %v13605_v0, %v13605_v0  ;;  %v13685_v50 = vmul.f32 %v13607_v14, %v13607_v14  ;;  %v2352_v4 = vsel %vm2319_vm2, %v1946_v1, %v2351_v28  ;;  %v2867_v49 = vrot.slane %v2506_v3, %v13210_v26 }
 0x155   :  { %v18574_v16 = vrot.slane %v13499_v53, %v13210_v26  ;;  %v3268_v34 = vsel %vm2315_vm0, %v2863_v60, %v2859_v18  ;;  %v1464_v54 = vmax.f32 %v565_v20, %v10836_v58  ;;  %v1465_v43 = vmax.f32 %v564_v24, %v10837_v46 }
 0x156   :  { %v18575_v17 = vrot.slane %v13559_v19, %v13210_v26  ;;  %v2875_v63 = vrot.slane %v13636_v42, %v13210_v26  ;;  %v1466_v1 = vmax.f32 %v566_v55, %v10838_v8  ;;  %v533_v28 = vcombine.high %v221_v12, %v221_v12 }
 0x157   :  { %v2349_v5 = vsel %vm2327_vm6, %v18574_v16, %v2348_v39  ;;  %v2879_v3 = vrot.slane %v13658_v45, %v13210_v26  ;;  %v18576_v39 = vrot.slane %v13589_v37, %v13210_v26  ;;  %v2871_v46 = vrot.slane %v2507_v13, %v13210_v26 }
 0x158   :  { %v3267_v21 = vsel %vm2327_vm6, %v18575_v17, %v3266_v23  ;;  %v13707_v24 = vmax.f32 %v1463_v48, 0.0  ;;  %v2452_v19 = vadd.f32 %v13594_v33, %v2349_v5  ;;  %v2883_v23 = vrot.slane %v13681_v38, %v13210_v26 }
 0x159   :  { %v2353_v60 = vsel %vm2321_vm3, %v18576_v39, %v2352_v4  ;;  %v2887_v8 = vrot.slane %v13685_v50, %v13210_v26  ;;  %v3269_v42 = vsel %vm2317_vm1, %v2867_v49, %v3268_v34  ;;  %v13716_v20 = vadd.f32 %v13597_v35, %v3267_v21 }
 0x15a   :  { %v13718_v55 = vmax.f32 %v1464_v54, 0.0  ;;  %v13720_v45 = vmax.f32 %v1465_v43, 0.0  ;;  %v540_v13 = vrot.slane %v221_v12, %v13198_v62  ;;  %v18577_v33 = vrot.slane %v13603_v9, %v13210_v26 }
 0x15b   :  { %v13727_v38 = vmax.f32 %v1466_v1, 0.0  ;;  %v547_v18 = vrot.slane %v533_v28, %v13198_v62  ;;  %v236_v48 = vadd.f32 %v13282_v15, %v13196_v61  ;;  %v3270_v35 = vsel %vm2319_vm2, %v2871_v46, %v3269_v42  ;;  %v13744_v46 = vpop.f32.mrb[26].mxu0 }
 0x15c   :  { %v2354_v58 = vsel %vm2323_vm4, %v18577_v33, %v2353_v60  ;;  %v548_v4 = vcombine.high %v540_v13, %v540_v13  ;;  %v10831_v49 = vrot.slane %v540_v13, 9  ;;  %v18579_v54 = vrot.slane %v13605_v0, %v13210_v26 }
 0x15d   :  { %18578 = vst [vmem:[#allocation39_spill] sm:$0xff] %v13727_v38  ;;  %v549_v12 = vcombine.high %v547_v18, %v547_v18  ;;  %v10833_v16 = vrot.slane %v547_v18, 9  ;;  %v584_v5 = vcombine.high %v236_v48, %v236_v48  ;;  %v591_v34 = vrot.slane %v236_v48, %v13198_v62 }
 0x15e   :  { %v2355_v43 = vsel %vm2325_vm5, %v18579_v54, %v2354_v58  ;;  %v10832_v17 = vrot.slane %v548_v4, 9  ;;  %v1459_v21 = vmax.f32 %v540_v13, %v10831_v49  ;;  %v3271_v1 = vsel %vm2321_vm3, %v2875_v63, %v3270_v35 }
 0x15f   :  { %v10834_v28 = vrot.slane %v549_v12, 9  ;;  %v1461_v39 = vmax.f32 %v547_v18, %v10833_v16  ;;  %v598_v60 = vrot.slane %v584_v5, %v13198_v62  ;;  %v13754_v13 = vmul.f32 %v13707_v24, %v13707_v24 }
 0x160   :  { %v1460_v58 = vmax.f32 %v548_v4, %v10832_v17  ;;  %v13750_v48 = vmax.f32 %v1459_v21, 0.0  ;;  %v599_v18 = vcombine.high %v591_v34, %v591_v34  ;;  %v18582_v49 = vrot.slane %v13607_v14, %v13210_v26 }
 0x161   :  { %v1462_v63 = vmax.f32 %v549_v12, %v10834_v28  ;;  %v13756_v35 = vmax.f32 %v1461_v39, 0.0  ;;  %v3272_v5 = vsel %vm2323_vm4, %v2879_v3, %v3271_v1  ;;  %v13765_v4 = vmul.f32 %v13718_v55, %v13718_v55 }
 0x162   :  { %18580 = vst [vmem:[#allocation40_spill] sm:$0xff] %v13750_v48  ;;  %v2356_v16 = vsel %vm2327_vm6, %v18582_v49, %v2355_v43  ;;  %v13767_v54 = vmax.f32 %v1460_v58, 0.0  ;;  %v600_v21 = vcombine.high %v598_v60, %v598_v60  ;;  %v231_v28 = vadd.f32 %v13196_v61, %v13290_v22 }
 0x163   :  { %18581 = vst [vmem:[#allocation41_spill] sm:$0xff] %v13756_v35  ;;  %v13769_v17 = vmax.f32 %v1462_v63, 0.0  ;;  %v1974_v12 = vrot.slane %v13756_v35, %v13210_v26  ;;  %v13777_v43 = vmul.f32 %v13720_v45, %v13720_v45  ;;  %v1966_v3 = vrot.slane %v13750_v48, %v13210_v26 }
 0x164   :  { %18583 = vst [vmem:[#allocation42_spill] sm:$0xff] %v13767_v54  ;;  %v1970_v1 = vrot.slane %v13767_v54, %v13210_v26  ;;  %v2513_v39 = vmul.f32 %v13767_v54, %v13767_v54  ;;  %v3273_v58 = vsel %vm2325_vm5, %v2883_v23, %v3272_v5  ;;  %v2512_v63 = vmul.f32 %v13750_v48, %v13750_v48  ;;  %v13795_v5 = vpop.f32.mrb[27].mxu0 }
 0x165   :  { %18584 = vst [vmem:[#allocation43_spill] sm:$0xff] %v13769_v17  ;;  %v10843_v49 = vrot.slane %v591_v34, 9  ;;  %v10844_v22 = vrot.slane %v599_v18, 9  ;;  %v1978_v33 = vrot.slane %v13769_v17, %v13210_v26  ;;  %v2514_v15 = vmul.f32 %v13756_v35, %v13756_v35 }
 0x166   :  { %v2357_v42 = vsel %vm2315_vm0, %v1970_v1, %v1966_v3  ;;  %v10845_v50 = vrot.slane %v598_v60, 9  ;;  %v2895_v54 = vrot.slane %v2513_v39, %v13210_v26  ;;  %v10846_v0 = vrot.slane %v600_v21, 9 }
 0x167   :  { %v2358_v14 = vsel %vm2317_vm1, %v1974_v12, %v2357_v42  ;;  %v567_v23 = vcombine.high %v231_v28, %v231_v28  ;;  %v13797_v48 = vadd.f32 %v2452_v19, %v2356_v16  ;;  %v3274_v9 = vsel %vm2327_vm6, %v2887_v8, %v3273_v58 }
 0x168   :  { %v13802_v37 = vmul.f32 %v13727_v38, %v13727_v38  ;;  %v2907_v3 = vrot.slane %v13754_v13, %v13210_v26  ;;  %v2515_v42 = vmul.f32 %v13769_v17, %v13769_v17  ;;  %v2891_v12 = vrot.slane %v2512_v63, %v13210_v26 }
 0x169   :  { %v1471_v1 = vmax.f32 %v591_v34, %v10843_v49  ;;  %v574_v39 = vrot.slane %v231_v28, %v13198_v62  ;;  %v2359_v19 = vsel %vm2319_vm2, %v1978_v33, %v2358_v14  ;;  %v2899_v16 = vrot.slane %v2514_v15, %v13210_v26 }
 0x16a   :  { %v1472_v8 = vmax.f32 %v599_v18, %v10844_v22  ;;  %v1473_v58 = vmax.f32 %v598_v60, %v10845_v50  ;;  %v2911_v35 = vrot.slane %v13765_v4, %v13210_v26  ;;  %v3275_v53 = vsel %vm2315_vm0, %v2895_v54, %v2891_v12 }
 0x16b   :  { %v1474_v13 = vmax.f32 %v600_v21, %v10846_v0  ;;  %v581_v56 = vrot.slane %v567_v23, %v13198_v62  ;;  %v13817_v17 = vadd.f32 %v13716_v20, %v3274_v9  ;;  %v246_v50 = vadd.f32 %v13300_v41, %v13196_v61 }
 0x16c   :  { %v18585_v15 = vrot.slane %v13707_v24, %v13210_v26  ;;  %v2903_v0 = vrot.slane %v2515_v42, %v13210_v26  ;;  %v13830_v33 = vmax.f32 %v1471_v1, 0.0  ;;  %v13834_v9 = vadd.f32 %v13196_v61, %v13305_v47 }
 0x16d   :  { %v3276_v20 = vsel %vm2317_vm1, %v2899_v16, %v3275_v53  ;;  %v13837_v18 = vmax.f32 %v1472_v8, 0.0  ;;  %v13839_v4 = vmax.f32 %v1473_v58, 0.0  ;;  %v582_v41 = vcombine.high %v574_v39, %v574_v39 }
 0x16e   :  { %v2360_v60 = vsel %vm2321_vm3, %v18585_v15, %v2359_v19  ;;  %18586 = vst [vmem:[#allocation44_spill] sm:$0xff] %v13830_v33  ;;  %v13841_v54 = vmax.f32 %v1474_v13, 0.0  ;;  %v583_v21 = vcombine.high %v581_v56, %v581_v56  ;;  %v10839_v28 = vrot.slane %v574_v39, 9  ;;  %v13849_v19 = vpop.f32.mrb[28].mxu0 }
 0x16f   :  { %18587 = vst [vmem:[#allocation45_spill] sm:$0xff] %v13837_v18  ;;  %v10841_v63 = vrot.slane %v581_v56, 9  ;;  %v18589_v49 = vrot.slane %v13718_v55, %v13210_v26  ;;  %v10840_v23 = vrot.slane %v582_v41, 9  ;;  %v618_v61 = vcombine.high %v246_v50, %v246_v50 }
 0x170   :  { %18588 = vst [vmem:[#allocation46_spill] sm:$0xff] %v13841_v54  ;;  %v625_v47 = vrot.slane %v246_v50, %v13198_v62  ;;  %v3277_v53 = vsel %vm2319_vm2, %v2903_v0, %v3276_v20  ;;  %v10842_v42 = vrot.slane %v583_v21, 9  ;;  %v1467_v12 = vmax.f32 %v574_v39, %v10839_v28 }
 0x171   :  { %v2361_v22 = vsel %vm2323_vm4, %v18589_v49, %v2360_v60  ;;  %v1469_v1 = vmax.f32 %v581_v56, %v10841_v63  ;;  %v2014_v16 = vrot.slane %v13830_v33, %v13210_v26  ;;  %v2018_v8 = vrot.slane %v13837_v18, %v13210_v26 }
 0x172   :  { %v1468_v13 = vmax.f32 %v582_v41, %v10840_v23  ;;  %v1470_v15 = vmax.f32 %v583_v21, %v10842_v42  ;;  %v13857_v60 = vmax.f32 %v1467_v12, 0.0  ;;  %v632_v39 = vrot.slane %v618_v61, %v13198_v62 }
 0x173   :  { %v13859_v50 = vmax.f32 %v1469_v1, 0.0  ;;  %v18592_v56 = vrot.slane %v13720_v45, %v13210_v26  ;;  %v3278_v20 = vsel %vm2321_vm3, %v2907_v3, %v3277_v53  ;;  %v633_v63 = vcombine.high %v625_v47, %v625_v47 }
 0x174   :  { %18590 = vst [vmem:[#allocation47_spill] sm:$0xff] %v13857_v60  ;;  %v13867_v28 = vmax.f32 %v1468_v13, 0.0  ;;  %v13871_v41 = vmul.f32 %v13830_v33, %v13830_v33  ;;  %v13873_v21 = vmax.f32 %v1470_v15, 0.0  ;;  %v2520_v23 = vmul.f32 %v13857_v60, %v13857_v60 }
 0x175   :  { %18591 = vst [vmem:[#allocation48_spill] sm:$0xff] %v13859_v50  ;;  %v2362_v0 = vsel %vm2325_vm5, %v18592_v56, %v2361_v22  ;;  %v2006_v49 = vrot.slane %v13859_v50, %v13210_v26  ;;  %v1998_v22 = vrot.slane %v13857_v60, %v13210_v26  ;;  %v2522_v53 = vmul.f32 %v13859_v50, %v13859_v50 }
 0x176   :  { %18593 = vst [vmem:[#allocation49_spill] sm:$0xff] %v13867_v28  ;;  %18594 = vst [vmem:[#allocation50_spill] sm:$0xff] %v13873_v21  ;;  %v2002_v3 = vrot.slane %v13867_v28, %v13210_v26  ;;  %v2521_v61 = vmul.f32 %v13867_v28, %v13867_v28  ;;  %v3279_v42 = vsel %vm2323_vm4, %v2911_v35, %v3278_v20  ;;  %v10851_v13 = vrot.slane %v625_v47, 9 }
 0x177   :  { %v2010_v12 = vrot.slane %v13873_v21, %v13210_v26  ;;  %v634_v1 = vcombine.high %v632_v39, %v632_v39  ;;  %v10852_v58 = vrot.slane %v633_v63, 9  ;;  %v601_v14 = vcombine.high %v13834_v9, %v13834_v9 }
 0x178   :  { %v2364_v15 = vsel %vm2315_vm0, %v2002_v3, %v1998_v22  ;;  %v2927_v56 = vrot.slane %v2521_v61, %v13210_v26  ;;  %v2523_v33 = vmul.f32 %v13873_v21, %v13873_v21  ;;  %v2923_v35 = vrot.slane %v2520_v23, %v13210_v26  ;;  %v13909_v61 = vpop.f32.mrb[29].mxu0 }
 0x179   :  { %v2365_v34 = vsel %vm2317_vm1, %v2006_v49, %v2364_v15  ;;  %v10853_v20 = vrot.slane %v632_v39, 9  ;;  %v18595_v50 = vrot.slane %v13727_v38, %v13210_v26  ;;  %v2525_v22 = vmul.f32 %v13837_v18, %v13837_v18 }
 0x17a   :  { %v13906_v3 = vmul.f32 %v13839_v4, %v13839_v4  ;;  %v2931_v49 = vrot.slane %v2522_v53, %v13210_v26  ;;  %v2366_v15 = vsel %vm2319_vm2, %v2010_v12, %v2365_v34  ;;  %v3282_v23 = vsel %vm2315_vm0, %v2927_v56, %v2923_v35 }
 0x17b   :  { %v2363_v28 = vsel %vm2327_vm6, %v18595_v50, %v2362_v0  ;;  %v10854_v21 = vrot.slane %v634_v1, 9  ;;  %v1479_v60 = vmax.f32 %v625_v47, %v10851_v13  ;;  %v18596_v50 = vrot.slane %v13777_v43, %v13210_v26 }
 0x17c   :  { %v13919_v18 = vmul.f32 %v13841_v54, %v13841_v54  ;;  %v1480_v38 = vmax.f32 %v633_v63, %v10852_v58  ;;  %v608_v53 = vrot.slane %v13834_v9, %v13198_v62  ;;  %v2026_v34 = vrot.slane %v13841_v54, %v13210_v26 }
 0x17d   :  { %v3280_v0 = vsel %vm2325_vm5, %v18596_v50, %v3279_v42  ;;  %v2935_v12 = vrot.slane %v2523_v33, %v13210_v26  ;;  %v1481_v56 = vmax.f32 %v632_v39, %v10853_v20  ;;  %v615_v47 = vrot.slane %v601_v14, %v13198_v62 }
 0x17e   :  { %v13928_v43 = vadd.f32 %v13797_v48, %v2363_v28  ;;  %v2939_v42 = vrot.slane %v13871_v41, %v13210_v26  ;;  %v2367_v13 = vsel %vm2321_vm3, %v2014_v16, %v2366_v15  ;;  %v3283_v58 = vsel %vm2317_vm1, %v2931_v49, %v3282_v23 }
 0x17f   :  { %v18597_v9 = vrot.slane %v13802_v37, %v13210_v26  ;;  %v2943_v33 = vrot.slane %v2525_v22, %v13210_v26  ;;  %v1482_v39 = vmax.f32 %v634_v1, %v10854_v21  ;;  %v13939_v35 = vmax.f32 %v1479_v60, 0.0  ;;  %v13954_v1 = vld [vmem:[%s18381_s2] ss:$0 sm:$0xff] }
 0x180   :  { %v2947_v48 = vrot.slane %v13906_v3, %v13210_v26  ;;  %v13945_v28 = vmax.f32 %v1480_v38, 0.0  ;;  %v616_v16 = vcombine.high %v608_v53, %v608_v53  ;;  %v2368_v41 = vsel %vm2323_vm4, %v2018_v8, %v2367_v13  ;;  %v13964_v13 = vpop.f32.mrb[30].mxu0 }
 0x181   :  { %v3281_v63 = vsel %vm2327_vm6, %v18597_v9, %v3280_v0  ;;  %18598 = vst [vmem:[#allocation51_spill] sm:$0xff] %v13939_v35  ;;  %v3284_v37 = vsel %vm2319_vm2, %v2935_v12, %v3283_v58  ;;  %v13949_v20 = vmax.f32 %v1481_v56, 0.0  ;;  %v617_v49 = vcombine.high %v615_v47, %v615_v47 }
 0x182   :  { %18599 = vst [vmem:[#allocation52_spill] sm:$0xff] %v13945_v28  ;;  %v10847_v22 = vrot.slane %v608_v53, 9  ;;  %v10848_v21 = vrot.slane %v616_v16, 9  ;;  %v10849_v60 = vrot.slane %v615_v47, 9  ;;  %v256_v38 = vadd.f32 %v13954_v1, %v13313_v6 }
 0x183   :  { %18600 = vst [vmem:[#allocation53_spill] sm:$0xff] %v13949_v20  ;;  %v3372_v3 = vadd.f32 %v13817_v17, %v3281_v63  ;;  %v13959_v15 = vmax.f32 %v1482_v39, 0.0  ;;  %v2046_v8 = vrot.slane %v13939_v35, %v13210_v26  ;;  %v10850_v23 = vrot.slane %v617_v49, 9 }
 0x184   :  { %v3285_v50 = vsel %vm2321_vm3, %v2939_v42, %v3284_v37  ;;  %v1475_v0 = vmax.f32 %v608_v53, %v10847_v22  ;;  %v1476_v12 = vmax.f32 %v616_v16, %v10848_v21  ;;  %v1477_v56 = vmax.f32 %v615_v47, %v10849_v60 }
 0x185   :  { %18601 = vst [vmem:[#allocation54_spill] sm:$0xff] %v13959_v15  ;;  %v18602_v58 = vrot.slane %v13839_v4, %v13210_v26  ;;  %v2050_v17 = vrot.slane %v13945_v28, %v13210_v26  ;;  %v1478_v9 = vmax.f32 %v617_v49, %v10850_v23  ;;  %v652_v63 = vcombine.high %v256_v38, %v256_v38 }
 0x186   :  { %v2054_v39 = vrot.slane %v13949_v20, %v13210_v26  ;;  %v13974_v14 = vmax.f32 %v1475_v0, 0.0  ;;  %v13976_v53 = vmax.f32 %v1476_v12, 0.0  ;;  %v13978_v47 = vmax.f32 %v1477_v56, 0.0 }
 0x187   :  { %v2369_v6 = vsel %vm2325_vm5, %v18602_v58, %v2368_v41  ;;  %v3286_v42 = vsel %vm2323_vm4, %v2943_v33, %v3285_v50  ;;  %v13981_v16 = vmax.f32 %v1478_v9, 0.0  ;;  %v659_v41 = vrot.slane %v256_v38, %v13198_v62 }
 0x188   :  { %18603 = vst [vmem:[#allocation55_spill] sm:$0xff] %v13974_v14  ;;  %18604 = vst [vmem:[#allocation56_spill] sm:$0xff] %v13976_v53  ;;  %v251_v37 = vadd.f32 %v13954_v1, %v13317_v11  ;;  %v2030_v49 = vrot.slane %v13974_v14, %v13210_v26  ;;  %v2034_v22 = vrot.slane %v13976_v53, %v13210_v26 }
 0x189   :  { %18605 = vst [vmem:[#allocation57_spill] sm:$0xff] %v13981_v16  ;;  %v2038_v21 = vrot.slane %v13978_v47, %v13210_v26  ;;  %v2528_v60 = vmul.f32 %v13974_v14, %v13974_v14  ;;  %v2042_v33 = vrot.slane %v13981_v16, %v13210_v26  ;;  %v2529_v38 = vmul.f32 %v13976_v53, %v13976_v53 }
 0x18a   :  { %v2530_v11 = vmul.f32 %v13978_v47, %v13978_v47  ;;  %v666_v23 = vrot.slane %v652_v63, %v13198_v62  ;;  %v2370_v50 = vsel %vm2327_vm6, %v2026_v34, %v2369_v6  ;;  %v3287_v0 = vsel %vm2325_vm5, %v2947_v48, %v3286_v42  ;;  %v14013_v6 = vpop.f32.mrb[31].mxu0 }
 0x18b   :  { %v2058_v12 = vrot.slane %v13959_v15, %v13210_v26  ;;  %v2371_v56 = vsel %vm2315_vm0, %v2034_v22, %v2030_v49  ;;  %v2959_v9 = vrot.slane %v2529_v38, %v13210_v26  ;;  %v667_v14 = vcombine.high %v659_v41, %v659_v41 }
 0x18c   :  { %v2372_v58 = vsel %vm2317_vm1, %v2038_v21, %v2371_v56  ;;  %v635_v53 = vcombine.high %v251_v37, %v251_v37  ;;  %v2531_v63 = vmul.f32 %v13981_v16, %v13981_v16  ;;  %v2955_v34 = vrot.slane %v2528_v60, %v13210_v26 }
 0x18d   :  { %v2373_v54 = vsel %vm2319_vm2, %v2042_v33, %v2372_v58  ;;  %v642_v48 = vrot.slane %v251_v37, %v13198_v62  ;;  %v2963_v49 = vrot.slane %v2530_v11, %v13210_v26  ;;  %v668_v22 = vcombine.high %v666_v23, %v666_v23 }
 0x18e   :  { %v2374_v42 = vsel %vm2321_vm3, %v2046_v8, %v2373_v54  ;;  %v10859_v21 = vrot.slane %v659_v41, 9  ;;  %v2532_v38 = vmul.f32 %v13939_v35, %v13939_v35  ;;  %v2533_v33 = vmul.f32 %v13945_v28, %v13945_v28 }
 0x18f   :  { %v2534_v56 = vmul.f32 %v13949_v20, %v13949_v20  ;;  %v3289_v60 = vsel %vm2315_vm0, %v2959_v9, %v2955_v34  ;;  %v2455_v37 = vadd.f32 %v13928_v43, %v2370_v50  ;;  %v18606_v54 = vrot.slane %v13919_v18, %v13210_v26 }
 0x190   :  { %v14031_v11 = vmul.f32 %v13959_v15, %v13959_v15  ;;  %v10860_v58 = vrot.slane %v667_v14, 9  ;;  %v2375_v35 = vsel %vm2323_vm4, %v2050_v17, %v2374_v42  ;;  %v2967_v28 = vrot.slane %v2531_v63, %v13210_v26 }
 0x191   :  { %v3288_v8 = vsel %vm2327_vm6, %v18606_v54, %v3287_v0  ;;  %v10861_v16 = vrot.slane %v666_v23, 9  ;;  %v649_v20 = vrot.slane %v635_v53, %v13198_v62  ;;  %v3290_v9 = vsel %vm2317_vm1, %v2963_v49, %v3289_v60 }
 0x192   :  { %v10862_v43 = vrot.slane %v668_v22, 9  ;;  %v1487_v50 = vmax.f32 %v659_v41, %v10859_v21  ;;  %v650_v34 = vcombine.high %v642_v48, %v642_v48  ;;  %v14037_v18 = vadd.f32 %v3372_v3, %v3288_v8 }
 0x193   :  { %v2971_v0 = vrot.slane %v2532_v38, %v13210_v26  ;;  %v2975_v54 = vrot.slane %v2533_v33, %v13210_v26  ;;  %v2979_v15 = vrot.slane %v2534_v56, %v13210_v26  ;;  %v2983_v17 = vrot.slane %v14031_v11, %v13210_v26 }
 0x194   :  { %v2376_v63 = vsel %vm2325_vm5, %v2054_v39, %v2375_v35  ;;  %v1488_v42 = vmax.f32 %v667_v14, %v10860_v58  ;;  %v266_v53 = vadd.f32 %v13954_v1, %v13337_v29  ;;  %v3291_v41 = vsel %vm2319_vm2, %v2967_v28, %v3290_v9 }
 0x195   :  { %v1489_v49 = vmax.f32 %v666_v23, %v10861_v16  ;;  %v651_v3 = vcombine.high %v649_v20, %v649_v20  ;;  %v10855_v21 = vrot.slane %v642_v48, 9  ;;  %v1490_v60 = vmax.f32 %v668_v22, %v10862_v43 }
 0x196   :  { %v14048_v38 = vmax.f32 %v1487_v50, 0.0  ;;  %v10856_v33 = vrot.slane %v650_v34, 9  ;;  %v261_v56 = vadd.f32 %v13954_v1, %v13370_v25  ;;  %v2377_v8 = vsel %vm2327_vm6, %v2058_v12, %v2376_v63 }
 0x197   :  { %v10857_v11 = vrot.slane %v649_v20, 9  ;;  %v10858_v35 = vrot.slane %v651_v3, 9  ;;  %v1483_v14 = vmax.f32 %v642_v48, %v10855_v21  ;;  %v3292_v39 = vsel %vm2321_vm3, %v2971_v0, %v3291_v41 }
 0x198   :  { %18607 = vst [vmem:[#allocation58_spill] sm:$0xff] %v14048_v38  ;;  %v14054_v29 = vmax.f32 %v1488_v42, 0.0  ;;  %v1484_v28 = vmax.f32 %v650_v34, %v10856_v33  ;;  %v686_v16 = vcombine.high %v266_v53, %v266_v53  ;;  %v14056_v23 = vmax.f32 %v1489_v49, 0.0 }
 0x199   :  { %v1485_v22 = vmax.f32 %v649_v20, %v10857_v11  ;;  %v1486_v58 = vmax.f32 %v651_v3, %v10858_v35  ;;  %v14058_v9 = vmax.f32 %v1483_v14, 0.0  ;;  %v14060_v43 = vadd.f32 %v2455_v37, %v2377_v8 }
 0x19a   :  { %18608 = vst [vmem:[#allocation59_spill] sm:$0xff] %v14054_v29  ;;  %18609 = vst [vmem:[#allocation60_spill] sm:$0xff] %v14056_v23  ;;  %v14062_v25 = vmax.f32 %v1490_v60, 0.0  ;;  %v14064_v12 = vmax.f32 %v1484_v28, 0.0  ;;  %v693_v48 = vrot.slane %v266_v53, %v13198_v62  ;;  %v3293_v50 = vsel %vm2323_vm4, %v2975_v54, %v3292_v39 }
 0x19b   :  { %v14068_v0 = vmax.f32 %v1485_v22, 0.0  ;;  %v14070_v34 = vmax.f32 %v1486_v58, 0.0  ;;  %v2536_v20 = vmul.f32 %v14058_v9, %v14058_v9  ;;  %v2062_v63 = vrot.slane %v14058_v9, %v13210_v26 }
 0x19c   :  { %18610 = vst [vmem:[#allocation61_spill] sm:$0xff] %v14062_v25  ;;  %18611 = vst [vmem:[#allocation62_spill] sm:$0xff] %v14064_v12  ;;  %v2066_v37 = vrot.slane %v14064_v12, %v13210_v26  ;;  %v2537_v42 = vmul.f32 %v14064_v12, %v14064_v12  ;;  %v700_v53 = vrot.slane %v686_v16, %v13198_v62  ;;  %v10867_v58 = vrot.slane %v693_v48, 9 }
 0x19d   :  { %18612 = vst [vmem:[#allocation63_spill] sm:$0xff] %v14068_v0  ;;  %18613 = vst [vmem:[#allocation64_spill] sm:$0xff] %v14070_v34  ;;  %v2078_v54 = vrot.slane %v14048_v38, %v13210_v26  ;;  %v2070_v41 = vrot.slane %v14068_v0, %v13210_v26  ;;  %v2074_v49 = vrot.slane %v14070_v34, %v13210_v26 }
 0x19e   :  { %v2538_v3 = vmul.f32 %v14068_v0, %v14068_v0  ;;  %v3294_v21 = vsel %vm2325_vm5, %v2979_v15, %v3293_v50  ;;  %v2378_v60 = vsel %vm2315_vm0, %v2066_v37, %v2062_v63  ;;  %v2991_v33 = vrot.slane %v2537_v42, %v13210_v26 }
 0x19f   :  { %v701_v8 = vcombine.high %v693_v48, %v693_v48  ;;  %v2379_v11 = vsel %vm2317_vm1, %v2070_v41, %v2378_v60  ;;  %v2539_v35 = vmul.f32 %v14070_v34, %v14070_v34  ;;  %v2987_v14 = vrot.slane %v2536_v20, %v13210_v26 }
 0x1a0   :  { %v669_v39 = vcombine.high %v261_v56, %v261_v56  ;;  %v2380_v28 = vsel %vm2319_vm2, %v2074_v49, %v2379_v11  ;;  %v2995_v16 = vrot.slane %v2538_v3, %v13210_v26  ;;  %v702_v22 = vcombine.high %v700_v53, %v700_v53 }
 0x1a1   :  { %v3295_v15 = vsel %vm2327_vm6, %v2983_v17, %v3294_v21  ;;  %v2082_v50 = vrot.slane %v14054_v29, %v13210_v26  ;;  %v2540_v63 = vmul.f32 %v14048_v38, %v14048_v38  ;;  %v3296_v37 = vsel %vm2315_vm0, %v2991_v33, %v2987_v14 }
 0x1a2   :  { %v2541_v20 = vmul.f32 %v14054_v29, %v14054_v29  ;;  %v2542_v42 = vmul.f32 %v14056_v23, %v14056_v23  ;;  %v10868_v41 = vrot.slane %v701_v8, 9  ;;  %v676_v49 = vrot.slane %v261_v56, %v13198_v62 }
 0x1a3   :  { %v2381_v3 = vsel %vm2321_vm3, %v2078_v54, %v2380_v28  ;;  %v2999_v17 = vrot.slane %v2539_v35, %v13210_v26  ;;  %v10869_v21 = vrot.slane %v700_v53, 9  ;;  %v683_v60 = vrot.slane %v669_v39, %v13198_v62 }
 0x1a4   :  { %v14114_v11 = vmul.f32 %v14062_v25, %v14062_v25  ;;  %v3297_v33 = vsel %vm2317_vm1, %v2995_v16, %v3296_v37  ;;  %v10870_v14 = vrot.slane %v702_v22, 9  ;;  %v1495_v29 = vmax.f32 %v693_v48, %v10867_v58 }
 0x1a5   :  { %v14118_v38 = vadd.f32 %v14037_v18, %v3295_v15  ;;  %v2086_v56 = vrot.slane %v14056_v23, %v13210_v26  ;;  %v2090_v54 = vrot.slane %v14062_v25, %v13210_v26  ;;  %v3003_v35 = vrot.slane %v2540_v63, %v13210_v26 }
 0x1a6   :  { %v3007_v39 = vrot.slane %v2541_v20, %v13210_v26  ;;  %v3011_v28 = vrot.slane %v2542_v42, %v13210_v26  ;;  %v2382_v34 = vsel %vm2323_vm4, %v2082_v50, %v2381_v3  ;;  %v1496_v16 = vmax.f32 %v701_v8, %v10868_v41 }
 0x1a7   :  { %v3298_v48 = vsel %vm2319_vm2, %v2999_v17, %v3297_v33  ;;  %v1497_v58 = vmax.f32 %v700_v53, %v10869_v21  ;;  %v684_v18 = vcombine.high %v676_v49, %v676_v49  ;;  %v685_v15 = vcombine.high %v683_v60, %v683_v60 }
 0x1a8   :  { %v3015_v37 = vrot.slane %v14114_v11, %v13210_v26  ;;  %v1498_v23 = vmax.f32 %v702_v22, %v10870_v14  ;;  %v14131_v0 = vmax.f32 %v1495_v29, 0.0  ;;  %v10863_v25 = vrot.slane %v676_v49, 9 }
 0x1a9   :  { %v2383_v63 = vsel %vm2325_vm5, %v2086_v56, %v2382_v34  ;;  %v10864_v20 = vrot.slane %v684_v18, 9  ;;  %v10865_v12 = vrot.slane %v683_v60, 9  ;;  %v10866_v42 = vrot.slane %v685_v15, 9 }
 0x1aa   :  { %18614 = vst [vmem:[#allocation65_spill] sm:$0xff] %v14131_v0  ;;  %v3299_v50 = vsel %vm2321_vm3, %v3003_v35, %v3298_v48  ;;  %v14135_v8 = vmax.f32 %v1496_v16, 0.0  ;;  %v1491_v41 = vmax.f32 %v676_v49, %v10863_v25  ;;  %v276_v53 = vadd.f32 %v13954_v1, %v13411_v10 }
 0x1ab   :  { %v14139_v3 = vmax.f32 %v1497_v58, 0.0  ;;  %v1492_v17 = vmax.f32 %v684_v18, %v10864_v20  ;;  %v1493_v22 = vmax.f32 %v683_v60, %v10865_v12  ;;  %v1494_v29 = vmax.f32 %v685_v15, %v10866_v42 }
 0x1ac   :  { %18615 = vst [vmem:[#allocation66_spill] sm:$0xff] %v14135_v8  ;;  %v2384_v21 = vsel %vm2327_vm6, %v2090_v54, %v2383_v63  ;;  %v14142_v11 = vmax.f32 %v1498_v23, 0.0  ;;  %v14144_v34 = vmax.f32 %v1491_v41, 0.0  ;;  %v720_v33 = vcombine.high %v276_v53, %v276_v53 }
 0x1ad   :  { %18616 = vst [vmem:[#allocation67_spill] sm:$0xff] %v14139_v3  ;;  %v3300_v14 = vsel %vm2323_vm4, %v3007_v39, %v3299_v50  ;;  %v14147_v56 = vmax.f32 %v1492_v17, 0.0  ;;  %v14149_v25 = vmax.f32 %v1493_v22, 0.0  ;;  %v14151_v49 = vmax.f32 %v1494_v29, 0.0 }
 0x1ae   :  { %18617 = vst [vmem:[#allocation68_spill] sm:$0xff] %v14142_v11  ;;  %v2094_v10 = vrot.slane %v14144_v34, %v13210_v26  ;;  %v2544_v12 = vmul.f32 %v14144_v34, %v14144_v34  ;;  %v727_v23 = vrot.slane %v276_v53, %v13198_v62  ;;  %v734_v60 = vrot.slane %v720_v33, %v13198_v62 }
 0x1af   :  { %18618 = vst [vmem:[#allocation69_spill] sm:$0xff] %v14151_v49  ;;  %v2098_v54 = vrot.slane %v14147_v56, %v13210_v26  ;;  %v2102_v35 = vrot.slane %v14149_v25, %v13210_v26  ;;  %v2106_v39 = vrot.slane %v14151_v49, %v13210_v26  ;;  %v2545_v16 = vmul.f32 %v14147_v56, %v14147_v56 }
 0x1b0   :  { %v3301_v48 = vsel %vm2325_vm5, %v3011_v28, %v3300_v14  ;;  %v2110_v58 = vrot.slane %v14131_v0, %v13210_v26  ;;  %v2546_v18 = vmul.f32 %v14149_v25, %v14149_v25  ;;  %v271_v15 = vadd.f32 %v13954_v1, %v13459_v57 }
 0x1b1   :  { %v2385_v63 = vsel %vm2315_vm0, %v2098_v54, %v2094_v10  ;;  %v2547_v20 = vmul.f32 %v14151_v49, %v14151_v49  ;;  %v3019_v42 = vrot.slane %v2544_v12, %v13210_v26  ;;  %v3023_v50 = vrot.slane %v2545_v16, %v13210_v26 }
 0x1b2   :  { %v2114_v28 = vrot.slane %v14135_v8, %v13210_v26  ;;  %v2386_v41 = vsel %vm2317_vm1, %v2102_v35, %v2385_v63  ;;  %v3027_v53 = vrot.slane %v2546_v18, %v13210_v26  ;;  %v735_v17 = vcombine.high %v727_v23, %v727_v23 }
 0x1b3   :  { %v2387_v22 = vsel %vm2319_vm2, %v2106_v39, %v2386_v41  ;;  %v3303_v57 = vsel %vm2315_vm0, %v3023_v50, %v3019_v42  ;;  %v736_v29 = vcombine.high %v734_v60, %v734_v60  ;;  %v10875_v33 = vrot.slane %v727_v23, 9 }
 0x1b4   :  { %v2457_v14 = vadd.f32 %v14060_v43, %v2384_v21  ;;  %v3302_v10 = vsel %vm2327_vm6, %v3015_v37, %v3301_v48  ;;  %v2548_v12 = vmul.f32 %v14131_v0, %v14131_v0  ;;  %v2549_v54 = vmul.f32 %v14135_v8, %v14135_v8 }
 0x1b5   :  { %v2550_v35 = vmul.f32 %v14139_v3, %v14139_v3  ;;  %v14195_v39 = vmul.f32 %v14142_v11, %v14142_v11  ;;  %v3031_v16 = vrot.slane %v2547_v20, %v13210_v26  ;;  %v703_v18 = vcombine.high %v271_v15, %v271_v15 }
 0x1b6   :  { %v2388_v43 = vsel %vm2321_vm3, %v2110_v58, %v2387_v22  ;;  %v3304_v37 = vsel %vm2317_vm1, %v3027_v53, %v3303_v57  ;;  %v10876_v21 = vrot.slane %v735_v17, 9  ;;  %v10877_v48 = vrot.slane %v734_v60, 9 }
 0x1b7   :  { %v2118_v63 = vrot.slane %v14139_v3, %v13210_v26  ;;  %v10878_v42 = vrot.slane %v736_v29, 9  ;;  %v1503_v50 = vmax.f32 %v727_v23, %v10875_v33  ;;  %v710_v41 = vrot.slane %v271_v15, %v13198_v62 }
 0x1b8   :  { %v14204_v8 = vadd.f32 %v14118_v38, %v3302_v10  ;;  %v2122_v20 = vrot.slane %v14142_v11, %v13210_v26  ;;  %v3035_v0 = vrot.slane %v2548_v12, %v13210_v26  ;;  %v3039_v58 = vrot.slane %v2549_v54, %v13210_v26 }
 0x1b9   :  { %v3043_v53 = vrot.slane %v2550_v35, %v13210_v26  ;;  %v2389_v22 = vsel %vm2323_vm4, %v2114_v28, %v2388_v43  ;;  %v3305_v57 = vsel %vm2319_vm2, %v3031_v16, %v3304_v37  ;;  %v286_v23 = vadd.f32 %v13954_v1, %v13512_v7 }
 0x1ba   :  { %v3047_v38 = vrot.slane %v14195_v39, %v13210_v26  ;;  %v1504_v15 = vmax.f32 %v735_v17, %v10876_v21  ;;  %v1505_v33 = vmax.f32 %v734_v60, %v10877_v48  ;;  %v717_v10 = vrot.slane %v703_v18, %v13198_v62 }
 0x1bb   :  { %v1506_v11 = vmax.f32 %v736_v29, %v10878_v42  ;;  %v14218_v12 = vmax.f32 %v1503_v50, 0.0  ;;  %v718_v54 = vcombine.high %v710_v41, %v710_v41  ;;  %v10871_v3 = vrot.slane %v710_v41, 9 }
 0x1bc   :  { %v2390_v35 = vsel %vm2325_vm5, %v2118_v63, %v2389_v22  ;;  %v3306_v28 = vsel %vm2321_vm3, %v3035_v0, %v3305_v57  ;;  %v719_v16 = vcombine.high %v717_v10, %v717_v10  ;;  %v10873_v43 = vrot.slane %v717_v10, 9 }
 0x1bd   :  { %18619 = vst [vmem:[#allocation70_spill] sm:$0xff] %v14218_v12  ;;  %v10872_v37 = vrot.slane %v718_v54, 9  ;;  %v1499_v7 = vmax.f32 %v710_v41, %v10871_v3  ;;  %v754_v49 = vcombine.high %v286_v23, %v286_v23  ;;  %v761_v39 = vrot.slane %v286_v23, %v13198_v62 }
 0x1be   :  { %v14223_v17 = vmax.f32 %v1504_v15, 0.0  ;;  %v10874_v60 = vrot.slane %v719_v16, 9  ;;  %v1501_v18 = vmax.f32 %v717_v10, %v10873_v43  ;;  %v281_v29 = vadd.f32 %v13954_v1, %v13566_v40 }
 0x1bf   :  { %v2391_v21 = vsel %vm2327_vm6, %v2122_v20, %v2390_v35  ;;  %v14228_v48 = vmax.f32 %v1505_v33, 0.0  ;;  %v1500_v63 = vmax.f32 %v718_v54, %v10872_v37  ;;  %v14230_v0 = vmax.f32 %v1499_v7, 0.0 }
 0x1c0   :  { %18620 = vst [vmem:[#allocation71_spill] sm:$0xff] %v14223_v17  ;;  %v3307_v42 = vsel %vm2323_vm4, %v3039_v58, %v3306_v28  ;;  %v1502_v3 = vmax.f32 %v719_v16, %v10874_v60  ;;  %v14233_v50 = vmax.f32 %v1501_v18, 0.0  ;;  %v768_v41 = vrot.slane %v754_v49, %v13198_v62 }
 0x1c1   :  { %18621 = vst [vmem:[#allocation72_spill] sm:$0xff] %v14228_v48  ;;  %v14236_v22 = vmax.f32 %v1506_v11, 0.0  ;;  %v2142_v57 = vrot.slane %v14218_v12, %v13210_v26  ;;  %v14240_v40 = vmax.f32 %v1500_v63, 0.0  ;;  %v769_v20 = vcombine.high %v761_v39, %v761_v39 }
 0x1c2   :  { %18622 = vst [vmem:[#allocation73_spill] sm:$0xff] %v14233_v50  ;;  %v14242_v23 = vadd.f32 %v2457_v14, %v2391_v21  ;;  %v14244_v15 = vmax.f32 %v1502_v3, 0.0  ;;  %v2134_v58 = vrot.slane %v14233_v50, %v13210_v26  ;;  %v2552_v33 = vmul.f32 %v14230_v0, %v14230_v0 }
 0x1c3   :  { %18623 = vst [vmem:[#allocation74_spill] sm:$0xff] %v14236_v22  ;;  %18624 = vst [vmem:[#allocation75_spill] sm:$0xff] %v14240_v40  ;;  %v2126_v11 = vrot.slane %v14230_v0, %v13210_v26  ;;  %v2130_v49 = vrot.slane %v14240_v40, %v13210_v26  ;;  %v2553_v10 = vmul.f32 %v14240_v40, %v14240_v40  ;;  %v10883_v16 = vrot.slane %v761_v39, 9 }
 0x1c4   :  { %18625 = vst [vmem:[#allocation76_spill] sm:$0xff] %v14244_v15  ;;  %v2554_v14 = vmul.f32 %v14233_v50, %v14233_v50  ;;  %v3308_v54 = vsel %vm2325_vm5, %v3043_v53, %v3307_v42  ;;  %v2138_v35 = vrot.slane %v14244_v15, %v13210_v26  ;;  %v770_v28 = vcombine.high %v768_v41, %v768_v41 }
 0x1c5   :  { %v2392_v43 = vsel %vm2315_vm0, %v2130_v49, %v2126_v11  ;;  %v3055_v37 = vrot.slane %v2553_v10, %v13210_v26  ;;  %v10884_v7 = vrot.slane %v769_v20, 9  ;;  %v737_v60 = vcombine.high %v281_v29, %v281_v29 }
 0x1c6   :  { %v2393_v18 = vsel %vm2317_vm1, %v2134_v58, %v2392_v43  ;;  %v2555_v21 = vmul.f32 %v14244_v15, %v14244_v15  ;;  %v3051_v63 = vrot.slane %v2552_v33, %v13210_v26  ;;  %v10885_v3 = vrot.slane %v768_v41, 9 }
 0x1c7   :  { %v3309_v53 = vsel %vm2327_vm6, %v3047_v38, %v3308_v54  ;;  %v2146_v42 = vrot.slane %v14223_v17, %v13210_v26  ;;  %v2556_v11 = vmul.f32 %v14218_v12, %v14218_v12  ;;  %v3059_v49 = vrot.slane %v2554_v14, %v13210_v26 }
 0x1c8   :  { %v2394_v10 = vsel %vm2319_vm2, %v2138_v35, %v2393_v18  ;;  %v3310_v58 = vsel %vm2315_vm0, %v3055_v37, %v3051_v63  ;;  %v10886_v43 = vrot.slane %v770_v28, 9  ;;  %v1511_v50 = vmax.f32 %v761_v39, %v10883_v16 }
 0x1c9   :  { %v2557_v33 = vmul.f32 %v14223_v17, %v14223_v17  ;;  %v2558_v38 = vmul.f32 %v14228_v48, %v14228_v48  ;;  %v1512_v54 = vmax.f32 %v769_v20, %v10884_v7  ;;  %v744_v15 = vrot.slane %v281_v29, %v13198_v62 }
 0x1ca   :  { %v2150_v12 = vrot.slane %v14228_v48, %v13210_v26  ;;  %v3063_v14 = vrot.slane %v2555_v21, %v13210_v26  ;;  %v1513_v40 = vmax.f32 %v768_v41, %v10885_v3  ;;  %v751_v35 = vrot.slane %v737_v60, %v13198_v62 }
 0x1cb   :  { %v14285_v37 = vadd.f32 %v14204_v8, %v3309_v53  ;;  %v2154_v39 = vrot.slane %v14236_v22, %v13210_v26  ;;  %v2395_v16 = vsel %vm2321_vm3, %v2142_v57, %v2394_v10  ;;  %v3311_v20 = vsel %vm2317_vm1, %v3059_v49, %v3310_v58 }
 0x1cc   :  { %v14293_v29 = vmul.f32 %v14236_v22, %v14236_v22  ;;  %v3067_v7 = vrot.slane %v2556_v11, %v13210_v26  ;;  %v1514_v18 = vmax.f32 %v770_v28, %v10886_v43  ;;  %v14296_v41 = vmax.f32 %v1511_v50, 0.0 }
 0x1cd   :  { %v3071_v60 = vrot.slane %v2557_v33, %v13210_v26  ;;  %v3075_v8 = vrot.slane %v2558_v38, %v13210_v26  ;;  %v14300_v21 = vmax.f32 %v1512_v54, 0.0  ;;  %v752_v63 = vcombine.high %v744_v15, %v744_v15 }
 0x1ce   :  { %18626 = vst [vmem:[#allocation77_spill] sm:$0xff] %v14296_v41  ;;  %v2396_v57 = vsel %vm2323_vm4, %v2146_v42, %v2395_v16  ;;  %v3312_v3 = vsel %vm2319_vm2, %v3063_v14, %v3311_v20  ;;  %v14304_v53 = vmax.f32 %v1513_v40, 0.0  ;;  %v753_v49 = vcombine.high %v751_v35, %v751_v35 }
 0x1cf   :  { %18627 = vst [vmem:[#allocation78_spill] sm:$0xff] %v14300_v21  ;;  %v10879_v10 = vrot.slane %v744_v15, 9  ;;  %v10880_v58 = vrot.slane %v752_v63, 9  ;;  %v10881_v11 = vrot.slane %v751_v35, 9  ;;  %v296_v50 = vadd.f32 %v13954_v1, %v13626_v52 }
 0x1d0   :  { %18628 = vst [vmem:[#allocation79_spill] sm:$0xff] %v14304_v53  ;;  %v3079_v28 = vrot.slane %v14293_v29, %v13210_v26  ;;  %v14310_v43 = vmax.f32 %v1514_v18, 0.0  ;;  %v2174_v33 = vrot.slane %v14296_v41, %v13210_v26  ;;  %v10882_v42 = vrot.slane %v753_v49, 9 }
 0x1d1   :  { %v3313_v38 = vsel %vm2321_vm3, %v3067_v7, %v3312_v3  ;;  %v1507_v40 = vmax.f32 %v744_v15, %v10879_v10  ;;  %v1508_v54 = vmax.f32 %v752_v63, %v10880_v58  ;;  %v1509_v14 = vmax.f32 %v751_v35, %v10881_v11 }
 0x1d2   :  { %v2397_v16 = vsel %vm2325_vm5, %v2150_v12, %v2396_v57  ;;  %v2178_v20 = vrot.slane %v14300_v21, %v13210_v26  ;;  %v1510_v52 = vmax.f32 %v753_v49, %v10882_v42  ;;  %v788_v22 = vcombine.high %v296_v50, %v296_v50 }
 0x1d3   :  { %v2182_v29 = vrot.slane %v14304_v53, %v13210_v26  ;;  %v14320_v18 = vmax.f32 %v1507_v40, 0.0  ;;  %v14322_v48 = vmax.f32 %v1508_v54, 0.0  ;;  %v14324_v17 = vmax.f32 %v1509_v14, 0.0 }
 0x1d4   :  { %v3314_v15 = vsel %vm2323_vm4, %v3071_v60, %v3313_v38  ;;  %v14327_v7 = vmax.f32 %v1510_v52, 0.0  ;;  %v795_v12 = vrot.slane %v296_v50, %v13198_v62  ;;  %v291_v35 = vadd.f32 %v13954_v1, %v13677_v44 }
 0x1d5   :  { %18629 = vst [vmem:[#allocation80_spill] sm:$0xff] %v14322_v48  ;;  %v2158_v63 = vrot.slane %v14320_v18, %v13210_v26  ;;  %v2162_v57 = vrot.slane %v14322_v48, %v13210_v26  ;;  %v2166_v3 = vrot.slane %v14324_v17, %v13210_v26  ;;  %v2560_v49 = vmul.f32 %v14320_v18, %v14320_v18 }
 0x1d6   :  { %18630 = vst [vmem:[#allocation81_spill] sm:$0xff] %v14327_v7  ;;  %v2170_v60 = vrot.slane %v14327_v7, %v13210_v26  ;;  %v2561_v10 = vmul.f32 %v14322_v48, %v14322_v48  ;;  %v2562_v44 = vmul.f32 %v14324_v17, %v14324_v17  ;;  %v802_v58 = vrot.slane %v788_v22, %v13198_v62 }
 0x1d7   :  { %v2398_v11 = vsel %vm2327_vm6, %v2154_v39, %v2397_v16  ;;  %v3315_v50 = vsel %vm2325_vm5, %v3075_v8, %v3314_v15  ;;  %v2186_v42 = vrot.slane %v14310_v43, %v13210_v26  ;;  %v2399_v38 = vsel %vm2315_vm0, %v2162_v57, %v2158_v63 }
 0x1d8   :  { %v2400_v40 = vsel %vm2317_vm1, %v2166_v3, %v2399_v38  ;;  %v3087_v54 = vrot.slane %v2561_v10, %v13210_v26  ;;  %v803_v14 = vcombine.high %v795_v12, %v795_v12  ;;  %v771_v52 = vcombine.high %v291_v35, %v291_v35 }
 0x1d9   :  { %v2401_v48 = vsel %vm2319_vm2, %v2170_v60, %v2400_v40  ;;  %v2563_v22 = vmul.f32 %v14327_v7, %v14327_v7  ;;  %v3083_v39 = vrot.slane %v2560_v49, %v13210_v26  ;;  %v778_v8 = vrot.slane %v291_v35, %v13198_v62 }
 0x1da   :  { %v2402_v16 = vsel %vm2321_vm3, %v2174_v33, %v2401_v48  ;;  %v3091_v15 = vrot.slane %v2562_v44, %v13210_v26  ;;  %v804_v63 = vcombine.high %v802_v58, %v802_v58  ;;  %v10891_v57 = vrot.slane %v795_v12, 9 }
 0x1db   :  { %v2564_v3 = vmul.f32 %v14296_v41, %v14296_v41  ;;  %v2565_v10 = vmul.f32 %v14300_v21, %v14300_v21  ;;  %v2566_v60 = vmul.f32 %v14304_v53, %v14304_v53  ;;  %v3317_v38 = vsel %vm2315_vm0, %v3087_v54, %v3083_v39 }
 0x1dc   :  { %v2459_v49 = vadd.f32 %v14242_v23, %v2398_v11  ;;  %v3316_v35 = vsel %vm2327_vm6, %v3079_v28, %v3315_v50  ;;  %v14372_v48 = vmul.f32 %v14310_v43, %v14310_v43  ;;  %v10892_v33 = vrot.slane %v803_v14, 9 }
 0x1dd   :  { %v2403_v44 = vsel %vm2323_vm4, %v2178_v20, %v2402_v16  ;;  %v3095_v40 = vrot.slane %v2563_v22, %v13210_v26  ;;  %v10893_v41 = vrot.slane %v802_v58, 9  ;;  %v785_v21 = vrot.slane %v771_v52, %v13198_v62 }
 0x1de   :  { %v3318_v53 = vsel %vm2317_vm1, %v3091_v15, %v3317_v38  ;;  %v10894_v7 = vrot.slane %v804_v63, 9  ;;  %v1519_v54 = vmax.f32 %v795_v12, %v10891_v57  ;;  %v786_v39 = vcombine.high %v778_v8, %v778_v8 }
 0x1df   :  { %v14379_v23 = vadd.f32 %v14285_v37, %v3316_v35  ;;  %v3099_v28 = vrot.slane %v2564_v3, %v13210_v26  ;;  %v3103_v11 = vrot.slane %v2565_v10, %v13210_v26  ;;  %v3107_v50 = vrot.slane %v2566_v60, %v13210_v26 }
 0x1e0   :  { %v3111_v20 = vrot.slane %v14372_v48, %v13210_v26  ;;  %v2404_v22 = vsel %vm2325_vm5, %v2182_v29, %v2403_v44  ;;  %v1520_v52 = vmax.f32 %v803_v14, %v10892_v33  ;;  %v306_v16 = vadd.f32 %v13954_v1, %v13744_v46 }
 0x1e1   :  { %v3319_v12 = vsel %vm2319_vm2, %v3095_v40, %v3318_v53  ;;  %v1521_v15 = vmax.f32 %v802_v58, %v10893_v41  ;;  %v787_v37 = vcombine.high %v785_v21, %v785_v21  ;;  %v10887_v57 = vrot.slane %v778_v8, 9 }
 0x1e2   :  { %v1522_v38 = vmax.f32 %v804_v63, %v10894_v7  ;;  %v14390_v3 = vmax.f32 %v1519_v54, 0.0  ;;  %v10888_v10 = vrot.slane %v786_v39, 9  ;;  %v301_v60 = vadd.f32 %v13954_v1, %v13795_v5 }
 0x1e3   :  { %v2405_v35 = vsel %vm2327_vm6, %v2186_v42, %v2404_v22  ;;  %v10889_v48 = vrot.slane %v785_v21, 9  ;;  %v10890_v29 = vrot.slane %v787_v37, 9  ;;  %v1515_v14 = vmax.f32 %v778_v8, %v10887_v57 }
 0x1e4   :  { %18631 = vst [vmem:[#allocation82_spill] sm:$0xff] %v14390_v3  ;;  %v3320_v33 = vsel %vm2321_vm3, %v3099_v28, %v3319_v12  ;;  %v14396_v46 = vmax.f32 %v1520_v52, 0.0  ;;  %v1516_v53 = vmax.f32 %v786_v39, %v10888_v10  ;;  %v822_v41 = vcombine.high %v306_v16, %v306_v16 }
 0x1e5   :  { %v14398_v58 = vmax.f32 %v1521_v15, 0.0  ;;  %v1517_v7 = vmax.f32 %v785_v21, %v10889_v48  ;;  %v1518_v63 = vmax.f32 %v787_v37, %v10890_v29  ;;  %v14400_v44 = vmax.f32 %v1515_v14, 0.0 }
 0x1e6   :  { %18632 = vst [vmem:[#allocation83_spill] sm:$0xff] %v14396_v46  ;;  %v14402_v40 = vadd.f32 %v2459_v49, %v2405_v35  ;;  %v14404_v5 = vmax.f32 %v1522_v38, 0.0  ;;  %v14406_v42 = vmax.f32 %v1516_v53, 0.0  ;;  %v829_v8 = vrot.slane %v306_v16, %v13198_v62 }
 0x1e7   :  { %18633 = vst [vmem:[#allocation84_spill] sm:$0xff] %v14398_v58  ;;  %18634 = vst [vmem:[#allocation85_spill] sm:$0xff] %v14400_v44  ;;  %v3321_v54 = vsel %vm2323_vm4, %v3103_v11, %v3320_v33  ;;  %v14410_v28 = vmax.f32 %v1517_v7, 0.0  ;;  %v14412_v39 = vmax.f32 %v1518_v63, 0.0  ;;  %v2568_v21 = vmul.f32 %v14400_v44, %v14400_v44 }
 0x1e8   :  { %18635 = vst [vmem:[#allocation86_spill] sm:$0xff] %v14404_v5  ;;  %18636 = vst [vmem:[#allocation87_spill] sm:$0xff] %v14406_v42  ;;  %v2190_v22 = vrot.slane %v14400_v44, %v13210_v26  ;;  %v2194_v49 = vrot.slane %v14406_v42, %v13210_v26  ;;  %v2569_v52 = vmul.f32 %v14406_v42, %v14406_v42  ;;  %v10899_v63 = vrot.slane %v829_v8, 9  ;;  %v18659_v44 = vld [vmem:[#allocation8_spill] sm:$0xff] }
 0x1e9   :  { %18637 = vst [vmem:[#allocation88_spill] sm:$0xff] %v14410_v28  ;;  %18638 = vst [vmem:[#allocation89_spill] sm:$0xff] %v14412_v39  ;;  %v836_v16 = vrot.slane %v822_v41, %v13198_v62  ;;  %v2206_v11 = vrot.slane %v14390_v3, %v13210_v26  ;;  %v2198_v12 = vrot.slane %v14410_v28, %v13210_v26 }
 0x1ea   :  { %v2202_v15 = vrot.slane %v14412_v39, %v13210_v26  ;;  %v2570_v37 = vmul.f32 %v14410_v28, %v14410_v28  ;;  %v3322_v57 = vsel %vm2325_vm5, %v3107_v50, %v3321_v54  ;;  %v2406_v38 = vsel %vm2315_vm0, %v2194_v49, %v2190_v22 }
 0x1eb   :  { %v3119_v10 = vrot.slane %v2569_v52, %v13210_v26  ;;  %v837_v35 = vcombine.high %v829_v8, %v829_v8  ;;  %v2407_v48 = vsel %vm2317_vm1, %v2198_v12, %v2406_v38  ;;  %v2571_v29 = vmul.f32 %v14412_v39, %v14412_v39 }
 0x1ec   :  { %v3115_v14 = vrot.slane %v2568_v21, %v13210_v26  ;;  %v805_v33 = vcombine.high %v301_v60, %v301_v60  ;;  %v2408_v53 = vsel %vm2319_vm2, %v2202_v15, %v2407_v48  ;;  %v3123_v41 = vrot.slane %v2570_v37, %v13210_v26 }
 0x1ed   :  { %v838_v7 = vcombine.high %v836_v16, %v836_v16  ;;  %v3323_v50 = vsel %vm2327_vm6, %v3111_v20, %v3322_v57  ;;  %v2210_v54 = vrot.slane %v14396_v46, %v13210_v26  ;;  %v2572_v22 = vmul.f32 %v14390_v3, %v14390_v3 }
 0x1ee   :  { %v3324_v49 = vsel %vm2315_vm0, %v3119_v10, %v3115_v14  ;;  %v2573_v21 = vmul.f32 %v14396_v46, %v14396_v46  ;;  %v2574_v52 = vmul.f32 %v14398_v58, %v14398_v58  ;;  %v10900_v12 = vrot.slane %v837_v35, 9 }
 0x1ef   :  { %v812_v15 = vrot.slane %v301_v60, %v13198_v62  ;;  %v2409_v37 = vsel %vm2321_vm3, %v2206_v11, %v2408_v53  ;;  %v3127_v20 = vrot.slane %v2571_v29, %v13210_v26  ;;  %v10901_v57 = vrot.slane %v836_v16, 9 }
 0x1f0   :  { %v819_v38 = vrot.slane %v805_v33, %v13198_v62  ;;  %v14456_v48 = vmul.f32 %v14404_v5, %v14404_v5  ;;  %v3325_v10 = vsel %vm2317_vm1, %v3123_v41, %v3324_v49  ;;  %v10902_v14 = vrot.slane %v838_v7, 9 }
 0x1f1   :  { %v1527_v46 = vmax.f32 %v829_v8, %v10899_v63  ;;  %v14460_v3 = vadd.f32 %v14379_v23, %v3323_v50  ;;  %v2214_v60 = vrot.slane %v14398_v58, %v13210_v26  ;;  %v2218_v11 = vrot.slane %v14404_v5, %v13210_v26 }
 0x1f2   :  { %v3131_v29 = vrot.slane %v2572_v22, %v13210_v26  ;;  %v3135_v33 = vrot.slane %v2573_v21, %v13210_v26  ;;  %v3139_v53 = vrot.slane %v2574_v52, %v13210_v26  ;;  %v2410_v39 = vsel %vm2323_vm4, %v2210_v54, %v2409_v37 }
 0x1f3   :  { %v1528_v41 = vmax.f32 %v837_v35, %v10900_v12  ;;  %v3326_v8 = vsel %vm2319_vm2, %v3127_v20, %v3325_v10  ;;  %v1529_v63 = vmax.f32 %v836_v16, %v10901_v57  ;;  %v820_v23 = vcombine.high %v812_v15, %v812_v15 }
 0x1f4   :  { %v821_v50 = vcombine.high %v819_v38, %v819_v38  ;;  %v3143_v49 = vrot.slane %v14456_v48, %v13210_v26  ;;  %v1530_v58 = vmax.f32 %v838_v7, %v10902_v14  ;;  %v14473_v28 = vmax.f32 %v1527_v46, 0.0 }
 0x1f5   :  { %v10895_v5 = vrot.slane %v812_v15, 9  ;;  %v2411_v22 = vsel %vm2325_vm5, %v2214_v60, %v2410_v39  ;;  %v10896_v21 = vrot.slane %v820_v23, 9  ;;  %v10897_v42 = vrot.slane %v819_v38, 9 }
 0x1f6   :  { %18639 = vst [vmem:[#allocation90_spill] sm:$0xff] %v14473_v28  ;;  %v10898_v52 = vrot.slane %v821_v50, 9  ;;  %v3327_v54 = vsel %vm2321_vm3, %v3131_v29, %v3326_v8  ;;  %v14477_v35 = vmax.f32 %v1528_v41, 0.0  ;;  %v316_v16 = vadd.f32 %v13954_v1, %v13849_v19 }
 0x1f7   :  { %v1523_v12 = vmax.f32 %v812_v15, %v10895_v5  ;;  %v14481_v37 = vmax.f32 %v1529_v63, 0.0  ;;  %v1524_v20 = vmax.f32 %v820_v23, %v10896_v21  ;;  %v1525_v7 = vmax.f32 %v819_v38, %v10897_v42 }
 0x1f8   :  { %18640 = vst [vmem:[#allocation91_spill] sm:$0xff] %v14477_v35  ;;  %v1526_v46 = vmax.f32 %v821_v50, %v10898_v52  ;;  %v2412_v57 = vsel %vm2327_vm6, %v2218_v11, %v2411_v22  ;;  %v14484_v48 = vmax.f32 %v1530_v58, 0.0  ;;  %v856_v10 = vcombine.high %v316_v16, %v316_v16 }
 0x1f9   :  { %18641 = vst [vmem:[#allocation92_spill] sm:$0xff] %v14481_v37  ;;  %v14486_v39 = vmax.f32 %v1523_v12, 0.0  ;;  %v3328_v14 = vsel %vm2323_vm4, %v3135_v33, %v3327_v54  ;;  %v14489_v60 = vmax.f32 %v1524_v20, 0.0  ;;  %v14491_v5 = vmax.f32 %v1525_v7, 0.0 }
 0x1fa   :  { %18642 = vst [vmem:[#allocation93_spill] sm:$0xff] %v14484_v48  ;;  %v14493_v15 = vmax.f32 %v1526_v46, 0.0  ;;  %v863_v58 = vrot.slane %v316_v16, %v13198_v62  ;;  %v870_v38 = vrot.slane %v856_v10, %v13198_v62  ;;  %v3329_v8 = vsel %vm2325_vm5, %v3139_v53, %v3328_v14 }
 0x1fb   :  { %18643 = vst [vmem:[#allocation94_spill] sm:$0xff] %v14486_v39  ;;  %18644 = vst [vmem:[#allocation95_spill] sm:$0xff] %v14489_v60  ;;  %v2222_v19 = vrot.slane %v14486_v39, %v13210_v26  ;;  %v2576_v42 = vmul.f32 %v14486_v39, %v14486_v39  ;;  %v2226_v11 = vrot.slane %v14489_v60, %v13210_v26 }
 0x1fc   :  { %18645 = vst [vmem:[#allocation96_spill] sm:$0xff] %v14491_v5  ;;  %18646 = vst [vmem:[#allocation97_spill] sm:$0xff] %v14493_v15  ;;  %v2230_v29 = vrot.slane %v14491_v5, %v13210_v26  ;;  %v2234_v33 = vrot.slane %v14493_v15, %v13210_v26  ;;  %v2577_v41 = vmul.f32 %v14489_v60, %v14489_v60  ;;  %v10907_v46 = vrot.slane %v863_v58, 9 }
 0x1fd   :  { %v2238_v63 = vrot.slane %v14473_v28, %v13210_v26  ;;  %v2578_v23 = vmul.f32 %v14491_v5, %v14491_v5  ;;  %v311_v50 = vadd.f32 %v13954_v1, %v13909_v61  ;;  %v2413_v22 = vsel %vm2315_vm0, %v2226_v11, %v2222_v19 }
 0x1fe   :  { %v2579_v21 = vmul.f32 %v14493_v15, %v14493_v15  ;;  %v3147_v52 = vrot.slane %v2576_v42, %v13210_v26  ;;  %v3151_v54 = vrot.slane %v2577_v41, %v13210_v26  ;;  %v2242_v53 = vrot.slane %v14477_v35, %v13210_v26 }
 0x1ff   :  { %v2414_v12 = vsel %vm2317_vm1, %v2230_v29, %v2413_v22  ;;  %v3155_v16 = vrot.slane %v2578_v23, %v13210_v26  ;;  %v871_v20 = vcombine.high %v863_v58, %v863_v58  ;;  %v872_v1 = vcombine.high %v870_v38, %v870_v38 }
 0x200   :  { %v2415_v7 = vsel %vm2319_vm2, %v2234_v33, %v2414_v12  ;;  %v3331_v61 = vsel %vm2315_vm0, %v3151_v54, %v3147_v52  ;;  %v2461_v10 = vadd.f32 %v14402_v40, %v2412_v57  ;;  %v3330_v14 = vsel %vm2327_vm6, %v3143_v49, %v3329_v8 }
 0x201   :  { %v2580_v19 = vmul.f32 %v14473_v28, %v14473_v28  ;;  %v2581_v42 = vmul.f32 %v14477_v35, %v14477_v35  ;;  %v14535_v11 = vmul.f32 %v14481_v37, %v14481_v37  ;;  %v14539_v29 = vmul.f32 %v14484_v48, %v14484_v48 }
 0x202   :  { %v3159_v33 = vrot.slane %v2579_v21, %v13210_v26  ;;  %v839_v41 = vcombine.high %v311_v50, %v311_v50  ;;  %v2416_v40 = vsel %vm2321_vm3, %v2238_v63, %v2415_v7  ;;  %v3332_v49 = vsel %vm2317_vm1, %v3155_v16, %v3331_v61 }
 0x203   :  { %v10908_v57 = vrot.slane %v871_v20, 9  ;;  %v10909_v8 = vrot.slane %v870_v38, 9  ;;  %v2246_v23 = vrot.slane %v14481_v37, %v13210_v26  ;;  %v10910_v22 = vrot.slane %v872_v1, 9 }
 0x204   :  { %v1535_v52 = vmax.f32 %v863_v58, %v10907_v46  ;;  %v846_v54 = vrot.slane %v311_v50, %v13198_v62  ;;  %v14548_v12 = vadd.f32 %v14460_v3, %v3330_v14  ;;  %v2250_v21 = vrot.slane %v14484_v48, %v13210_v26  ;;  %v12939_v58 = vld [vmem:[%s18381_s2] ss:$0 sm:$0xff] }
 0x205   :  { %v3163_v35 = vrot.slane %v2580_v19, %v13210_v26  ;;  %v3167_v63 = vrot.slane %v2581_v42, %v13210_v26  ;;  %v3171_v16 = vrot.slane %v14535_v11, %v13210_v26  ;;  %v2417_v7 = vsel %vm2323_vm4, %v2242_v53, %v2416_v40 }
 0x206   :  { %v3333_v61 = vsel %vm2319_vm2, %v3159_v33, %v3332_v49  ;;  %v326_v3 = vadd.f32 %v12939_v58, %v13964_v13  ;;  %v1536_v46 = vmax.f32 %v871_v20, %v10908_v57  ;;  %v1537_v14 = vmax.f32 %v870_v38, %v10909_v8 }
 0x207   :  { %v853_v19 = vrot.slane %v839_v41, %v13198_v62  ;;  %v1538_v42 = vmax.f32 %v872_v1, %v10910_v22  ;;  %v14565_v48 = vmax.f32 %v1535_v52, 0.0  ;;  %v854_v11 = vcombine.high %v846_v54, %v846_v54 }
 0x208   :  { %v10903_v53 = vrot.slane %v846_v54, 9  ;;  %v2418_v33 = vsel %vm2325_vm5, %v2246_v23, %v2417_v7  ;;  %v3334_v40 = vsel %vm2321_vm3, %v3163_v35, %v3333_v61  ;;  %v890_v15 = vcombine.high %v326_v3, %v326_v3 }
 0x209   :  { %18647 = vst [vmem:[#allocation98_spill] sm:$0xff] %v14565_v48  ;;  %v855_v49 = vcombine.high %v853_v19, %v853_v19  ;;  %v10905_v37 = vrot.slane %v853_v19, 9  ;;  %v10904_v28 = vrot.slane %v854_v11, 9  ;;  %v897_v50 = vrot.slane %v326_v3, %v13198_v62 }
 0x20a   :  { %v1531_v13 = vmax.f32 %v846_v54, %v10903_v53  ;;  %v14570_v20 = vmax.f32 %v1536_v46, 0.0  ;;  %v321_v1 = vadd.f32 %v12939_v58, %v14013_v6  ;;  %v2419_v57 = vsel %vm2327_vm6, %v2250_v21, %v2418_v33 }
 0x20b   :  { %v10906_v38 = vrot.slane %v855_v49, 9  ;;  %v1533_v41 = vmax.f32 %v853_v19, %v10905_v37  ;;  %v14574_v8 = vmax.f32 %v1537_v14, 0.0  ;;  %v1532_v23 = vmax.f32 %v854_v11, %v10904_v28 }
 0x20c   :  { %18648 = vst [vmem:[#allocation99_spill] sm:$0xff] %v14570_v20  ;;  %v14576_v22 = vmax.f32 %v1531_v13, 0.0  ;;  %v3335_v35 = vsel %vm2323_vm4, %v3167_v63, %v3334_v40  ;;  %v904_v7 = vrot.slane %v890_v15, %v13198_v62  ;;  %v14582_v61 = vmax.f32 %v1538_v42, 0.0 }
 0x20d   :  { %18649 = vst [vmem:[#allocation100_spill] sm:$0xff] %v14574_v8  ;;  %v1534_v52 = vmax.f32 %v855_v49, %v10906_v38  ;;  %v14579_v54 = vmax.f32 %v1533_v41, 0.0  ;;  %v2270_v37 = vrot.slane %v14565_v48, %v13210_v26  ;;  %v14586_v6 = vmax.f32 %v1532_v23, 0.0 }
 0x20e   :  { %18650 = vst [vmem:[#allocation101_spill] sm:$0xff] %v14576_v22  ;;  %18652 = vst [vmem:[#allocation103_spill] sm:$0xff] %v14582_v61  ;;  %v905_v21 = vcombine.high %v897_v50, %v897_v50  ;;  %v14588_v58 = vadd.f32 %v2461_v10, %v2419_v57  ;;  %v2584_v3 = vmul.f32 %v14576_v22, %v14576_v22  ;;  %v10915_v49 = vrot.slane %v897_v50, 9 }
 0x20f   :  { %18651 = vst [vmem:[#allocation102_spill] sm:$0xff] %v14579_v54  ;;  %18653 = vst [vmem:[#allocation104_spill] sm:$0xff] %v14586_v6  ;;  %v14590_v28 = vmax.f32 %v1534_v52, 0.0  ;;  %v2262_v63 = vrot.slane %v14579_v54, %v13210_v26  ;;  %v2254_v15 = vrot.slane %v14576_v22, %v13210_v26  ;;  %v2258_v46 = vrot.slane %v14586_v6, %v13210_v26 }
 0x210   :  { %v2585_v14 = vmul.f32 %v14586_v6, %v14586_v6  ;;  %v2586_v10 = vmul.f32 %v14579_v54, %v14579_v54  ;;  %v3336_v19 = vsel %vm2325_vm5, %v3171_v16, %v3335_v35  ;;  %v906_v11 = vcombine.high %v904_v7, %v904_v7 }
 0x211   :  { %18654 = vst [vmem:[#allocation105_spill] sm:$0xff] %v14590_v28  ;;  %v2266_v42 = vrot.slane %v14590_v28, %v13210_v26  ;;  %v873_v53 = vcombine.high %v321_v1, %v321_v1  ;;  %v2420_v33 = vsel %vm2315_vm0, %v2258_v46, %v2254_v15  ;;  %v10916_v13 = vrot.slane %v905_v21, 9 }
 0x212   :  { %v3183_v40 = vrot.slane %v2585_v14, %v13210_v26  ;;  %v2421_v38 = vsel %vm2317_vm1, %v2262_v63, %v2420_v33  ;;  %v2587_v41 = vmul.f32 %v14590_v28, %v14590_v28  ;;  %v3179_v57 = vrot.slane %v2584_v3, %v13210_v26 }
 0x213   :  { %v10917_v23 = vrot.slane %v904_v7, 9  ;;  %v2274_v16 = vrot.slane %v14570_v20, %v13210_v26  ;;  %v2588_v35 = vmul.f32 %v14565_v48, %v14565_v48  ;;  %v2422_v52 = vsel %vm2319_vm2, %v2266_v42, %v2421_v38 }
 0x214   :  { %v3187_v15 = vrot.slane %v2586_v10, %v13210_v26  ;;  %v2589_v46 = vmul.f32 %v14570_v20, %v14570_v20  ;;  %v14623_v63 = vmul.f32 %v14574_v8, %v14574_v8  ;;  %v3338_v3 = vsel %vm2315_vm0, %v3183_v40, %v3179_v57 }
 0x215   :  { %v10918_v14 = vrot.slane %v906_v11, 9  ;;  %v14628_v33 = vmul.f32 %v14582_v61, %v14582_v61  ;;  %v1543_v28 = vmax.f32 %v897_v50, %v10915_v49  ;;  %v880_v48 = vrot.slane %v321_v1, %v13198_v62 }
 0x216   :  { %v887_v42 = vrot.slane %v873_v53, %v13198_v62  ;;  %v2423_v10 = vsel %vm2321_vm3, %v2270_v37, %v2422_v52  ;;  %v3191_v38 = vrot.slane %v2587_v41, %v13210_v26  ;;  %v1544_v20 = vmax.f32 %v905_v21, %v10916_v13 }
 0x217   :  { %v1545_v54 = vmax.f32 %v904_v7, %v10917_v23  ;;  %v18655_v6 = vrot.slane %v14539_v29, %v13210_v26  ;;  %v2278_v57 = vrot.slane %v14574_v8, %v13210_v26  ;;  %v2282_v50 = vrot.slane %v14582_v61, %v13210_v26  ;;  %v10919_v29 = vld [vmem:[%s18382_s3 + $0x80] sm:$0xff]  ;;  %v10922_v23 = vld [vmem:[%s18382_s3 + $0x98] sm:$0xff] }
 0x218   :  { %v3339_v1 = vsel %vm2317_vm1, %v3187_v15, %v3338_v3  ;;  %v3195_v37 = vrot.slane %v2588_v35, %v13210_v26  ;;  %v3199_v53 = vrot.slane %v2589_v46, %v13210_v26  ;;  %v1546_v21 = vmax.f32 %v906_v11, %v10918_v14  ;;  %v10921_v11 = vld [vmem:[%s18382_s3 + $0x90] sm:$0xff]  ;;  %v10923_v8 = vld [vmem:[%s18382_s3 + $0xa0] sm:$0xff] }
 0x219   :  { %v14638_v40 = vsel %vm2327_vm6, %v18655_v6, %v3336_v19  ;;  %v10920_v6 = vld [vmem:[%s18382_s3 + $0x88] sm:$0xff]  ;;  %v2424_v49 = vsel %vm2323_vm4, %v2274_v16, %v2423_v10  ;;  %v14658_v13 = vmax.f32 %v1543_v28, 0.0  ;;  %v888_v41 = vcombine.high %v880_v48, %v880_v48 }
 0x21a   :  { %v3340_v35 = vsel %vm2319_vm2, %v3191_v38, %v3339_v1  ;;  %v14667_v52 = vmax.f32 %v1544_v20, 0.0  ;;  %v14669_v15 = vmax.f32 %v1545_v54, 0.0  ;;  %v889_v46 = vcombine.high %v887_v42, %v887_v42  ;;  %v10924_v20 = vld [vmem:[%s18382_s3 + $0xa8] sm:$0xff] }
 0x21b   :  { %v10911_v3 = vrot.slane %v880_v48, 9  ;;  %v10912_v16 = vrot.slane %v888_v41, 9  ;;  %v10913_v28 = vrot.slane %v887_v42, 9  ;;  %v12372_v14 = vpack.c.bf16 %v10920_v6, %v10919_v29 }
 0x21c   :  { %v2425_v10 = vsel %vm2325_vm5, %v2278_v57, %v2424_v49  ;;  %v14672_v19 = vmax.f32 %v1546_v21, 0.0  ;;  %v10914_v7 = vrot.slane %v889_v46, 9  ;;  %v12376_v61 = vpack.c.bf16 %v10922_v23, %v10921_v11 }
 0x21d   :  { %v3341_v54 = vsel %vm2321_vm3, %v3195_v37, %v3340_v35  ;;  %v1539_v38 = vmax.f32 %v880_v48, %v10911_v3  ;;  %v1540_v1 = vmax.f32 %v888_v41, %v10912_v16  ;;  %v1541_v22 = vmax.f32 %v887_v42, %v10913_v28  ;;  %12373 = vmatprep.subr.bf16.mxu1 %v12372_v14 }
 0x21e   :  { %v2302_v57 = vrot.slane %v14658_v13, %v13210_v26  ;;  %v2306_v21 = vrot.slane %v14667_v52, %v13210_v26  ;;  %v2310_v29 = vrot.slane %v14669_v15, %v13210_v26  ;;  %v1542_v6 = vmax.f32 %v889_v46, %v10914_v7  ;;  %12375 = vmatpush3.bf16.msra.mxu1 %v12372_v14  ;;  %v10925_v7 = vld [vmem:[%s18382_s3 + $0xb0] sm:$0xff] }
 0x21f   :  { %v14687_v49 = vmax.f32 %v1539_v38, 0.0  ;;  %v14689_v11 = vmax.f32 %v1540_v1, 0.0  ;;  %v14691_v37 = vmax.f32 %v1541_v22, 0.0  ;;  %12377 = vmatprep.subr.bf16.mxu1 %v12376_v61  ;;  %v12380_v48 = vpack.c.bf16 %v10924_v20, %v10923_v8  ;;  %v10926_v22 = vld [vmem:[%s18382_s3 + $0xb8] sm:$0xff] }
 0x220   :  { %v2426_v42 = vsel %vm2327_vm6, %v2282_v50, %v2425_v10  ;;  %v3342_v41 = vsel %vm2323_vm4, %v3199_v53, %v3341_v54  ;;  %v2596_v23 = vmul.f32 %v14658_v13, %v14658_v13  ;;  %v14697_v35 = vmax.f32 %v1542_v6, 0.0 }
 0x221   :  { %v2286_v8 = vrot.slane %v14687_v49, %v13210_v26  ;;  %v2290_v50 = vrot.slane %v14689_v11, %v13210_v26  ;;  %v2294_v53 = vrot.slane %v14691_v37, %v13210_v26  ;;  %v2592_v46 = vmul.f32 %v14687_v49, %v14687_v49 }
 0x222   :  { %v2298_v3 = vrot.slane %v14697_v35, %v13210_v26  ;;  %v2593_v16 = vmul.f32 %v14689_v11, %v14689_v11  ;;  %v2594_v28 = vmul.f32 %v14691_v37, %v14691_v37  ;;  %v2595_v14 = vmul.f32 %v14697_v35, %v14697_v35  ;;  %12379 = vmatpush3.bf16.msra.mxu1 %v12376_v61  ;;  %v10927_v61 = vld [vmem:[%s18382_s3 + $0xc0] sm:$0xff] }
 0x223   :  { %v2597_v10 = vmul.f32 %v14667_v52, %v14667_v52  ;;  %v2427_v20 = vsel %vm2315_vm0, %v2290_v50, %v2286_v8  ;;  %v3211_v54 = vrot.slane %v2592_v46, %v13210_v26  ;;  %12381 = vmatprep.subr.bf16.mxu1 %v12380_v48  ;;  %v12384_v38 = vpack.c.bf16 %v10926_v22, %v10925_v7  ;;  %v10928_v8 = vld [vmem:[%s18382_s3 + $0xc8] sm:$0xff] }
 0x224   :  { %v2428_v1 = vsel %vm2317_vm1, %v2294_v53, %v2427_v20  ;;  %v3215_v6 = vrot.slane %v2593_v16, %v13210_v26  ;;  %v3219_v5 = vrot.slane %v2594_v28, %v13210_v26  ;;  %v3223_v60 = vrot.slane %v2595_v14, %v13210_v26 }
 0x225   :  { %v18656_v50 = vrot.slane %v14623_v63, %v13210_v26  ;;  %v2314_v22 = vrot.slane %v14672_v19, %v13210_v26  ;;  %v2598_v53 = vmul.f32 %v14669_v15, %v14669_v15  ;;  %v2429_v46 = vsel %vm2319_vm2, %v2298_v3, %v2428_v1 }
 0x226   :  { %v2463_v16 = vadd.f32 %v14588_v58, %v2426_v42  ;;  %v2599_v28 = vmul.f32 %v14672_v19, %v14672_v19  ;;  %v2430_v14 = vsel %vm2321_vm3, %v2302_v57, %v2429_v46  ;;  %v3345_v20 = vsel %vm2315_vm0, %v3215_v6, %v3211_v54  ;;  %12383 = vmatpush3.bf16.msra.mxu1 %v12380_v48  ;;  %v10929_v48 = vld [vmem:[%s18382_s3 + $0xd0] sm:$0xff] }
 0x227   :  { %v3343_v7 = vsel %vm2325_vm5, %v18656_v50, %v3342_v41  ;;  %v3227_v63 = vrot.slane %v2596_v23, %v13210_v26  ;;  %v2431_v41 = vsel %vm2323_vm4, %v2306_v21, %v2430_v14  ;;  %v3346_v50 = vsel %vm2317_vm1, %v3219_v5, %v3345_v20  ;;  %12385 = vmatprep.subr.bf16.mxu1 %v12384_v38  ;;  %v10930_v5 = vld [vmem:[%s18382_s3 + $0xd8] sm:$0xff]  ;;  %v10933_v14 = vld [vmem:[%s18382_s3 + $0xf0] sm:$0xff] }
 0x228   :  { %v12388_v39 = vpack.c.bf16 %v10928_v8, %v10927_v61  ;;  %v18657_v3 = vrot.slane %v14628_v33, %v13210_v26  ;;  %v3231_v42 = vrot.slane %v2597_v10, %v13210_v26  ;;  %v2432_v57 = vsel %vm2325_vm5, %v2310_v29, %v2431_v41  ;;  %v10934_v20 = vld [vmem:[%s18382_s3 + $0xf8] sm:$0xff] }
 0x229   :  { %v3347_v54 = vsel %vm2319_vm2, %v3223_v60, %v3346_v50  ;;  %v3380_v21 = vadd.f32 %v14548_v12, %v14638_v40  ;;  %v3235_v33 = vrot.slane %v2598_v53, %v13210_v26  ;;  %v2433_v23 = vsel %vm2327_vm6, %v2314_v22, %v2432_v57  ;;  %v10931_v40 = vld [vmem:[%s18382_s3 + $0xe0] sm:$0xff]  ;;  %v10932_v22 = vld [vmem:[%s18382_s3 + $0xe8] sm:$0xff] }
 0x22a   :  { %v3344_v58 = vsel %vm2327_vm6, %v18657_v3, %v3343_v7  ;;  %v3348_v10 = vsel %vm2321_vm3, %v3227_v63, %v3347_v54  ;;  %v3239_v29 = vrot.slane %v2599_v28, %v13210_v26  ;;  %v2464_v60 = vadd.f32 %v2463_v16, %v2433_v23  ;;  %12387 = vmatpush3.bf16.msra.mxu1 %v12384_v38 }
 0x22b   :  { %v3349_v1 = vsel %vm2323_vm4, %v3231_v42, %v3348_v10  ;;  %v3381_v6 = vadd.f32 %v3380_v21, %v3344_v58  ;;  %12389 = vmatprep.subr.bf16.mxu1 %v12388_v39  ;;  %v12392_v8 = vpack.c.bf16 %v10930_v5, %v10929_v48  ;;  %v12396_v16 = vpack.c.bf16 %v10932_v22, %v10931_v40  ;;  %v4526_v42 = vld [vmem:[%s18382_s3 + $0x8] sm:$0xff] }
 0x22c   :  { %v3350_v61 = vsel %vm2325_vm5, %v3235_v33, %v3349_v1  ;;  %v2465_v7 = vrot.slane %v2464_v60, 4  ;;  %v12400_v3 = vpack.c.bf16 %v10934_v20, %v10933_v14  ;;  %v329_v1 = vld [vmem:[%s18381_s2 + $0x1] sm:$0x1]  ;;  %v4530_v22 = vld [vmem:[%s18382_s3 + $0x28] sm:$0xff] }
 0x22d   :  { %v3351_v12 = vsel %vm2327_vm6, %v3239_v29, %v3350_v61  ;;  %v330_v61 = vld [vmem:[%s18381_s2 + $0x2] sm:$0x1] }
 0x22e   :  { %v3382_v53 = vadd.f32 %v3381_v6, %v3351_v12  ;;  %v2466_v46 = vadd.f32 %v2465_v7, %v2464_v60  ;;  %12391 = vmatpush3.bf16.msra.mxu1 %v12388_v39  ;;  %v4525_v39 = vld [vmem:[%s18382_s3] sm:$0xff]  ;;  %v4528_v7 = vld [vmem:[%s18382_s3 + $0x18] sm:$0xff] }
 0x22f   :  { %12393 = vmatprep.subr.bf16.mxu1 %v12392_v8  ;;  %v14792_v5 = vpack.c.bf16 %v4526_v42, %v4525_v39  ;;  %v4529_v12 = vld [vmem:[%s18382_s3 + $0x20] sm:$0xff] }
 0x230   :  { %v3383_v38 = vrot.slane %v3382_v53, 4  ;;  %v2467_v28 = vrot.slane %v2466_v46, 2 }
 0x232   :  { %v3384_v63 = vadd.f32 %v3383_v38, %v3382_v53  ;;  %v2468_v41 = vadd.f32 %v2467_v28, %v2466_v46  ;;  %12395 = vmatpush3.bf16.msra.mxu1 %v12392_v8  ;;  %v4527_v8 = vld [vmem:[%s18382_s3 + $0x10] sm:$0xff]  ;;  %v4532_v46 = vld [vmem:[%s18382_s3 + $0x38] sm:$0xff]  ;;  %v4533_v38 = vld [vmem:[%s18382_s3 + $0x40] sm:$0xff] }
 0x233   :  { %12397 = vmatprep.subr.bf16.mxu1 %v12396_v16  ;;  %v4531_v53 = vld [vmem:[%s18382_s3 + $0x30] sm:$0xff] }
 0x234   :  { %v3385_v50 = vrot.slane %v3384_v63, 2  ;;  %v2469_v58 = vrot.slane %v2468_v41, 1  ;;  %v4535_v28 = vld [vmem:[%s18382_s3 + $0x50] sm:$0xff] }
 0x236   :  { %v3386_v57 = vadd.f32 %v3385_v50, %v3384_v63  ;;  %v2470_v54 = vadd.f32 %v2469_v58, %v2468_v41  ;;  %12399 = vmatpush3.bf16.msra.mxu1 %v12396_v16  ;;  %v4534_v16 = vld [vmem:[%s18382_s3 + $0x48] sm:$0xff]  ;;  %v4536_v63 = vld [vmem:[%s18382_s3 + $0x58] sm:$0xff]  ;;  %v4537_v41 = vld [vmem:[%s18382_s3 + $0x60] sm:$0xff] }
 0x237   :  { %12401 = vmatprep.subr.bf16.mxu1 %v12400_v3  ;;  %v4538_v50 = vld [vmem:[%s18382_s3 + $0x68] sm:$0xff] }
 0x238   :  { %v3387_v48 = vrot.slane %v3386_v57, 1  ;;  %v2471_v21 = vmul.f32 0.0078125, %v2470_v54  ;;  %v14845_v54 = vpack.c.bf16 %v4532_v46, %v4531_v53 }
 0x23a   :  { %v3388_v33 = vadd.f32 %v3387_v48, %v3386_v57  ;;  %v3390_v23 = vmul.f32 %v2471_v21, %v2471_v21  ;;  %12403 = vmatpush3.bf16.msra.mxu1 %v12400_v3  ;;  %v14838_v3 = vpack.c.bf16 %v4528_v7, %v4527_v8  ;;  %v14843_v57 = vpack.c.bf16 %v4530_v22, %v4529_v12 }
 0x23b   :  { %12405 = vmatprep.subr.bf16.mxu1 %v14792_v5  ;;  %v14847_v48 = vpack.c.bf16 %v4534_v16, %v4533_v38 }
 0x23c   :  { %v3389_v10 = vmul.f32 0.0078125, %v3388_v33  ;;  %v14851_v33 = vpack.c.bf16 %v4538_v50, %v4537_v41 }
 0x23e   :  { %v3391_v29 = vsub.f32 %v3389_v10, %v3390_v23 }
 0x240   :  { %v3392_v60 = vadd.f32 1e-05, %v3391_v29 }
 0x242   :  { %12928 = vrsqrt.f32 %v3392_v60 }
 0x24c   :  { %v12929_v6 = vpop.eup %12928 }
 0x24d   :  { %v3394_v40 = vmul.f32 %v12929_v6, %v329_v1 }
 0x24f   :  { %v3395_v14 = vmul.f32 %v3394_v40, %v2471_v21  ;;  %v3400_v20 = vrot.slane %v3394_v40, %v13210_v26  ;;  %v14849_v21 = vpack.c.bf16 %v4536_v63, %v4535_v28 }
 0x251   :  { %v3396_v58 = vsub.f32 %v330_v61, %v3395_v14  ;;  %v3402_v39 = vcombine.high %v3400_v20, %v3400_v20  ;;  %v14841_v42 = vrot.slane %v3400_v20, %v13198_v62 }
 0x253   :  { %v14854_v23 = vrot.slane %v3402_v39, %v13198_v62  ;;  %v14858_v10 = vcombine.high %v14841_v42, %v14841_v42  ;;  %v14861_v29 = vrot.slane %v14841_v42, 1  ;;  %v3551_v60 = vmul.f32 %v14841_v42, %v14687_v49 }
 0x254   :  { %v3562_v1 = vrot.slane %v3396_v58, %v13210_v26  ;;  %v3431_v6 = vmul.f32 %v14841_v42, %v13212_v27  ;;  %v14870_v61 = vmul.f32 %v14841_v42, %v13315_v2  ;;  %v14874_v8 = vmul.f32 %v14841_v42, %v13419_v32 }
 0x255   :  { %v14878_v7 = vcombine.high %v14854_v23, %v14854_v23  ;;  %v14881_v12 = vrot.slane %v14858_v10, 1  ;;  %v14884_v49 = vrot.slane %v14854_v23, 1  ;;  %v3552_v27 = vmul.f32 %v14861_v29, %v14689_v11 }
 0x256   :  { %v3553_v2 = vmul.f32 %v14858_v10, %v14691_v37  ;;  %v3555_v32 = vmul.f32 %v14854_v23, %v14658_v13  ;;  %v3564_v40 = vcombine.high %v3562_v1, %v3562_v1  ;;  %v14893_v22 = vrot.slane %v3562_v1, %v13198_v62 }
 0x257   :  { %v14896_v53 = vrot.slane %v14878_v7, 1  ;;  %v3554_v46 = vmul.f32 %v14881_v12, %v14697_v35  ;;  %v3556_v38 = vmul.f32 %v14884_v49, %v14667_v52  ;;  %v3557_v11 = vmul.f32 %v14878_v7, %v14669_v15 }
 0x258   :  { %v14905_v37 = vrot.slane %v3564_v40, %v13198_v62  ;;  %v14909_v13 = vcombine.high %v14893_v22, %v14893_v22  ;;  %v14912_v16 = vrot.slane %v14893_v22, 1  ;;  %v3713_v28 = vadd.f32 %v14893_v22, %v3551_v60 }
 0x259   :  { %v3558_v35 = vmul.f32 %v14896_v53, %v14672_v19  ;;  %v3432_v52 = vmul.f32 %v14861_v29, %v13214_v30  ;;  %v3433_v15 = vmul.f32 %v14858_v10, %v13216_v31  ;;  %v3434_v14 = vmul.f32 %v14881_v12, %v13222_v36 }
 0x25a   :  { %v14925_v20 = vcombine.high %v14905_v37, %v14905_v37  ;;  %v14928_v63 = vrot.slane %v14909_v13, 1  ;;  %v14931_v41 = vrot.slane %v14905_v37, 1  ;;  %v3714_v19 = vadd.f32 %v14912_v16, %v3552_v27 }
 0x25b   :  { %v3715_v30 = vadd.f32 %v14909_v13, %v3553_v2  ;;  %v3717_v50 = vadd.f32 %v14905_v37, %v3555_v32  ;;  %v4336_v31 = vrot.slane %v3713_v28, %v13210_v26  ;;  %v3435_v36 = vmul.f32 %v14854_v23, %v13243_v51 }
 0x25c   :  { %v14940_v58 = vrot.slane %v14925_v20, 1  ;;  %v3716_v39 = vadd.f32 %v14928_v63, %v3554_v46  ;;  %v3718_v60 = vadd.f32 %v14931_v41, %v3556_v38  ;;  %v3719_v1 = vadd.f32 %v14925_v20, %v3557_v11  ;;  %v18658_v11 = vld [vmem:[#allocation7_spill] sm:$0xff] }
 0x25d   :  { %v4340_v27 = vrot.slane %v3714_v19, %v13210_v26  ;;  %v4344_v2 = vrot.slane %v3715_v30, %v13210_v26  ;;  %v4352_v32 = vrot.slane %v3717_v50, %v13210_v26  ;;  %v3436_v40 = vmul.f32 %v14884_v49, %v13253_v59 }
 0x25e   :  { %v3720_v51 = vadd.f32 %v14940_v58, %v3558_v35  ;;  %v4348_v28 = vrot.slane %v3716_v39, %v13210_v26  ;;  %v4356_v62 = vrot.slane %v3718_v60, %v13210_v26  ;;  %v4360_v46 = vrot.slane %v3719_v1, %v13210_v26 }
 0x25f   :  { %v4470_v38 = vsel %vm2315_vm0, %v4340_v27, %v4336_v31  ;;  %v3437_v19 = vmul.f32 %v14878_v7, %v18658_v11  ;;  %v3438_v30 = vmul.f32 %v14896_v53, %v18659_v44  ;;  %v3593_v50 = vadd.f32 %v14893_v22, %v3431_v6 }
 0x260   :  { %v4364_v59 = vrot.slane %v3720_v51, %v13210_v26  ;;  %v4471_v35 = vsel %vm2317_vm1, %v4344_v2, %v4470_v38  ;;  %v3594_v39 = vadd.f32 %v14912_v16, %v3432_v52  ;;  %v3595_v60 = vadd.f32 %v14909_v13, %v3433_v15 }
 0x261   :  { %v4472_v1 = vsel %vm2319_vm2, %v4348_v28, %v4471_v35  ;;  %v3596_v31 = vadd.f32 %v14928_v63, %v3434_v14  ;;  %v3597_v27 = vadd.f32 %v14905_v37, %v3435_v36  ;;  %v3598_v11 = vadd.f32 %v14931_v41, %v3436_v40 }
 0x262   :  { %v4473_v44 = vsel %vm2321_vm3, %v4352_v32, %v4472_v1  ;;  %v3599_v6 = vadd.f32 %v14925_v20, %v3437_v19  ;;  %v3600_v51 = vadd.f32 %v14940_v58, %v3438_v30  ;;  %v3856_v2 = vrot.slane %v3593_v50, %v13210_v26  ;;  %v18660_v50 = vld [vmem:[#allocation10_spill] sm:$0xff]  ;;  %v18662_v1 = vld [vmem:[#allocation12_spill] sm:$0xff] }
 0x263   :  { %v4474_v52 = vsel %vm2323_vm4, %v4356_v62, %v4473_v44  ;;  %v3860_v15 = vrot.slane %v3594_v39, %v13210_v26  ;;  %v3864_v28 = vrot.slane %v3595_v60, %v13210_v26  ;;  %v3868_v14 = vrot.slane %v3596_v31, %v13210_v26  ;;  %v18661_v60 = vld [vmem:[#allocation11_spill] sm:$0xff]  ;;  %v18664_v44 = vld [vmem:[#allocation14_spill] sm:$0xff] }
 0x264   :  { %v4475_v36 = vsel %vm2325_vm5, %v4360_v46, %v4474_v52  ;;  %v3872_v40 = vrot.slane %v3597_v27, %v13210_v26  ;;  %v3876_v32 = vrot.slane %v3598_v11, %v13210_v26  ;;  %v3880_v38 = vrot.slane %v3599_v6, %v13210_v26  ;;  %v18663_v27 = vld [vmem:[#allocation9_spill] sm:$0xff]  ;;  %v18666_v52 = vld [vmem:[#allocation15_spill] sm:$0xff] }
 0x265   :  { %v4476_v19 = vsel %vm2327_vm6, %v4364_v59, %v4475_v36  ;;  %v3884_v30 = vrot.slane %v3600_v51, %v13210_v26  ;;  %v4365_v62 = vsel %vm2315_vm0, %v3860_v15, %v3856_v2  ;;  %v3440_v35 = vmul.f32 %v14861_v29, %v18660_v50  ;;  %v18665_v51 = vld [vmem:[#allocation13_spill] sm:$0xff] }
 0x266   :  { %4508 = vst [vmem:[#allocation2 + $0x81] sm:$0xff] %v4476_v19  ;;  %v4366_v39 = vsel %vm2317_vm1, %v3864_v28, %v4365_v62  ;;  %v3441_v46 = vmul.f32 %v14858_v10, %v18661_v60  ;;  %v3442_v31 = vmul.f32 %v14881_v12, %v18662_v1  ;;  %v3443_v11 = vmul.f32 %v14854_v23, %v18663_v27 }
 0x267   :  { %v4367_v59 = vsel %vm2319_vm2, %v3868_v14, %v4366_v39  ;;  %v3444_v6 = vmul.f32 %v14884_v49, %v18664_v44  ;;  %v3445_v2 = vmul.f32 %v14878_v7, %v18665_v51  ;;  %v3446_v15 = vmul.f32 %v14896_v53, %v18666_v52  ;;  %v18667_v51 = vld [vmem:[#allocation21_spill] sm:$0xff] }
 0x268   :  { %v4368_v28 = vsel %vm2321_vm3, %v3872_v40, %v4367_v59  ;;  %v3601_v36 = vadd.f32 %v14893_v22, %v14870_v61  ;;  %v3602_v19 = vadd.f32 %v14912_v16, %v3440_v35  ;;  %v3603_v62 = vadd.f32 %v14909_v13, %v3441_v46 }
 0x269   :  { %v4369_v14 = vsel %vm2323_vm4, %v3876_v32, %v4368_v28  ;;  %v3604_v50 = vadd.f32 %v14928_v63, %v3442_v31  ;;  %v3605_v39 = vadd.f32 %v14905_v37, %v3443_v11  ;;  %v3606_v60 = vadd.f32 %v14931_v41, %v3444_v6 }
 0x26a   :  { %v4370_v1 = vsel %vm2325_vm5, %v3880_v38, %v4369_v14  ;;  %v3607_v27 = vadd.f32 %v14925_v20, %v3445_v2  ;;  %v3608_v40 = vadd.f32 %v14940_v58, %v3446_v15  ;;  %v3888_v61 = vrot.slane %v3601_v36, %v13210_v26  ;;  %v18668_v2 = vld [vmem:[#allocation20_spill] sm:$0xff]  ;;  %v18669_v15 = vld [vmem:[#allocation22_spill] sm:$0xff]  ;;  %v18671_v14 = vld [vmem:[#allocation17_spill] sm:$0xff] }
 0x26b   :  { %v4371_v35 = vsel %vm2327_vm6, %v3884_v30, %v4370_v1  ;;  %v3892_v46 = vrot.slane %v3602_v19, %v13210_v26  ;;  %v3896_v32 = vrot.slane %v3603_v62, %v13210_v26  ;;  %v3900_v31 = vrot.slane %v3604_v50, %v13210_v26  ;;  %v18670_v19 = vld [vmem:[#allocation16_spill] sm:$0xff] }
 0x26c   :  { %4493 = vst [vmem:[#allocation2 + $0x1] sm:$0xff] %v4371_v35  ;;  %11713 = vmatprep.mubr.f32.mxu1 %v4371_v35  ;;  %v3904_v11 = vrot.slane %v3605_v39, %v13210_v26  ;;  %v3908_v38 = vrot.slane %v3606_v60, %v13210_v26  ;;  %v3912_v59 = vrot.slane %v3607_v27, %v13210_v26  ;;  %v18672_v39 = vld [vmem:[#allocation18_spill] sm:$0xff]  ;;  %v18673_v27 = vld [vmem:[#allocation19_spill] sm:$0xff] }
 0x26d   :  { %v3916_v44 = vrot.slane %v3608_v40, %v13210_v26  ;;  %v4372_v6 = vsel %vm2315_vm0, %v3892_v46, %v3888_v61  ;;  %v3448_v30 = vmul.f32 %v14861_v29, %v18667_v51  ;;  %v3449_v52 = vmul.f32 %v14858_v10, %v18668_v2 }
 0x26e   :  { %v3450_v28 = vmul.f32 %v14881_v12, %v18669_v15  ;;  %v4373_v36 = vsel %vm2317_vm1, %v3896_v32, %v4372_v6  ;;  %v3451_v62 = vmul.f32 %v14854_v23, %v18670_v19  ;;  %v3452_v50 = vmul.f32 %v14884_v49, %v18671_v14 }
 0x26f   :  { %v3453_v60 = vmul.f32 %v14878_v7, %v18672_v39  ;;  %v4374_v1 = vsel %vm2319_vm2, %v3900_v31, %v4373_v36  ;;  %v3454_v40 = vmul.f32 %v14896_v53, %v18673_v27  ;;  %v3609_v61 = vadd.f32 %v14893_v22, %v14874_v8  ;;  %v18674_v39 = vld [vmem:[#allocation27_spill] sm:$0xff] }
 0x270   :  { %v3610_v35 = vadd.f32 %v14912_v16, %v3448_v30  ;;  %v4375_v46 = vsel %vm2321_vm3, %v3904_v11, %v4374_v1  ;;  %v3611_v32 = vadd.f32 %v14909_v13, %v3449_v52  ;;  %v3612_v6 = vadd.f32 %v14928_v63, %v3450_v28  ;;  %v18675_v1 = vld [vmem:[#allocation29_spill] sm:$0xff] }
 0x271   :  { %v3613_v51 = vadd.f32 %v14905_v37, %v3451_v62  ;;  %v4376_v2 = vsel %vm2323_vm4, %v3908_v38, %v4375_v46  ;;  %v3614_v31 = vadd.f32 %v14931_v41, %v3452_v50  ;;  %v3615_v15 = vadd.f32 %v14925_v20, %v3453_v60 }
 0x272   :  { %v3616_v36 = vadd.f32 %v14940_v58, %v3454_v40  ;;  %v4377_v8 = vsel %vm2325_vm5, %v3912_v59, %v4376_v2  ;;  %v3920_v30 = vrot.slane %v3609_v61, %v13210_v26  ;;  %v3924_v11 = vrot.slane %v3610_v35, %v13210_v26  ;;  %v18676_v40 = vld [vmem:[#allocation28_spill] sm:$0xff]  ;;  %v18677_v35 = vld [vmem:[#allocation30_spill] sm:$0xff] }
 0x273   :  { %v3928_v52 = vrot.slane %v3611_v32, %v13210_v26  ;;  %v4378_v28 = vsel %vm2327_vm6, %v3916_v44, %v4377_v8  ;;  %v3932_v19 = vrot.slane %v3612_v6, %v13210_v26  ;;  %v3936_v38 = vrot.slane %v3613_v51, %v13210_v26  ;;  %v18678_v6 = vld [vmem:[#allocation23_spill] sm:$0xff]  ;;  %v18679_v2 = vld [vmem:[#allocation24_spill] sm:$0xff]  ;;  %v18681_v8 = vld [vmem:[#allocation26_spill] sm:$0xff] }
 0x274   :  { %v3940_v62 = vrot.slane %v3614_v31, %v13210_v26  ;;  %4494 = vst [vmem:[#allocation2 + $0x9] sm:$0xff] %v4378_v28  ;;  %11714 = vmatmul.mubr.f32.vlgmr.msra.gmra.mrb[0].mxu1 %v4378_v28  ;;  %v3944_v14 = vrot.slane %v3615_v15, %v13210_v26  ;;  %v3948_v59 = vrot.slane %v3616_v36, %v13210_v26  ;;  %v18680_v31 = vld [vmem:[#allocation25_spill] sm:$0xff] }
 0x275   :  { %v4379_v50 = vsel %vm2315_vm0, %v3924_v11, %v3920_v30  ;;  %v3455_v60 = vmul.f32 %v14841_v42, %v18674_v39  ;;  %12407 = vmatpush3.bf16.msra.mxu1 %v14792_v5  ;;  %v3456_v27 = vmul.f32 %v14861_v29, %v18675_v1  ;;  %v3457_v61 = vmul.f32 %v14858_v10, %v18676_v40 }
 0x276   :  { %v4380_v44 = vsel %vm2317_vm1, %v3928_v52, %v4379_v50  ;;  %v3458_v46 = vmul.f32 %v14881_v12, %v18677_v35  ;;  %12409 = vmatprep.subr.bf16.mxu1 %v14838_v3  ;;  %v3459_v51 = vmul.f32 %v14854_v23, %v18678_v6  ;;  %v3460_v5 = vmul.f32 %v14884_v49, %v18679_v2  ;;  %v18682_v6 = vld [vmem:[#allocation35_spill] sm:$0xff]  ;;  %v18683_v2 = vld [vmem:[#allocation36_spill] sm:$0xff] }
 0x277   :  { %v4381_v32 = vsel %vm2319_vm2, %v3932_v19, %v4380_v44  ;;  %v3461_v15 = vmul.f32 %v14878_v7, %v18680_v31  ;;  %v3462_v30 = vmul.f32 %v14896_v53, %v18681_v8  ;;  %v3617_v11 = vadd.f32 %v14893_v22, %v3455_v60  ;;  %v18685_v8 = vld [vmem:[#allocation38_spill] sm:$0xff] }
 0x278   :  { %v4382_v36 = vsel %vm2321_vm3, %v3936_v38, %v4381_v32  ;;  %v3618_v52 = vadd.f32 %v14912_v16, %v3456_v27  ;;  %v3619_v19 = vadd.f32 %v14909_v13, %v3457_v61  ;;  %v3620_v50 = vadd.f32 %v14928_v63, %v3458_v46 }
 0x279   :  { %v4383_v28 = vsel %vm2323_vm4, %v3940_v62, %v4382_v36  ;;  %v3621_v39 = vadd.f32 %v14905_v37, %v3459_v51  ;;  %v3622_v1 = vadd.f32 %v14931_v41, %v3460_v5  ;;  %v3623_v38 = vadd.f32 %v14925_v20, %v3461_v15  ;;  %12411 = vmatpush3.bf16.msra.mxu1 %v14838_v3  ;;  %v18684_v15 = vld [vmem:[#allocation37_spill] sm:$0xff] }
 0x27a   :  { %v4384_v44 = vsel %vm2325_vm5, %v3944_v14, %v4383_v28  ;;  %v3624_v40 = vadd.f32 %v14940_v58, %v3462_v30  ;;  %v3952_v62 = vrot.slane %v3617_v11, %v13210_v26  ;;  %v3956_v27 = vrot.slane %v3618_v52, %v13210_v26  ;;  %12413 = vmatprep.subr.bf16.mxu1 %v14843_v57  ;;  %v18686_v11 = vld [vmem:[#allocation31_spill] sm:$0xff] }
 0x27b   :  { %v4385_v60 = vsel %vm2327_vm6, %v3948_v59, %v4384_v44  ;;  %v3960_v61 = vrot.slane %v3619_v19, %v13210_v26  ;;  %v3964_v14 = vrot.slane %v3620_v50, %v13210_v26  ;;  %v3968_v35 = vrot.slane %v3621_v39, %v13210_v26  ;;  %v18687_v19 = vld [vmem:[#allocation32_spill] sm:$0xff]  ;;  %v18688_v39 = vld [vmem:[#allocation33_spill] sm:$0xff] }
 0x27c   :  { %4495 = vst [vmem:[#allocation2 + $0x11] sm:$0xff] %v4385_v60  ;;  %11716 = vmatprep.mubr.f32.mxu1 %v4385_v60  ;;  %v3972_v46 = vrot.slane %v3622_v1, %v13210_v26  ;;  %v3976_v3 = vrot.slane %v3623_v38, %v13210_v26  ;;  %v3980_v59 = vrot.slane %v3624_v40, %v13210_v26  ;;  %v18689_v1 = vld [vmem:[#allocation34_spill] sm:$0xff] }
 0x27d   :  { %v4386_v32 = vsel %vm2315_vm0, %v3956_v27, %v3952_v62  ;;  %v3463_v51 = vmul.f32 %v14841_v42, %v18682_v6  ;;  %v3464_v5 = vmul.f32 %v14861_v29, %v18683_v2  ;;  %v3465_v36 = vmul.f32 %v14858_v10, %v18684_v15  ;;  %12415 = vmatpush3.bf16.msra.mxu1 %v14843_v57 }
 0x27e   :  { %v4387_v31 = vsel %vm2317_vm1, %v3960_v61, %v4386_v32  ;;  %v3466_v30 = vmul.f32 %v14881_v12, %v18685_v8  ;;  %v3467_v52 = vmul.f32 %v14854_v23, %v18686_v11  ;;  %v3468_v50 = vmul.f32 %v14884_v49, %v18687_v19  ;;  %12417 = vmatprep.subr.bf16.mxu1 %v14845_v54  ;;  %v18692_v19 = vld [vmem:[#allocation41_spill] sm:$0xff] }
 0x27f   :  { %v4388_v28 = vsel %vm2319_vm2, %v3964_v14, %v4387_v31  ;;  %v3469_v44 = vmul.f32 %v14878_v7, %v18688_v39  ;;  %v3470_v38 = vmul.f32 %v14896_v53, %v18689_v1  ;;  %v3625_v60 = vadd.f32 %v14893_v22, %v3463_v51 }
 0x280   :  { %v4389_v40 = vsel %vm2321_vm3, %v3968_v35, %v4388_v28  ;;  %v3626_v62 = vadd.f32 %v14912_v16, %v3464_v5  ;;  %v3627_v57 = vadd.f32 %v14909_v13, %v3465_v36  ;;  %v3628_v61 = vadd.f32 %v14928_v63, %v3466_v30  ;;  %v18690_v30 = vld [vmem:[#allocation40_spill] sm:$0xff] }
 0x281   :  { %v4390_v27 = vsel %vm2323_vm4, %v3972_v46, %v4389_v40  ;;  %v3629_v14 = vadd.f32 %v14905_v37, %v3467_v52  ;;  %v3630_v32 = vadd.f32 %v14931_v41, %v3468_v50  ;;  %v3631_v2 = vadd.f32 %v14925_v20, %v3469_v44  ;;  %12419 = vmatpush3.bf16.msra.mxu1 %v14845_v54  ;;  %v18691_v52 = vld [vmem:[#allocation42_spill] sm:$0xff]  ;;  %v18693_v44 = vld [vmem:[#allocation43_spill] sm:$0xff] }
 0x282   :  { %v4391_v6 = vsel %vm2325_vm5, %v3976_v3, %v4390_v27  ;;  %v3632_v35 = vadd.f32 %v14940_v58, %v3470_v38  ;;  %v3984_v51 = vrot.slane %v3625_v60, %v13210_v26  ;;  %v3988_v46 = vrot.slane %v3626_v62, %v13210_v26  ;;  %12421 = vmatprep.subr.bf16.mxu1 %v14847_v48 }
 0x283   :  { %v4392_v5 = vsel %vm2327_vm6, %v3980_v59, %v4391_v6  ;;  %v3992_v31 = vrot.slane %v3627_v57, %v13210_v26  ;;  %v3996_v15 = vrot.slane %v3628_v61, %v13210_v26  ;;  %v4000_v3 = vrot.slane %v3629_v14, %v13210_v26  ;;  %v18694_v57 = vld [vmem:[#allocation39_spill] sm:$0xff] }
 0x284   :  { %4496 = vst [vmem:[#allocation2 + $0x19] sm:$0xff] %v4392_v5  ;;  %11717 = vmatmul.mubr.f32.gmra.mrb[2].mxu1 %v4392_v5  ;;  %v4004_v36 = vrot.slane %v3630_v32, %v13210_v26  ;;  %v4008_v8 = vrot.slane %v3631_v2, %v13210_v26  ;;  %v4012_v54 = vrot.slane %v3632_v35, %v13210_v26 }
 0x285   :  { %v4393_v59 = vsel %vm2315_vm0, %v3988_v46, %v3984_v51  ;;  %v3471_v11 = vmul.f32 %v14841_v42, %v18690_v30  ;;  %v3472_v28 = vmul.f32 %v14861_v29, %v18691_v52  ;;  %v3473_v50 = vmul.f32 %v14858_v10, %v18692_v19  ;;  %12423 = vmatpush3.bf16.msra.mxu1 %v14847_v48 }
 0x286   :  { %v4394_v39 = vsel %vm2317_vm1, %v3992_v31, %v4393_v59  ;;  %v3474_v1 = vmul.f32 %v14881_v12, %v18693_v44  ;;  %v3475_v38 = vmul.f32 %v14854_v23, %v13707_v24  ;;  %v3476_v40 = vmul.f32 %v14884_v49, %v13718_v55  ;;  %12425 = vmatprep.subr.bf16.mxu1 %v14849_v21 }
 0x287   :  { %v4395_v60 = vsel %vm2319_vm2, %v3996_v15, %v4394_v39  ;;  %v3477_v62 = vmul.f32 %v14878_v7, %v13720_v45  ;;  %v3478_v27 = vmul.f32 %v14896_v53, %v18694_v57  ;;  %v3633_v61 = vadd.f32 %v14893_v22, %v3471_v11  ;;  %v18695_v11 = vld [vmem:[#allocation47_spill] sm:$0xff] }
 0x288   :  { %v4396_v14 = vsel %vm2321_vm3, %v4000_v3, %v4395_v60  ;;  %v3634_v24 = vadd.f32 %v14912_v16, %v3472_v28  ;;  %v3635_v55 = vadd.f32 %v14909_v13, %v3473_v50  ;;  %v3636_v48 = vadd.f32 %v14928_v63, %v3474_v1  ;;  %v18696_v28 = vld [vmem:[#allocation49_spill] sm:$0xff]  ;;  %v18697_v50 = vld [vmem:[#allocation48_spill] sm:$0xff]  ;;  %v18698_v1 = vld [vmem:[#allocation50_spill] sm:$0xff] }
 0x289   :  { %v4397_v32 = vsel %vm2323_vm4, %v4004_v36, %v4396_v14  ;;  %v3637_v6 = vadd.f32 %v14905_v37, %v3475_v38  ;;  %v3638_v45 = vadd.f32 %v14931_v41, %v3476_v40  ;;  %v3639_v2 = vadd.f32 %v14925_v20, %v3477_v62  ;;  %12427 = vmatpush3.bf16.msra.mxu1 %v14849_v21  ;;  %v18699_v40 = vld [vmem:[#allocation44_spill] sm:$0xff]  ;;  %v18700_v62 = vld [vmem:[#allocation45_spill] sm:$0xff]  ;;  %v18701_v14 = vld [vmem:[#allocation46_spill] sm:$0xff] }
 0x28a   :  { %v4398_v35 = vsel %vm2325_vm5, %v4008_v8, %v4397_v32  ;;  %v3640_v51 = vadd.f32 %v14940_v58, %v3478_v27  ;;  %v4016_v5 = vrot.slane %v3633_v61, %v13210_v26  ;;  %v4020_v46 = vrot.slane %v3634_v24, %v13210_v26  ;;  %12429 = vmatprep.subr.bf16.mxu1 %v14851_v33 }
 0x28b   :  { %v4399_v31 = vsel %vm2327_vm6, %v4012_v54, %v4398_v35  ;;  %v4024_v15 = vrot.slane %v3635_v55, %v13210_v26  ;;  %v4028_v3 = vrot.slane %v3636_v48, %v13210_v26  ;;  %v4032_v36 = vrot.slane %v3637_v6, %v13210_v26 }
 0x28c   :  { %4497 = vst [vmem:[#allocation2 + $0x21] sm:$0xff] %v4399_v31  ;;  %11719 = vmatprep.mubr.f32.mxu1 %v4399_v31  ;;  %v4036_v8 = vrot.slane %v3638_v45, %v13210_v26  ;;  %v4040_v59 = vrot.slane %v3639_v2, %v13210_v26  ;;  %v4044_v30 = vrot.slane %v3640_v51, %v13210_v26 }
 0x28d   :  { %v4400_v21 = vsel %vm2315_vm0, %v4020_v46, %v4016_v5  ;;  %v3479_v52 = vmul.f32 %v14841_v42, %v18695_v11  ;;  %v3480_v19 = vmul.f32 %v14861_v29, %v18696_v28  ;;  %v3481_v39 = vmul.f32 %v14858_v10, %v18697_v50  ;;  %12431 = vmatpush3.bf16.msra.mxu1 %v14851_v33  ;;  %v18703_v28 = vld [vmem:[#allocation56_spill] sm:$0xff] }
 0x28e   :  { %v4401_v54 = vsel %vm2317_vm1, %v4024_v15, %v4400_v21  ;;  %v3482_v38 = vmul.f32 %v14881_v12, %v18698_v1  ;;  %v3483_v60 = vmul.f32 %v14854_v23, %v18699_v40  ;;  %v3484_v57 = vmul.f32 %v14884_v49, %v18700_v62 }
 0x28f   :  { %v4402_v44 = vsel %vm2319_vm2, %v4028_v3, %v4401_v54  ;;  %v3485_v61 = vmul.f32 %v14878_v7, %v13839_v4  ;;  %v3486_v24 = vmul.f32 %v14896_v53, %v18701_v14  ;;  %v3641_v55 = vadd.f32 %v14893_v22, %v3479_v52  ;;  %v18702_v54 = vld [vmem:[#allocation55_spill] sm:$0xff]  ;;  %v18708_v14 = vld [vmem:[#allocation54_spill] sm:$0xff] }
 0x290   :  { %v4403_v27 = vsel %vm2321_vm3, %v4032_v36, %v4402_v44  ;;  %v3642_v32 = vadd.f32 %v14912_v16, %v3480_v19  ;;  %v3643_v6 = vadd.f32 %v14909_v13, %v3481_v39  ;;  %v3644_v45 = vadd.f32 %v14928_v63, %v3482_v38  ;;  %v18704_v39 = vld [vmem:[#allocation57_spill] sm:$0xff]  ;;  %v18705_v38 = vld [vmem:[#allocation51_spill] sm:$0xff] }
 0x291   :  { %v4404_v48 = vsel %vm2323_vm4, %v4036_v8, %v4403_v27  ;;  %v3645_v2 = vadd.f32 %v14905_v37, %v3483_v60  ;;  %v3646_v35 = vadd.f32 %v14931_v41, %v3484_v57  ;;  %v3647_v4 = vadd.f32 %v14925_v20, %v3485_v61  ;;  %v18706_v60 = vld [vmem:[#allocation52_spill] sm:$0xff]  ;;  %v18707_v57 = vld [vmem:[#allocation53_spill] sm:$0xff] }
 0x292   :  { %v4405_v33 = vsel %vm2325_vm5, %v4040_v59, %v4404_v48  ;;  %v3648_v5 = vadd.f32 %v14940_v58, %v3486_v24  ;;  %v4048_v46 = vrot.slane %v3641_v55, %v13210_v26  ;;  %v4052_v31 = vrot.slane %v3642_v32, %v13210_v26 }
 0x293   :  { %v4406_v51 = vsel %vm2327_vm6, %v4044_v30, %v4405_v33  ;;  %v4056_v15 = vrot.slane %v3643_v6, %v13210_v26  ;;  %v4060_v3 = vrot.slane %v3644_v45, %v13210_v26  ;;  %v4064_v36 = vrot.slane %v3645_v2, %v13210_v26 }
 0x294   :  { %4498 = vst [vmem:[#allocation2 + $0x29] sm:$0xff] %v4406_v51  ;;  %11720 = vmatmul.mubr.f32.gmra.mrb[4].mxu1 %v4406_v51  ;;  %v4068_v8 = vrot.slane %v3646_v35, %v13210_v26  ;;  %v4072_v59 = vrot.slane %v3647_v4, %v13210_v26  ;;  %v4076_v30 = vrot.slane %v3648_v5, %v13210_v26 }
 0x295   :  { %v4407_v21 = vsel %vm2315_vm0, %v4052_v31, %v4048_v46  ;;  %v3487_v11 = vmul.f32 %v14841_v42, %v18702_v54  ;;  %v3488_v19 = vmul.f32 %v14861_v29, %v18703_v28  ;;  %v3489_v50 = vmul.f32 %v14858_v10, %v13978_v47  ;;  %v18709_v54 = vld [vmem:[#allocation62_spill] sm:$0xff]  ;;  %v18710_v28 = vld [vmem:[#allocation63_spill] sm:$0xff] }
 0x296   :  { %v4408_v52 = vsel %vm2317_vm1, %v4056_v15, %v4407_v21  ;;  %v3490_v44 = vmul.f32 %v14881_v12, %v18704_v39  ;;  %v3491_v40 = vmul.f32 %v14854_v23, %v18705_v38  ;;  %v3492_v62 = vmul.f32 %v14884_v49, %v18706_v60 }
 0x297   :  { %v4409_v1 = vsel %vm2319_vm2, %v4060_v3, %v4408_v52  ;;  %v3493_v27 = vmul.f32 %v14878_v7, %v18707_v57  ;;  %v3494_v24 = vmul.f32 %v14896_v53, %v18708_v14  ;;  %v3649_v47 = vadd.f32 %v14893_v22, %v3487_v11  ;;  %v18715_v57 = vld [vmem:[#allocation61_spill] sm:$0xff] }
 0x298   :  { %v4410_v61 = vsel %vm2321_vm3, %v4064_v36, %v4409_v1  ;;  %v3650_v55 = vadd.f32 %v14912_v16, %v3488_v19  ;;  %v3651_v32 = vadd.f32 %v14909_v13, %v3489_v50  ;;  %v3652_v6 = vadd.f32 %v14928_v63, %v3490_v44  ;;  %v18711_v50 = vld [vmem:[#allocation64_spill] sm:$0xff]  ;;  %v18712_v44 = vld [vmem:[#allocation58_spill] sm:$0xff] }
 0x299   :  { %v4411_v48 = vsel %vm2323_vm4, %v4068_v8, %v4410_v61  ;;  %v3653_v45 = vadd.f32 %v14905_v37, %v3491_v40  ;;  %v3654_v2 = vadd.f32 %v14931_v41, %v3492_v62  ;;  %v3655_v35 = vadd.f32 %v14925_v20, %v3493_v27  ;;  %v18713_v40 = vld [vmem:[#allocation59_spill] sm:$0xff] }
 0x29a   :  { %v4412_v33 = vsel %vm2325_vm5, %v4072_v59, %v4411_v48  ;;  %v3656_v4 = vadd.f32 %v14940_v58, %v3494_v24  ;;  %v4080_v5 = vrot.slane %v3649_v47, %v13210_v26  ;;  %v4084_v46 = vrot.slane %v3650_v55, %v13210_v26 }
 0x29b   :  { %v4413_v51 = vsel %vm2327_vm6, %v4076_v30, %v4412_v33  ;;  %v4088_v31 = vrot.slane %v3651_v32, %v13210_v26  ;;  %v4092_v15 = vrot.slane %v3652_v6, %v13210_v26  ;;  %v4096_v3 = vrot.slane %v3653_v45, %v13210_v26 }
 0x29c   :  { %4499 = vst [vmem:[#allocation2 + $0x31] sm:$0xff] %v4413_v51  ;;  %11722 = vmatprep.mubr.f32.mxu1 %v4413_v51  ;;  %v4100_v36 = vrot.slane %v3654_v2, %v13210_v26  ;;  %v4104_v8 = vrot.slane %v3655_v35, %v13210_v26  ;;  %v4108_v59 = vrot.slane %v3656_v4, %v13210_v26 }
 0x29d   :  { %v4414_v30 = vsel %vm2315_vm0, %v4084_v46, %v4080_v5  ;;  %v3495_v21 = vmul.f32 %v14841_v42, %v14058_v9  ;;  %v3496_v11 = vmul.f32 %v14861_v29, %v18709_v54  ;;  %v3497_v19 = vmul.f32 %v14858_v10, %v18710_v28  ;;  %v18714_v9 = vld [vmem:[#allocation60_spill] sm:$0xff]  ;;  %v18717_v28 = vld [vmem:[#allocation65_spill] sm:$0xff] }
 0x29e   :  { %v4415_v52 = vsel %vm2317_vm1, %v4088_v31, %v4414_v30  ;;  %v3498_v39 = vmul.f32 %v14881_v12, %v18711_v50  ;;  %v3499_v1 = vmul.f32 %v14854_v23, %v18712_v44  ;;  %v3500_v60 = vmul.f32 %v14884_v49, %v18713_v40  ;;  %v18718_v50 = vld [vmem:[#allocation66_spill] sm:$0xff] }
 0x29f   :  { %v4416_v38 = vsel %vm2319_vm2, %v4092_v15, %v4415_v52  ;;  %v3501_v62 = vmul.f32 %v14878_v7, %v18714_v9  ;;  %v3502_v27 = vmul.f32 %v14896_v53, %v18715_v57  ;;  %v3657_v14 = vadd.f32 %v14893_v22, %v3495_v21 }
 0x2a0   :  { %v4417_v61 = vsel %vm2321_vm3, %v4096_v3, %v4416_v38  ;;  %v3658_v24 = vadd.f32 %v14912_v16, %v3496_v11  ;;  %v3659_v47 = vadd.f32 %v14909_v13, %v3497_v19  ;;  %v3660_v48 = vadd.f32 %v14928_v63, %v3498_v39  ;;  %v18716_v11 = vld [vmem:[#allocation69_spill] sm:$0xff] }
 0x2a1   :  { %v4418_v55 = vsel %vm2323_vm4, %v4100_v36, %v4417_v61  ;;  %v3661_v32 = vadd.f32 %v14905_v37, %v3499_v1  ;;  %v3662_v6 = vadd.f32 %v14931_v41, %v3500_v60  ;;  %v3663_v33 = vadd.f32 %v14925_v20, %v3501_v62 }
 0x2a2   :  { %v4419_v45 = vsel %vm2325_vm5, %v4104_v8, %v4418_v55  ;;  %v3664_v2 = vadd.f32 %v14940_v58, %v3502_v27  ;;  %v4112_v35 = vrot.slane %v3657_v14, %v13210_v26  ;;  %v4116_v51 = vrot.slane %v3658_v24, %v13210_v26 }
 0x2a3   :  { %v4420_v4 = vsel %vm2327_vm6, %v4108_v59, %v4419_v45  ;;  %v4120_v5 = vrot.slane %v3659_v47, %v13210_v26  ;;  %v4124_v46 = vrot.slane %v3660_v48, %v13210_v26  ;;  %v4128_v31 = vrot.slane %v3661_v32, %v13210_v26 }
 0x2a4   :  { %4500 = vst [vmem:[#allocation2 + $0x39] sm:$0xff] %v4420_v4  ;;  %11723 = vmatmul.mubr.f32.gmra.mrb[6].mxu1 %v4420_v4  ;;  %v4132_v15 = vrot.slane %v3662_v6, %v13210_v26  ;;  %v4136_v3 = vrot.slane %v3663_v33, %v13210_v26  ;;  %v4140_v36 = vrot.slane %v3664_v2, %v13210_v26 }
 0x2a5   :  { %v4421_v8 = vsel %vm2315_vm0, %v4116_v51, %v4112_v35  ;;  %v3503_v59 = vmul.f32 %v14841_v42, %v14144_v34  ;;  %v3504_v30 = vmul.f32 %v14861_v29, %v14147_v56  ;;  %v3505_v21 = vmul.f32 %v14858_v10, %v14149_v25  ;;  %v18719_v34 = vld [vmem:[#allocation67_spill] sm:$0xff]  ;;  %v18720_v56 = vld [vmem:[#allocation68_spill] sm:$0xff] }
 0x2a6   :  { %v4422_v54 = vsel %vm2317_vm1, %v4120_v5, %v4421_v8  ;;  %v3506_v52 = vmul.f32 %v14881_v12, %v18716_v11  ;;  %v3507_v19 = vmul.f32 %v14854_v23, %v18717_v28  ;;  %v3508_v39 = vmul.f32 %v14884_v49, %v18718_v50  ;;  %v18725_v11 = vld [vmem:[#allocation71_spill] sm:$0xff]  ;;  %v18727_v50 = vld [vmem:[#allocation74_spill] sm:$0xff] }
 0x2a7   :  { %v4423_v44 = vsel %vm2319_vm2, %v4124_v46, %v4422_v54  ;;  %v3509_v1 = vmul.f32 %v14878_v7, %v18719_v34  ;;  %v3510_v38 = vmul.f32 %v14896_v53, %v18720_v56  ;;  %v3665_v25 = vadd.f32 %v14893_v22, %v3503_v59  ;;  %v18723_v59 = vld [vmem:[#allocation76_spill] sm:$0xff] }
 0x2a8   :  { %v4424_v40 = vsel %vm2321_vm3, %v4128_v31, %v4423_v44  ;;  %v3666_v60 = vadd.f32 %v14912_v16, %v3504_v30  ;;  %v3667_v9 = vadd.f32 %v14909_v13, %v3505_v21  ;;  %v3668_v62 = vadd.f32 %v14928_v63, %v3506_v52  ;;  %v18721_v31 = vld [vmem:[#allocation75_spill] sm:$0xff]  ;;  %v18724_v21 = vld [vmem:[#allocation70_spill] sm:$0xff] }
 0x2a9   :  { %v4425_v57 = vsel %vm2323_vm4, %v4132_v15, %v4424_v40  ;;  %v3669_v27 = vadd.f32 %v14905_v37, %v3507_v19  ;;  %v3670_v61 = vadd.f32 %v14931_v41, %v3508_v39  ;;  %v3671_v14 = vadd.f32 %v14925_v20, %v3509_v1 }
 0x2aa   :  { %v4426_v24 = vsel %vm2325_vm5, %v4136_v3, %v4425_v57  ;;  %v3672_v47 = vadd.f32 %v14940_v58, %v3510_v38  ;;  %v4144_v55 = vrot.slane %v3665_v25, %v13210_v26  ;;  %v4148_v48 = vrot.slane %v3666_v60, %v13210_v26  ;;  %v18722_v3 = vld [vmem:[#allocation73_spill] sm:$0xff] }
 0x2ab   :  { %v4427_v32 = vsel %vm2327_vm6, %v4140_v36, %v4426_v24  ;;  %v4152_v6 = vrot.slane %v3667_v9, %v13210_v26  ;;  %v4156_v45 = vrot.slane %v3668_v62, %v13210_v26  ;;  %v4160_v33 = vrot.slane %v3669_v27, %v13210_v26 }
 0x2ac   :  { %4501 = vst [vmem:[#allocation2 + $0x49] sm:$0xff] %v4427_v32  ;;  %11725 = vmatprep.mubr.f32.mxu1 %v4427_v32  ;;  %v4164_v2 = vrot.slane %v3670_v61, %v13210_v26  ;;  %v4168_v35 = vrot.slane %v3671_v14, %v13210_v26  ;;  %v4172_v4 = vrot.slane %v3672_v47, %v13210_v26 }
 0x2ad   :  { %v4428_v51 = vsel %vm2315_vm0, %v4148_v48, %v4144_v55  ;;  %v3511_v46 = vmul.f32 %v14841_v42, %v14230_v0  ;;  %v3512_v15 = vmul.f32 %v14861_v29, %v18721_v31  ;;  %v3513_v36 = vmul.f32 %v14858_v10, %v18722_v3  ;;  %v18726_v0 = vld [vmem:[#allocation72_spill] sm:$0xff]  ;;  %v18730_v31 = vld [vmem:[#allocation77_spill] sm:$0xff]  ;;  %v18731_v3 = vld [vmem:[#allocation78_spill] sm:$0xff] }
 0x2ae   :  { %v4429_v5 = vsel %vm2317_vm1, %v4152_v6, %v4428_v51  ;;  %v3514_v30 = vmul.f32 %v14881_v12, %v18723_v59  ;;  %v3515_v54 = vmul.f32 %v14854_v23, %v18724_v21  ;;  %v3516_v52 = vmul.f32 %v14884_v49, %v18725_v11  ;;  %v18729_v51 = vld [vmem:[#allocation81_spill] sm:$0xff] }
 0x2af   :  { %v4430_v8 = vsel %vm2319_vm2, %v4156_v45, %v4429_v5  ;;  %v3517_v19 = vmul.f32 %v14878_v7, %v18726_v0  ;;  %v3518_v39 = vmul.f32 %v14896_v53, %v18727_v50  ;;  %v3673_v44 = vadd.f32 %v14893_v22, %v3511_v46 }
 0x2b0   :  { %v4431_v28 = vsel %vm2321_vm3, %v4160_v33, %v4430_v8  ;;  %v3674_v1 = vadd.f32 %v14912_v16, %v3512_v15  ;;  %v3675_v56 = vadd.f32 %v14909_v13, %v3513_v36  ;;  %v3676_v38 = vadd.f32 %v14928_v63, %v3514_v30 }
 0x2b1   :  { %v4432_v34 = vsel %vm2323_vm4, %v4164_v2, %v4431_v28  ;;  %v3677_v40 = vadd.f32 %v14905_v37, %v3515_v54  ;;  %v3678_v60 = vadd.f32 %v14931_v41, %v3516_v52  ;;  %v3679_v9 = vadd.f32 %v14925_v20, %v3517_v19  ;;  %v18728_v2 = vld [vmem:[#allocation80_spill] sm:$0xff] }
 0x2b2   :  { %v4433_v25 = vsel %vm2325_vm5, %v4168_v35, %v4432_v34  ;;  %v3680_v57 = vadd.f32 %v14940_v58, %v3518_v39  ;;  %v4176_v27 = vrot.slane %v3673_v44, %v13210_v26  ;;  %v4180_v61 = vrot.slane %v3674_v1, %v13210_v26 }
 0x2b3   :  { %v4434_v62 = vsel %vm2327_vm6, %v4172_v4, %v4433_v25  ;;  %v4184_v14 = vrot.slane %v3675_v56, %v13210_v26  ;;  %v4188_v24 = vrot.slane %v3676_v38, %v13210_v26  ;;  %v4192_v47 = vrot.slane %v3677_v40, %v13210_v26 }
 0x2b4   :  { %4502 = vst [vmem:[#allocation2 + $0x51] sm:$0xff] %v4434_v62  ;;  %11726 = vmatmul.mubr.f32.gmra.mrb[8].mxu1 %v4434_v62  ;;  %v4196_v55 = vrot.slane %v3678_v60, %v13210_v26  ;;  %v4200_v48 = vrot.slane %v3679_v9, %v13210_v26  ;;  %v4204_v32 = vrot.slane %v3680_v57, %v13210_v26  ;;  %v18733_v62 = vld [vmem:[#allocation85_spill] sm:$0xff] }
 0x2b5   :  { %v4435_v6 = vsel %vm2315_vm0, %v4180_v61, %v4176_v27  ;;  %v3519_v45 = vmul.f32 %v14841_v42, %v14320_v18  ;;  %v3520_v35 = vmul.f32 %v14861_v29, %v18728_v2  ;;  %v3521_v4 = vmul.f32 %v14858_v10, %v14324_v17  ;;  %v18732_v18 = vld [vmem:[#allocation79_spill] sm:$0xff] }
 0x2b6   :  { %v4436_v33 = vsel %vm2317_vm1, %v4184_v14, %v4435_v6  ;;  %v3522_v5 = vmul.f32 %v14881_v12, %v18729_v51  ;;  %v3523_v15 = vmul.f32 %v14854_v23, %v18730_v31  ;;  %v3524_v36 = vmul.f32 %v14884_v49, %v18731_v3  ;;  %v18734_v27 = vld [vmem:[#allocation87_spill] sm:$0xff]  ;;  %v18740_v51 = vld [vmem:[#allocation86_spill] sm:$0xff] }
 0x2b7   :  { %v4437_v46 = vsel %vm2319_vm2, %v4188_v24, %v4436_v33  ;;  %v3525_v8 = vmul.f32 %v14878_v7, %v18732_v18  ;;  %v3526_v30 = vmul.f32 %v14896_v53, %v14310_v43  ;;  %v3681_v17 = vadd.f32 %v14893_v22, %v3519_v45  ;;  %v18735_v24 = vld [vmem:[#allocation88_spill] sm:$0xff]  ;;  %v18738_v33 = vld [vmem:[#allocation83_spill] sm:$0xff] }
 0x2b8   :  { %v4438_v59 = vsel %vm2321_vm3, %v4192_v47, %v4437_v46  ;;  %v3682_v21 = vadd.f32 %v14912_v16, %v3520_v35  ;;  %v3683_v11 = vadd.f32 %v14909_v13, %v3521_v4  ;;  %v3684_v52 = vadd.f32 %v14928_v63, %v3522_v5  ;;  %v18739_v35 = vld [vmem:[#allocation84_spill] sm:$0xff] }
 0x2b9   :  { %v4439_v54 = vsel %vm2323_vm4, %v4196_v55, %v4438_v59  ;;  %v3685_v28 = vadd.f32 %v14905_v37, %v3523_v15  ;;  %v3686_v19 = vadd.f32 %v14931_v41, %v3524_v36  ;;  %v3687_v50 = vadd.f32 %v14925_v20, %v3525_v8  ;;  %v18736_v55 = vld [vmem:[#allocation89_spill] sm:$0xff] }
 0x2ba   :  { %v4440_v0 = vsel %vm2325_vm5, %v4200_v48, %v4439_v54  ;;  %v3688_v43 = vadd.f32 %v14940_v58, %v3526_v30  ;;  %v4208_v44 = vrot.slane %v3681_v17, %v13210_v26  ;;  %v4212_v34 = vrot.slane %v3682_v21, %v13210_v26 }
 0x2bb   :  { %v4441_v39 = vsel %vm2327_vm6, %v4204_v32, %v4440_v0  ;;  %v4216_v1 = vrot.slane %v3683_v11, %v13210_v26  ;;  %v4220_v56 = vrot.slane %v3684_v52, %v13210_v26  ;;  %v4224_v38 = vrot.slane %v3685_v28, %v13210_v26  ;;  %v18737_v32 = vld [vmem:[#allocation82_spill] sm:$0xff] }
 0x2bc   :  { %4503 = vst [vmem:[#allocation2 + $0x59] sm:$0xff] %v4441_v39  ;;  %11728 = vmatprep.mubr.f32.mxu1 %v4441_v39  ;;  %v4228_v25 = vrot.slane %v3686_v19, %v13210_v26  ;;  %v4232_v40 = vrot.slane %v3687_v50, %v13210_v26  ;;  %v4236_v60 = vrot.slane %v3688_v43, %v13210_v26 }
 0x2bd   :  { %v4442_v9 = vsel %vm2315_vm0, %v4212_v34, %v4208_v44  ;;  %v3527_v57 = vmul.f32 %v14841_v42, %v18733_v62  ;;  %v3528_v61 = vmul.f32 %v14861_v29, %v18734_v27  ;;  %v3529_v47 = vmul.f32 %v14858_v10, %v18735_v24  ;;  %v18741_v34 = vld [vmem:[#allocation94_spill] sm:$0xff] }
 0x2be   :  { %v4443_v14 = vsel %vm2317_vm1, %v4216_v1, %v4442_v9  ;;  %v3530_v48 = vmul.f32 %v14881_v12, %v18736_v55  ;;  %v3531_v6 = vmul.f32 %v14854_v23, %v18737_v32  ;;  %v3532_v2 = vmul.f32 %v14884_v49, %v18738_v33  ;;  %v18744_v9 = vld [vmem:[#allocation97_spill] sm:$0xff] }
 0x2bf   :  { %v4444_v45 = vsel %vm2319_vm2, %v4220_v56, %v4443_v14  ;;  %v3533_v4 = vmul.f32 %v14878_v7, %v18739_v35  ;;  %v3534_v5 = vmul.f32 %v14896_v53, %v18740_v51  ;;  %v3689_v31 = vadd.f32 %v14893_v22, %v3527_v57  ;;  %v18742_v56 = vld [vmem:[#allocation95_spill] sm:$0xff]  ;;  %v18745_v57 = vld [vmem:[#allocation90_spill] sm:$0xff] }
 0x2c0   :  { %v4445_v46 = vsel %vm2321_vm3, %v4224_v38, %v4444_v45  ;;  %v3690_v15 = vadd.f32 %v14912_v16, %v3528_v61  ;;  %v3691_v3 = vadd.f32 %v14909_v13, %v3529_v47  ;;  %v3692_v18 = vadd.f32 %v14928_v63, %v3530_v48  ;;  %v18746_v61 = vld [vmem:[#allocation91_spill] sm:$0xff]  ;;  %v18747_v47 = vld [vmem:[#allocation92_spill] sm:$0xff]  ;;  %v18748_v48 = vld [vmem:[#allocation93_spill] sm:$0xff] }
 0x2c1   :  { %v4446_v36 = vsel %vm2323_vm4, %v4228_v25, %v4445_v46  ;;  %v3693_v8 = vadd.f32 %v14905_v37, %v3531_v6  ;;  %v3694_v59 = vadd.f32 %v14931_v41, %v3532_v2  ;;  %v3695_v17 = vadd.f32 %v14925_v20, %v3533_v4  ;;  %v18743_v25 = vld [vmem:[#allocation96_spill] sm:$0xff] }
 0x2c2   :  { %v4447_v30 = vsel %vm2325_vm5, %v4232_v40, %v4446_v36  ;;  %v3696_v21 = vadd.f32 %v14940_v58, %v3534_v5  ;;  %v4240_v54 = vrot.slane %v3689_v31, %v13210_v26  ;;  %v4244_v52 = vrot.slane %v3690_v15, %v13210_v26 }
 0x2c3   :  { %v4448_v11 = vsel %vm2327_vm6, %v4236_v60, %v4447_v30  ;;  %v4248_v28 = vrot.slane %v3691_v3, %v13210_v26  ;;  %v4252_v0 = vrot.slane %v3692_v18, %v13210_v26  ;;  %v4256_v19 = vrot.slane %v3693_v8, %v13210_v26 }
 0x2c4   :  { %4504 = vst [vmem:[#allocation2 + $0x61] sm:$0xff] %v4448_v11  ;;  %11729 = vmatmul.mubr.f32.gmra.mrb[10].mxu1 %v4448_v11  ;;  %v4260_v50 = vrot.slane %v3694_v59, %v13210_v26  ;;  %v4264_v43 = vrot.slane %v3695_v17, %v13210_v26  ;;  %v4268_v39 = vrot.slane %v3696_v21, %v13210_v26 }
 0x2c5   :  { %v4449_v44 = vsel %vm2315_vm0, %v4244_v52, %v4240_v54  ;;  %v3535_v1 = vmul.f32 %v14841_v42, %v18741_v34  ;;  %v3536_v38 = vmul.f32 %v14861_v29, %v18742_v56  ;;  %v3537_v40 = vmul.f32 %v14858_v10, %v18743_v25  ;;  %v18752_v34 = vld [vmem:[#allocation105_spill] sm:$0xff] }
 0x2c6   :  { %v4450_v60 = vsel %vm2317_vm1, %v4248_v28, %v4449_v44  ;;  %v3538_v62 = vmul.f32 %v14881_v12, %v18744_v9  ;;  %v3539_v27 = vmul.f32 %v14854_v23, %v18745_v57  ;;  %v3540_v14 = vmul.f32 %v14884_v49, %v18746_v61  ;;  %v18749_v28 = vld [vmem:[#allocation101_spill] sm:$0xff]  ;;  %v18755_v57 = vld [vmem:[#allocation100_spill] sm:$0xff]  ;;  %v18756_v61 = vld [vmem:[#allocation103_spill] sm:$0xff] }
 0x2c7   :  { %v4451_v24 = vsel %vm2319_vm2, %v4252_v0, %v4450_v60  ;;  %v3541_v55 = vmul.f32 %v14878_v7, %v18747_v47  ;;  %v3542_v32 = vmul.f32 %v14896_v53, %v18748_v48  ;;  %v3697_v6 = vadd.f32 %v14893_v22, %v3535_v1 }
 0x2c8   :  { %v4452_v45 = vsel %vm2321_vm3, %v4256_v19, %v4451_v24  ;;  %v3698_v33 = vadd.f32 %v14912_v16, %v3536_v38  ;;  %v3699_v2 = vadd.f32 %v14909_v13, %v3537_v40  ;;  %v3700_v35 = vadd.f32 %v14928_v63, %v3538_v62  ;;  %v18753_v38 = vld [vmem:[#allocation98_spill] sm:$0xff]  ;;  %v18754_v40 = vld [vmem:[#allocation99_spill] sm:$0xff] }
 0x2c9   :  { %v4453_v4 = vsel %vm2323_vm4, %v4260_v50, %v4452_v45  ;;  %v3701_v51 = vadd.f32 %v14905_v37, %v3539_v27  ;;  %v3702_v5 = vadd.f32 %v14931_v41, %v3540_v14  ;;  %v3703_v46 = vadd.f32 %v14925_v20, %v3541_v55  ;;  %v18750_v50 = vld [vmem:[#allocation104_spill] sm:$0xff] }
 0x2ca   :  { %v4454_v31 = vsel %vm2325_vm5, %v4264_v43, %v4453_v4  ;;  %v3704_v15 = vadd.f32 %v14940_v58, %v3542_v32  ;;  %v4272_v3 = vrot.slane %v3697_v6, %v13210_v26  ;;  %v4276_v36 = vrot.slane %v3698_v33, %v13210_v26  ;;  %v4513_v6 = vld [vmem:[#allocation2 + $0x20] sm:$0xff] }
 0x2cb   :  { %v4455_v18 = vsel %vm2327_vm6, %v4268_v39, %v4454_v31  ;;  %v4280_v8 = vrot.slane %v3699_v2, %v13210_v26  ;;  %v4284_v59 = vrot.slane %v3700_v35, %v13210_v26  ;;  %v4288_v30 = vrot.slane %v3701_v51, %v13210_v26  ;;  %v18751_v39 = vld [vmem:[#allocation102_spill] sm:$0xff]  ;;  %v15552_v4 = vld [vmem:[#allocation2 + $0x1a] sm:$0xff] }
 0x2cc   :  { %4505 = vst [vmem:[#allocation2 + $0x69] sm:$0xff] %v4455_v18  ;;  %11731 = vmatprep.mubr.f32.mxu1 %v4455_v18  ;;  %v4292_v17 = vrot.slane %v3702_v5, %v13210_v26  ;;  %v4456_v21 = vsel %vm2315_vm0, %v4276_v36, %v4272_v3  ;;  %v4296_v54 = vrot.slane %v3703_v46, %v13210_v26 }
 0x2cd   :  { %v4300_v11 = vrot.slane %v3704_v15, %v13210_v26  ;;  %v4457_v52 = vsel %vm2317_vm1, %v4280_v8, %v4456_v21  ;;  %v3543_v0 = vmul.f32 %v14841_v42, %v18749_v28  ;;  %v3544_v43 = vmul.f32 %v14861_v29, %v18750_v50  ;;  %v4556_v8 = vld [vmem:[#allocation2 + $0x81] sm:$0xff]  ;;  %v4512_v50 = vld [vmem:[#allocation2 + $0x18] sm:$0xff] }
 0x2ce   :  { %v4458_v19 = vsel %vm2319_vm2, %v4284_v59, %v4457_v52  ;;  %v3545_v44 = vmul.f32 %v14858_v10, %v18751_v39  ;;  %v3546_v1 = vmul.f32 %v14881_v12, %v18752_v34  ;;  %v3547_v25 = vmul.f32 %v14854_v23, %v18753_v38  ;;  %v10937_v59 = vld [vmem:[%s18382_s3 + $0x110] sm:$0xff]  ;;  %v10939_v52 = vld [vmem:[%s18382_s3 + $0x120] sm:$0xff]  ;;  %v10940_v28 = vld [vmem:[%s18382_s3 + $0x128] sm:$0xff] }
 0x2cf   :  { %v4459_v56 = vsel %vm2321_vm3, %v4288_v30, %v4458_v19  ;;  %v3548_v60 = vmul.f32 %v14884_v49, %v18754_v40  ;;  %v3705_v42 = vadd.f32 %v14893_v22, %v3543_v0  ;;  %v3706_v29 = vadd.f32 %v14912_v16, %v3544_v43  ;;  %v4539_v22 = vld [vmem:[%s18382_s3 + $0x70] sm:$0xff]  ;;  %v10938_v30 = vld [vmem:[%s18382_s3 + $0x118] sm:$0xff]  ;;  %v4514_v34 = vld [vmem:[#allocation2 + $0x28] sm:$0xff] }
 0x2d0   :  { %v4460_v9 = vsel %vm2323_vm4, %v4292_v17, %v4459_v56  ;;  %v3707_v62 = vadd.f32 %v14909_v13, %v3545_v44  ;;  %v3708_v10 = vadd.f32 %v14928_v63, %v3546_v1  ;;  %v3549_v27 = vmul.f32 %v14878_v7, %v18755_v57  ;;  %v4540_v13 = vld [vmem:[%s18382_s3 + $0x78] sm:$0xff]  ;;  %v4511_v0 = vld [vmem:[#allocation2 + $0x10] sm:$0xff]  ;;  %v10943_v1 = vld [vmem:[%s18382_s3 + $0x140] sm:$0xff] }
 0x2d1   :  { %v4461_v12 = vsel %vm2325_vm5, %v4296_v54, %v4460_v9  ;;  %v3550_v23 = vmul.f32 %v14896_v53, %v18756_v61  ;;  %v3709_v49 = vadd.f32 %v14905_v37, %v3547_v25  ;;  %v3710_v63 = vadd.f32 %v14931_v41, %v3548_v60  ;;  %v10935_v53 = vld [vmem:[%s18382_s3 + $0x100] sm:$0xff]  ;;  %v10936_v37 = vld [vmem:[%s18382_s3 + $0x108] sm:$0xff]  ;;  %v10941_v43 = vld [vmem:[%s18382_s3 + $0x130] sm:$0xff] }
 0x2d2   :  { %v4462_v16 = vsel %vm2327_vm6, %v4300_v11, %v4461_v12  ;;  %v4304_v14 = vrot.slane %v3705_v42, %v13210_v26  ;;  %v4308_v7 = vrot.slane %v3706_v29, %v13210_v26  ;;  %v3711_v24 = vadd.f32 %v14925_v20, %v3549_v27  ;;  %v4510_v11 = vld [vmem:[#allocation2 + $0x8] sm:$0xff]  ;;  %v10942_v39 = vld [vmem:[%s18382_s3 + $0x138] sm:$0xff]  ;;  %v4515_v38 = vld [vmem:[#allocation2 + $0x30] sm:$0xff] }
 0x2d3   :  { %4506 = vst [vmem:[#allocation2 + $0x71] sm:$0xff] %v4462_v16  ;;  %11732 = vmatmul.mubr.f32.gmra.mrb[12].mxu1 %v4462_v16  ;;  %v4312_v47 = vrot.slane %v3707_v62, %v13210_v26  ;;  %v4316_v41 = vrot.slane %v3708_v10, %v13210_v26  ;;  %v3712_v55 = vadd.f32 %v14940_v58, %v3550_v23  ;;  %v15550_v35 = vld [vmem:[#allocation2 + $0x68] sm:$0xff]  ;;  %v18496_v58 = vmov 0.0   ;;  %v4516_v40 = vld [vmem:[#allocation2 + $0x38] sm:$0xff]  ;;  %v10945_v60 = vld [vmem:[%s18382_s3 + $0x150] sm:$0xff] }
 0x2d4   :  { %v4463_v48 = vsel %vm2315_vm0, %v4308_v7, %v4304_v14  ;;  %v12432_v32 = vpack.c.bf16 %v4540_v13, %v4539_v22  ;;  %v4320_v45 = vrot.slane %v3709_v49, %v13210_v26  ;;  %v12436_v2 = vpack.c.bf16 %v10936_v37, %v10935_v53  ;;  %v15554_v20 = vld [vmem:[#allocation2 + $0x62] sm:$0xff]  ;;  %3721 = vst [vmem:[#allocation2] sm:$0x1] %v18496_v58  ;;  %v10946_v42 = vld [vmem:[%s18382_s3 + $0x158] sm:$0xff]  ;;  %v4518_v29 = vld [vmem:[#allocation2 + $0x50] sm:$0xff] }
 0x2d5   :  { %v4464_v33 = vsel %vm2317_vm1, %v4312_v47, %v4463_v48  ;;  %v4324_v51 = vrot.slane %v3710_v63, %v13210_v26  ;;  %3722 = vst [vmem:[#allocation2 + $0x48] sm:$0x1] %v18496_v58  ;;  %3723 = vst [vmem:[#allocation2 + $0x41] sm:$0x1] %v18496_v58  ;;  %v4328_v46 = vrot.slane %v3711_v24, %v13210_v26  ;;  %v10944_v56 = vld [vmem:[%s18382_s3 + $0x148] sm:$0xff]  ;;  %v10947_v62 = vld [vmem:[%s18382_s3 + $0x160] sm:$0xff] }
 0x2d6   :  { %v4465_v5 = vsel %vm2319_vm2, %v4316_v41, %v4464_v33  ;;  %12433 = vmatprep.subr.bf16.mxu1 %v12432_v32  ;;  %3724 = vst [vmem:[#allocation2 + $0x89] sm:$0x1] %v18496_v58  ;;  %6818 = vst [vmem:[#allocation2 + $0x21] sm:$0x1] %v18496_v58  ;;  %v4332_v15 = vrot.slane %v3712_v55, %v13210_v26  ;;  %v12440_v54 = vpack.c.bf16 %v10938_v30, %v10937_v59  ;;  %v10948_v10 = vld [vmem:[%s18382_s3 + $0x168] sm:$0xff]  ;;  %v4519_v12 = vld [vmem:[#allocation2 + $0x58] sm:$0xff] }
 0x2d7   :  { %6819 = vst [vmem:[#allocation2 + $0x69] sm:$0x1] %v18496_v58  ;;  %v4466_v31 = vsel %vm2321_vm3, %v4320_v45, %v4465_v5  ;;  %12435 = vmatpush3.bf16.msra.mxu1 %v12432_v32  ;;  %v12444_v19 = vpack.c.bf16 %v10940_v28, %v10939_v52  ;;  %v12448_v44 = vpack.c.bf16 %v10942_v39, %v10941_v43  ;;  %v4520_v27 = vld [vmem:[#allocation2 + $0x60] sm:$0xff]  ;;  %v10949_v61 = vld [vmem:[%s18382_s3 + $0x170] sm:$0xff]  ;;  %v10950_v23 = vld [vmem:[%s18382_s3 + $0x178] sm:$0xff] }
 0x2d8   :  { %v4467_v3 = vsel %vm2323_vm4, %v4324_v51, %v4466_v31  ;;  %12437 = vmatprep.subr.bf16.mxu1 %v12436_v2  ;;  %v12452_v25 = vpack.c.bf16 %v10944_v56, %v10943_v1  ;;  %v12456_v9 = vpack.c.bf16 %v10946_v42, %v10945_v60  ;;  %v12460_v57 = vpack.c.bf16 %v10948_v10, %v10947_v62  ;;  %v4864_v63 = vld [vmem:[#allocation2 + $0x2] sm:$0xff]  ;;  %v4865_v14 = vld [vmem:[#allocation2 + $0xa] sm:$0xff]  ;;  %v4866_v7 = vld [vmem:[#allocation2 + $0x12] sm:$0xff] }
 0x2d9   :  { %v4468_v36 = vsel %vm2325_vm5, %v4328_v46, %v4467_v3  ;;  %v12464_v49 = vpack.c.bf16 %v10950_v23, %v10949_v61  ;;  %v4868_v53 = vld [vmem:[#allocation2 + $0x22] sm:$0xff]  ;;  %v4869_v37 = vld [vmem:[#allocation2 + $0x2a] sm:$0xff]  ;;  %v4870_v24 = vld [vmem:[#allocation2 + $0x32] sm:$0xff] }
 0x2da   :  { %v4469_v18 = vsel %vm2327_vm6, %v4332_v15, %v4468_v36  ;;  %v4522_v22 = vld [vmem:[#allocation2 + $0x70] sm:$0xff]  ;;  %v4874_v48 = vld [vmem:[#allocation2 + $0x5a] sm:$0xff] }
 0x2db   :  { %4507 = vst [vmem:[#allocation2 + $0x79] sm:$0xff] %v4469_v18  ;;  %11734 = vmatprep.mubr.f32.mxu1 %v4469_v18  ;;  %v4509_v17 = vld [vmem:[#allocation2] sm:$0xff]  ;;  %v4872_v41 = vld [vmem:[#allocation2 + $0x4a] sm:$0xff]  ;;  %v4873_v55 = vld [vmem:[#allocation2 + $0x52] sm:$0xff] }
 0x2dc   :  { %11735 = vmatmul.mubr.f32.gmra.mrb[14].mxu1 %v4556_v8  ;;  %v4517_v21 = vld [vmem:[#allocation2 + $0x48] sm:$0xff]  ;;  %6816 = vst [vmem:[#allocation2] sm:$0x1] %v18496_v58  ;;  %v4871_v47 = vld [vmem:[#allocation2 + $0x3a] sm:$0xff]  ;;  %v18757_v46 = vld [vmem:[#allocation6_spill] sm:$0xff] }
 0x2dd   :  { %11769 = vmatprep.mubr.f32.mxu1 %v4509_v17  ;;  %6817 = vst [vmem:[#allocation2 + $0x48] sm:$0x1] %v18496_v58  ;;  %v4876_v32 = vld [vmem:[#allocation2 + $0x6a] sm:$0xff]  ;;  %v4879_v33 = vld [vmem:[#allocation2 + $0x82] sm:$0xff] }
 0x2e0   :  { %11770 = vmatmul.mubr.f32.vlgmr.msra.gmra.mrb[0].mxu1 %v4510_v11 }
 0x2e1   :  { %12439 = vmatpush3.bf16.msra.mxu1 %v12436_v2  ;;  %11772 = vmatprep.mubr.f32.mxu1 %v4511_v0  ;;  %v15620_v2 = vld [vmem:[%s18383_s4] ss:$0 sm:$0xff] }
 0x2e2   :  { %12441 = vmatprep.subr.bf16.mxu1 %v12440_v54  ;;  %v4523_v13 = vld [vmem:[#allocation2 + $0x78] sm:$0xff]  ;;  %v4524_v16 = vld [vmem:[#allocation2 + $0x80] sm:$0xff] }
 0x2e3   :  { %v4878_v45 = vld [vmem:[#allocation2 + $0x7a] sm:$0xff] }
 0x2e4   :  { %11773 = vmatmul.mubr.f32.gmra.mrb[2].mxu1 %v4512_v50 }
 0x2e5   :  { %12443 = vmatpush3.bf16.msra.mxu1 %v12440_v54  ;;  %11775 = vmatprep.mubr.f32.mxu1 %v4513_v6  ;;  %v4877_v6 = vld [vmem:[#allocation2 + $0x72] sm:$0xff] }
 0x2e6   :  { %12445 = vmatprep.subr.bf16.mxu1 %v12444_v19 }
 0x2e8   :  { %11776 = vmatmul.mubr.f32.gmra.mrb[4].mxu1 %v4514_v34 }
 0x2e9   :  { %12447 = vmatpush3.bf16.msra.mxu1 %v12444_v19  ;;  %11778 = vmatprep.mubr.f32.mxu1 %v4515_v38 }
 0x2ea   :  { %12449 = vmatprep.subr.bf16.mxu1 %v12448_v44 }
 0x2ec   :  { %11779 = vmatmul.mubr.f32.gmra.mrb[6].mxu1 %v4516_v40 }
 0x2ed   :  { %12451 = vmatpush3.bf16.msra.mxu1 %v12448_v44  ;;  %11781 = vmatprep.mubr.f32.mxu1 %v4517_v21 }
 0x2ee   :  { %12453 = vmatprep.subr.bf16.mxu1 %v12452_v25 }
 0x2f0   :  { %11782 = vmatmul.mubr.f32.gmra.mrb[8].mxu1 %v4518_v29 }
 0x2f1   :  { %12455 = vmatpush3.bf16.msra.mxu1 %v12452_v25  ;;  %11784 = vmatprep.mubr.f32.mxu1 %v4519_v12 }
 0x2f2   :  { %12457 = vmatprep.subr.bf16.mxu1 %v12456_v9 }
 0x2f4   :  { %11785 = vmatmul.mubr.f32.gmra.mrb[10].mxu1 %v4520_v27 }
 0x2f5   :  { %12459 = vmatpush3.bf16.msra.mxu1 %v12456_v9  ;;  %11787 = vmatprep.mubr.f32.mxu1 %v15550_v35 }
 0x2f6   :  { %12461 = vmatprep.subr.bf16.mxu1 %v12460_v57 }
 0x2f8   :  { %11788 = vmatmul.mubr.f32.gmra.mrb[12].mxu1 %v4522_v22 }
 0x2f9   :  { %12463 = vmatpush3.bf16.msra.mxu1 %v12460_v57  ;;  %11790 = vmatprep.mubr.f32.mxu1 %v4523_v13 }
 0x2fa   :  { %12465 = vmatprep.subr.bf16.mxu1 %v12464_v49 }
 0x2fc   :  { %11791 = vmatmul.mubr.f32.gmra.mrb[14].mxu1 %v4524_v16 }
 0x2fd   :  { %12467 = vmatpush3.bf16.msra.mxu1 %v12464_v49  ;;  %11825 = vmatprep.mubr.f32.mxu1 %v4864_v63 }
 0x300   :  { %11826 = vmatmul.mubr.f32.vlgmr.msra.gmra.mrb[0].mxu1 %v4865_v14 }
 0x301   :  { %11828 = vmatprep.mubr.f32.mxu1 %v4866_v7 }
 0x304   :  { %11829 = vmatmul.mubr.f32.gmra.mrb[2].mxu1 %v15552_v4 }
 0x305   :  { %11831 = vmatprep.mubr.f32.mxu1 %v4868_v53 }
 0x308   :  { %11832 = vmatmul.mubr.f32.gmra.mrb[4].mxu1 %v4869_v37 }
 0x309   :  { %11834 = vmatprep.mubr.f32.mxu1 %v4870_v24 }
 0x30c   :  { %11835 = vmatmul.mubr.f32.gmra.mrb[6].mxu1 %v4871_v47 }
 0x30d   :  { %11837 = vmatprep.mubr.f32.mxu1 %v4872_v41 }
 0x310   :  { %11838 = vmatmul.mubr.f32.gmra.mrb[8].mxu1 %v4873_v55 }
 0x311   :  { %11840 = vmatprep.mubr.f32.mxu1 %v4874_v48 }
 0x314   :  { %11841 = vmatmul.mubr.f32.gmra.mrb[10].mxu1 %v15554_v20 }
 0x315   :  { %11843 = vmatprep.mubr.f32.mxu1 %v4876_v32 }
 0x318   :  { %11844 = vmatmul.mubr.f32.gmra.mrb[12].mxu1 %v4877_v6 }
 0x319   :  { %11846 = vmatprep.mubr.f32.mxu1 %v4878_v45 }
 0x31c   :  { %11847 = vmatmul.mubr.f32.gmra.mrb[14].mxu1 %v4879_v33 }
 0x3d3   :  { %v11827_v35 = vpop.f32.mrb[0].mxu1 }
 0x3d4   :  { %v5064_v4 = vadd.f32 %v11827_v35, %v15620_v2  ;;  %v4963_v51 = vpop.f32.mrb[1].mxu1 }
 0x3d5   :  { %v5063_v5 = vadd.f32 %v15620_v2, %v4963_v51 }
 0x3d6   :  { %v5114_v20 = vcombine.high %v5064_v4, %v5064_v4  ;;  %v5121_v31 = vrot.slane %v5064_v4, %v18757_v46 }
 0x3d7   :  { %v5097_v15 = vcombine.high %v5063_v5, %v5063_v5  ;;  %v5104_v3 = vrot.slane %v5063_v5, %v18757_v46  ;;  %v11830_v36 = vpop.f32.mrb[2].mxu1 }
 0x3d8   :  { %v5128_v18 = vrot.slane %v5114_v20, %v18757_v46  ;;  %v4973_v8 = vpop.f32.mrb[3].mxu1  ;;  %v5129_v21 = vcombine.high %v5121_v31, %v5121_v31  ;;  %v10956_v43 = vrot.slane %v5121_v31, 9  ;;  %v5066_v12 = vadd.f32 %v11830_v36, %v15620_v2 }
 0x3d9   :  { %v5111_v59 = vrot.slane %v5097_v15, %v18757_v46  ;;  %v5112_v30 = vcombine.high %v5104_v3, %v5104_v3  ;;  %v10952_v17 = vrot.slane %v5104_v3, 9  ;;  %v5065_v61 = vadd.f32 %v15620_v2, %v4973_v8 }
 0x3da   :  { %v5130_v19 = vcombine.high %v5128_v18, %v5128_v18  ;;  %v10957_v1 = vrot.slane %v5129_v21, 9  ;;  %v10958_v38 = vrot.slane %v5128_v18, 9  ;;  %v5629_v62 = vmax.f32 %v5121_v31, %v10956_v43 }
 0x3db   :  { %v5113_v54 = vcombine.high %v5111_v59, %v5111_v59  ;;  %v10953_v11 = vrot.slane %v5112_v30, 9  ;;  %v10954_v52 = vrot.slane %v5111_v59, 9  ;;  %v5625_v28 = vmax.f32 %v5104_v3, %v10952_v17  ;;  %v15628_v0 = vpop.f32.mrb[4].mxu1 }
 0x3dc   :  { %v15630_v50 = vpop.f32.mrb[5].mxu1  ;;  %v10959_v9 = vrot.slane %v5130_v19, 9  ;;  %v5630_v23 = vmax.f32 %v5129_v21, %v10957_v1  ;;  %v5631_v49 = vmax.f32 %v5128_v18, %v10958_v38  ;;  %v15663_v24 = vmax.f32 %v5629_v62, 0.0 }
 0x3dd   :  { %v10955_v39 = vrot.slane %v5113_v54, 9  ;;  %v5626_v44 = vmax.f32 %v5112_v30, %v10953_v11  ;;  %v5627_v34 = vmax.f32 %v5111_v59, %v10954_v52  ;;  %v15632_v56 = vmax.f32 %v5625_v28, 0.0 }
 0x3de   :  { %v5632_v63 = vmax.f32 %v5130_v19, %v10959_v9  ;;  %v5148_v55 = vcombine.high %v5066_v12, %v5066_v12  ;;  %v15673_v33 = vmax.f32 %v5630_v23, 0.0  ;;  %v15675_v35 = vmax.f32 %v5631_v49, 0.0 }
 0x3df   :  { %v5628_v25 = vmax.f32 %v5113_v54, %v10955_v39  ;;  %v15634_v40 = vmax.f32 %v5626_v44, 0.0  ;;  %v15636_v60 = vmax.f32 %v5627_v34, 0.0  ;;  %v15638_v42 = vpop.f32.mrb[6].mxu1  ;;  %v5820_v57 = vrot.slane %v15632_v56, %v13210_v26 }
 0x3e0   :  { %v15640_v29 = vpop.f32.mrb[7].mxu1  ;;  %v6151_v13 = vmul.f32 %v15632_v56, %v15632_v56  ;;  %v15679_v51 = vmax.f32 %v5632_v63, 0.0  ;;  %v5155_v20 = vrot.slane %v5066_v12, %v18757_v46  ;;  %v5131_v31 = vcombine.high %v5065_v61, %v5065_v61 }
 0x3e1   :  { %v15642_v10 = vmax.f32 %v5628_v25, 0.0  ;;  %v5824_v27 = vrot.slane %v15634_v40, %v13210_v26  ;;  %v5828_v22 = vrot.slane %v15636_v60, %v13210_v26  ;;  %v6152_v7 = vmul.f32 %v15634_v40, %v15634_v40 }
 0x3e2   :  { %v6153_v53 = vmul.f32 %v15636_v60, %v15636_v60  ;;  %v6282_v32 = vrot.slane %v6151_v13, %v13210_v26  ;;  %v5162_v18 = vrot.slane %v5148_v55, %v18757_v46  ;;  %v5836_v8 = vrot.slane %v15663_v24, %v13210_v26 }
 0x3e3   :  { %v15654_v16 = vpop.f32.mrb[8].mxu1  ;;  %v6073_v14 = vsel %vm2315_vm0, %v5824_v27, %v5820_v57  ;;  %v5832_v47 = vrot.slane %v15642_v10, %v13210_v26  ;;  %v6154_v41 = vmul.f32 %v15642_v10, %v15642_v10  ;;  %v6286_v6 = vrot.slane %v6152_v7, %v13210_v26 }
 0x3e4   :  { %v15661_v37 = vpop.f32.mrb[9].mxu1  ;;  %v6074_v48 = vsel %vm2317_vm1, %v5828_v22, %v6073_v14  ;;  %v6290_v45 = vrot.slane %v6153_v53, %v13210_v26  ;;  %v6155_v59 = vmul.f32 %v15663_v24, %v15663_v24  ;;  %v5840_v17 = vrot.slane %v15673_v33, %v13210_v26 }
 0x3e5   :  { %v6535_v5 = vsel %vm2315_vm0, %v6286_v6, %v6282_v32  ;;  %v6075_v3 = vsel %vm2319_vm2, %v5832_v47, %v6074_v48  ;;  %v6294_v36 = vrot.slane %v6154_v41, %v13210_v26  ;;  %v6156_v21 = vmul.f32 %v15673_v33, %v15673_v33 }
 0x3e6   :  { %v6536_v30 = vsel %vm2317_vm1, %v6290_v45, %v6535_v5  ;;  %v15699_v54 = vmul.f32 %v15675_v35, %v15675_v35  ;;  %v5138_v11 = vrot.slane %v5065_v61, %v18757_v46  ;;  %v15706_v28 = vmul.f32 %v15679_v51, %v15679_v51 }
 0x3e7   :  { %v15677_v4 = vpop.f32.mrb[10].mxu1  ;;  %v6076_v19 = vsel %vm2321_vm3, %v5836_v8, %v6075_v3  ;;  %v5163_v43 = vcombine.high %v5155_v20, %v5155_v20  ;;  %v5145_v39 = vrot.slane %v5131_v31, %v18757_v46  ;;  %v6537_v34 = vsel %vm2319_vm2, %v6294_v36, %v6536_v30 }
 0x3e8   :  { %v15683_v15 = vpop.f32.mrb[11].mxu1  ;;  %v5164_v1 = vcombine.high %v5162_v18, %v5162_v18  ;;  %v10964_v38 = vrot.slane %v5155_v20, 9  ;;  %v5146_v25 = vcombine.high %v5138_v11, %v5138_v11  ;;  %v5844_v9 = vrot.slane %v15675_v35, %v13210_v26 }
 0x3e9   :  { %v5848_v62 = vrot.slane %v15679_v51, %v13210_v26  ;;  %v6298_v12 = vrot.slane %v6155_v59, %v13210_v26  ;;  %v6302_v57 = vrot.slane %v6156_v21, %v13210_v26  ;;  %v6077_v27 = vsel %vm2323_vm4, %v5840_v17, %v6076_v19 }
 0x3ea   :  { %v10966_v61 = vrot.slane %v5162_v18, 9  ;;  %v5147_v23 = vcombine.high %v5145_v39, %v5145_v39  ;;  %v6306_v22 = vrot.slane %v15699_v54, %v13210_v26  ;;  %v10965_v63 = vrot.slane %v5163_v43, 9 }
 0x3eb   :  { %v15702_v52 = vpop.f32.mrb[12].mxu1  ;;  %v6538_v13 = vsel %vm2321_vm3, %v6298_v12, %v6537_v34  ;;  %v10960_v14 = vrot.slane %v5138_v11, 9  ;;  %v6310_v53 = vrot.slane %v15706_v28, %v13210_v26  ;;  %v10967_v47 = vrot.slane %v5164_v1, 9 }
 0x3ec   :  { %v15710_v44 = vpop.f32.mrb[13].mxu1  ;;  %v5637_v41 = vmax.f32 %v5155_v20, %v10964_v38  ;;  %v10961_v55 = vrot.slane %v5146_v25, 9  ;;  %v6078_v48 = vsel %vm2325_vm5, %v5844_v9, %v6077_v27  ;;  %v10962_v32 = vrot.slane %v5145_v39, 9 }
 0x3ed   :  { %v10963_v6 = vrot.slane %v5147_v23, 9  ;;  %v5633_v45 = vmax.f32 %v5138_v11, %v10960_v14  ;;  %v6539_v5 = vsel %vm2323_vm4, %v6302_v57, %v6538_v13  ;;  %v5639_v31 = vmax.f32 %v5162_v18, %v10966_v61 }
 0x3ee   :  { %v5634_v3 = vmax.f32 %v5146_v25, %v10961_v55  ;;  %v5068_v36 = vadd.f32 %v15628_v0, %v15620_v2  ;;  %v5638_v8 = vmax.f32 %v5163_v43, %v10965_v63  ;;  %v5635_v59 = vmax.f32 %v5145_v39, %v10962_v32 }
 0x3ef   :  { %v15720_v49 = vpop.f32.mrb[14].mxu1  ;;  %v5636_v30 = vmax.f32 %v5147_v23, %v10963_v6  ;;  %v15733_v17 = vmax.f32 %v5633_v45, 0.0  ;;  %v5640_v21 = vmax.f32 %v5164_v1, %v10967_v47  ;;  %v15735_v20 = vmax.f32 %v5637_v41, 0.0 }
 0x3f0   :  { %v15725_v7 = vpop.f32.mrb[15].mxu1  ;;  %v15737_v54 = vmax.f32 %v5634_v3, 0.0  ;;  %v5182_v28 = vcombine.high %v5068_v36, %v5068_v36  ;;  %v15739_v19 = vmax.f32 %v5635_v59, 0.0  ;;  %v5189_v0 = vrot.slane %v5068_v36, %v18757_v46 }
 0x3f1   :  { %v15741_v11 = vmax.f32 %v5636_v30, 0.0  ;;  %v6159_v18 = vmul.f32 %v15733_v17, %v15733_v17  ;;  %v5852_v43 = vrot.slane %v15733_v17, %v13210_v26  ;;  %v15761_v57 = vmax.f32 %v5639_v31, 0.0 }
 0x3f2   :  { %v5856_v39 = vrot.slane %v15737_v54, %v13210_v26  ;;  %v6160_v34 = vmul.f32 %v15737_v54, %v15737_v54  ;;  %v5196_v1 = vrot.slane %v5182_v28, %v18757_v46  ;;  %v5860_v38 = vrot.slane %v15739_v19, %v13210_v26 }
 0x3f3   :  { %v5864_v25 = vrot.slane %v15741_v11, %v13210_v26  ;;  %v6161_v9 = vmul.f32 %v15739_v19, %v15739_v19  ;;  %v6162_v12 = vmul.f32 %v15741_v11, %v15741_v11  ;;  %v6314_v61 = vrot.slane %v6159_v18, %v13210_v26 }
 0x3f4   :  { %v6080_v27 = vsel %vm2315_vm0, %v5856_v39, %v5852_v43  ;;  %v6318_v23 = vrot.slane %v6160_v34, %v13210_v26  ;;  %v15766_v13 = vmax.f32 %v5638_v8, 0.0  ;;  %v5197_v47 = vcombine.high %v5189_v0, %v5189_v0 }
 0x3f5   :  { %v6081_v63 = vsel %vm2317_vm1, %v5860_v38, %v6080_v27  ;;  %v6322_v14 = vrot.slane %v6161_v9, %v13210_v26  ;;  %v5868_v41 = vrot.slane %v15735_v20, %v13210_v26  ;;  %v5067_v6 = vadd.f32 %v15620_v2, %v15630_v50 }
 0x3f6   :  { %v6082_v55 = vsel %vm2319_vm2, %v5864_v25, %v6081_v63  ;;  %v6542_v32 = vsel %vm2315_vm0, %v6318_v23, %v6314_v61  ;;  %v6540_v45 = vsel %vm2325_vm5, %v6306_v22, %v6539_v5  ;;  %v6163_v31 = vmul.f32 %v15735_v20, %v15735_v20 }
 0x3f7   :  { %v6326_v3 = vrot.slane %v6162_v12, %v13210_v26  ;;  %v5198_v36 = vcombine.high %v5196_v1, %v5196_v1  ;;  %v15780_v8 = vmax.f32 %v5640_v21, 0.0  ;;  %v6083_v59 = vsel %vm2321_vm3, %v5868_v41, %v6082_v55 }
 0x3f8   :  { %v6543_v30 = vsel %vm2317_vm1, %v6322_v14, %v6542_v32  ;;  %v10972_v28 = vrot.slane %v5189_v0, 9  ;;  %v5872_v18 = vrot.slane %v15766_v13, %v13210_v26  ;;  %v6164_v50 = vmul.f32 %v15766_v13, %v15766_v13 }
 0x3f9   :  { %18758 = vst [vmem:[#allocation7_spill] sm:$0xff] %v15780_v8  ;;  %v6165_v22 = vmul.f32 %v15761_v57, %v15761_v57  ;;  %v10973_v5 = vrot.slane %v5197_v47, 9  ;;  %v6079_v21 = vsel %vm2327_vm6, %v5848_v62, %v6078_v48  ;;  %v15795_v43 = vsel %vm2327_vm6, %v6310_v53, %v6540_v45 }
 0x3fa   :  { %v5165_v39 = vcombine.high %v5067_v6, %v5067_v6  ;;  %v5070_v34 = vadd.f32 %v15638_v42, %v15620_v2  ;;  %v6084_v38 = vsel %vm2323_vm4, %v5872_v18, %v6083_v59  ;;  %v6544_v25 = vsel %vm2319_vm2, %v6326_v3, %v6543_v30 }
 0x3fb   :  { %v10974_v9 = vrot.slane %v5196_v1, 9  ;;  %v10975_v12 = vrot.slane %v5198_v36, 9  ;;  %v5876_v27 = vrot.slane %v15761_v57, %v13210_v26  ;;  %v5880_v61 = vrot.slane %v15780_v8, %v13210_v26 }
 0x3fc   :  { %v6330_v62 = vrot.slane %v6163_v31, %v13210_v26  ;;  %v5645_v53 = vmax.f32 %v5189_v0, %v10972_v28  ;;  %v6166_v48 = vmul.f32 %v15780_v8, %v15780_v8  ;;  %v6334_v42 = vrot.slane %v6164_v50, %v13210_v26 }
 0x3fd   :  { %v6338_v23 = vrot.slane %v6165_v22, %v13210_v26  ;;  %v5646_v63 = vmax.f32 %v5197_v47, %v10973_v5  ;;  %v6085_v14 = vsel %vm2325_vm5, %v5876_v27, %v6084_v38  ;;  %v5172_v55 = vrot.slane %v5067_v6, %v18757_v46 }
 0x3fe   :  { %v6545_v41 = vsel %vm2321_vm3, %v6330_v62, %v6544_v25  ;;  %v5179_v32 = vrot.slane %v5165_v39, %v18757_v46  ;;  %v5647_v45 = vmax.f32 %v5196_v1, %v10974_v9  ;;  %v5648_v3 = vmax.f32 %v5198_v36, %v10975_v12 }
 0x3ff   :  { %v5216_v31 = vcombine.high %v5070_v34, %v5070_v34  ;;  %v5223_v0 = vrot.slane %v5070_v34, %v18757_v46  ;;  %v15815_v59 = vmax.f32 %v5645_v53, 0.0  ;;  %v5180_v30 = vcombine.high %v5172_v55, %v5172_v55 }
 0x400   :  { %v5181_v28 = vcombine.high %v5179_v32, %v5179_v32  ;;  %v10968_v18 = vrot.slane %v5172_v55, 9  ;;  %v6086_v47 = vsel %vm2327_vm6, %v5880_v61, %v6085_v14  ;;  %v6546_v50 = vsel %vm2323_vm4, %v6334_v42, %v6545_v41 }
 0x401   :  { %18759 = vst [vmem:[#allocation8_spill] sm:$0xff] %v15815_v59  ;;  %v10970_v22 = vrot.slane %v5179_v32, 9  ;;  %v5230_v5 = vrot.slane %v5216_v31, %v18757_v46  ;;  %v10969_v6 = vrot.slane %v5180_v30, 9  ;;  %v5231_v1 = vcombine.high %v5223_v0, %v5223_v0 }
 0x402   :  { %v10971_v38 = vrot.slane %v5181_v28, 9  ;;  %v5641_v39 = vmax.f32 %v5172_v55, %v10968_v18  ;;  %v6342_v36 = vrot.slane %v6166_v48, %v13210_v26  ;;  %v15821_v25 = vmax.f32 %v5646_v63, 0.0 }
 0x403   :  { %v15823_v34 = vmax.f32 %v5647_v45, 0.0  ;;  %v5643_v9 = vmax.f32 %v5179_v32, %v10970_v22  ;;  %v6547_v12 = vsel %vm2325_vm5, %v6338_v23, %v6546_v50  ;;  %v5642_v27 = vmax.f32 %v5180_v30, %v10969_v6 }
 0x404   :  { %18760 = vst [vmem:[#allocation10_spill] sm:$0xff] %v15821_v25  ;;  %v5644_v61 = vmax.f32 %v5181_v28, %v10971_v38  ;;  %v15826_v62 = vmax.f32 %v5641_v39, 0.0  ;;  %v15828_v53 = vadd.f32 %v6086_v47, %v6079_v21  ;;  %v15830_v42 = vmax.f32 %v5648_v3, 0.0 }
 0x405   :  { %18761 = vst [vmem:[#allocation11_spill] sm:$0xff] %v15823_v34  ;;  %v15832_v14 = vmax.f32 %v5643_v9, 0.0  ;;  %v10980_v41 = vrot.slane %v5223_v0, 9  ;;  %v5900_v48 = vrot.slane %v15815_v59, %v13210_v26  ;;  %v15836_v63 = vmax.f32 %v5642_v27, 0.0 }
 0x406   :  { %18762 = vst [vmem:[#allocation12_spill] sm:$0xff] %v15830_v42  ;;  %v5232_v55 = vcombine.high %v5230_v5, %v5230_v5  ;;  %v10981_v32 = vrot.slane %v5231_v1, 9  ;;  %v6548_v23 = vsel %vm2327_vm6, %v6342_v36, %v6547_v12  ;;  %v15841_v31 = vmax.f32 %v5644_v61, 0.0 }
 0x407   :  { %18763 = vst [vmem:[#allocation9_spill] sm:$0xff] %v15832_v14  ;;  %18764 = vst [vmem:[#allocation14_spill] sm:$0xff] %v15836_v63  ;;  %v6167_v21 = vmul.f32 %v15826_v62, %v15826_v62  ;;  %v5888_v30 = vrot.slane %v15836_v63, %v13210_v26  ;;  %v6168_v28 = vmul.f32 %v15836_v63, %v15836_v63  ;;  %v10982_v22 = vrot.slane %v5230_v5, 9 }
 0x408   :  { %18765 = vst [vmem:[#allocation13_spill] sm:$0xff] %v15841_v31  ;;  %v6169_v18 = vmul.f32 %v15832_v14, %v15832_v14  ;;  %v6171_v47 = vmul.f32 %v15815_v59, %v15815_v59  ;;  %v5884_v50 = vrot.slane %v15826_v62, %v13210_v26  ;;  %v5653_v6 = vmax.f32 %v5223_v0, %v10980_v41 }
 0x409   :  { %v5892_v38 = vrot.slane %v15832_v14, %v13210_v26  ;;  %v6350_v39 = vrot.slane %v6168_v28, %v13210_v26  ;;  %v10983_v36 = vrot.slane %v5232_v55, 9  ;;  %v5654_v9 = vmax.f32 %v5231_v1, %v10981_v32 }
 0x40a   :  { %v6172_v12 = vmul.f32 %v15821_v25, %v15821_v25  ;;  %v6087_v27 = vsel %vm2315_vm0, %v5888_v30, %v5884_v50  ;;  %v6170_v61 = vmul.f32 %v15841_v31, %v15841_v31  ;;  %v6346_v58 = vrot.slane %v6167_v21, %v13210_v26 }
 0x40b   :  { %v15868_v0 = vmul.f32 %v15823_v34, %v15823_v34  ;;  %v15872_v41 = vmul.f32 %v15830_v42, %v15830_v42  ;;  %v6354_v1 = vrot.slane %v6169_v18, %v13210_v26  ;;  %v5069_v32 = vadd.f32 %v15620_v2, %v15640_v29 }
 0x40c   :  { %v15878_v30 = vadd.f32 %v6548_v23, %v15795_v43  ;;  %v5896_v28 = vrot.slane %v15841_v31, %v13210_v26  ;;  %v6549_v21 = vsel %vm2315_vm0, %v6350_v39, %v6346_v58  ;;  %v5655_v50 = vmax.f32 %v5230_v5, %v10982_v22 }
 0x40d   :  { %v6088_v3 = vsel %vm2317_vm1, %v5892_v38, %v6087_v27  ;;  %v5656_v45 = vmax.f32 %v5232_v55, %v10983_v36  ;;  %v15884_v59 = vmax.f32 %v5653_v6, 0.0  ;;  %v15886_v14 = vmax.f32 %v5654_v9, 0.0 }
 0x40e   :  { %v5912_v18 = vrot.slane %v15830_v42, %v13210_v26  ;;  %v6362_v29 = vrot.slane %v6171_v47, %v13210_v26  ;;  %v6366_v43 = vrot.slane %v6172_v12, %v13210_v26  ;;  %v6358_v23 = vrot.slane %v6170_v61, %v13210_v26 }
 0x40f   :  { %18766 = vst [vmem:[#allocation15_spill] sm:$0xff] %v15886_v14  ;;  %v6370_v58 = vrot.slane %v15868_v0, %v13210_v26  ;;  %v6374_v5 = vrot.slane %v15872_v41, %v13210_v26  ;;  %v6550_v55 = vsel %vm2317_vm1, %v6354_v1, %v6549_v21  ;;  %v5199_v22 = vcombine.high %v5069_v32, %v5069_v32 }
 0x410   :  { %v6089_v6 = vsel %vm2319_vm2, %v5896_v28, %v6088_v3  ;;  %v15899_v38 = vmax.f32 %v5655_v50, 0.0  ;;  %v5206_v39 = vrot.slane %v5069_v32, %v18757_v46  ;;  %v5072_v47 = vadd.f32 %v15654_v16, %v15620_v2 }
 0x411   :  { %v15904_v36 = vmax.f32 %v5656_v45, 0.0  ;;  %v5213_v27 = vrot.slane %v5199_v22, %v18757_v46  ;;  %v6551_v61 = vsel %vm2319_vm2, %v6358_v23, %v6550_v55  ;;  %v6090_v1 = vsel %vm2321_vm3, %v5900_v48, %v6089_v6 }
 0x412   :  { %v5214_v3 = vcombine.high %v5206_v39, %v5206_v39  ;;  %v10976_v0 = vrot.slane %v5206_v39, 9  ;;  %v5250_v41 = vcombine.high %v5072_v47, %v5072_v47  ;;  %v5257_v16 = vrot.slane %v5072_v47, %v18757_v46 }
 0x413   :  { %18767 = vst [vmem:[#allocation21_spill] sm:$0xff] %v15904_v36  ;;  %v5215_v32 = vcombine.high %v5213_v27, %v5213_v27  ;;  %v10978_v28 = vrot.slane %v5213_v27, 9  ;;  %v6552_v22 = vsel %vm2321_vm3, %v6362_v29, %v6551_v61  ;;  %v18768_v42 = vrot.slane %v15821_v25, %v13210_v26 }
 0x414   :  { %v10977_v21 = vrot.slane %v5214_v3, 9  ;;  %v5649_v50 = vmax.f32 %v5206_v39, %v10976_v0  ;;  %v5264_v12 = vrot.slane %v5250_v41, %v18757_v46  ;;  %v5265_v55 = vcombine.high %v5257_v16, %v5257_v16 }
 0x415   :  { %v10979_v9 = vrot.slane %v5215_v32, 9  ;;  %v5651_v23 = vmax.f32 %v5213_v27, %v10978_v28  ;;  %v6091_v48 = vsel %vm2323_vm4, %v18768_v42, %v6090_v1  ;;  %v15928_v39 = vmul.f32 %v15884_v59, %v15884_v59 }
 0x416   :  { %v5650_v47 = vmax.f32 %v5214_v3, %v10977_v21  ;;  %v15924_v31 = vmax.f32 %v5649_v50, 0.0  ;;  %v5266_v27 = vcombine.high %v5264_v12, %v5264_v12  ;;  %v6553_v61 = vsel %vm2323_vm4, %v6366_v43, %v6552_v22 }
 0x417   :  { %v5652_v0 = vmax.f32 %v5215_v32, %v10979_v9  ;;  %v15930_v29 = vmax.f32 %v5651_v23, 0.0  ;;  %v15935_v41 = vmul.f32 %v15886_v14, %v15886_v14  ;;  %v15939_v42 = vmul.f32 %v15899_v38, %v15899_v38 }
 0x418   :  { %18769 = vst [vmem:[#allocation20_spill] sm:$0xff] %v15924_v31  ;;  %v15941_v3 = vmax.f32 %v5650_v47, 0.0  ;;  %v18772_v1 = vrot.slane %v15823_v34, %v13210_v26  ;;  %v5916_v32 = vrot.slane %v15924_v31, %v13210_v26  ;;  %v10988_v28 = vrot.slane %v5257_v16, 9 }
 0x419   :  { %18770 = vst [vmem:[#allocation22_spill] sm:$0xff] %v15930_v29  ;;  %v10989_v43 = vrot.slane %v5265_v55, 9  ;;  %v15949_v21 = vmax.f32 %v5652_v0, 0.0  ;;  %v6175_v22 = vmul.f32 %v15924_v31, %v15924_v31  ;;  %v6554_v47 = vsel %vm2325_vm5, %v6370_v58, %v6553_v61 }
 0x41a   :  { %18771 = vst [vmem:[#allocation16_spill] sm:$0xff] %v15941_v3  ;;  %v6092_v9 = vsel %vm2325_vm5, %v18772_v1, %v6091_v48  ;;  %v5920_v50 = vrot.slane %v15941_v3, %v13210_v26  ;;  %v6176_v23 = vmul.f32 %v15941_v3, %v15941_v3  ;;  %v5924_v48 = vrot.slane %v15930_v29, %v13210_v26 }
 0x41b   :  { %v10990_v1 = vrot.slane %v5264_v12, 9  ;;  %v10991_v6 = vrot.slane %v5266_v27, 9  ;;  %v15962_v0 = vmul.f32 %v15904_v36, %v15904_v36  ;;  %v6177_v34 = vmul.f32 %v15930_v29, %v15930_v29 }
 0x41c   :  { %v6094_v45 = vsel %vm2315_vm0, %v5920_v50, %v5916_v32  ;;  %v5071_v31 = vadd.f32 %v15620_v2, %v15661_v37  ;;  %v6093_v3 = vsel %vm2327_vm6, %v5912_v18, %v6092_v9  ;;  %v6394_v58 = vrot.slane %v15928_v39, %v13210_v26 }
 0x41d   :  { %v6382_v61 = vrot.slane %v6176_v23, %v13210_v26  ;;  %v5661_v25 = vmax.f32 %v5257_v16, %v10988_v28  ;;  %v6555_v63 = vsel %vm2327_vm6, %v6374_v5, %v6554_v47  ;;  %v5928_v8 = vrot.slane %v15949_v21, %v13210_v26 }
 0x41e   :  { %v6378_v32 = vrot.slane %v6175_v22, %v13210_v26  ;;  %v5662_v50 = vmax.f32 %v5265_v55, %v10989_v43  ;;  %v6095_v29 = vsel %vm2317_vm1, %v5924_v48, %v6094_v45  ;;  %v6178_v37 = vmul.f32 %v15949_v21, %v15949_v21 }
 0x41f   :  { %v5663_v18 = vmax.f32 %v5264_v12, %v10990_v1  ;;  %v5664_v9 = vmax.f32 %v5266_v27, %v10991_v6  ;;  %v6398_v39 = vrot.slane %v15935_v41, %v13210_v26  ;;  %v6386_v16 = vrot.slane %v6177_v34, %v13210_v26 }
 0x420   :  { %v5233_v28 = vcombine.high %v5071_v31, %v5071_v31  ;;  %v5240_v5 = vrot.slane %v5071_v31, %v18757_v46  ;;  %v6402_v23 = vrot.slane %v15939_v42, %v13210_v26  ;;  %v6556_v55 = vsel %vm2315_vm0, %v6382_v61, %v6378_v32 }
 0x421   :  { %v15987_v43 = vmax.f32 %v5661_v25, 0.0  ;;  %v5074_v45 = vadd.f32 %v15677_v4, %v15620_v2  ;;  %v15992_v12 = vadd.f32 %v15828_v53, %v6093_v3  ;;  %v15995_v6 = vadd.f32 %v15878_v30, %v6555_v63 }
 0x422   :  { %v6096_v31 = vsel %vm2319_vm2, %v5928_v8, %v6095_v29  ;;  %v6390_v27 = vrot.slane %v6178_v37, %v13210_v26  ;;  %v16001_v41 = vmax.f32 %v5662_v50, 0.0  ;;  %v16003_v25 = vmax.f32 %v5663_v18, 0.0 }
 0x423   :  { %18773 = vst [vmem:[#allocation17_spill] sm:$0xff] %v15987_v43  ;;  %v16005_v42 = vmax.f32 %v5664_v9, 0.0  ;;  %v6557_v4 = vsel %vm2317_vm1, %v6386_v16, %v6556_v55  ;;  %v5247_v53 = vrot.slane %v5233_v28, %v18757_v46  ;;  %v5248_v3 = vcombine.high %v5240_v5, %v5240_v5 }
 0x424   :  { %18774 = vst [vmem:[#allocation18_spill] sm:$0xff] %v16003_v25  ;;  %v10984_v63 = vrot.slane %v5240_v5, 9  ;;  %v18776_v30 = vrot.slane %v15884_v59, %v13210_v26  ;;  %v5964_v8 = vrot.slane %v15987_v43, %v13210_v26  ;;  %v5284_v29 = vcombine.high %v5074_v45, %v5074_v45 }
 0x425   :  { %18775 = vst [vmem:[#allocation19_spill] sm:$0xff] %v16005_v42  ;;  %v5291_v47 = vrot.slane %v5074_v45, %v18757_v46  ;;  %v5249_v48 = vcombine.high %v5247_v53, %v5247_v53  ;;  %v10985_v1 = vrot.slane %v5248_v3, 9  ;;  %v10986_v61 = vrot.slane %v5247_v53, 9 }
 0x426   :  { %v6097_v22 = vsel %vm2321_vm3, %v18776_v30, %v6096_v31  ;;  %v5657_v32 = vmax.f32 %v5240_v5, %v10984_v63  ;;  %v6558_v50 = vsel %vm2319_vm2, %v6390_v27, %v6557_v4  ;;  %v5298_v9 = vrot.slane %v5284_v29, %v18757_v46 }
 0x427   :  { %v10987_v16 = vrot.slane %v5249_v48, 9  ;;  %v5658_v28 = vmax.f32 %v5248_v3, %v10985_v1  ;;  %v5659_v55 = vmax.f32 %v5247_v53, %v10986_v61  ;;  %v18778_v45 = vrot.slane %v15886_v14, %v13210_v26 }
 0x428   :  { %v16022_v31 = vmax.f32 %v5657_v32, 0.0  ;;  %v16032_v4 = vmul.f32 %v15987_v43, %v15987_v43  ;;  %v5299_v63 = vcombine.high %v5291_v47, %v5291_v47  ;;  %v6559_v30 = vsel %vm2321_vm3, %v6394_v58, %v6558_v50 }
 0x429   :  { %v6098_v5 = vsel %vm2323_vm4, %v18778_v45, %v6097_v22  ;;  %v5660_v29 = vmax.f32 %v5249_v48, %v10987_v16  ;;  %v16035_v3 = vmax.f32 %v5658_v28, 0.0  ;;  %v16037_v53 = vmax.f32 %v5659_v55, 0.0 }
 0x42a   :  { %18777 = vst [vmem:[#allocation27_spill] sm:$0xff] %v16022_v31  ;;  %v5948_v1 = vrot.slane %v16022_v31, %v13210_v26  ;;  %v6183_v22 = vmul.f32 %v16022_v31, %v16022_v31  ;;  %v5300_v61 = vcombine.high %v5298_v9, %v5298_v9  ;;  %v10996_v32 = vrot.slane %v5291_v47, 9 }
 0x42b   :  { %18779 = vst [vmem:[#allocation29_spill] sm:$0xff] %v16035_v3  ;;  %18780 = vst [vmem:[#allocation28_spill] sm:$0xff] %v16037_v53  ;;  %v16043_v45 = vmax.f32 %v5660_v29, 0.0  ;;  %v5952_v27 = vrot.slane %v16035_v3, %v13210_v26  ;;  %v5956_v58 = vrot.slane %v16037_v53, %v13210_v26  ;;  %v6184_v48 = vmul.f32 %v16035_v3, %v16035_v3 }
 0x42c   :  { %v6560_v50 = vsel %vm2323_vm4, %v6398_v39, %v6559_v30  ;;  %v16054_v16 = vmul.f32 %v16001_v41, %v16001_v41  ;;  %v6185_v28 = vmul.f32 %v16037_v53, %v16037_v53  ;;  %v10997_v55 = vrot.slane %v5299_v63, 9 }
 0x42d   :  { %18781 = vst [vmem:[#allocation30_spill] sm:$0xff] %v16043_v45  ;;  %v5960_v29 = vrot.slane %v16043_v45, %v13210_v26  ;;  %v6101_v18 = vsel %vm2315_vm0, %v5952_v27, %v5948_v1  ;;  %v6414_v37 = vrot.slane %v6184_v48, %v13210_v26  ;;  %v10998_v34 = vrot.slane %v5298_v9, 9 }
 0x42e   :  { %v18782_v43 = vrot.slane %v15899_v38, %v13210_v26  ;;  %v6102_v30 = vsel %vm2317_vm1, %v5956_v58, %v6101_v18  ;;  %v10999_v3 = vrot.slane %v5300_v61, 9  ;;  %v5073_v53 = vadd.f32 %v15620_v2, %v15683_v15 }
 0x42f   :  { %v6561_v31 = vsel %vm2325_vm5, %v6402_v23, %v6560_v50  ;;  %v6186_v14 = vmul.f32 %v16043_v45, %v16043_v45  ;;  %v6410_v27 = vrot.slane %v6183_v22, %v13210_v26  ;;  %v5669_v1 = vmax.f32 %v5291_v47, %v10996_v32 }
 0x430   :  { %v6099_v39 = vsel %vm2325_vm5, %v18782_v43, %v6098_v5  ;;  %v16075_v48 = vmul.f32 %v16003_v25, %v16003_v25  ;;  %v16079_v43 = vmul.f32 %v16005_v42, %v16005_v42  ;;  %v6103_v18 = vsel %vm2319_vm2, %v5960_v29, %v6102_v30 }
 0x431   :  { %v6418_v15 = vrot.slane %v6185_v28, %v13210_v26  ;;  %v18783_v23 = vrot.slane %v15904_v36, %v13210_v26  ;;  %v6563_v22 = vsel %vm2315_vm0, %v6414_v37, %v6410_v27  ;;  %v5670_v47 = vmax.f32 %v5299_v63, %v10997_v55 }
 0x432   :  { %v5671_v32 = vmax.f32 %v5298_v9, %v10998_v34  ;;  %v18784_v58 = vrot.slane %v15962_v0, %v13210_v26  ;;  %v6426_v45 = vrot.slane %v16032_v4, %v13210_v26  ;;  %v5672_v29 = vmax.f32 %v5300_v61, %v10999_v3 }
 0x433   :  { %v6100_v5 = vsel %vm2327_vm6, %v18783_v23, %v6099_v39  ;;  %v5267_v30 = vcombine.high %v5073_v53, %v5073_v53  ;;  %v6430_v28 = vrot.slane %v16054_v16, %v13210_v26  ;;  %v6104_v36 = vsel %vm2321_vm3, %v5964_v8, %v6103_v18 }
 0x434   :  { %v6562_v50 = vsel %vm2327_vm6, %v18784_v58, %v6561_v31  ;;  %v6422_v39 = vrot.slane %v6186_v14, %v13210_v26  ;;  %v16098_v37 = vmax.f32 %v5669_v1, 0.0  ;;  %v6139_v34 = vadd.f32 %v15992_v12, %v6100_v5 }
 0x435   :  { %v6434_v0 = vrot.slane %v16075_v48, %v13210_v26  ;;  %v6438_v9 = vrot.slane %v16079_v43, %v13210_v26  ;;  %v6564_v31 = vsel %vm2317_vm1, %v6418_v15, %v6563_v22  ;;  %v16107_v4 = vadd.f32 %v15995_v6, %v6562_v50 }
 0x436   :  { %v16109_v63 = vmax.f32 %v5670_v47, 0.0  ;;  %v16111_v8 = vmax.f32 %v5671_v32, 0.0  ;;  %v5274_v14 = vrot.slane %v5073_v53, %v18757_v46  ;;  %v18786_v12 = vrot.slane %v16001_v41, %v13210_v26 }
 0x437   :  { %v16118_v61 = vmax.f32 %v5672_v29, 0.0  ;;  %v5281_v16 = vrot.slane %v5267_v30, %v18757_v46  ;;  %v5076_v55 = vadd.f32 %v15702_v52, %v15620_v2  ;;  %v6565_v6 = vsel %vm2319_vm2, %v6422_v39, %v6564_v31 }
 0x438   :  { %18785 = vst [vmem:[#allocation23_spill] sm:$0xff] %v16111_v8  ;;  %v6105_v3 = vsel %vm2323_vm4, %v18786_v12, %v6104_v36  ;;  %v5282_v1 = vcombine.high %v5274_v14, %v5274_v14  ;;  %v10992_v48 = vrot.slane %v5274_v14, 9  ;;  %v18788_v36 = vrot.slane %v16003_v25, %v13210_v26 }
 0x439   :  { %18787 = vst [vmem:[#allocation24_spill] sm:$0xff] %v16118_v61  ;;  %v5283_v53 = vcombine.high %v5281_v16, %v5281_v16  ;;  %v10994_v43 = vrot.slane %v5281_v16, 9  ;;  %v5318_v18 = vcombine.high %v5076_v55, %v5076_v55  ;;  %v5325_v15 = vrot.slane %v5076_v55, %v18757_v46 }
 0x43a   :  { %v6106_v23 = vsel %vm2325_vm5, %v18788_v36, %v6105_v3  ;;  %v10993_v5 = vrot.slane %v5282_v1, 9  ;;  %v5665_v22 = vmax.f32 %v5274_v14, %v10992_v48  ;;  %v6566_v47 = vsel %vm2321_vm3, %v6426_v45, %v6565_v6 }
 0x43b   :  { %v10995_v32 = vrot.slane %v5283_v53, 9  ;;  %v5667_v58 = vmax.f32 %v5281_v16, %v10994_v43  ;;  %v5332_v50 = vrot.slane %v5318_v18, %v18757_v46  ;;  %v16143_v12 = vmul.f32 %v16098_v37, %v16098_v37 }
 0x43c   :  { %v5666_v39 = vmax.f32 %v5282_v1, %v10993_v5  ;;  %v16139_v31 = vmax.f32 %v5665_v22, 0.0  ;;  %v5333_v45 = vcombine.high %v5325_v15, %v5325_v15  ;;  %v18791_v16 = vrot.slane %v16005_v42, %v13210_v26 }
 0x43d   :  { %v5668_v14 = vmax.f32 %v5283_v53, %v10995_v32  ;;  %v16145_v3 = vmax.f32 %v5667_v58, 0.0  ;;  %v6567_v6 = vsel %vm2323_vm4, %v6430_v28, %v6566_v47  ;;  %v16154_v1 = vmul.f32 %v16109_v63, %v16109_v63 }
 0x43e   :  { %18789 = vst [vmem:[#allocation25_spill] sm:$0xff] %v16139_v31  ;;  %v6107_v55 = vsel %vm2327_vm6, %v18791_v16, %v6106_v23  ;;  %v16156_v48 = vmax.f32 %v5666_v39, 0.0  ;;  %v5334_v18 = vcombine.high %v5332_v50, %v5332_v50  ;;  %v5075_v36 = vadd.f32 %v15620_v2, %v15710_v44 }
 0x43f   :  { %18790 = vst [vmem:[#allocation26_spill] sm:$0xff] %v16145_v3  ;;  %v16158_v43 = vmax.f32 %v5668_v14, 0.0  ;;  %v5988_v53 = vrot.slane %v16145_v3, %v13210_v26  ;;  %v16166_v23 = vmul.f32 %v16111_v8, %v16111_v8  ;;  %v5980_v28 = vrot.slane %v16139_v31, %v13210_v26 }
 0x440   :  { %18792 = vst [vmem:[#allocation35_spill] sm:$0xff] %v16156_v48  ;;  %v5984_v5 = vrot.slane %v16156_v48, %v13210_v26  ;;  %v6192_v22 = vmul.f32 %v16156_v48, %v16156_v48  ;;  %v6568_v47 = vsel %vm2325_vm5, %v6434_v0, %v6567_v6  ;;  %v6191_v32 = vmul.f32 %v16139_v31, %v16139_v31 }
 0x441   :  { %18793 = vst [vmem:[#allocation36_spill] sm:$0xff] %v16158_v43  ;;  %v11004_v58 = vrot.slane %v5325_v15, 9  ;;  %v11005_v44 = vrot.slane %v5333_v45, 9  ;;  %v5992_v39 = vrot.slane %v16158_v43, %v13210_v26  ;;  %v6193_v16 = vmul.f32 %v16145_v3, %v16145_v3 }
 0x442   :  { %v6108_v14 = vsel %vm2315_vm0, %v5984_v5, %v5980_v28  ;;  %v11006_v30 = vrot.slane %v5332_v50, 9  ;;  %v6446_v52 = vrot.slane %v6192_v22, %v13210_v26  ;;  %v11007_v27 = vrot.slane %v5334_v18, 9 }
 0x443   :  { %v6109_v29 = vsel %vm2317_vm1, %v5988_v53, %v6108_v14  ;;  %v5301_v0 = vcombine.high %v5075_v36, %v5075_v36  ;;  %v16184_v6 = vadd.f32 %v6139_v34, %v6107_v55  ;;  %v6569_v48 = vsel %vm2327_vm6, %v6438_v9, %v6568_v47 }
 0x444   :  { %v16189_v31 = vmul.f32 %v16118_v61, %v16118_v61  ;;  %v6458_v28 = vrot.slane %v16143_v12, %v13210_v26  ;;  %v6194_v5 = vmul.f32 %v16158_v43, %v16158_v43  ;;  %v6442_v53 = vrot.slane %v6191_v32, %v13210_v26 }
 0x445   :  { %v5677_v14 = vmax.f32 %v5325_v15, %v11004_v58  ;;  %v5308_v22 = vrot.slane %v5075_v36, %v18757_v46  ;;  %v6110_v34 = vsel %vm2319_vm2, %v5992_v39, %v6109_v29  ;;  %v6450_v55 = vrot.slane %v6193_v16, %v13210_v26 }
 0x446   :  { %v5678_v9 = vmax.f32 %v5333_v45, %v11005_v44  ;;  %v5679_v47 = vmax.f32 %v5332_v50, %v11006_v30  ;;  %v6462_v3 = vrot.slane %v16154_v1, %v13210_v26  ;;  %v6570_v42 = vsel %vm2315_vm0, %v6446_v52, %v6442_v53 }
 0x447   :  { %v5680_v12 = vmax.f32 %v5334_v18, %v11007_v27  ;;  %v5315_v25 = vrot.slane %v5301_v0, %v18757_v46  ;;  %v16204_v43 = vadd.f32 %v16107_v4, %v6569_v48  ;;  %v5078_v50 = vadd.f32 %v15720_v49, %v15620_v2 }
 0x448   :  { %v18794_v30 = vrot.slane %v16098_v37, %v13210_v26  ;;  %v6454_v27 = vrot.slane %v6194_v5, %v13210_v26  ;;  %v16217_v45 = vmax.f32 %v5677_v14, 0.0  ;;  %v5077_v4 = vadd.f32 %v15620_v2, %v15725_v7 }
 0x449   :  { %v6571_v1 = vsel %vm2317_vm1, %v6450_v55, %v6570_v42  ;;  %v16222_v48 = vmax.f32 %v5678_v9, 0.0  ;;  %v16224_v18 = vmax.f32 %v5679_v47, 0.0  ;;  %v5316_v36 = vcombine.high %v5308_v22, %v5308_v22 }
 0x44a   :  { %v6111_v52 = vsel %vm2321_vm3, %v18794_v30, %v6110_v34  ;;  %18795 = vst [vmem:[#allocation37_spill] sm:$0xff] %v16217_v45  ;;  %v16226_v49 = vmax.f32 %v5680_v12, 0.0  ;;  %v5317_v32 = vcombine.high %v5315_v25, %v5315_v25  ;;  %v11000_v58 = vrot.slane %v5308_v22, 9 }
 0x44b   :  { %18796 = vst [vmem:[#allocation38_spill] sm:$0xff] %v16222_v48  ;;  %18797 = vst [vmem:[#allocation31_spill] sm:$0xff] %v16224_v18  ;;  %v11002_v44 = vrot.slane %v5315_v25, 9  ;;  %v18799_v39 = vrot.slane %v16109_v63, %v13210_v26  ;;  %v11001_v0 = vrot.slane %v5316_v36, 9  ;;  %v5352_v5 = vcombine.high %v5078_v50, %v5078_v50 }
 0x44c   :  { %18798 = vst [vmem:[#allocation32_spill] sm:$0xff] %v16226_v49  ;;  %v5359_v2 = vrot.slane %v5078_v50, %v18757_v46  ;;  %v6572_v7 = vsel %vm2319_vm2, %v6454_v27, %v6571_v1  ;;  %v11003_v42 = vrot.slane %v5317_v32, 9  ;;  %v5673_v53 = vmax.f32 %v5308_v22, %v11000_v58 }
 0x44d   :  { %v6112_v16 = vsel %vm2323_vm4, %v18799_v39, %v6111_v52  ;;  %v5675_v14 = vmax.f32 %v5315_v25, %v11002_v44  ;;  %v6028_v34 = vrot.slane %v16217_v45, %v13210_v26  ;;  %v6032_v55 = vrot.slane %v16222_v48, %v13210_v26 }
 0x44e   :  { %v5674_v47 = vmax.f32 %v5316_v36, %v11001_v0  ;;  %v5676_v12 = vmax.f32 %v5317_v32, %v11003_v42  ;;  %v16240_v30 = vmax.f32 %v5673_v53, 0.0  ;;  %v5366_v50 = vrot.slane %v5352_v5, %v18757_v46 }
 0x44f   :  { %v16242_v52 = vmax.f32 %v5675_v14, 0.0  ;;  %v18802_v25 = vrot.slane %v16111_v8, %v13210_v26  ;;  %v6573_v27 = vsel %vm2321_vm3, %v6458_v28, %v6572_v7  ;;  %v5367_v58 = vcombine.high %v5359_v2, %v5359_v2 }
 0x450   :  { %18800 = vst [vmem:[#allocation33_spill] sm:$0xff] %v16240_v30  ;;  %v16250_v1 = vmax.f32 %v5674_v47, 0.0  ;;  %v16254_v36 = vmul.f32 %v16217_v45, %v16217_v45  ;;  %v16256_v32 = vmax.f32 %v5676_v12, 0.0  ;;  %v6199_v39 = vmul.f32 %v16240_v30, %v16240_v30 }
 0x451   :  { %18801 = vst [vmem:[#allocation34_spill] sm:$0xff] %v16242_v52  ;;  %v6113_v22 = vsel %vm2325_vm5, %v18802_v25, %v6112_v16  ;;  %v6020_v44 = vrot.slane %v16242_v52, %v13210_v26  ;;  %v6012_v16 = vrot.slane %v16240_v30, %v13210_v26  ;;  %v6201_v5 = vmul.f32 %v16242_v52, %v16242_v52 }
 0x452   :  { %18803 = vst [vmem:[#allocation40_spill] sm:$0xff] %v16250_v1  ;;  %18804 = vst [vmem:[#allocation42_spill] sm:$0xff] %v16256_v32  ;;  %v6016_v28 = vrot.slane %v16250_v1, %v13210_v26  ;;  %v6200_v0 = vmul.f32 %v16250_v1, %v16250_v1  ;;  %v6574_v7 = vsel %vm2323_vm4, %v6462_v3, %v6573_v27  ;;  %v11012_v25 = vrot.slane %v5359_v2, 9 }
 0x453   :  { %v6024_v42 = vrot.slane %v16256_v32, %v13210_v26  ;;  %v5368_v53 = vcombine.high %v5366_v50, %v5366_v50  ;;  %v5335_v14 = vcombine.high %v5077_v4, %v5077_v4  ;;  %v11013_v9 = vrot.slane %v5367_v58, 9 }
 0x454   :  { %v6115_v47 = vsel %vm2315_vm0, %v6016_v28, %v6012_v16  ;;  %v6478_v12 = vrot.slane %v6200_v0, %v13210_v26  ;;  %v6202_v15 = vmul.f32 %v16256_v32, %v16256_v32  ;;  %v6474_v45 = vrot.slane %v6199_v39, %v13210_v26 }
 0x455   :  { %v6116_v29 = vsel %vm2317_vm1, %v6020_v44, %v6115_v47  ;;  %v11014_v52 = vrot.slane %v5366_v50, 9  ;;  %v18805_v3 = vrot.slane %v16118_v61, %v13210_v26  ;;  %v16285_v16 = vmul.f32 %v16222_v48, %v16222_v48 }
 0x456   :  { %v6117_v28 = vsel %vm2319_vm2, %v6024_v42, %v6116_v29  ;;  %v6482_v0 = vrot.slane %v6201_v5, %v13210_v26  ;;  %v16291_v44 = vmul.f32 %v16224_v18, %v16224_v18  ;;  %v16295_v39 = vmul.f32 %v16226_v49, %v16226_v49 }
 0x457   :  { %v6114_v27 = vsel %vm2327_vm6, %v18805_v3, %v6113_v22  ;;  %v6577_v47 = vsel %vm2315_vm0, %v6478_v12, %v6474_v45  ;;  %v11015_v32 = vrot.slane %v5368_v53, 9  ;;  %v18806_v22 = vrot.slane %v16166_v23, %v13210_v26 }
 0x458   :  { %v5685_v48 = vmax.f32 %v5359_v2, %v11012_v25  ;;  %v5342_v29 = vrot.slane %v5077_v4, %v18757_v46  ;;  %v5349_v5 = vrot.slane %v5335_v14, %v18757_v46  ;;  %v6118_v42 = vsel %vm2321_vm3, %v6028_v34, %v6117_v28 }
 0x459   :  { %v6575_v3 = vsel %vm2325_vm5, %v18806_v22, %v6574_v7  ;;  %v6486_v1 = vrot.slane %v6202_v15, %v13210_v26  ;;  %v5686_v30 = vmax.f32 %v5367_v58, %v11013_v9  ;;  %v5687_v61 = vmax.f32 %v5366_v50, %v11014_v52  ;;  %v11016_v52 = vld [vmem:[%s18384_s5 + $0x80] sm:$0xff]  ;;  %v11017_v50 = vld [vmem:[%s18384_s5 + $0x88] sm:$0xff] }
 0x45a   :  { %v16307_v8 = vadd.f32 %v16184_v6, %v6114_v27  ;;  %v6040_v45 = vrot.slane %v16226_v49, %v13210_v26  ;;  %v6490_v23 = vrot.slane %v16254_v36, %v13210_v26  ;;  %v6578_v2 = vsel %vm2317_vm1, %v6482_v0, %v6577_v47 }
 0x45b   :  { %v18807_v4 = vrot.slane %v16189_v31, %v13210_v26  ;;  %v6494_v15 = vrot.slane %v16285_v16, %v13210_v26  ;;  %v5688_v9 = vmax.f32 %v5368_v53, %v11015_v32  ;;  %v6119_v58 = vsel %vm2323_vm4, %v6032_v55, %v6118_v42  ;;  %v11018_v32 = vld [vmem:[%s18384_s5 + $0x90] sm:$0xff]  ;;  %v11019_v53 = vld [vmem:[%s18384_s5 + $0x98] sm:$0xff] }
 0x45c   :  { %v16333_v36 = vmax.f32 %v5685_v48, 0.0  ;;  %v5350_v7 = vcombine.high %v5342_v29, %v5342_v29  ;;  %v6579_v14 = vsel %vm2319_vm2, %v6486_v1, %v6578_v2  ;;  %v16342_v12 = vmax.f32 %v5686_v30, 0.0  ;;  %v11020_v30 = vld [vmem:[%s18384_s5 + $0xa0] sm:$0xff] }
 0x45d   :  { %v16318_v34 = vsel %vm2327_vm6, %v18807_v4, %v6575_v3  ;;  %v16344_v25 = vmax.f32 %v5687_v61, 0.0  ;;  %v5351_v27 = vcombine.high %v5349_v5, %v5349_v5  ;;  %v11008_v16 = vrot.slane %v5342_v29, 9  ;;  %v11021_v61 = vld [vmem:[%s18384_s5 + $0xa8] sm:$0xff] }
 0x45e   :  { %v11009_v55 = vrot.slane %v5350_v7, 9  ;;  %v11010_v48 = vrot.slane %v5349_v5, 9  ;;  %v12468_v28 = vpack.c.bf16 %v11017_v50, %v11016_v52  ;;  %v18808_v0 = vrot.slane %v16224_v18, %v13210_v26 }
 0x45f   :  { %v16350_v22 = vmax.f32 %v5688_v9, 0.0  ;;  %v11011_v3 = vrot.slane %v5351_v27, 9  ;;  %v12472_v42 = vpack.c.bf16 %v11019_v53, %v11018_v32  ;;  %v6580_v1 = vsel %vm2321_vm3, %v6490_v23, %v6579_v14 }
 0x460   :  { %v6120_v47 = vsel %vm2325_vm5, %v18808_v0, %v6119_v58  ;;  %v5681_v2 = vmax.f32 %v5342_v29, %v11008_v16  ;;  %v5682_v4 = vmax.f32 %v5350_v7, %v11009_v55  ;;  %v5683_v52 = vmax.f32 %v5349_v5, %v11010_v48  ;;  %12469 = vmatprep.subr.bf16.mxu0 %v12468_v28  ;;  %v11023_v55 = vld [vmem:[%s18384_s5 + $0xb8] sm:$0xff] }
 0x461   :  { %v6060_v9 = vrot.slane %v16333_v36, %v13210_v26  ;;  %v6064_v50 = vrot.slane %v16342_v12, %v13210_v26  ;;  %v6068_v58 = vrot.slane %v16344_v25, %v13210_v26  ;;  %v5684_v32 = vmax.f32 %v5351_v27, %v11011_v3  ;;  %12471 = vmatpush3.bf16.msra.mxu0 %v12468_v28  ;;  %v11022_v27 = vld [vmem:[%s18384_s5 + $0xb0] sm:$0xff] }
 0x462   :  { %v16365_v53 = vmax.f32 %v5681_v2, 0.0  ;;  %v16367_v0 = vmax.f32 %v5682_v4, 0.0  ;;  %v16369_v23 = vmax.f32 %v5683_v52, 0.0  ;;  %12473 = vmatprep.subr.bf16.mxu0 %v12472_v42  ;;  %v12476_v29 = vpack.c.bf16 %v11021_v61, %v11020_v30 }
 0x463   :  { %v6121_v5 = vsel %vm2327_vm6, %v6040_v45, %v6120_v47  ;;  %v6581_v7 = vsel %vm2323_vm4, %v6494_v15, %v6580_v1  ;;  %v6211_v14 = vmul.f32 %v16333_v36, %v16333_v36  ;;  %v16375_v16 = vmax.f32 %v5684_v32, 0.0 }
 0x464   :  { %v6044_v48 = vrot.slane %v16365_v53, %v13210_v26  ;;  %v6048_v45 = vrot.slane %v16367_v0, %v13210_v26  ;;  %v6052_v15 = vrot.slane %v16369_v23, %v13210_v26  ;;  %v6207_v28 = vmul.f32 %v16365_v53, %v16365_v53 }
 0x465   :  { %v6056_v47 = vrot.slane %v16375_v16, %v13210_v26  ;;  %v6208_v3 = vmul.f32 %v16367_v0, %v16367_v0  ;;  %v6209_v30 = vmul.f32 %v16369_v23, %v16369_v23  ;;  %v6210_v61 = vmul.f32 %v16375_v16, %v16375_v16  ;;  %12475 = vmatpush3.bf16.msra.mxu0 %v12472_v42  ;;  %v11024_v42 = vld [vmem:[%s18384_s5 + $0xc0] sm:$0xff] }
 0x466   :  { %v6212_v1 = vmul.f32 %v16342_v12, %v16342_v12  ;;  %v6122_v2 = vsel %vm2315_vm0, %v6048_v45, %v6044_v48  ;;  %v6506_v4 = vrot.slane %v6207_v28, %v13210_v26  ;;  %12477 = vmatprep.subr.bf16.mxu0 %v12476_v29  ;;  %v12480_v52 = vpack.c.bf16 %v11023_v55, %v11022_v27  ;;  %v11025_v48 = vld [vmem:[%s18384_s5 + $0xc8] sm:$0xff] }
 0x467   :  { %v6123_v32 = vsel %vm2317_vm1, %v6052_v15, %v6122_v2  ;;  %v6510_v31 = vrot.slane %v6208_v3, %v13210_v26  ;;  %v6514_v6 = vrot.slane %v6209_v30, %v13210_v26  ;;  %v6518_v49 = vrot.slane %v6210_v61, %v13210_v26 }
 0x468   :  { %v18809_v45 = vrot.slane %v16291_v44, %v13210_v26  ;;  %v6072_v55 = vrot.slane %v16350_v22, %v13210_v26  ;;  %v6213_v15 = vmul.f32 %v16344_v25, %v16344_v25  ;;  %v6124_v28 = vsel %vm2319_vm2, %v6056_v47, %v6123_v32 }
 0x469   :  { %v6142_v3 = vadd.f32 %v16307_v8, %v6121_v5  ;;  %v6214_v30 = vmul.f32 %v16350_v22, %v16350_v22  ;;  %v6125_v61 = vsel %vm2321_vm3, %v6060_v9, %v6124_v28  ;;  %v6584_v2 = vsel %vm2315_vm0, %v6510_v31, %v6506_v4  ;;  %12479 = vmatpush3.bf16.msra.mxu0 %v12476_v29  ;;  %v11026_v29 = vld [vmem:[%s18384_s5 + $0xd0] sm:$0xff] }
 0x46a   :  { %v6582_v27 = vsel %vm2325_vm5, %v18809_v45, %v6581_v7  ;;  %v6522_v44 = vrot.slane %v6211_v14, %v13210_v26  ;;  %v6126_v7 = vsel %vm2323_vm4, %v6064_v50, %v6125_v61  ;;  %v6585_v45 = vsel %vm2317_vm1, %v6514_v6, %v6584_v2  ;;  %12481 = vmatprep.subr.bf16.mxu0 %v12480_v52  ;;  %v11027_v6 = vld [vmem:[%s18384_s5 + $0xd8] sm:$0xff]  ;;  %v11030_v61 = vld [vmem:[%s18384_s5 + $0xf0] sm:$0xff] }
 0x46b   :  { %v12484_v18 = vpack.c.bf16 %v11025_v48, %v11024_v42  ;;  %v18810_v47 = vrot.slane %v16295_v39, %v13210_v26  ;;  %v6526_v5 = vrot.slane %v6212_v1, %v13210_v26  ;;  %v6127_v9 = vsel %vm2325_vm5, %v6068_v58, %v6126_v7  ;;  %v11031_v2 = vld [vmem:[%s18384_s5 + $0xf8] sm:$0xff] }
 0x46c   :  { %v6586_v31 = vsel %vm2319_vm2, %v6518_v49, %v6585_v45  ;;  %v6603_v50 = vadd.f32 %v16204_v43, %v16318_v34  ;;  %v6530_v39 = vrot.slane %v6213_v15, %v13210_v26  ;;  %v6128_v14 = vsel %vm2327_vm6, %v6072_v55, %v6127_v9  ;;  %v11028_v34 = vld [vmem:[%s18384_s5 + $0xe0] sm:$0xff]  ;;  %v11029_v55 = vld [vmem:[%s18384_s5 + $0xe8] sm:$0xff] }
 0x46d   :  { %v6583_v8 = vsel %vm2327_vm6, %v18810_v47, %v6582_v27  ;;  %v6587_v1 = vsel %vm2321_vm3, %v6522_v44, %v6586_v31  ;;  %v6534_v58 = vrot.slane %v6214_v30, %v13210_v26  ;;  %v6143_v49 = vadd.f32 %v6142_v3, %v6128_v14  ;;  %12483 = vmatpush3.bf16.msra.mxu0 %v12480_v52 }
 0x46e   :  { %v6588_v4 = vsel %vm2323_vm4, %v6526_v5, %v6587_v1  ;;  %v6604_v32 = vadd.f32 %v6603_v50, %v6583_v8  ;;  %12485 = vmatprep.subr.bf16.mxu0 %v12484_v18  ;;  %v12488_v48 = vpack.c.bf16 %v11027_v6, %v11026_v29  ;;  %v12492_v3 = vpack.c.bf16 %v11029_v55, %v11028_v34  ;;  %v7221_v5 = vld [vmem:[%s18384_s5 + $0x8] sm:$0xff]  ;;  %v5080_v34 = vld [vmem:[%s18383_s4 + $0x2] sm:$0x1]  ;;  %v7226_v55 = vld [vmem:[%s18384_s5 + $0x30] sm:$0xff] }
 0x46f   :  { %v6589_v42 = vsel %vm2325_vm5, %v6530_v39, %v6588_v4  ;;  %v6144_v27 = vrot.slane %v6143_v49, 4  ;;  %v12496_v47 = vpack.c.bf16 %v11031_v2, %v11030_v61  ;;  %v5079_v4 = vld [vmem:[%s18383_s4 + $0x1] sm:$0x1]  ;;  %v7231_v61 = vld [vmem:[%s18384_s5 + $0x58] sm:$0xff] }
 0x470   :  { %v6590_v43 = vsel %vm2327_vm6, %v6534_v58, %v6589_v42  ;;  %v7223_v42 = vld [vmem:[%s18384_s5 + $0x18] sm:$0xff]  ;;  %v7232_v2 = vld [vmem:[%s18384_s5 + $0x60] sm:$0xff] }
 0x471   :  { %v6605_v15 = vadd.f32 %v6604_v32, %v6590_v43  ;;  %v6145_v28 = vadd.f32 %v6144_v27, %v6143_v49  ;;  %12487 = vmatpush3.bf16.msra.mxu0 %v12484_v18  ;;  %v7220_v18 = vld [vmem:[%s18384_s5] sm:$0xff]  ;;  %v7222_v32 = vld [vmem:[%s18384_s5 + $0x10] sm:$0xff]  ;;  %v7225_v27 = vld [vmem:[%s18384_s5 + $0x28] sm:$0xff] }
 0x472   :  { %12489 = vmatprep.subr.bf16.mxu0 %v12488_v48  ;;  %v16470_v6 = vpack.c.bf16 %v7221_v5, %v7220_v18  ;;  %v11032_v18 = vld [vmem:[%s18384_s5 + $0x100] sm:$0xff]  ;;  %v11033_v5 = vld [vmem:[%s18384_s5 + $0x108] sm:$0xff] }
 0x473   :  { %v6606_v52 = vrot.slane %v6605_v15, 4  ;;  %v6146_v30 = vrot.slane %v6145_v28, 2 }
 0x475   :  { %v6607_v44 = vadd.f32 %v6606_v52, %v6605_v15  ;;  %v6147_v7 = vadd.f32 %v6146_v30, %v6145_v28  ;;  %12491 = vmatpush3.bf16.msra.mxu0 %v12488_v48  ;;  %v7224_v48 = vld [vmem:[%s18384_s5 + $0x20] sm:$0xff]  ;;  %v7227_v15 = vld [vmem:[%s18384_s5 + $0x38] sm:$0xff]  ;;  %v7230_v30 = vld [vmem:[%s18384_s5 + $0x50] sm:$0xff] }
 0x476   :  { %12493 = vmatprep.subr.bf16.mxu0 %v12492_v3  ;;  %v7228_v28 = vld [vmem:[%s18384_s5 + $0x40] sm:$0xff] }
 0x477   :  { %v6608_v45 = vrot.slane %v6607_v44, 2  ;;  %v6148_v8 = vrot.slane %v6147_v7, 1 }
 0x479   :  { %v6609_v9 = vadd.f32 %v6608_v45, %v6607_v44  ;;  %v6149_v31 = vadd.f32 %v6148_v8, %v6147_v7  ;;  %12495 = vmatpush3.bf16.msra.mxu0 %v12492_v3  ;;  %v7229_v3 = vld [vmem:[%s18384_s5 + $0x48] sm:$0xff]  ;;  %v7234_v7 = vld [vmem:[%s18384_s5 + $0x70] sm:$0xff]  ;;  %v7235_v8 = vld [vmem:[%s18384_s5 + $0x78] sm:$0xff] }
 0x47a   :  { %12497 = vmatprep.subr.bf16.mxu0 %v12496_v47  ;;  %v7233_v44 = vld [vmem:[%s18384_s5 + $0x68] sm:$0xff] }
 0x47b   :  { %v6610_v29 = vrot.slane %v6609_v9, 1  ;;  %v6150_v50 = vmul.f32 0.015625, %v6149_v31  ;;  %v16530_v31 = vpack.c.bf16 %v7225_v27, %v7224_v48 }
 0x47d   :  { %v6611_v39 = vadd.f32 %v6610_v29, %v6609_v9  ;;  %v6613_v14 = vmul.f32 %v6150_v50, %v6150_v50  ;;  %12499 = vmatpush3.bf16.msra.mxu0 %v12496_v47  ;;  %v16528_v9 = vpack.c.bf16 %v7223_v42, %v7222_v32  ;;  %v16532_v29 = vpack.c.bf16 %v7227_v15, %v7226_v55 }
 0x47e   :  { %12501 = vmatprep.subr.bf16.mxu0 %v16470_v6 }
 0x47f   :  { %v6612_v1 = vmul.f32 0.015625, %v6611_v39 }
 0x481   :  { %v6614_v58 = vsub.f32 %v6612_v1, %v6613_v14  ;;  %v16537_v1 = vpack.c.bf16 %v7229_v3, %v7228_v28 }
 0x483   :  { %v6615_v49 = vadd.f32 1e-05, %v6614_v58  ;;  %v16539_v58 = vpack.c.bf16 %v7231_v61, %v7230_v30 }
 0x485   :  { %12930 = vrsqrt.f32 %v6615_v49  ;;  %v16541_v49 = vpack.c.bf16 %v7233_v44, %v7232_v2 }
 0x48f   :  { %v12931_v43 = vpop.eup %12930 }
 0x490   :  { %v6617_v52 = vmul.f32 %v12931_v43, %v5079_v4  ;;  %v16543_v4 = vpack.c.bf16 %v7235_v8, %v7234_v7  ;;  %v16545_v43 = vpack.c.bf16 %v11033_v5, %v11032_v18 }
 0x492   :  { %v6618_v45 = vmul.f32 %v6617_v52, %v6150_v50  ;;  %v6623_v47 = vrot.slane %v6617_v52, %v13210_v26  ;;  %18811 = vst [vmem:[#allocation41_spill] sm:$0xff] %v16543_v4  ;;  %18812 = vst [vmem:[#allocation43_spill] sm:$0xff] %v16545_v43 }
 0x494   :  { %v6619_v50 = vsub.f32 %v5080_v34, %v6618_v45  ;;  %v6625_v39 = vcombine.high %v6623_v47, %v6623_v47  ;;  %v16535_v14 = vrot.slane %v6623_v47, %v18757_v46 }
 0x496   :  { %v16548_v32 = vrot.slane %v6625_v39, %v18757_v46  ;;  %v16552_v42 = vcombine.high %v16535_v14, %v16535_v14  ;;  %v16555_v48 = vrot.slane %v16535_v14, 1  ;;  %v6710_v27 = vmul.f32 %v16535_v14, %v16365_v53 }
 0x497   :  { %v6721_v34 = vrot.slane %v6619_v50, %v13210_v26  ;;  %v6654_v55 = vmul.f32 %v16535_v14, %v15632_v56  ;;  %v16564_v15 = vmul.f32 %v16535_v14, %v15733_v17  ;;  %v16568_v28 = vmul.f32 %v16535_v14, %v15826_v62 }
 0x498   :  { %v16572_v52 = vcombine.high %v16548_v32, %v16548_v32  ;;  %v16575_v3 = vrot.slane %v16552_v42, 1  ;;  %v16578_v53 = vrot.slane %v16548_v32, 1  ;;  %v6711_v56 = vmul.f32 %v16555_v48, %v16367_v0 }
 0x499   :  { %v6712_v17 = vmul.f32 %v16552_v42, %v16369_v23  ;;  %v6714_v62 = vmul.f32 %v16548_v32, %v16333_v36  ;;  %v6723_v30 = vcombine.high %v6721_v34, %v6721_v34  ;;  %v16587_v61 = vrot.slane %v6721_v34, %v18757_v46 }
 0x49a   :  { %v16590_v2 = vrot.slane %v16572_v52, 1  ;;  %v6713_v44 = vmul.f32 %v16575_v3, %v16375_v16  ;;  %v6715_v7 = vmul.f32 %v16578_v53, %v16342_v12  ;;  %v6716_v0 = vmul.f32 %v16572_v52, %v16344_v25 }
 0x49b   :  { %v16599_v23 = vrot.slane %v6723_v30, %v18757_v46  ;;  %v16603_v36 = vcombine.high %v16587_v61, %v16587_v61  ;;  %v16606_v45 = vrot.slane %v16587_v61, 1  ;;  %v6808_v47 = vadd.f32 %v16587_v61, %v6710_v27 }
 0x49c   :  { %v6717_v16 = vmul.f32 %v16590_v2, %v16350_v22  ;;  %v6655_v12 = vmul.f32 %v16555_v48, %v15634_v40  ;;  %v6656_v25 = vmul.f32 %v16552_v42, %v15636_v60  ;;  %v6657_v8 = vmul.f32 %v16575_v3, %v15642_v10 }
 0x49d   :  { %v16619_v18 = vcombine.high %v16599_v23, %v16599_v23  ;;  %v16622_v5 = vrot.slane %v16603_v36, 1  ;;  %v16625_v50 = vrot.slane %v16599_v23, 1  ;;  %v6809_v22 = vadd.f32 %v16606_v45, %v6711_v56 }
 0x49e   :  { %v6810_v40 = vadd.f32 %v16603_v36, %v6712_v17  ;;  %v6812_v39 = vadd.f32 %v16599_v23, %v6714_v62  ;;  %v7111_v60 = vrot.slane %v6808_v47, %v13210_v26  ;;  %v6658_v10 = vmul.f32 %v16548_v32, %v15663_v24 }
 0x49f   :  { %v16634_v27 = vrot.slane %v16619_v18, 1  ;;  %v6811_v34 = vadd.f32 %v16622_v5, %v6713_v44  ;;  %v6813_v30 = vadd.f32 %v16625_v50, %v6715_v7  ;;  %v6814_v46 = vadd.f32 %v16619_v18, %v6716_v0 }
 0x4a0   :  { %v7115_v56 = vrot.slane %v6809_v22, %v13210_v26  ;;  %v7119_v17 = vrot.slane %v6810_v40, %v13210_v26  ;;  %v7127_v62 = vrot.slane %v6812_v39, %v13210_v26  ;;  %v6659_v47 = vmul.f32 %v16578_v53, %v15673_v33 }
 0x4a1   :  { %v6815_v24 = vadd.f32 %v16634_v27, %v6717_v16  ;;  %v7123_v43 = vrot.slane %v6811_v34, %v13210_v26  ;;  %v7131_v4 = vrot.slane %v6813_v30, %v13210_v26  ;;  %v7135_v44 = vrot.slane %v6814_v46, %v13210_v26 }
 0x4a2   :  { %v7189_v7 = vsel %vm2315_vm0, %v7115_v56, %v7111_v60  ;;  %v6660_v0 = vmul.f32 %v16572_v52, %v15675_v35  ;;  %v6661_v22 = vmul.f32 %v16590_v2, %v15679_v51  ;;  %v6752_v40 = vadd.f32 %v16587_v61, %v6654_v55 }
 0x4a3   :  { %v7139_v33 = vrot.slane %v6815_v24, %v13210_v26  ;;  %v7190_v16 = vsel %vm2317_vm1, %v7119_v17, %v7189_v7  ;;  %v6753_v39 = vadd.f32 %v16606_v45, %v6655_v12  ;;  %v6754_v34 = vadd.f32 %v16603_v36, %v6656_v25 }
 0x4a4   :  { %v7191_v46 = vsel %vm2319_vm2, %v7123_v43, %v7190_v16  ;;  %v6755_v60 = vadd.f32 %v16622_v5, %v6657_v8  ;;  %v6756_v30 = vadd.f32 %v16599_v23, %v6658_v10  ;;  %v6757_v35 = vadd.f32 %v16625_v50, %v6659_v47 }
 0x4a5   :  { %v7192_v51 = vsel %vm2321_vm3, %v7127_v62, %v7191_v46  ;;  %v6758_v55 = vadd.f32 %v16619_v18, %v6660_v0  ;;  %v6759_v56 = vadd.f32 %v16634_v27, %v6661_v22  ;;  %v6887_v17 = vrot.slane %v6752_v40, %v13210_v26  ;;  %v18813_v46 = vld [vmem:[#allocation7_spill] sm:$0xff] }
 0x4a6   :  { %v7193_v12 = vsel %vm2323_vm4, %v7131_v4, %v7192_v51  ;;  %v6891_v25 = vrot.slane %v6753_v39, %v13210_v26  ;;  %v6895_v43 = vrot.slane %v6754_v34, %v13210_v26  ;;  %v6899_v8 = vrot.slane %v6755_v60, %v13210_v26 }
 0x4a7   :  { %v7194_v10 = vsel %vm2325_vm5, %v7135_v44, %v7193_v12  ;;  %v6903_v47 = vrot.slane %v6756_v30, %v13210_v26  ;;  %v6907_v62 = vrot.slane %v6757_v35, %v13210_v26  ;;  %v6911_v24 = vrot.slane %v6758_v55, %v13210_v26 }
 0x4a8   :  { %v16675_v7 = vsel %vm2327_vm6, %v7139_v33, %v7194_v10  ;;  %v6915_v0 = vrot.slane %v6759_v56, %v13210_v26  ;;  %v7140_v4 = vsel %vm2315_vm0, %v6891_v25, %v6887_v17  ;;  %v6663_v22 = vmul.f32 %v16555_v48, %v15737_v54 }
 0x4a9   :  { %7211 = vst [vmem:[#allocation2 + $0x61] sm:$0xff] %v16675_v7  ;;  %v7141_v44 = vsel %vm2317_vm1, %v6895_v43, %v7140_v4  ;;  %v6664_v40 = vmul.f32 %v16552_v42, %v15739_v19  ;;  %v6665_v16 = vmul.f32 %v16575_v3, %v15741_v11  ;;  %v6666_v33 = vmul.f32 %v16548_v32, %v15735_v20 }
 0x4aa   :  { %v7142_v39 = vsel %vm2319_vm2, %v6899_v8, %v7141_v44  ;;  %v6667_v34 = vmul.f32 %v16578_v53, %v15766_v13  ;;  %v6668_v54 = vmul.f32 %v16572_v52, %v15761_v57  ;;  %v6669_v60 = vmul.f32 %v16590_v2, %v18813_v46  ;;  %v18815_v44 = vld [vmem:[#allocation9_spill] sm:$0xff]  ;;  %v18818_v46 = vld [vmem:[#allocation10_spill] sm:$0xff] }
 0x4ab   :  { %v7143_v30 = vsel %vm2321_vm3, %v6903_v47, %v7142_v39  ;;  %v6760_v19 = vadd.f32 %v16587_v61, %v16564_v15  ;;  %v6761_v11 = vadd.f32 %v16606_v45, %v6663_v22  ;;  %v6762_v20 = vadd.f32 %v16603_v36, %v6664_v40  ;;  %v18814_v22 = vld [vmem:[#allocation14_spill] sm:$0xff] }
 0x4ac   :  { %v7144_v35 = vsel %vm2323_vm4, %v6907_v62, %v7143_v30  ;;  %v6763_v51 = vadd.f32 %v16622_v5, %v6665_v16  ;;  %v6764_v13 = vadd.f32 %v16599_v23, %v6666_v33  ;;  %v6765_v57 = vadd.f32 %v16625_v50, %v6667_v34  ;;  %v18816_v16 = vld [vmem:[#allocation13_spill] sm:$0xff]  ;;  %v18817_v34 = vld [vmem:[#allocation8_spill] sm:$0xff]  ;;  %v18819_v30 = vld [vmem:[#allocation11_spill] sm:$0xff] }
 0x4ad   :  { %v7145_v55 = vsel %vm2325_vm5, %v6911_v24, %v7144_v35  ;;  %v6766_v56 = vadd.f32 %v16619_v18, %v6668_v54  ;;  %v6767_v17 = vadd.f32 %v16634_v27, %v6669_v60  ;;  %v6919_v15 = vrot.slane %v6760_v19, %v13210_v26 }
 0x4ae   :  { %v7146_v12 = vsel %vm2327_vm6, %v6915_v0, %v7145_v55  ;;  %v6923_v25 = vrot.slane %v6761_v11, %v13210_v26  ;;  %v6927_v43 = vrot.slane %v6762_v20, %v13210_v26  ;;  %v6931_v8 = vrot.slane %v6763_v51, %v13210_v26  ;;  %v18820_v20 = vld [vmem:[#allocation12_spill] sm:$0xff] }
 0x4af   :  { %7204 = vst [vmem:[#allocation2 + $0x1] sm:$0xff] %v7146_v12  ;;  %11881 = vmatprep.mubr.f32.mxu0 %v7146_v12  ;;  %v6935_v10 = vrot.slane %v6764_v13, %v13210_v26  ;;  %v6939_v47 = vrot.slane %v6765_v57, %v13210_v26  ;;  %v6943_v62 = vrot.slane %v6766_v56, %v13210_v26 }
 0x4b0   :  { %v6947_v24 = vrot.slane %v6767_v17, %v13210_v26  ;;  %v7147_v4 = vsel %vm2315_vm0, %v6923_v25, %v6919_v15  ;;  %v6671_v0 = vmul.f32 %v16555_v48, %v18814_v22  ;;  %v6672_v40 = vmul.f32 %v16552_v42, %v18815_v44 }
 0x4b1   :  { %v6673_v33 = vmul.f32 %v16575_v3, %v18816_v16  ;;  %v7148_v39 = vsel %vm2317_vm1, %v6927_v43, %v7147_v4  ;;  %v6674_v54 = vmul.f32 %v16548_v32, %v18817_v34  ;;  %v6675_v60 = vmul.f32 %v16578_v53, %v18818_v46  ;;  %v18823_v46 = vld [vmem:[#allocation16_spill] sm:$0xff] }
 0x4b2   :  { %v6676_v19 = vmul.f32 %v16572_v52, %v18819_v30  ;;  %v7149_v11 = vsel %vm2319_vm2, %v6931_v8, %v7148_v39  ;;  %v6677_v35 = vmul.f32 %v16590_v2, %v18820_v20  ;;  %v6768_v51 = vadd.f32 %v16587_v61, %v16568_v28  ;;  %v18821_v39 = vld [vmem:[#allocation20_spill] sm:$0xff]  ;;  %v18824_v30 = vld [vmem:[#allocation22_spill] sm:$0xff] }
 0x4b3   :  { %v6769_v13 = vadd.f32 %v16606_v45, %v6671_v0  ;;  %v7150_v57 = vsel %vm2321_vm3, %v6935_v10, %v7149_v11  ;;  %v6770_v55 = vadd.f32 %v16603_v36, %v6672_v40  ;;  %v6771_v56 = vadd.f32 %v16622_v5, %v6673_v33 }
 0x4b4   :  { %v6772_v17 = vadd.f32 %v16599_v23, %v6674_v54  ;;  %v7151_v15 = vsel %vm2323_vm4, %v6939_v47, %v7150_v57  ;;  %v6773_v12 = vadd.f32 %v16625_v50, %v6675_v60  ;;  %v6774_v25 = vadd.f32 %v16619_v18, %v6676_v19 }
 0x4b5   :  { %v6775_v43 = vadd.f32 %v16634_v27, %v6677_v35  ;;  %v7152_v28 = vsel %vm2325_vm5, %v6943_v62, %v7151_v15  ;;  %v6951_v8 = vrot.slane %v6768_v51, %v13210_v26  ;;  %v6955_v10 = vrot.slane %v6769_v13, %v13210_v26  ;;  %v18825_v51 = vld [vmem:[#allocation15_spill] sm:$0xff] }
 0x4b6   :  { %v6959_v4 = vrot.slane %v6770_v55, %v13210_v26  ;;  %v7153_v22 = vsel %vm2327_vm6, %v6947_v24, %v7152_v28  ;;  %v6963_v0 = vrot.slane %v6771_v56, %v13210_v26  ;;  %v6967_v47 = vrot.slane %v6772_v17, %v13210_v26  ;;  %v16753_v40 = vld [vmem:[#allocation2] sm:$0xff]  ;;  %v18826_v55 = vld [vmem:[#allocation21_spill] sm:$0xff] }
 0x4b7   :  { %v6971_v44 = vrot.slane %v6773_v12, %v13210_v26  ;;  %7205 = vst [vmem:[#allocation2 + $0x9] sm:$0xff] %v7153_v22  ;;  %11882 = vmatmul.mubr.f32.vlgmr.msra.gmra.mrb[32].mxu0 %v7153_v22  ;;  %v6975_v62 = vrot.slane %v6774_v25, %v13210_v26  ;;  %v6979_v16 = vrot.slane %v6775_v43, %v13210_v26  ;;  %v18822_v24 = vmov 0.0  }
 0x4b8   :  { %v7154_v33 = vsel %vm2315_vm0, %v6955_v10, %v6951_v8  ;;  %v6678_v34 = vmul.f32 %v16535_v14, %v18821_v39  ;;  %8535 = vst [vmem:[#allocation2] sm:$0x1] %v18822_v24  ;;  %12503 = vmatpush3.bf16.msra.mxu0 %v16470_v6  ;;  %v6679_v60 = vmul.f32 %v16555_v48, %v18823_v46  ;;  %v18827_v39 = vld [vmem:[#allocation27_spill] sm:$0xff] }
 0x4b9   :  { %v7155_v54 = vsel %vm2317_vm1, %v6959_v4, %v7154_v33  ;;  %v6680_v19 = vmul.f32 %v16552_v42, %v18824_v30  ;;  %v6681_v11 = vmul.f32 %v16575_v3, %v15949_v21  ;;  %12505 = vmatprep.subr.bf16.mxu0 %v16528_v9  ;;  %v6682_v35 = vmul.f32 %v16548_v32, %v15884_v59  ;;  %v18829_v30 = vld [vmem:[#allocation28_spill] sm:$0xff] }
 0x4ba   :  { %v7156_v20 = vsel %vm2319_vm2, %v6963_v0, %v7155_v54  ;;  %v6683_v6 = vmul.f32 %v16578_v53, %v18825_v51  ;;  %v6684_v13 = vmul.f32 %v16572_v52, %v15899_v38  ;;  %v6685_v56 = vmul.f32 %v16590_v2, %v18826_v55  ;;  %v18828_v54 = vld [vmem:[#allocation29_spill] sm:$0xff] }
 0x4bb   :  { %v7157_v57 = vsel %vm2321_vm3, %v6967_v47, %v7156_v20  ;;  %v6776_v21 = vadd.f32 %v16587_v61, %v6678_v34  ;;  %v6777_v17 = vadd.f32 %v16606_v45, %v6679_v60  ;;  %v6778_v12 = vadd.f32 %v16603_v36, %v6680_v19 }
 0x4bc   :  { %v7158_v15 = vsel %vm2323_vm4, %v6971_v44, %v7157_v57  ;;  %v6779_v59 = vadd.f32 %v16622_v5, %v6681_v11  ;;  %v6780_v25 = vadd.f32 %v16599_v23, %v6682_v35  ;;  %v6781_v38 = vadd.f32 %v16625_v50, %v6683_v6  ;;  %12507 = vmatpush3.bf16.msra.mxu0 %v16528_v9  ;;  %v18830_v11 = vld [vmem:[#allocation30_spill] sm:$0xff]  ;;  %v18831_v35 = vld [vmem:[#allocation17_spill] sm:$0xff] }
 0x4bd   :  { %v7159_v43 = vsel %vm2325_vm5, %v6975_v62, %v7158_v15  ;;  %v6782_v28 = vadd.f32 %v16619_v18, %v6684_v13  ;;  %v6783_v8 = vadd.f32 %v16634_v27, %v6685_v56  ;;  %v6983_v4 = vrot.slane %v6776_v21, %v13210_v26  ;;  %12509 = vmatprep.subr.bf16.mxu0 %v16530_v31  ;;  %v18832_v57 = vld [vmem:[#allocation18_spill] sm:$0xff]  ;;  %v18833_v56 = vld [vmem:[#allocation19_spill] sm:$0xff] }
 0x4be   :  { %v7160_v10 = vsel %vm2327_vm6, %v6979_v16, %v7159_v43  ;;  %v6987_v22 = vrot.slane %v6777_v17, %v13210_v26  ;;  %v6991_v0 = vrot.slane %v6778_v12, %v13210_v26  ;;  %v6995_v47 = vrot.slane %v6779_v59, %v13210_v26 }
 0x4bf   :  { %7206 = vst [vmem:[#allocation2 + $0x11] sm:$0xff] %v7160_v10  ;;  %11884 = vmatprep.mubr.f32.mxu0 %v7160_v10  ;;  %v6999_v44 = vrot.slane %v6780_v25, %v13210_v26  ;;  %v7003_v62 = vrot.slane %v6781_v38, %v13210_v26  ;;  %v7007_v9 = vrot.slane %v6782_v28, %v13210_v26 }
 0x4c0   :  { %v7011_v16 = vrot.slane %v6783_v8, %v13210_v26  ;;  %v7161_v33 = vsel %vm2315_vm0, %v6987_v22, %v6983_v4  ;;  %v6686_v34 = vmul.f32 %v16535_v14, %v18827_v39  ;;  %v6687_v46 = vmul.f32 %v16555_v48, %v18828_v54  ;;  %12511 = vmatpush3.bf16.msra.mxu0 %v16530_v31 }
 0x4c1   :  { %v7162_v60 = vsel %vm2317_vm1, %v6991_v0, %v7161_v33  ;;  %v6688_v19 = vmul.f32 %v16552_v42, %v18829_v30  ;;  %v6689_v20 = vmul.f32 %v16575_v3, %v18830_v11  ;;  %v6690_v51 = vmul.f32 %v16548_v32, %v18831_v35  ;;  %12513 = vmatprep.subr.bf16.mxu0 %v16532_v29  ;;  %v18836_v30 = vld [vmem:[#allocation26_spill] sm:$0xff] }
 0x4c2   :  { %v7163_v6 = vsel %vm2319_vm2, %v6995_v47, %v7162_v60  ;;  %v6691_v13 = vmul.f32 %v16578_v53, %v16001_v41  ;;  %v6692_v55 = vmul.f32 %v16572_v52, %v18832_v57  ;;  %v6693_v21 = vmul.f32 %v16590_v2, %v18833_v56  ;;  %v18838_v57 = vld [vmem:[#allocation23_spill] sm:$0xff]  ;;  %v18839_v56 = vld [vmem:[#allocation24_spill] sm:$0xff] }
 0x4c3   :  { %v7164_v17 = vsel %vm2321_vm3, %v6999_v44, %v7163_v6  ;;  %v6784_v15 = vadd.f32 %v16587_v61, %v6686_v34  ;;  %v6785_v12 = vadd.f32 %v16606_v45, %v6687_v46  ;;  %v6786_v31 = vadd.f32 %v16603_v36, %v6688_v19  ;;  %v18834_v34 = vld [vmem:[#allocation25_spill] sm:$0xff]  ;;  %v18835_v46 = vld [vmem:[#allocation35_spill] sm:$0xff] }
 0x4c4   :  { %v7165_v59 = vsel %vm2323_vm4, %v7003_v62, %v7164_v17  ;;  %v6787_v41 = vadd.f32 %v16622_v5, %v6689_v20  ;;  %v6788_v25 = vadd.f32 %v16599_v23, %v6690_v51  ;;  %v6789_v43 = vadd.f32 %v16625_v50, %v6691_v13  ;;  %12515 = vmatpush3.bf16.msra.mxu0 %v16532_v29  ;;  %v18837_v20 = vld [vmem:[#allocation36_spill] sm:$0xff] }
 0x4c5   :  { %v7166_v38 = vsel %vm2325_vm5, %v7007_v9, %v7165_v59  ;;  %v6790_v28 = vadd.f32 %v16619_v18, %v6692_v55  ;;  %v6791_v8 = vadd.f32 %v16634_v27, %v6693_v21  ;;  %v7015_v10 = vrot.slane %v6784_v15, %v13210_v26  ;;  %12517 = vmatprep.subr.bf16.mxu0 %v16537_v1 }
 0x4c6   :  { %v7167_v4 = vsel %vm2327_vm6, %v7011_v16, %v7166_v38  ;;  %v7019_v22 = vrot.slane %v6785_v12, %v13210_v26  ;;  %v7023_v0 = vrot.slane %v6786_v31, %v13210_v26  ;;  %v7027_v47 = vrot.slane %v6787_v41, %v13210_v26  ;;  %v16840_v44 = vld [vmem:[#allocation2 + $0x10] sm:$0xff] }
 0x4c7   :  { %v16842_v62 = vld [vmem:[#allocation2 + $0xa] sm:$0xff]  ;;  %7207 = vst [vmem:[#allocation2 + $0x19] sm:$0xff] %v7167_v4  ;;  %11885 = vmatmul.mubr.f32.gmra.mrb[34].mxu0 %v7167_v4  ;;  %v7031_v9 = vrot.slane %v6788_v25, %v13210_v26  ;;  %v7035_v29 = vrot.slane %v6789_v43, %v13210_v26  ;;  %v7039_v16 = vrot.slane %v6790_v28, %v13210_v26 }
 0x4c8   :  { %v7043_v33 = vrot.slane %v6791_v8, %v13210_v26  ;;  %8537 = vst [vmem:[#allocation2 + $0x11] sm:$0x1] %v18822_v24  ;;  %v7168_v39 = vsel %vm2315_vm0, %v7019_v22, %v7015_v10  ;;  %v6694_v54 = vmul.f32 %v16535_v14, %v18834_v34  ;;  %v6695_v60 = vmul.f32 %v16555_v48, %v18835_v46 }
 0x4c9   :  { %v6696_v19 = vmul.f32 %v16552_v42, %v18836_v30  ;;  %v7169_v11 = vsel %vm2317_vm1, %v7023_v0, %v7168_v39  ;;  %v6697_v35 = vmul.f32 %v16575_v3, %v18837_v20  ;;  %v6698_v51 = vmul.f32 %v16548_v32, %v16098_v37  ;;  %12519 = vmatpush3.bf16.msra.mxu0 %v16537_v1  ;;  %v18841_v39 = vld [vmem:[#allocation40_spill] sm:$0xff]  ;;  %v18843_v30 = vld [vmem:[#allocation42_spill] sm:$0xff] }
 0x4ca   :  { %v6699_v6 = vmul.f32 %v16578_v53, %v16109_v63  ;;  %v7170_v13 = vsel %vm2319_vm2, %v7027_v47, %v7169_v11  ;;  %v6700_v55 = vmul.f32 %v16572_v52, %v18838_v57  ;;  %v6701_v21 = vmul.f32 %v16590_v2, %v18839_v56  ;;  %12521 = vmatprep.subr.bf16.mxu0 %v16539_v58  ;;  %v18844_v11 = vld [vmem:[#allocation37_spill] sm:$0xff] }
 0x4cb   :  { %v6792_v17 = vadd.f32 %v16587_v61, %v6694_v54  ;;  %v7171_v15 = vsel %vm2321_vm3, %v7031_v9, %v7170_v13  ;;  %v6793_v37 = vadd.f32 %v16606_v45, %v6695_v60  ;;  %v6794_v63 = vadd.f32 %v16603_v36, %v6696_v19  ;;  %v18842_v54 = vld [vmem:[#allocation34_spill] sm:$0xff]  ;;  %v18847_v13 = vld [vmem:[#allocation32_spill] sm:$0xff] }
 0x4cc   :  { %v6795_v1 = vadd.f32 %v16622_v5, %v6697_v35  ;;  %v7172_v12 = vsel %vm2323_vm4, %v7035_v29, %v7171_v15  ;;  %v6796_v31 = vadd.f32 %v16599_v23, %v6698_v51  ;;  %v6797_v59 = vadd.f32 %v16625_v50, %v6699_v6  ;;  %v18845_v35 = vld [vmem:[#allocation38_spill] sm:$0xff]  ;;  %v18846_v6 = vld [vmem:[#allocation31_spill] sm:$0xff] }
 0x4cd   :  { %v6798_v41 = vadd.f32 %v16619_v18, %v6700_v55  ;;  %v7173_v25 = vsel %vm2325_vm5, %v7039_v16, %v7172_v12  ;;  %v6799_v43 = vadd.f32 %v16634_v27, %v6701_v21  ;;  %v7047_v38 = vrot.slane %v6792_v17, %v13210_v26  ;;  %12523 = vmatpush3.bf16.msra.mxu0 %v16539_v58  ;;  %v18840_v16 = vld [vmem:[#allocation33_spill] sm:$0xff] }
 0x4ce   :  { %v7051_v28 = vrot.slane %v6793_v37, %v13210_v26  ;;  %v7174_v8 = vsel %vm2327_vm6, %v7043_v33, %v7173_v25  ;;  %v7055_v10 = vrot.slane %v6794_v63, %v13210_v26  ;;  %v7059_v4 = vrot.slane %v6795_v1, %v13210_v26  ;;  %12525 = vmatprep.subr.bf16.mxu0 %v16541_v49  ;;  %v18848_v55 = vld [vmem:[#allocation41_spill] sm:$0xff] }
 0x4cf   :  { %v7063_v22 = vrot.slane %v6796_v31, %v13210_v26  ;;  %7208 = vst [vmem:[#allocation2 + $0x49] sm:$0xff] %v7174_v8  ;;  %11887 = vmatprep.mubr.f32.mxu0 %v7174_v8  ;;  %v7067_v0 = vrot.slane %v6797_v59, %v13210_v26  ;;  %v7071_v47 = vrot.slane %v6798_v41, %v13210_v26 }
 0x4d0   :  { %v7075_v9 = vrot.slane %v6799_v43, %v13210_v26  ;;  %v7175_v58 = vsel %vm2315_vm0, %v7051_v28, %v7047_v38  ;;  %v6702_v33 = vmul.f32 %v16535_v14, %v18840_v16  ;;  %v6703_v34 = vmul.f32 %v16555_v48, %v18841_v39  ;;  %v11034_v38 = vld [vmem:[%s18384_s5 + $0x110] sm:$0xff]  ;;  %v11035_v28 = vld [vmem:[%s18384_s5 + $0x118] sm:$0xff]  ;;  %v11040_v16 = vld [vmem:[%s18384_s5 + $0x140] sm:$0xff] }
 0x4d1   :  { %v7176_v29 = vsel %vm2317_vm1, %v7055_v10, %v7175_v58  ;;  %v6704_v46 = vmul.f32 %v16552_v42, %v18842_v54  ;;  %v6705_v19 = vmul.f32 %v16575_v3, %v18843_v30  ;;  %v6706_v20 = vmul.f32 %v16548_v32, %v18844_v11  ;;  %12527 = vmatpush3.bf16.msra.mxu0 %v16541_v49  ;;  %v7213_v10 = vld [vmem:[#allocation2 + $0x8] sm:$0xff]  ;;  %v11039_v58 = vld [vmem:[%s18384_s5 + $0x138] sm:$0xff]  ;;  %v11042_v54 = vld [vmem:[%s18384_s5 + $0x150] sm:$0xff] }
 0x4d2   :  { %v7177_v60 = vsel %vm2319_vm2, %v7059_v4, %v7176_v29  ;;  %v6707_v51 = vmul.f32 %v16578_v53, %v18845_v35  ;;  %v6708_v48 = vmul.f32 %v16572_v52, %v18846_v6  ;;  %v6709_v42 = vmul.f32 %v16590_v2, %v18847_v13  ;;  %12529 = vmatprep.subr.bf16.mxu0 %v18848_v55  ;;  %v11036_v4 = vld [vmem:[%s18384_s5 + $0x120] sm:$0xff]  ;;  %v11045_v11 = vld [vmem:[%s18384_s5 + $0x168] sm:$0xff]  ;;  %v11046_v35 = vld [vmem:[%s18384_s5 + $0x170] sm:$0xff] }
 0x4d3   :  { %v7178_v14 = vsel %vm2321_vm3, %v7063_v22, %v7177_v60  ;;  %v6800_v57 = vadd.f32 %v16587_v61, %v6702_v33  ;;  %v6801_v32 = vadd.f32 %v16606_v45, %v6703_v34  ;;  %v6802_v53 = vadd.f32 %v16603_v36, %v6704_v46  ;;  %v11037_v22 = vld [vmem:[%s18384_s5 + $0x128] sm:$0xff]  ;;  %v11043_v46 = vld [vmem:[%s18384_s5 + $0x158] sm:$0xff] }
 0x4d4   :  { %v7179_v3 = vsel %vm2323_vm4, %v7067_v0, %v7178_v14  ;;  %v6803_v49 = vadd.f32 %v16622_v5, %v6705_v19  ;;  %v6804_v21 = vadd.f32 %v16599_v23, %v6706_v20  ;;  %v6805_v52 = vadd.f32 %v16625_v50, %v6707_v51  ;;  %v11041_v33 = vld [vmem:[%s18384_s5 + $0x148] sm:$0xff]  ;;  %v11044_v19 = vld [vmem:[%s18384_s5 + $0x160] sm:$0xff]  ;;  %v11047_v51 = vld [vmem:[%s18384_s5 + $0x178] sm:$0xff] }
 0x4d5   :  { %v7180_v56 = vsel %vm2325_vm5, %v7071_v47, %v7179_v3  ;;  %v6806_v2 = vadd.f32 %v16619_v18, %v6708_v48  ;;  %v6807_v17 = vadd.f32 %v16634_v27, %v6709_v42  ;;  %v7079_v15 = vrot.slane %v6800_v57, %v13210_v26  ;;  %12531 = vmatpush3.bf16.msra.mxu0 %v18848_v55  ;;  %v18849_v18 = vld [vmem:[#allocation43_spill] sm:$0xff]  ;;  %v7471_v60 = vld [vmem:[#allocation2 + $0x2] sm:$0xff]  ;;  %v7473_v6 = vld [vmem:[#allocation2 + $0x12] sm:$0xff] }
 0x4d6   :  { %v7181_v61 = vsel %vm2327_vm6, %v7075_v9, %v7180_v56  ;;  %v7083_v45 = vrot.slane %v6801_v32, %v13210_v26  ;;  %v7087_v36 = vrot.slane %v6802_v53, %v13210_v26  ;;  %v7091_v23 = vrot.slane %v6803_v49, %v13210_v26  ;;  %v7216_v5 = vld [vmem:[#allocation2 + $0x48] sm:$0xff]  ;;  %12533 = vmatprep.subr.bf16.mxu0 %v18849_v18  ;;  %v11038_v9 = vld [vmem:[%s18384_s5 + $0x130] sm:$0xff]  ;;  %v7474_v48 = vld [vmem:[#allocation2 + $0x1a] sm:$0xff] }
 0x4d7   :  { %7209 = vst [vmem:[#allocation2 + $0x51] sm:$0xff] %v7181_v61  ;;  %11888 = vmatmul.mubr.f32.gmra.mrb[36].mxu0 %v7181_v61  ;;  %8536 = vst [vmem:[#allocation2 + $0x48] sm:$0x1] %v18822_v24  ;;  %v7095_v27 = vrot.slane %v6804_v21, %v13210_v26  ;;  %v7099_v63 = vrot.slane %v6805_v52, %v13210_v26  ;;  %v7103_v12 = vrot.slane %v6806_v2, %v13210_v26  ;;  %v7478_v57 = vld [vmem:[#allocation2 + $0x62] sm:$0xff]  ;;  %v16994_v55 = vld [vmem:[%s18385_s6] ss:$0 sm:$0xff] }
 0x4d8   :  { %v7182_v50 = vsel %vm2315_vm0, %v7083_v45, %v7079_v15  ;;  %v7107_v59 = vrot.slane %v6807_v17, %v13210_v26  ;;  %v12536_v8 = vpack.c.bf16 %v11035_v28, %v11034_v38  ;;  %v12540_v0 = vpack.c.bf16 %v11037_v22, %v11036_v4  ;;  %v11081_v53 = vld [vmem:[%s18386_s7 + $0x80] sm:$0xff]  ;;  %v11082_v49 = vld [vmem:[%s18386_s7 + $0x88] sm:$0xff]  ;;  %v18850_v2 = vld [vmem:[#allocation6_spill] sm:$0xff] }
 0x4d9   :  { %v7183_v37 = vsel %vm2317_vm1, %v7087_v36, %v7182_v50  ;;  %v12548_v39 = vpack.c.bf16 %v11041_v33, %v11040_v16  ;;  %v12552_v30 = vpack.c.bf16 %v11043_v46, %v11042_v54  ;;  %v12556_v20 = vpack.c.bf16 %v11045_v11, %v11044_v19 }
 0x4da   :  { %v7184_v1 = vsel %vm2319_vm2, %v7091_v23, %v7183_v37  ;;  %v12560_v14 = vpack.c.bf16 %v11047_v51, %v11046_v35  ;;  %v12564_v21 = vpack.c.bf16 %v11082_v49, %v11081_v53 }
 0x4db   :  { %v7185_v31 = vsel %vm2321_vm3, %v7095_v27, %v7184_v1 }
 0x4dc   :  { %v7186_v41 = vsel %vm2323_vm4, %v7099_v63, %v7185_v31  ;;  %12565 = vmatprep.subr.bf16.mxu1 %v12564_v21 }
 0x4dd   :  { %v7187_v25 = vsel %vm2325_vm5, %v7103_v12, %v7186_v41  ;;  %12567 = vmatpush3.bf16.msra.mxu1 %v12564_v21 }
 0x4de   :  { %v7188_v43 = vsel %vm2327_vm6, %v7107_v59, %v7187_v25  ;;  %v7217_v29 = vld [vmem:[#allocation2 + $0x50] sm:$0xff] }
 0x4df   :  { %7210 = vst [vmem:[#allocation2 + $0x59] sm:$0xff] %v7188_v43  ;;  %11890 = vmatprep.mubr.f32.mxu0 %v7188_v43  ;;  %v7475_v13 = vld [vmem:[#allocation2 + $0x4a] sm:$0xff] }
 0x4e0   :  { %11891 = vmatmul.mubr.f32.gmra.mrb[38].mxu0 %v16675_v7 }
 0x4e1   :  { %11925 = vmatprep.mubr.f32.mxu0 %v16753_v40  ;;  %v7215_v40 = vld [vmem:[#allocation2 + $0x18] sm:$0xff] }
 0x4e4   :  { %11926 = vmatmul.mubr.f32.vlgmr.msra.gmra.mrb[32].mxu0 %v7213_v10 }
 0x4e5   :  { %11928 = vmatprep.mubr.f32.mxu0 %v16840_v44  ;;  %12535 = vmatpush3.bf16.msra.mxu0 %v18849_v18  ;;  %v12544_v44 = vpack.c.bf16 %v11039_v58, %v11038_v9 }
 0x4e6   :  { %12537 = vmatprep.subr.bf16.mxu0 %v12536_v8  ;;  %v7218_v7 = vld [vmem:[#allocation2 + $0x58] sm:$0xff]  ;;  %v7219_v34 = vld [vmem:[#allocation2 + $0x60] sm:$0xff] }
 0x4e7   :  { %v7476_v47 = vld [vmem:[#allocation2 + $0x52] sm:$0xff]  ;;  %v7477_v42 = vld [vmem:[#allocation2 + $0x5a] sm:$0xff] }
 0x4e8   :  { %8538 = vst [vmem:[#allocation2 + $0x59] sm:$0x1] %v18822_v24  ;;  %11929 = vmatmul.mubr.f32.gmra.mrb[34].mxu0 %v7215_v40 }
 0x4e9   :  { %11931 = vmatprep.mubr.f32.mxu0 %v7216_v5  ;;  %12539 = vmatpush3.bf16.msra.mxu0 %v12536_v8 }
 0x4ea   :  { %12541 = vmatprep.subr.bf16.mxu0 %v12540_v0 }
 0x4ec   :  { %11932 = vmatmul.mubr.f32.gmra.mrb[36].mxu0 %v7217_v29 }
 0x4ed   :  { %11934 = vmatprep.mubr.f32.mxu0 %v7218_v7  ;;  %12543 = vmatpush3.bf16.msra.mxu0 %v12540_v0 }
 0x4ee   :  { %12545 = vmatprep.subr.bf16.mxu0 %v12544_v44 }
 0x4f0   :  { %11935 = vmatmul.mubr.f32.gmra.mrb[38].mxu0 %v7219_v34 }
 0x4f1   :  { %12547 = vmatpush3.bf16.msra.mxu0 %v12544_v44  ;;  %11969 = vmatprep.mubr.f32.mxu0 %v7471_v60 }
 0x4f2   :  { %12549 = vmatprep.subr.bf16.mxu0 %v12548_v39 }
 0x4f5   :  { %12551 = vmatpush3.bf16.msra.mxu0 %v12548_v39 }
 0x4f6   :  { %12553 = vmatprep.subr.bf16.mxu0 %v12552_v30 }
 0x4f9   :  { %12555 = vmatpush3.bf16.msra.mxu0 %v12552_v30 }
 0x4fa   :  { %12557 = vmatprep.subr.bf16.mxu0 %v12556_v20 }
 0x4fd   :  { %12559 = vmatpush3.bf16.msra.mxu0 %v12556_v20 }
 0x4fe   :  { %12561 = vmatprep.subr.bf16.mxu0 %v12560_v14 }
 0x501   :  { %12563 = vmatpush3.bf16.msra.mxu0 %v12560_v14 }
 0x504   :  { %11970 = vmatmul.mubr.f32.vlgmr.msra.gmra.mrb[32].mxu0 %v16842_v62 }
 0x505   :  { %11972 = vmatprep.mubr.f32.mxu0 %v7473_v6 }
 0x508   :  { %11973 = vmatmul.mubr.f32.gmra.mrb[34].mxu0 %v7474_v48 }
 0x509   :  { %11975 = vmatprep.mubr.f32.mxu0 %v7475_v13 }
 0x50c   :  { %11976 = vmatmul.mubr.f32.gmra.mrb[36].mxu0 %v7476_v47 }
 0x50d   :  { %11978 = vmatprep.mubr.f32.mxu0 %v7477_v42 }
 0x510   :  { %11979 = vmatmul.mubr.f32.gmra.mrb[38].mxu0 %v7478_v57 }
 0x5d7   :  { %v11971_v3 = vpop.f32.mrb[32].mxu0 }
 0x5d8   :  { %v7615_v32 = vadd.f32 %v11971_v3, %v16994_v55  ;;  %v7562_v62 = vpop.f32.mrb[33].mxu0 }
 0x5d9   :  { %v7614_v56 = vadd.f32 %v16994_v55, %v7562_v62 }
 0x5da   :  { %v7649_v52 = vcombine.high %v7615_v32, %v7615_v32  ;;  %v7656_v61 = vrot.slane %v7615_v32, %v18850_v2 }
 0x5db   :  { %v7632_v17 = vcombine.high %v7614_v56, %v7614_v56  ;;  %v7639_v15 = vrot.slane %v7614_v56, %v18850_v2  ;;  %v11974_v45 = vpop.f32.mrb[34].mxu0 }
 0x5dc   :  { %v7663_v36 = vrot.slane %v7649_v52, %v18850_v2  ;;  %v7664_v23 = vcombine.high %v7656_v61, %v7656_v61  ;;  %v11053_v5 = vrot.slane %v7656_v61, 9  ;;  %v7572_v50 = vpop.f32.mrb[35].mxu0  ;;  %v7617_v63 = vadd.f32 %v11974_v45, %v16994_v55 }
 0x5dd   :  { %v7646_v18 = vrot.slane %v7632_v17, %v18850_v2  ;;  %v7647_v27 = vcombine.high %v7639_v15, %v7639_v15  ;;  %v11049_v37 = vrot.slane %v7639_v15, 9  ;;  %v17016_v9 = vadd.f32 %v16994_v55, %v7572_v50 }
 0x5de   :  { %v7665_v1 = vcombine.high %v7663_v36, %v7663_v36  ;;  %v11054_v12 = vrot.slane %v7664_v23, 9  ;;  %v11055_v31 = vrot.slane %v7663_v36, 9  ;;  %v7900_v59 = vmax.f32 %v7656_v61, %v11053_v5 }
 0x5df   :  { %v7648_v41 = vcombine.high %v7646_v18, %v7646_v18  ;;  %v11050_v25 = vrot.slane %v7647_v27, 9  ;;  %v11051_v43 = vrot.slane %v7646_v18, 9  ;;  %v7896_v38 = vmax.f32 %v7639_v15, %v11049_v37  ;;  %v17009_v28 = vpop.f32.mrb[36].mxu0 }
 0x5e0   :  { %v11056_v8 = vrot.slane %v7665_v1, 9  ;;  %v7901_v10 = vmax.f32 %v7664_v23, %v11054_v12  ;;  %v7902_v4 = vmax.f32 %v7663_v36, %v11055_v31  ;;  %v17011_v22 = vmax.f32 %v7900_v59, 0.0  ;;  %v17013_v0 = vpop.f32.mrb[37].mxu0 }
 0x5e1   :  { %v11052_v7 = vrot.slane %v7648_v41, 9  ;;  %v7897_v47 = vmax.f32 %v7647_v27, %v11050_v25  ;;  %v7898_v40 = vmax.f32 %v7646_v18, %v11051_v43  ;;  %v17022_v16 = vmax.f32 %v7896_v38, 0.0 }
 0x5e2   :  { %v7903_v58 = vmax.f32 %v7665_v1, %v11056_v8  ;;  %v17018_v44 = vmax.f32 %v7901_v10, 0.0  ;;  %v17020_v29 = vmax.f32 %v7902_v4, 0.0  ;;  %v8166_v33 = vmul.f32 %v17011_v22, %v17011_v22 }
 0x5e3   :  { %v7899_v39 = vmax.f32 %v7648_v41, %v11052_v7  ;;  %v17026_v34 = vmax.f32 %v7897_v47, 0.0  ;;  %v17028_v54 = vmax.f32 %v7898_v40, 0.0  ;;  %v17030_v46 = vpop.f32.mrb[38].mxu0  ;;  %v8011_v30 = vrot.slane %v17011_v22, %v13210_v26 }
 0x5e4   :  { %v17032_v60 = vmax.f32 %v7903_v58, 0.0  ;;  %v8015_v19 = vrot.slane %v17018_v44, %v13210_v26  ;;  %v8167_v11 = vmul.f32 %v17018_v44, %v17018_v44  ;;  %v17040_v20 = vpop.f32.mrb[39].mxu0  ;;  %v8019_v35 = vrot.slane %v17020_v29, %v13210_v26 }
 0x5e5   :  { %v8168_v51 = vmul.f32 %v17020_v29, %v17020_v29  ;;  %v8245_v14 = vrot.slane %v8166_v33, %v13210_v26  ;;  %v17047_v6 = vmax.f32 %v7899_v39, 0.0  ;;  %v7995_v42 = vrot.slane %v17022_v16, %v13210_v26 }
 0x5e6   :  { %v8023_v48 = vrot.slane %v17032_v60, %v13210_v26  ;;  %v8169_v13 = vmul.f32 %v17032_v60, %v17032_v60  ;;  %v7999_v57 = vrot.slane %v17026_v34, %v13210_v26  ;;  %v8249_v3 = vrot.slane %v8167_v11, %v13210_v26 }
 0x5e7   :  { %v8003_v32 = vrot.slane %v17028_v54, %v13210_v26  ;;  %v8007_v62 = vrot.slane %v17047_v6, %v13210_v26  ;;  %v8162_v53 = vmul.f32 %v17022_v16, %v17022_v16  ;;  %v8253_v49 = vrot.slane %v8168_v51, %v13210_v26 }
 0x5e8   :  { %v8120_v56 = vsel %vm2315_vm0, %v7999_v57, %v7995_v42  ;;  %v8163_v21 = vmul.f32 %v17026_v34, %v17026_v34  ;;  %v8164_v52 = vmul.f32 %v17028_v54, %v17028_v54  ;;  %v8165_v17 = vmul.f32 %v17047_v6, %v17047_v6 }
 0x5e9   :  { %v8121_v61 = vsel %vm2317_vm1, %v8003_v32, %v8120_v56  ;;  %v8229_v15 = vrot.slane %v8162_v53, %v13210_v26  ;;  %v7683_v45 = vcombine.high %v7617_v63, %v7617_v63  ;;  %v7690_v50 = vrot.slane %v7617_v63, %v18850_v2 }
 0x5ea   :  { %v8122_v36 = vsel %vm2319_vm2, %v8007_v62, %v8121_v61  ;;  %v8233_v23 = vrot.slane %v8163_v21, %v13210_v26  ;;  %v8237_v5 = vrot.slane %v8164_v52, %v13210_v26  ;;  %v8241_v27 = vrot.slane %v8165_v17, %v13210_v26 }
 0x5eb   :  { %v8123_v18 = vsel %vm2321_vm3, %v8011_v30, %v8122_v36  ;;  %v7697_v37 = vrot.slane %v7683_v45, %v18850_v2  ;;  %v7666_v1 = vcombine.high %v17016_v9, %v17016_v9  ;;  %v7698_v59 = vcombine.high %v7690_v50, %v7690_v50 }
 0x5ec   :  { %v8124_v12 = vsel %vm2323_vm4, %v8015_v19, %v8123_v18  ;;  %v8354_v31 = vsel %vm2315_vm0, %v8233_v23, %v8229_v15  ;;  %v11061_v41 = vrot.slane %v7690_v50, 9  ;;  %v7673_v33 = vrot.slane %v17016_v9, %v18850_v2 }
 0x5ed   :  { %v8125_v25 = vsel %vm2325_vm5, %v8019_v35, %v8124_v12  ;;  %v8355_v43 = vsel %vm2317_vm1, %v8237_v5, %v8354_v31  ;;  %v7699_v63 = vcombine.high %v7697_v37, %v7697_v37  ;;  %v11063_v38 = vrot.slane %v7697_v37, 9 }
 0x5ee   :  { %v17088_v8 = vsel %vm2327_vm6, %v8023_v48, %v8125_v25  ;;  %v8356_v10 = vsel %vm2319_vm2, %v8241_v27, %v8355_v43  ;;  %v11062_v4 = vrot.slane %v7698_v59, 9  ;;  %v7908_v7 = vmax.f32 %v7690_v50, %v11061_v41 }
 0x5ef   :  { %v8357_v47 = vsel %vm2321_vm3, %v8245_v14, %v8356_v10  ;;  %v11064_v40 = vrot.slane %v7699_v63, 9  ;;  %v7910_v58 = vmax.f32 %v7697_v37, %v11063_v38  ;;  %v8257_v39 = vrot.slane %v8169_v13, %v13210_v26 }
 0x5f0   :  { %v8358_v30 = vsel %vm2323_vm4, %v8249_v3, %v8357_v47  ;;  %v7909_v19 = vmax.f32 %v7698_v59, %v11062_v4  ;;  %v7680_v11 = vrot.slane %v7666_v1, %v18850_v2  ;;  %v17098_v51 = vmax.f32 %v7908_v7, 0.0 }
 0x5f1   :  { %v8359_v35 = vsel %vm2325_vm5, %v8253_v49, %v8358_v30  ;;  %v7681_v48 = vcombine.high %v7673_v33, %v7673_v33  ;;  %v7911_v14 = vmax.f32 %v7699_v63, %v11064_v40  ;;  %v17103_v57 = vmax.f32 %v7910_v58, 0.0 }
 0x5f2   :  { %v17101_v42 = vsel %vm2327_vm6, %v8257_v39, %v8359_v35  ;;  %v7682_v32 = vcombine.high %v7680_v11, %v7680_v11  ;;  %v17105_v9 = vmax.f32 %v7909_v19, 0.0  ;;  %v11057_v13 = vrot.slane %v7673_v33, 9 }
 0x5f3   :  { %v8043_v3 = vrot.slane %v17098_v51, %v13210_v26  ;;  %v8174_v62 = vmul.f32 %v17098_v51, %v17098_v51  ;;  %v11058_v53 = vrot.slane %v7681_v48, 9  ;;  %v17111_v49 = vmax.f32 %v7911_v14, 0.0 }
 0x5f4   :  { %v11059_v56 = vrot.slane %v7680_v11, 9  ;;  %v11060_v21 = vrot.slane %v7682_v32, 9  ;;  %v7904_v52 = vmax.f32 %v7673_v33, %v11057_v13  ;;  %v8051_v61 = vrot.slane %v17103_v57, %v13210_v26 }
 0x5f5   :  { %v8176_v17 = vmul.f32 %v17103_v57, %v17103_v57  ;;  %v7905_v15 = vmax.f32 %v7681_v48, %v11058_v53  ;;  %v7619_v45 = vadd.f32 %v17009_v28, %v16994_v55  ;;  %v8047_v36 = vrot.slane %v17105_v9, %v13210_v26 }
 0x5f6   :  { %v7906_v23 = vmax.f32 %v7680_v11, %v11059_v56  ;;  %v7907_v5 = vmax.f32 %v7682_v32, %v11060_v21  ;;  %v17121_v50 = vmax.f32 %v7904_v52, 0.0  ;;  %v8175_v18 = vmul.f32 %v17105_v9, %v17105_v9 }
 0x5f7   :  { %v8277_v27 = vrot.slane %v8174_v62, %v13210_v26  ;;  %v17126_v37 = vmax.f32 %v7905_v15, 0.0  ;;  %v7717_v1 = vcombine.high %v7619_v45, %v7619_v45  ;;  %v7724_v59 = vrot.slane %v7619_v45, %v18850_v2 }
 0x5f8   :  { %v17128_v12 = vmax.f32 %v7906_v23, 0.0  ;;  %v17130_v31 = vmax.f32 %v7907_v5, 0.0  ;;  %v8170_v28 = vmul.f32 %v17121_v50, %v17121_v50  ;;  %v8027_v41 = vrot.slane %v17121_v50, %v13210_v26 }
 0x5f9   :  { %v8031_v25 = vrot.slane %v17126_v37, %v13210_v26  ;;  %v8171_v43 = vmul.f32 %v17126_v37, %v17126_v37  ;;  %v7731_v63 = vrot.slane %v7717_v1, %v18850_v2  ;;  %v8055_v47 = vrot.slane %v17111_v49, %v13210_v26 }
 0x5fa   :  { %v8035_v38 = vrot.slane %v17128_v12, %v13210_v26  ;;  %v8039_v10 = vrot.slane %v17130_v31, %v13210_v26  ;;  %v8172_v4 = vmul.f32 %v17128_v12, %v17128_v12  ;;  %v8173_v7 = vmul.f32 %v17130_v31, %v17130_v31 }
 0x5fb   :  { %v8127_v40 = vsel %vm2315_vm0, %v8031_v25, %v8027_v41  ;;  %v8261_v58 = vrot.slane %v8170_v28, %v13210_v26  ;;  %v8265_v33 = vrot.slane %v8171_v43, %v13210_v26  ;;  %v7732_v11 = vcombine.high %v7724_v59, %v7724_v59 }
 0x5fc   :  { %v8128_v39 = vsel %vm2317_vm1, %v8035_v38, %v8127_v40  ;;  %v8269_v30 = vrot.slane %v8172_v4, %v13210_v26  ;;  %v8273_v19 = vrot.slane %v8173_v7, %v13210_v26  ;;  %v8177_v35 = vmul.f32 %v17111_v49, %v17111_v49 }
 0x5fd   :  { %v8129_v48 = vsel %vm2319_vm2, %v8039_v10, %v8128_v39  ;;  %v8361_v14 = vsel %vm2315_vm0, %v8265_v33, %v8261_v58  ;;  %v7618_v32 = vadd.f32 %v16994_v55, %v17013_v0  ;;  %v8285_v13 = vrot.slane %v8176_v17, %v13210_v26 }
 0x5fe   :  { %v8130_v62 = vsel %vm2321_vm3, %v8043_v3, %v8129_v48  ;;  %v8362_v53 = vsel %vm2317_vm1, %v8269_v30, %v8361_v14  ;;  %v7733_v56 = vcombine.high %v7731_v63, %v7731_v63  ;;  %v8281_v21 = vrot.slane %v8175_v18, %v13210_v26 }
 0x5ff   :  { %v8131_v52 = vsel %vm2323_vm4, %v8047_v36, %v8130_v62  ;;  %v8363_v15 = vsel %vm2319_vm2, %v8273_v19, %v8362_v53  ;;  %v11069_v45 = vrot.slane %v7724_v59, 9  ;;  %v11070_v1 = vrot.slane %v7732_v11, 9 }
 0x600   :  { %v8132_v23 = vsel %vm2325_vm5, %v8051_v61, %v8131_v52  ;;  %v8364_v5 = vsel %vm2321_vm3, %v8277_v27, %v8363_v15  ;;  %v11071_v0 = vrot.slane %v7731_v63, 9  ;;  %v8289_v17 = vrot.slane %v8177_v35, %v13210_v26 }
 0x601   :  { %v8133_v3 = vsel %vm2327_vm6, %v8055_v47, %v8132_v23  ;;  %v8365_v28 = vsel %vm2323_vm4, %v8281_v21, %v8364_v5  ;;  %v7700_v41 = vcombine.high %v7618_v32, %v7618_v32  ;;  %v11072_v25 = vrot.slane %v7733_v56, 9 }
 0x602   :  { %v17176_v18 = vadd.f32 %v8133_v3, %v17088_v8  ;;  %v8366_v36 = vsel %vm2325_vm5, %v8285_v13, %v8365_v28  ;;  %v7916_v61 = vmax.f32 %v7724_v59, %v11069_v45  ;;  %v7917_v38 = vmax.f32 %v7732_v11, %v11070_v1 }
 0x603   :  { %v8367_v43 = vsel %vm2327_vm6, %v8289_v17, %v8366_v36  ;;  %v7918_v10 = vmax.f32 %v7731_v63, %v11071_v0  ;;  %v7707_v4 = vrot.slane %v7618_v32, %v18850_v2  ;;  %v7714_v7 = vrot.slane %v7700_v41, %v18850_v2 }
 0x604   :  { %v17181_v27 = vadd.f32 %v8367_v43, %v17101_v42  ;;  %v7919_v47 = vmax.f32 %v7733_v56, %v11072_v25  ;;  %v7621_v8 = vadd.f32 %v17030_v46, %v16994_v55  ;;  %v17187_v40 = vmax.f32 %v7916_v61, 0.0 }
 0x605   :  { %v7715_v58 = vcombine.high %v7707_v4, %v7707_v4  ;;  %v7716_v33 = vcombine.high %v7714_v7, %v7714_v7  ;;  %v11065_v39 = vrot.slane %v7707_v4, 9  ;;  %v17189_v30 = vmax.f32 %v7917_v38, 0.0 }
 0x606   :  { %v17191_v59 = vmax.f32 %v7918_v10, 0.0  ;;  %v11067_v42 = vrot.slane %v7714_v7, 9  ;;  %v17193_v35 = vmax.f32 %v7919_v47, 0.0  ;;  %v7751_v14 = vcombine.high %v7621_v8, %v7621_v8 }
 0x607   :  { %v11066_v19 = vrot.slane %v7715_v58, 9  ;;  %v11068_v63 = vrot.slane %v7716_v33, 9  ;;  %v7912_v11 = vmax.f32 %v7707_v4, %v11065_v39  ;;  %v8075_v46 = vrot.slane %v17187_v40, %v13210_v26 }
 0x608   :  { %v7914_v48 = vmax.f32 %v7714_v7, %v11067_v42  ;;  %v8079_v53 = vrot.slane %v17189_v30, %v13210_v26  ;;  %v8083_v56 = vrot.slane %v17191_v59, %v13210_v26  ;;  %v8182_v21 = vmul.f32 %v17187_v40, %v17187_v40 }
 0x609   :  { %v7913_v32 = vmax.f32 %v7715_v58, %v11066_v19  ;;  %v7915_v13 = vmax.f32 %v7716_v33, %v11068_v63  ;;  %v17197_v62 = vmax.f32 %v7912_v11, 0.0  ;;  %v7758_v5 = vrot.slane %v7621_v8, %v18850_v2 }
 0x60a   :  { %v17205_v52 = vmax.f32 %v7914_v48, 0.0  ;;  %v7765_v3 = vrot.slane %v7751_v14, %v18850_v2  ;;  %v8183_v43 = vmul.f32 %v17189_v30, %v17189_v30  ;;  %v8184_v61 = vmul.f32 %v17191_v59, %v17191_v59 }
 0x60b   :  { %v17207_v15 = vmax.f32 %v7913_v32, 0.0  ;;  %v17209_v45 = vmax.f32 %v7915_v13, 0.0  ;;  %v8178_v23 = vmul.f32 %v17197_v62, %v17197_v62  ;;  %v8059_v1 = vrot.slane %v17197_v62, %v13210_v26 }
 0x60c   :  { %v8067_v0 = vrot.slane %v17205_v52, %v13210_v26  ;;  %v8180_v17 = vmul.f32 %v17205_v52, %v17205_v52  ;;  %v8185_v38 = vmul.f32 %v17193_v35, %v17193_v35  ;;  %v8087_v58 = vrot.slane %v17193_v35, %v13210_v26 }
 0x60d   :  { %v8063_v28 = vrot.slane %v17207_v15, %v13210_v26  ;;  %v8071_v41 = vrot.slane %v17209_v45, %v13210_v26  ;;  %v8179_v36 = vmul.f32 %v17207_v15, %v17207_v15  ;;  %v8181_v25 = vmul.f32 %v17209_v45, %v17209_v45 }
 0x60e   :  { %v8301_v10 = vrot.slane %v8180_v17, %v13210_v26  ;;  %v8293_v7 = vrot.slane %v8178_v23, %v13210_v26  ;;  %v8309_v33 = vrot.slane %v8182_v21, %v13210_v26  ;;  %v7766_v42 = vcombine.high %v7758_v5, %v7758_v5 }
 0x60f   :  { %v8134_v4 = vsel %vm2315_vm0, %v8063_v28, %v8059_v1  ;;  %v8297_v47 = vrot.slane %v8179_v36, %v13210_v26  ;;  %v8305_v8 = vrot.slane %v8181_v25, %v13210_v26  ;;  %v7767_v11 = vcombine.high %v7765_v3, %v7765_v3  ;;  %v11083_v28 = vld [vmem:[%s18386_s7 + $0x90] sm:$0xff]  ;;  %v11086_v25 = vld [vmem:[%s18386_s7 + $0xa8] sm:$0xff] }
 0x610   :  { %v8135_v39 = vsel %vm2317_vm1, %v8067_v0, %v8134_v4  ;;  %v7620_v48 = vadd.f32 %v16994_v55, %v17040_v20  ;;  %v8313_v14 = vrot.slane %v8183_v43, %v13210_v26  ;;  %v8317_v32 = vrot.slane %v8184_v61, %v13210_v26  ;;  %v11084_v55 = vld [vmem:[%s18386_s7 + $0x98] sm:$0xff] }
 0x611   :  { %v8136_v19 = vsel %vm2319_vm2, %v8071_v41, %v8135_v39  ;;  %v8368_v63 = vsel %vm2315_vm0, %v8297_v47, %v8293_v7  ;;  %v8321_v21 = vrot.slane %v8185_v38, %v13210_v26  ;;  %v11077_v17 = vrot.slane %v7758_v5, 9 }
 0x612   :  { %v8137_v13 = vsel %vm2321_vm3, %v8075_v46, %v8136_v19  ;;  %v8369_v23 = vsel %vm2317_vm1, %v8301_v10, %v8368_v63  ;;  %v11078_v41 = vrot.slane %v7766_v42, 9  ;;  %v11079_v36 = vrot.slane %v7765_v3, 9 }
 0x613   :  { %v8138_v1 = vsel %vm2323_vm4, %v8079_v53, %v8137_v13  ;;  %v8370_v0 = vsel %vm2319_vm2, %v8305_v8, %v8369_v23  ;;  %v11085_v53 = vld [vmem:[%s18386_s7 + $0xa0] sm:$0xff]  ;;  %v11080_v38 = vrot.slane %v7767_v11, 9  ;;  %v7734_v10 = vcombine.high %v7620_v48, %v7620_v48 }
 0x614   :  { %v8139_v20 = vsel %vm2325_vm5, %v8083_v56, %v8138_v1  ;;  %v8371_v46 = vsel %vm2321_vm3, %v8309_v33, %v8370_v0  ;;  %v7741_v7 = vrot.slane %v7620_v48, %v18850_v2  ;;  %v12568_v47 = vpack.c.bf16 %v11084_v55, %v11083_v28 }
 0x615   :  { %v8140_v43 = vsel %vm2327_vm6, %v8087_v58, %v8139_v20  ;;  %v8372_v61 = vsel %vm2323_vm4, %v8313_v14, %v8371_v46  ;;  %v7924_v33 = vmax.f32 %v7758_v5, %v11077_v17  ;;  %v7748_v39 = vrot.slane %v7734_v10, %v18850_v2  ;;  %v11087_v58 = vld [vmem:[%s18386_s7 + $0xb0] sm:$0xff] }
 0x616   :  { %v17272_v56 = vadd.f32 %v17176_v18, %v8140_v43  ;;  %v8373_v4 = vsel %vm2325_vm5, %v8317_v32, %v8372_v61  ;;  %v12572_v19 = vpack.c.bf16 %v11086_v25, %v11085_v53  ;;  %v11088_v18 = vld [vmem:[%s18386_s7 + $0xb8] sm:$0xff]  ;;  %v7749_v14 = vcombine.high %v7741_v7, %v7741_v7  ;;  %12569 = vmatprep.subr.bf16.mxu1 %v12568_v47 }
 0x617   :  { %v8374_v8 = vsel %vm2327_vm6, %v8321_v21, %v8373_v4  ;;  %v11073_v48 = vrot.slane %v7741_v7, 9  ;;  %v7925_v32 = vmax.f32 %v7766_v42, %v11078_v41  ;;  %v7926_v13 = vmax.f32 %v7765_v3, %v11079_v36  ;;  %12571 = vmatpush3.bf16.msra.mxu1 %v12568_v47  ;;  %v11090_v3 = vld [vmem:[%s18386_s7 + $0xc8] sm:$0xff] }
 0x618   :  { %v17285_v63 = vadd.f32 %v17181_v27, %v8374_v8  ;;  %v7750_v5 = vcombine.high %v7748_v39, %v7748_v39  ;;  %v11075_v23 = vrot.slane %v7748_v39, 9  ;;  %v7927_v21 = vmax.f32 %v7767_v11, %v11080_v38  ;;  %12573 = vmatprep.subr.bf16.mxu1 %v12572_v19  ;;  %v11089_v27 = vld [vmem:[%s18386_s7 + $0xc0] sm:$0xff]  ;;  %v11091_v8 = vld [vmem:[%s18386_s7 + $0xd0] sm:$0xff] }
 0x619   :  { %v11074_v1 = vrot.slane %v7749_v14, 9  ;;  %v7920_v0 = vmax.f32 %v7741_v7, %v11073_v48  ;;  %v12576_v17 = vpack.c.bf16 %v11088_v18, %v11087_v58  ;;  %v17287_v28 = vmax.f32 %v7924_v33, 0.0  ;;  %v11092_v33 = vld [vmem:[%s18386_s7 + $0xd8] sm:$0xff] }
 0x61a   :  { %v11076_v55 = vrot.slane %v7750_v5, 9  ;;  %v7922_v20 = vmax.f32 %v7748_v39, %v11075_v23  ;;  %v17297_v11 = vmax.f32 %v7925_v32, 0.0  ;;  %v17299_v41 = vmax.f32 %v7926_v13, 0.0 }
 0x61b   :  { %v7921_v42 = vmax.f32 %v7749_v14, %v11074_v1  ;;  %v17295_v46 = vmax.f32 %v7920_v0, 0.0  ;;  %12575 = vmatpush3.bf16.msra.mxu1 %v12572_v19  ;;  %v17303_v25 = vmax.f32 %v7927_v21, 0.0  ;;  %v12580_v38 = vpack.c.bf16 %v11090_v3, %v11089_v27  ;;  %v11094_v3 = vld [vmem:[%s18386_s7 + $0xe8] sm:$0xff] }
 0x61c   :  { %v7923_v36 = vmax.f32 %v7750_v5, %v11076_v55  ;;  %v17301_v53 = vmax.f32 %v7922_v20, 0.0  ;;  %12577 = vmatprep.subr.bf16.mxu1 %v12576_v17  ;;  %v8107_v10 = vrot.slane %v17287_v28, %v13210_v26  ;;  %v8190_v39 = vmul.f32 %v17287_v28, %v17287_v28 }
 0x61d   :  { %v17305_v43 = vmax.f32 %v7921_v42, 0.0  ;;  %v8186_v61 = vmul.f32 %v17295_v46, %v17295_v46  ;;  %v8091_v19 = vrot.slane %v17295_v46, %v13210_v26  ;;  %v8191_v14 = vmul.f32 %v17297_v11, %v17297_v11 }
 0x61e   :  { %v17311_v4 = vmax.f32 %v7923_v36, 0.0  ;;  %v8099_v7 = vrot.slane %v17301_v53, %v13210_v26  ;;  %v8188_v47 = vmul.f32 %v17301_v53, %v17301_v53  ;;  %v12584_v1 = vpack.c.bf16 %v11092_v33, %v11091_v8 }
 0x61f   :  { %v8095_v58 = vrot.slane %v17305_v43, %v13210_v26  ;;  %v8187_v18 = vmul.f32 %v17305_v43, %v17305_v43  ;;  %12579 = vmatpush3.bf16.msra.mxu1 %v12576_v17  ;;  %v8325_v23 = vrot.slane %v8186_v61, %v13210_v26  ;;  %v8111_v0 = vrot.slane %v17297_v11, %v13210_v26  ;;  %v11093_v17 = vld [vmem:[%s18386_s7 + $0xe0] sm:$0xff] }
 0x620   :  { %v8103_v48 = vrot.slane %v17311_v4, %v13210_v26  ;;  %v8189_v32 = vmul.f32 %v17311_v4, %v17311_v4  ;;  %v8333_v13 = vrot.slane %v8188_v47, %v13210_v26  ;;  %12581 = vmatprep.subr.bf16.mxu1 %v12580_v38  ;;  %v8192_v55 = vmul.f32 %v17299_v41, %v17299_v41 }
 0x621   :  { %v8141_v5 = vsel %vm2315_vm0, %v8095_v58, %v8091_v19  ;;  %v8329_v21 = vrot.slane %v8187_v18, %v13210_v26  ;;  %v8115_v42 = vrot.slane %v17299_v41, %v13210_v26  ;;  %v8193_v36 = vmul.f32 %v17303_v25, %v17303_v25 }
 0x622   :  { %v8142_v20 = vsel %vm2317_vm1, %v8099_v7, %v8141_v5  ;;  %v8337_v27 = vrot.slane %v8189_v32, %v13210_v26  ;;  %v8119_v47 = vrot.slane %v17303_v25, %v13210_v26  ;;  %v8341_v8 = vrot.slane %v8190_v39, %v13210_v26 }
 0x623   :  { %v8143_v61 = vsel %vm2319_vm2, %v8103_v48, %v8142_v20  ;;  %v8375_v7 = vsel %vm2315_vm0, %v8329_v21, %v8325_v23  ;;  %12583 = vmatpush3.bf16.msra.mxu1 %v12580_v38  ;;  %v8345_v58 = vrot.slane %v8191_v14, %v13210_v26  ;;  %v12588_v48 = vpack.c.bf16 %v11094_v3, %v11093_v17  ;;  %v11096_v38 = vld [vmem:[%s18386_s7 + $0xf8] sm:$0xff] }
 0x624   :  { %v8144_v33 = vsel %vm2321_vm3, %v8107_v10, %v8143_v61  ;;  %v8376_v19 = vsel %vm2317_vm1, %v8333_v13, %v8375_v7  ;;  %12585 = vmatprep.subr.bf16.mxu1 %v12584_v1  ;;  %v8349_v5 = vrot.slane %v8192_v55, %v13210_v26  ;;  %v11095_v10 = vld [vmem:[%s18386_s7 + $0xf0] sm:$0xff]  ;;  %v8353_v39 = vrot.slane %v8193_v36, %v13210_v26  ;;  %v8740_v36 = vld [vmem:[%s18386_s7 + $0x8] sm:$0xff] }
 0x625   :  { %v8145_v18 = vsel %vm2323_vm4, %v8111_v0, %v8144_v33  ;;  %v8377_v32 = vsel %vm2319_vm2, %v8337_v27, %v8376_v19  ;;  %v12592_v27 = vpack.c.bf16 %v11096_v38, %v11095_v10  ;;  %v7622_v38 = vld [vmem:[%s18385_s6 + $0x1] sm:$0x1] }
 0x626   :  { %v8146_v23 = vsel %vm2325_vm5, %v8115_v42, %v8145_v18  ;;  %v8378_v21 = vsel %vm2321_vm3, %v8341_v8, %v8377_v32  ;;  %v8739_v42 = vld [vmem:[%s18386_s7] sm:$0xff] }
 0x627   :  { %v8147_v14 = vsel %vm2327_vm6, %v8119_v47, %v8146_v23  ;;  %v8379_v13 = vsel %vm2323_vm4, %v8345_v58, %v8378_v21  ;;  %12587 = vmatpush3.bf16.msra.mxu1 %v12584_v1  ;;  %v17389_v1 = vpack.c.bf16 %v8740_v36, %v8739_v42 }
 0x628   :  { %v8154_v0 = vadd.f32 %v17272_v56, %v8147_v14  ;;  %v8380_v55 = vsel %vm2325_vm5, %v8349_v5, %v8379_v13  ;;  %12589 = vmatprep.subr.bf16.mxu1 %v12588_v48  ;;  %v7623_v13 = vld [vmem:[%s18385_s6 + $0x2] sm:$0x1] }
 0x629   :  { %v8381_v20 = vsel %vm2327_vm6, %v8353_v39, %v8380_v55 }
 0x62a   :  { %v8155_v17 = vrot.slane %v8154_v0, 4  ;;  %v8388_v3 = vadd.f32 %v17285_v63, %v8381_v20 }
 0x62b   :  { %12591 = vmatpush3.bf16.msra.mxu1 %v12588_v48 }
 0x62c   :  { %v8156_v61 = vadd.f32 %v8155_v17, %v8154_v0  ;;  %v8389_v56 = vrot.slane %v8388_v3, 4  ;;  %12593 = vmatprep.subr.bf16.mxu1 %v12592_v27 }
 0x62e   :  { %v8157_v7 = vrot.slane %v8156_v61, 2  ;;  %v8390_v47 = vadd.f32 %v8389_v56, %v8388_v3 }
 0x62f   :  { %12595 = vmatpush3.bf16.msra.mxu1 %v12592_v27 }
 0x630   :  { %v8158_v8 = vadd.f32 %v8157_v7, %v8156_v61  ;;  %v8391_v33 = vrot.slane %v8390_v47, 2  ;;  %12597 = vmatprep.subr.bf16.mxu1 %v17389_v1 }
 0x632   :  { %v8159_v63 = vrot.slane %v8158_v8, 1  ;;  %v8392_v19 = vadd.f32 %v8391_v33, %v8390_v47 }
 0x634   :  { %v8160_v58 = vadd.f32 %v8159_v63, %v8158_v8  ;;  %v8393_v18 = vrot.slane %v8392_v19, 1 }
 0x636   :  { %v8161_v32 = vmul.f32 0.03125, %v8160_v58  ;;  %v8394_v5 = vadd.f32 %v8393_v18, %v8392_v19 }
 0x638   :  { %v8395_v23 = vmul.f32 0.03125, %v8394_v5  ;;  %v8396_v21 = vmul.f32 %v8161_v32, %v8161_v32 }
 0x63a   :  { %v8397_v10 = vsub.f32 %v8395_v23, %v8396_v21 }
 0x63c   :  { %v8398_v48 = vadd.f32 1e-05, %v8397_v10 }
 0x63e   :  { %12932 = vrsqrt.f32 %v8398_v48 }
 0x648   :  { %v12933_v39 = vpop.eup %12932 }
 0x649   :  { %v8400_v14 = vmul.f32 %v12933_v39, %v7622_v38 }
 0x64b   :  { %v8401_v0 = vmul.f32 %v8400_v14, %v8161_v32  ;;  %v8406_v55 = vrot.slane %v8400_v14, %v13210_v26 }
 0x64d   :  { %v8402_v20 = vsub.f32 %v7623_v13, %v8401_v0  ;;  %v8408_v27 = vcombine.high %v8406_v55, %v8406_v55  ;;  %v8415_v17 = vrot.slane %v8406_v55, %v18850_v2 }
 0x64f   :  { %v8422_v3 = vrot.slane %v8408_v27, %v18850_v2  ;;  %v8423_v42 = vcombine.high %v8415_v17, %v8415_v17  ;;  %v8425_v36 = vrot.slane %v8415_v17, 1  ;;  %v8437_v61 = vmul.f32 %v8415_v17, %v17022_v16 }
 0x650   :  { %v8445_v56 = vmul.f32 %v8415_v17, %v17121_v50  ;;  %v8453_v7 = vmul.f32 %v8415_v17, %v17197_v62  ;;  %v8461_v47 = vmul.f32 %v8415_v17, %v17295_v46  ;;  %v8472_v8 = vrot.slane %v8402_v20, %v13210_v26 }
 0x651   :  { %v8424_v33 = vcombine.high %v8422_v3, %v8422_v3  ;;  %v8426_v63 = vrot.slane %v8423_v42, 1  ;;  %v8427_v19 = vrot.slane %v8422_v3, 1  ;;  %v8438_v58 = vmul.f32 %v8425_v36, %v17026_v34 }
 0x652   :  { %v8439_v18 = vmul.f32 %v8423_v42, %v17028_v54  ;;  %v8441_v32 = vmul.f32 %v8422_v3, %v17011_v22  ;;  %v8446_v5 = vmul.f32 %v8425_v36, %v17126_v37  ;;  %v8447_v16 = vmul.f32 %v8423_v42, %v17128_v12 }
 0x653   :  { %v8428_v50 = vrot.slane %v8424_v33, 1  ;;  %v8440_v62 = vmul.f32 %v8426_v63, %v17047_v6  ;;  %v8442_v46 = vmul.f32 %v8427_v19, %v17018_v44  ;;  %v8443_v23 = vmul.f32 %v8424_v33, %v17020_v29 }
 0x654   :  { %v8448_v21 = vmul.f32 %v8426_v63, %v17130_v31  ;;  %v8449_v10 = vmul.f32 %v8422_v3, %v17098_v51  ;;  %v8450_v34 = vmul.f32 %v8427_v19, %v17105_v9  ;;  %v8451_v54 = vmul.f32 %v8424_v33, %v17103_v57 }
 0x655   :  { %v8444_v22 = vmul.f32 %v8428_v50, %v17032_v60  ;;  %v8452_v37 = vmul.f32 %v8428_v50, %v17111_v49  ;;  %v8454_v12 = vmul.f32 %v8425_v36, %v17207_v15  ;;  %v8455_v6 = vmul.f32 %v8423_v42, %v17205_v52 }
 0x656   :  { %v8456_v44 = vmul.f32 %v8426_v63, %v17209_v45  ;;  %v8457_v29 = vmul.f32 %v8422_v3, %v17187_v40  ;;  %v8458_v31 = vmul.f32 %v8427_v19, %v17189_v30  ;;  %v8459_v51 = vmul.f32 %v8424_v33, %v17191_v59  ;;  %v8741_v59 = vld [vmem:[%s18386_s7 + $0x10] sm:$0xff] }
 0x657   :  { %v8460_v9 = vmul.f32 %v8428_v50, %v17193_v35  ;;  %v8462_v57 = vmul.f32 %v8425_v36, %v17305_v43  ;;  %v8463_v60 = vmul.f32 %v8423_v42, %v17301_v53  ;;  %v8464_v49 = vmul.f32 %v8426_v63, %v17311_v4  ;;  %v8742_v35 = vld [vmem:[%s18386_s7 + $0x18] sm:$0xff] }
 0x658   :  { %v8465_v15 = vmul.f32 %v8422_v3, %v17287_v28  ;;  %v8466_v52 = vmul.f32 %v8427_v19, %v17297_v11  ;;  %v8467_v45 = vmul.f32 %v8424_v33, %v17299_v41  ;;  %v8468_v40 = vmul.f32 %v8428_v50, %v17303_v25 }
 0x659   :  { %v8474_v48 = vcombine.high %v8472_v8, %v8472_v8  ;;  %v8481_v30 = vrot.slane %v8472_v8, %v18850_v2  ;;  %v17450_v38 = vpack.c.bf16 %v8742_v35, %v8741_v59 }
 0x65b   :  { %v8488_v53 = vrot.slane %v8474_v48, %v18850_v2  ;;  %v8489_v28 = vcombine.high %v8481_v30, %v8481_v30  ;;  %v8491_v43 = vrot.slane %v8481_v30, 1  ;;  %v17442_v11 = vadd.f32 %v8481_v30, %v8437_v61 }
 0x65c   :  { %v17444_v41 = vadd.f32 %v8481_v30, %v8445_v56  ;;  %v17446_v25 = vadd.f32 %v8481_v30, %v8453_v7  ;;  %v17448_v4 = vadd.f32 %v8481_v30, %v8461_v47 }
 0x65d   :  { %v8490_v39 = vcombine.high %v8488_v53, %v8488_v53  ;;  %v8492_v14 = vrot.slane %v8489_v28, 1  ;;  %v8493_v13 = vrot.slane %v8488_v53, 1  ;;  %v17452_v0 = vadd.f32 %v8491_v43, %v8438_v58 }
 0x65e   :  { %v17454_v55 = vadd.f32 %v8489_v28, %v8439_v18  ;;  %v17456_v20 = vadd.f32 %v8488_v53, %v8441_v32  ;;  %v8512_v27 = vadd.f32 %v8491_v43, %v8446_v5  ;;  %v17458_v17 = vadd.f32 %v8489_v28, %v8447_v16 }
 0x65f   :  { %v8494_v3 = vrot.slane %v8490_v39, 1  ;;  %v17460_v42 = vadd.f32 %v8492_v14, %v8440_v62  ;;  %v17462_v36 = vadd.f32 %v8493_v13, %v8442_v46  ;;  %v17464_v61 = vadd.f32 %v8490_v39, %v8443_v23 }
 0x660   :  { %v17466_v56 = vadd.f32 %v8492_v14, %v8448_v21  ;;  %v17468_v7 = vadd.f32 %v8488_v53, %v8449_v10  ;;  %v17470_v47 = vadd.f32 %v8493_v13, %v8450_v34  ;;  %v17472_v8 = vadd.f32 %v8490_v39, %v8451_v54 }
 0x661   :  { %v17474_v33 = vadd.f32 %v8494_v3, %v8444_v22  ;;  %v17476_v63 = vadd.f32 %v8494_v3, %v8452_v37  ;;  %v8520_v19 = vadd.f32 %v8491_v43, %v8454_v12  ;;  %v8521_v58 = vadd.f32 %v8489_v28, %v8455_v6 }
 0x662   :  { %v8522_v18 = vadd.f32 %v8492_v14, %v8456_v44  ;;  %v8523_v32 = vadd.f32 %v8488_v53, %v8457_v29  ;;  %v8524_v5 = vadd.f32 %v8493_v13, %v8458_v31  ;;  %v17478_v16 = vadd.f32 %v8490_v39, %v8459_v51 }
 0x663   :  { %v17480_v50 = vadd.f32 %v8494_v3, %v8460_v9  ;;  %v8528_v62 = vadd.f32 %v8491_v43, %v8462_v57  ;;  %v8529_v46 = vadd.f32 %v8489_v28, %v8463_v60  ;;  %v8530_v23 = vadd.f32 %v8492_v14, %v8464_v49 }
 0x664   :  { %v8531_v21 = vadd.f32 %v8488_v53, %v8465_v15  ;;  %v8532_v10 = vadd.f32 %v8493_v13, %v8466_v52  ;;  %v8533_v34 = vadd.f32 %v8490_v39, %v8467_v45  ;;  %v8534_v54 = vadd.f32 %v8494_v3, %v8468_v40 }
 0x665   :  { %v8574_v22 = vrot.slane %v17442_v11, %v13210_v26  ;;  %v8578_v37 = vrot.slane %v17452_v0, %v13210_v26  ;;  %v8582_v12 = vrot.slane %v17454_v55, %v13210_v26  ;;  %v8586_v6 = vrot.slane %v17460_v42, %v13210_v26 }
 0x666   :  { %v8590_v44 = vrot.slane %v17456_v20, %v13210_v26  ;;  %v8594_v29 = vrot.slane %v17462_v36, %v13210_v26  ;;  %v8598_v31 = vrot.slane %v17464_v61, %v13210_v26  ;;  %v8602_v51 = vrot.slane %v17474_v33, %v13210_v26 }
 0x667   :  { %v8606_v9 = vrot.slane %v17444_v41, %v13210_v26  ;;  %v8610_v57 = vrot.slane %v8512_v27, %v13210_v26  ;;  %v8614_v60 = vrot.slane %v17458_v17, %v13210_v26  ;;  %v8618_v49 = vrot.slane %v17466_v56, %v13210_v26 }
 0x668   :  { %v8622_v15 = vrot.slane %v17468_v7, %v13210_v26  ;;  %v8626_v52 = vrot.slane %v17470_v47, %v13210_v26  ;;  %v8630_v45 = vrot.slane %v17472_v8, %v13210_v26  ;;  %v8634_v40 = vrot.slane %v17476_v63, %v13210_v26 }
 0x669   :  { %v8638_v48 = vrot.slane %v17446_v25, %v13210_v26  ;;  %v8642_v30 = vrot.slane %v8520_v19, %v13210_v26  ;;  %v8646_v59 = vrot.slane %v8521_v58, %v13210_v26  ;;  %v8650_v35 = vrot.slane %v8522_v18, %v13210_v26 }
 0x66a   :  { %v8654_v53 = vrot.slane %v8523_v32, %v13210_v26  ;;  %v8658_v28 = vrot.slane %v8524_v5, %v13210_v26  ;;  %v8662_v43 = vrot.slane %v17478_v16, %v13210_v26  ;;  %v8666_v11 = vrot.slane %v17480_v50, %v13210_v26 }
 0x66b   :  { %v8670_v41 = vrot.slane %v17448_v4, %v13210_v26  ;;  %v8674_v25 = vrot.slane %v8528_v62, %v13210_v26  ;;  %v8678_v39 = vrot.slane %v8529_v46, %v13210_v26  ;;  %v8682_v14 = vrot.slane %v8530_v23, %v13210_v26 }
 0x66c   :  { %v8686_v13 = vrot.slane %v8531_v21, %v13210_v26  ;;  %v8690_v0 = vrot.slane %v8532_v10, %v13210_v26  ;;  %v8694_v55 = vrot.slane %v8533_v34, %v13210_v26  ;;  %v8698_v20 = vrot.slane %v8534_v54, %v13210_v26 }
 0x66d   :  { %v8699_v27 = vsel %vm2315_vm0, %v8578_v37, %v8574_v22  ;;  %v8706_v17 = vsel %vm2315_vm0, %v8610_v57, %v8606_v9  ;;  %v8713_v4 = vsel %vm2315_vm0, %v8642_v30, %v8638_v48  ;;  %v8720_v3 = vsel %vm2315_vm0, %v8674_v25, %v8670_v41  ;;  %v8743_v37 = vld [vmem:[%s18386_s7 + $0x20] sm:$0xff]  ;;  %v8748_v9 = vld [vmem:[%s18386_s7 + $0x48] sm:$0xff]  ;;  %v8754_v48 = vld [vmem:[%s18386_s7 + $0x78] sm:$0xff] }
 0x66e   :  { %v8700_v42 = vsel %vm2317_vm1, %v8582_v12, %v8699_v27  ;;  %v8707_v36 = vsel %vm2317_vm1, %v8614_v60, %v8706_v17  ;;  %v8714_v61 = vsel %vm2317_vm1, %v8646_v59, %v8713_v4  ;;  %v8721_v56 = vsel %vm2317_vm1, %v8678_v39, %v8720_v3  ;;  %v8744_v12 = vld [vmem:[%s18386_s7 + $0x28] sm:$0xff]  ;;  %v8749_v60 = vld [vmem:[%s18386_s7 + $0x50] sm:$0xff]  ;;  %v11097_v59 = vld [vmem:[%s18386_s7 + $0x100] sm:$0xff] }
 0x66f   :  { %v8701_v7 = vsel %vm2319_vm2, %v8586_v6, %v8700_v42  ;;  %v8708_v47 = vsel %vm2319_vm2, %v8618_v49, %v8707_v36  ;;  %v8715_v8 = vsel %vm2319_vm2, %v8650_v35, %v8714_v61  ;;  %v8722_v33 = vsel %vm2319_vm2, %v8682_v14, %v8721_v56  ;;  %v11098_v35 = vld [vmem:[%s18386_s7 + $0x108] sm:$0xff]  ;;  %v11101_v25 = vld [vmem:[%s18386_s7 + $0x120] sm:$0xff]  ;;  %v11107_v36 = vld [vmem:[%s18386_s7 + $0x150] sm:$0xff] }
 0x670   :  { %v8702_v63 = vsel %vm2321_vm3, %v8590_v44, %v8701_v7  ;;  %v8709_v19 = vsel %vm2321_vm3, %v8622_v15, %v8708_v47  ;;  %v8716_v58 = vsel %vm2321_vm3, %v8654_v53, %v8715_v8  ;;  %v8723_v18 = vsel %vm2321_vm3, %v8686_v13, %v8722_v33  ;;  %v8745_v44 = vld [vmem:[%s18386_s7 + $0x30] sm:$0xff]  ;;  %v8751_v15 = vld [vmem:[%s18386_s7 + $0x60] sm:$0xff]  ;;  %v11102_v39 = vld [vmem:[%s18386_s7 + $0x128] sm:$0xff] }
 0x671   :  { %v8703_v32 = vsel %vm2323_vm4, %v8594_v29, %v8702_v63  ;;  %v8710_v5 = vsel %vm2323_vm4, %v8626_v52, %v8709_v19  ;;  %v8717_v16 = vsel %vm2323_vm4, %v8658_v28, %v8716_v58  ;;  %v8724_v50 = vsel %vm2323_vm4, %v8690_v0, %v8723_v18  ;;  %v8746_v29 = vld [vmem:[%s18386_s7 + $0x38] sm:$0xff]  ;;  %v8752_v52 = vld [vmem:[%s18386_s7 + $0x68] sm:$0xff]  ;;  %v11099_v28 = vld [vmem:[%s18386_s7 + $0x110] sm:$0xff] }
 0x672   :  { %v8704_v62 = vsel %vm2325_vm5, %v8598_v31, %v8703_v32  ;;  %v8711_v46 = vsel %vm2325_vm5, %v8630_v45, %v8710_v5  ;;  %v8718_v23 = vsel %vm2325_vm5, %v8662_v43, %v8717_v16  ;;  %v8725_v21 = vsel %vm2325_vm5, %v8694_v55, %v8724_v50  ;;  %v11100_v43 = vld [vmem:[%s18386_s7 + $0x118] sm:$0xff]  ;;  %v11103_v55 = vld [vmem:[%s18386_s7 + $0x130] sm:$0xff]  ;;  %v11105_v4 = vld [vmem:[%s18386_s7 + $0x140] sm:$0xff] }
 0x673   :  { %v8705_v10 = vsel %vm2327_vm6, %v8602_v51, %v8704_v62  ;;  %v8712_v34 = vsel %vm2327_vm6, %v8634_v40, %v8711_v46  ;;  %v8719_v54 = vsel %vm2327_vm6, %v8666_v11, %v8718_v23  ;;  %v8726_v22 = vsel %vm2327_vm6, %v8698_v20, %v8725_v21  ;;  %v8753_v40 = vld [vmem:[%s18386_s7 + $0x70] sm:$0xff]  ;;  %v11104_v20 = vld [vmem:[%s18386_s7 + $0x138] sm:$0xff]  ;;  %v11106_v3 = vld [vmem:[%s18386_s7 + $0x148] sm:$0xff] }
 0x674   :  { %8731 = vst [vmem:[#allocation2 + $0x1] sm:$0xff] %v8705_v10  ;;  %8732 = vst [vmem:[#allocation2 + $0x9] sm:$0xff] %v8712_v34  ;;  %12013 = vmatprep.mubr.f32.mxu1 %v8705_v10  ;;  %v12604_v6 = vpack.c.bf16 %v8744_v12, %v8743_v37  ;;  %v12608_v51 = vpack.c.bf16 %v8746_v29, %v8745_v44  ;;  %v12620_v45 = vpack.c.bf16 %v8752_v52, %v8751_v15  ;;  %v11108_v61 = vld [vmem:[%s18386_s7 + $0x158] sm:$0xff]  ;;  %v11109_v7 = vld [vmem:[%s18386_s7 + $0x160] sm:$0xff] }
 0x675   :  { %8733 = vst [vmem:[#allocation2 + $0x49] sm:$0xff] %v8719_v54  ;;  %8734 = vst [vmem:[#allocation2 + $0x51] sm:$0xff] %v8726_v22  ;;  %12014 = vmatmul.mubr.f32.vlgmr.msra.gmra.mrb[16].mxu1 %v8712_v34  ;;  %v12624_v30 = vpack.c.bf16 %v8754_v48, %v8753_v40  ;;  %v12628_v53 = vpack.c.bf16 %v11098_v35, %v11097_v59  ;;  %v12632_v11 = vpack.c.bf16 %v11100_v43, %v11099_v28  ;;  %v11110_v47 = vld [vmem:[%s18386_s7 + $0x168] sm:$0xff]  ;;  %v11111_v33 = vld [vmem:[%s18386_s7 + $0x170] sm:$0xff] }
 0x676   :  { %12599 = vmatpush3.bf16.msra.mxu1 %v17389_v1  ;;  %12016 = vmatprep.mubr.f32.mxu1 %v8719_v54  ;;  %v8747_v1 = vld [vmem:[%s18386_s7 + $0x40] sm:$0xff]  ;;  %v12636_v13 = vpack.c.bf16 %v11102_v39, %v11101_v25  ;;  %v12640_v17 = vpack.c.bf16 %v11104_v20, %v11103_v55  ;;  %v12644_v42 = vpack.c.bf16 %v11106_v3, %v11105_v4  ;;  %v11112_v63 = vld [vmem:[%s18386_s7 + $0x178] sm:$0xff]  ;;  %v11131_v16 = vld [vmem:[%s18388_s9 + $0x88] sm:$0xff] }
 0x677   :  { %12601 = vmatprep.subr.bf16.mxu1 %v17450_v38  ;;  %v12612_v57 = vpack.c.bf16 %v8748_v9, %v8747_v1  ;;  %v12648_v56 = vpack.c.bf16 %v11108_v61, %v11107_v36  ;;  %v12652_v8 = vpack.c.bf16 %v11110_v47, %v11109_v7  ;;  %v12656_v19 = vpack.c.bf16 %v11112_v63, %v11111_v33  ;;  %v11130_v5 = vld [vmem:[%s18388_s9 + $0x80] sm:$0xff]  ;;  %v11132_v62 = vld [vmem:[%s18388_s9 + $0x90] sm:$0xff]  ;;  %v11133_v46 = vld [vmem:[%s18388_s9 + $0x98] sm:$0xff] }
 0x678   :  { %v12660_v50 = vpack.c.bf16 %v11131_v16, %v11130_v5  ;;  %v12664_v23 = vpack.c.bf16 %v11133_v46, %v11132_v62  ;;  %v11134_v21 = vld [vmem:[%s18388_s9 + $0xa0] sm:$0xff]  ;;  %v11135_v10 = vld [vmem:[%s18388_s9 + $0xa8] sm:$0xff]  ;;  %v11136_v54 = vld [vmem:[%s18388_s9 + $0xb0] sm:$0xff] }
 0x679   :  { %12017 = vmatmul.mubr.f32.gmra.mrb[18].mxu1 %v8726_v22  ;;  %v12668_v34 = vpack.c.bf16 %v11135_v10, %v11134_v21  ;;  %v11137_v22 = vld [vmem:[%s18388_s9 + $0xb8] sm:$0xff]  ;;  %v11138_v12 = vld [vmem:[%s18388_s9 + $0xc0] sm:$0xff]  ;;  %v11140_v44 = vld [vmem:[%s18388_s9 + $0xd0] sm:$0xff] }
 0x67a   :  { %12603 = vmatpush3.bf16.msra.mxu1 %v17450_v38  ;;  %v8750_v38 = vld [vmem:[%s18386_s7 + $0x58] sm:$0xff]  ;;  %12661 = vmatprep.subr.bf16.mxu0 %v12660_v50  ;;  %v12672_v37 = vpack.c.bf16 %v11137_v22, %v11136_v54  ;;  %v11142_v1 = vld [vmem:[%s18388_s9 + $0xe0] sm:$0xff]  ;;  %v11143_v9 = vld [vmem:[%s18388_s9 + $0xe8] sm:$0xff] }
 0x67b   :  { %v8735_v31 = vld [vmem:[#allocation2] sm:$0xff]  ;;  %12605 = vmatprep.subr.bf16.mxu1 %v12604_v6  ;;  %v12616_v49 = vpack.c.bf16 %v8750_v38, %v8749_v60  ;;  %v8736_v41 = vld [vmem:[#allocation2 + $0x8] sm:$0xff]  ;;  %12663 = vmatpush3.bf16.msra.mxu0 %v12660_v50  ;;  %v11144_v60 = vld [vmem:[%s18388_s9 + $0xf0] sm:$0xff] }
 0x67c   :  { %12051 = vmatprep.mubr.f32.mxu1 %v8735_v31  ;;  %v8737_v14 = vld [vmem:[#allocation2 + $0x48] sm:$0xff]  ;;  %v8738_v0 = vld [vmem:[#allocation2 + $0x50] sm:$0xff]  ;;  %12665 = vmatprep.subr.bf16.mxu0 %v12664_v23  ;;  %v11141_v31 = vld [vmem:[%s18388_s9 + $0xd8] sm:$0xff] }
 0x67d   :  { %v8946_v27 = vld [vmem:[#allocation2 + $0x2] sm:$0xff]  ;;  %v8947_v58 = vld [vmem:[#allocation2 + $0xa] sm:$0xff]  ;;  %v8949_v32 = vld [vmem:[#allocation2 + $0x52] sm:$0xff] }
 0x67e   :  { %12607 = vmatpush3.bf16.msra.mxu1 %v12604_v6  ;;  %v8948_v18 = vld [vmem:[#allocation2 + $0x4a] sm:$0xff]  ;;  %v11145_v38 = vld [vmem:[%s18388_s9 + $0xf8] sm:$0xff]  ;;  %v11113_v15 = vld [vmem:[%s18387_s8] ss:$0 sm:$0xff] }
 0x67f   :  { %12609 = vmatprep.subr.bf16.mxu1 %v12608_v51  ;;  %12667 = vmatpush3.bf16.msra.mxu0 %v12664_v23  ;;  %v11139_v6 = vld [vmem:[%s18388_s9 + $0xc8] sm:$0xff]  ;;  %v9700_v52 = vld [vmem:[%s18388_s9] sm:$0xff] }
 0x680   :  { %12669 = vmatprep.subr.bf16.mxu0 %v12668_v34  ;;  %v12676_v29 = vpack.c.bf16 %v11139_v6, %v11138_v12 }
 0x682   :  { %12611 = vmatpush3.bf16.msra.mxu1 %v12608_v51  ;;  %v12680_v51 = vpack.c.bf16 %v11141_v31, %v11140_v44 }
 0x683   :  { %12613 = vmatprep.subr.bf16.mxu1 %v12612_v57  ;;  %12671 = vmatpush3.bf16.msra.mxu0 %v12668_v34 }
 0x684   :  { %12673 = vmatprep.subr.bf16.mxu0 %v12672_v37 }
 0x686   :  { %12615 = vmatpush3.bf16.msra.mxu1 %v12612_v57  ;;  %v12684_v57 = vpack.c.bf16 %v11143_v9, %v11142_v1 }
 0x687   :  { %12617 = vmatprep.subr.bf16.mxu1 %v12616_v49  ;;  %12675 = vmatpush3.bf16.msra.mxu0 %v12672_v37 }
 0x688   :  { %12677 = vmatprep.subr.bf16.mxu0 %v12676_v29 }
 0x68a   :  { %12619 = vmatpush3.bf16.msra.mxu1 %v12616_v49  ;;  %v12688_v49 = vpack.c.bf16 %v11145_v38, %v11144_v60 }
 0x68b   :  { %12621 = vmatprep.subr.bf16.mxu1 %v12620_v45  ;;  %12679 = vmatpush3.bf16.msra.mxu0 %v12676_v29 }
 0x68c   :  { %12681 = vmatprep.subr.bf16.mxu0 %v12680_v51 }
 0x68e   :  { %12623 = vmatpush3.bf16.msra.mxu1 %v12620_v45  ;;  %v9701_v45 = vld [vmem:[%s18388_s9 + $0x8] sm:$0xff] }
 0x68f   :  { %12625 = vmatprep.subr.bf16.mxu1 %v12624_v30  ;;  %12683 = vmatpush3.bf16.msra.mxu0 %v12680_v51  ;;  %v17705_v40 = vpack.c.bf16 %v9701_v45, %v9700_v52 }
 0x690   :  { %12685 = vmatprep.subr.bf16.mxu0 %v12684_v57 }
 0x692   :  { %12627 = vmatpush3.bf16.msra.mxu1 %v12624_v30 }
 0x693   :  { %12629 = vmatprep.subr.bf16.mxu1 %v12628_v53  ;;  %12687 = vmatpush3.bf16.msra.mxu0 %v12684_v57 }
 0x694   :  { %12689 = vmatprep.subr.bf16.mxu0 %v12688_v49 }
 0x695   :  { %12052 = vmatmul.mubr.f32.vlgmr.msra.gmra.mrb[16].mxu1 %v8736_v41 }
 0x696   :  { %12054 = vmatprep.mubr.f32.mxu1 %v8737_v14  ;;  %12631 = vmatpush3.bf16.msra.mxu1 %v12628_v53 }
 0x697   :  { %12633 = vmatprep.subr.bf16.mxu1 %v12632_v11  ;;  %12691 = vmatpush3.bf16.msra.mxu0 %v12688_v49 }
 0x698   :  { %12693 = vmatprep.subr.bf16.mxu0 %v17705_v40 }
 0x699   :  { %12055 = vmatmul.mubr.f32.gmra.mrb[18].mxu1 %v8738_v0 }
 0x69a   :  { %12635 = vmatpush3.bf16.msra.mxu1 %v12632_v11  ;;  %12089 = vmatprep.mubr.f32.mxu1 %v8946_v27 }
 0x69b   :  { %12637 = vmatprep.subr.bf16.mxu1 %v12636_v13 }
 0x69e   :  { %12639 = vmatpush3.bf16.msra.mxu1 %v12636_v13 }
 0x69f   :  { %12641 = vmatprep.subr.bf16.mxu1 %v12640_v17 }
 0x6a2   :  { %12643 = vmatpush3.bf16.msra.mxu1 %v12640_v17 }
 0x6a3   :  { %12645 = vmatprep.subr.bf16.mxu1 %v12644_v42 }
 0x6a6   :  { %12647 = vmatpush3.bf16.msra.mxu1 %v12644_v42 }
 0x6a7   :  { %12649 = vmatprep.subr.bf16.mxu1 %v12648_v56 }
 0x6aa   :  { %12651 = vmatpush3.bf16.msra.mxu1 %v12648_v56 }
 0x6ab   :  { %12653 = vmatprep.subr.bf16.mxu1 %v12652_v8 }
 0x6ae   :  { %12655 = vmatpush3.bf16.msra.mxu1 %v12652_v8 }
 0x6af   :  { %12657 = vmatprep.subr.bf16.mxu1 %v12656_v19 }
 0x6b2   :  { %12659 = vmatpush3.bf16.msra.mxu1 %v12656_v19 }
 0x6b5   :  { %12090 = vmatmul.mubr.f32.vlgmr.msra.gmra.mrb[16].mxu1 %v8947_v58 }
 0x6b6   :  { %12092 = vmatprep.mubr.f32.mxu1 %v8948_v18 }
 0x6b9   :  { %12093 = vmatmul.mubr.f32.gmra.mrb[18].mxu1 %v8949_v32 }
 0x6ba   :  { %12232 = vmatprep.mubr.msk.f32.mxu1 %vm12967_vm7, %v18822_v24 }
 0x788   :  { %v12091_v48 = vpop.f32.mrb[16].mxu1 }
 0x789   :  { %v9062_v30 = vadd.f32 %v12091_v48, %v11113_v15  ;;  %v9033_v59 = vpop.f32.mrb[17].mxu1 }
 0x78a   :  { %v9061_v35 = vadd.f32 %v11113_v15, %v9033_v59 }
 0x78b   :  { %v9088_v53 = vcombine.high %v9062_v30, %v9062_v30  ;;  %v9095_v28 = vrot.slane %v9062_v30, %v18850_v2 }
 0x78c   :  { %v9071_v43 = vcombine.high %v9061_v35, %v9061_v35  ;;  %v9078_v11 = vrot.slane %v9061_v35, %v18850_v2  ;;  %v12094_v41 = vpop.f32.mrb[18].mxu1 }
 0x78d   :  { %v9102_v25 = vrot.slane %v9088_v53, %v18850_v2  ;;  %v9103_v39 = vcombine.high %v9095_v28, %v9095_v28  ;;  %v11118_v14 = vrot.slane %v9095_v28, 9  ;;  %v9043_v13 = vpop.f32.mrb[19].mxu1  ;;  %v9064_v21 = vadd.f32 %v12094_v41, %v11113_v15 }
 0x78e   :  { %v9085_v0 = vrot.slane %v9071_v43, %v18850_v2  ;;  %v9086_v55 = vcombine.high %v9078_v11, %v9078_v11  ;;  %v11114_v20 = vrot.slane %v9078_v11, 9  ;;  %v9063_v10 = vadd.f32 %v11113_v15, %v9043_v13 }
 0x78f   :  { %v9104_v27 = vcombine.high %v9102_v25, %v9102_v25  ;;  %v11119_v17 = vrot.slane %v9103_v39, 9  ;;  %v11120_v4 = vrot.slane %v9102_v25, 9  ;;  %v9207_v3 = vmax.f32 %v9095_v28, %v11118_v14 }
 0x790   :  { %v9087_v42 = vcombine.high %v9085_v0, %v9085_v0  ;;  %v11115_v36 = vrot.slane %v9086_v55, 9  ;;  %v11116_v61 = vrot.slane %v9085_v0, 9  ;;  %v9203_v56 = vmax.f32 %v9078_v11, %v11114_v20 }
 0x791   :  { %v11121_v7 = vrot.slane %v9104_v27, 9  ;;  %v9208_v47 = vmax.f32 %v9103_v39, %v11119_v17  ;;  %v9209_v8 = vmax.f32 %v9102_v25, %v11120_v4  ;;  %v17712_v33 = vmax.f32 %v9207_v3, 0.0 }
 0x792   :  { %v11117_v63 = vrot.slane %v9087_v42, 9  ;;  %v9204_v19 = vmax.f32 %v9086_v55, %v11115_v36  ;;  %v9205_v58 = vmax.f32 %v9085_v0, %v11116_v61  ;;  %v17718_v16 = vmax.f32 %v9203_v56, 0.0 }
 0x793   :  { %v9210_v18 = vmax.f32 %v9104_v27, %v11121_v7  ;;  %v17714_v32 = vmax.f32 %v9208_v47, 0.0  ;;  %v17716_v5 = vmax.f32 %v9209_v8, 0.0  ;;  %v9343_v23 = vmul.f32 %v17712_v33, %v17712_v33 }
 0x794   :  { %v9206_v50 = vmax.f32 %v9087_v42, %v11117_v63  ;;  %v17720_v62 = vmax.f32 %v9204_v19, 0.0  ;;  %v17722_v46 = vmax.f32 %v9205_v58, 0.0  ;;  %v9270_v54 = vrot.slane %v17712_v33, %v13210_v26 }
 0x795   :  { %v17726_v34 = vmax.f32 %v9210_v18, 0.0  ;;  %v9274_v22 = vrot.slane %v17714_v32, %v13210_v26  ;;  %v9278_v12 = vrot.slane %v17716_v5, %v13210_v26  ;;  %v9344_v6 = vmul.f32 %v17714_v32, %v17714_v32 }
 0x796   :  { %v17732_v37 = vmax.f32 %v9206_v50, 0.0  ;;  %v9254_v44 = vrot.slane %v17718_v16, %v13210_v26  ;;  %v9258_v29 = vrot.slane %v17720_v62, %v13210_v26  ;;  %v9345_v31 = vmul.f32 %v17716_v5, %v17716_v5 }
 0x797   :  { %v9262_v51 = vrot.slane %v17722_v46, %v13210_v26  ;;  %v9339_v9 = vmul.f32 %v17718_v16, %v17718_v16  ;;  %v9390_v57 = vrot.slane %v9343_v23, %v13210_v26  ;;  %v9340_v38 = vmul.f32 %v17720_v62, %v17720_v62 }
 0x798   :  { %v9266_v1 = vrot.slane %v17732_v37, %v13210_v26  ;;  %v9315_v60 = vsel %vm2315_vm0, %v9258_v29, %v9254_v44  ;;  %v9341_v49 = vmul.f32 %v17722_v46, %v17722_v46  ;;  %v9342_v52 = vmul.f32 %v17732_v37, %v17732_v37 }
 0x799   :  { %v9316_v15 = vsel %vm2317_vm1, %v9262_v51, %v9315_v60  ;;  %v9374_v45 = vrot.slane %v9339_v9, %v13210_v26  ;;  %v9122_v48 = vcombine.high %v9064_v21, %v9064_v21  ;;  %v9378_v59 = vrot.slane %v9340_v38, %v13210_v26 }
 0x79a   :  { %v9317_v30 = vsel %vm2319_vm2, %v9266_v1, %v9316_v15  ;;  %v9382_v35 = vrot.slane %v9341_v49, %v13210_v26  ;;  %v9129_v53 = vrot.slane %v9064_v21, %v18850_v2  ;;  %v9282_v28 = vrot.slane %v17726_v34, %v13210_v26 }
 0x79b   :  { %v9318_v43 = vsel %vm2321_vm3, %v9270_v54, %v9317_v30  ;;  %v9386_v11 = vrot.slane %v9342_v52, %v13210_v26  ;;  %v9136_v41 = vrot.slane %v9122_v48, %v18850_v2  ;;  %v9346_v25 = vmul.f32 %v17726_v34, %v17726_v34 }
 0x79c   :  { %v9319_v39 = vsel %vm2323_vm4, %v9274_v22, %v9318_v43  ;;  %v9435_v14 = vsel %vm2315_vm0, %v9378_v59, %v9374_v45  ;;  %v9105_v13 = vcombine.high %v9063_v10, %v9063_v10  ;;  %v9137_v20 = vcombine.high %v9129_v53, %v9129_v53 }
 0x79d   :  { %v9320_v0 = vsel %vm2325_vm5, %v9278_v12, %v9319_v39  ;;  %v9436_v55 = vsel %vm2317_vm1, %v9382_v35, %v9435_v14  ;;  %v11126_v27 = vrot.slane %v9129_v53, 9  ;;  %v9394_v17 = vrot.slane %v9344_v6, %v13210_v26 }
 0x79e   :  { %v17777_v4 = vsel %vm2327_vm6, %v9282_v28, %v9320_v0  ;;  %v9437_v3 = vsel %vm2319_vm2, %v9386_v11, %v9436_v55  ;;  %v9398_v42 = vrot.slane %v9345_v31, %v13210_v26  ;;  %v9138_v61 = vcombine.high %v9136_v41, %v9136_v41 }
 0x79f   :  { %v9438_v36 = vsel %vm2321_vm3, %v9390_v57, %v9437_v3  ;;  %v9112_v56 = vrot.slane %v9063_v10, %v18850_v2  ;;  %v9402_v7 = vrot.slane %v9346_v25, %v13210_v26  ;;  %v11128_v8 = vrot.slane %v9136_v41, 9 }
 0x7a0   :  { %v9439_v47 = vsel %vm2323_vm4, %v9394_v17, %v9438_v36  ;;  %v9119_v63 = vrot.slane %v9105_v13, %v18850_v2  ;;  %v11127_v58 = vrot.slane %v9137_v20, 9  ;;  %v9215_v18 = vmax.f32 %v9129_v53, %v11126_v27 }
 0x7a1   :  { %v9440_v19 = vsel %vm2325_vm5, %v9398_v42, %v9439_v47  ;;  %v9120_v50 = vcombine.high %v9112_v56, %v9112_v56  ;;  %v11129_v21 = vrot.slane %v9138_v61, 9  ;;  %v11122_v22 = vrot.slane %v9112_v56, 9 }
 0x7a2   :  { %v9441_v23 = vsel %vm2327_vm6, %v9402_v7, %v9440_v19  ;;  %v9121_v54 = vcombine.high %v9119_v63, %v9119_v63  ;;  %v9216_v12 = vmax.f32 %v9137_v20, %v11127_v58  ;;  %v9217_v6 = vmax.f32 %v9136_v41, %v11128_v8 }
 0x7a3   :  { %v17788_v10 = vmax.f32 %v9215_v18, 0.0  ;;  %v11123_v44 = vrot.slane %v9120_v50, 9  ;;  %v11124_v29 = vrot.slane %v9119_v63, 9  ;;  %v9211_v51 = vmax.f32 %v9112_v56, %v11122_v22 }
 0x7a4   :  { %v11125_v31 = vrot.slane %v9121_v54, 9  ;;  %v9218_v1 = vmax.f32 %v9138_v61, %v11129_v21  ;;  %v17792_v49 = vmax.f32 %v9216_v12, 0.0  ;;  %v17794_v15 = vmax.f32 %v9217_v6, 0.0 }
 0x7a5   :  { %v9212_v9 = vmax.f32 %v9120_v50, %v11123_v44  ;;  %v9213_v57 = vmax.f32 %v9119_v63, %v11124_v29  ;;  %v17790_v38 = vmax.f32 %v9211_v51, 0.0  ;;  %v9302_v52 = vrot.slane %v17788_v10, %v13210_v26 }
 0x7a6   :  { %v9214_v60 = vmax.f32 %v9121_v54, %v11125_v31  ;;  %v9351_v48 = vmul.f32 %v17788_v10, %v17788_v10  ;;  %v17808_v53 = vmax.f32 %v9218_v1, 0.0  ;;  %v9352_v13 = vmul.f32 %v17792_v49, %v17792_v49 }
 0x7a7   :  { %v17798_v45 = vmax.f32 %v9212_v9, 0.0  ;;  %v17802_v30 = vmax.f32 %v9213_v57, 0.0  ;;  %v9347_v35 = vmul.f32 %v17790_v38, %v17790_v38  ;;  %v9286_v28 = vrot.slane %v17790_v38, %v13210_v26 }
 0x7a8   :  { %v17804_v59 = vmax.f32 %v9214_v60, 0.0  ;;  %v9353_v27 = vmul.f32 %v17794_v15, %v17794_v15  ;;  %v9306_v36 = vrot.slane %v17792_v49, %v13210_v26  ;;  %v9354_v61 = vmul.f32 %v17808_v53, %v17808_v53 }
 0x7a9   :  { %v9290_v43 = vrot.slane %v17798_v45, %v13210_v26  ;;  %v9348_v11 = vmul.f32 %v17798_v45, %v17798_v45  ;;  %v9294_v41 = vrot.slane %v17802_v30, %v13210_v26  ;;  %v9349_v39 = vmul.f32 %v17802_v30, %v17802_v30 }
 0x7aa   :  { %v9298_v25 = vrot.slane %v17804_v59, %v13210_v26  ;;  %v9350_v14 = vmul.f32 %v17804_v59, %v17804_v59  ;;  %v9406_v55 = vrot.slane %v9347_v35, %v13210_v26  ;;  %v9310_v47 = vrot.slane %v17794_v15, %v13210_v26 }
 0x7ab   :  { %v9322_v0 = vsel %vm2315_vm0, %v9290_v43, %v9286_v28  ;;  %v9410_v20 = vrot.slane %v9348_v11, %v13210_v26  ;;  %v9414_v3 = vrot.slane %v9349_v39, %v13210_v26  ;;  %v9422_v8 = vrot.slane %v9351_v48, %v13210_v26 }
 0x7ac   :  { %v9323_v17 = vsel %vm2317_vm1, %v9294_v41, %v9322_v0  ;;  %v9418_v42 = vrot.slane %v9350_v14, %v13210_v26  ;;  %v9314_v58 = vrot.slane %v17808_v53, %v13210_v26  ;;  %v9426_v18 = vrot.slane %v9352_v13, %v13210_v26 }
 0x7ad   :  { %v9324_v56 = vsel %vm2319_vm2, %v9298_v25, %v9323_v17  ;;  %v9442_v7 = vsel %vm2315_vm0, %v9410_v20, %v9406_v55  ;;  %v9430_v54 = vrot.slane %v9353_v27, %v13210_v26  ;;  %v9434_v6 = vrot.slane %v9354_v61, %v13210_v26 }
 0x7ae   :  { %v9325_v63 = vsel %vm2321_vm3, %v9302_v52, %v9324_v56  ;;  %v9443_v19 = vsel %vm2317_vm1, %v9414_v3, %v9442_v7  ;;  %v9066_v3 = vld [vmem:[%s18387_s8 + $0x2] sm:$0x1] }
 0x7af   :  { %v9326_v50 = vsel %vm2323_vm4, %v9306_v36, %v9325_v63  ;;  %v9444_v21 = vsel %vm2319_vm2, %v9418_v42, %v9443_v19 }
 0x7b0   :  { %v9327_v22 = vsel %vm2325_vm5, %v9310_v47, %v9326_v50  ;;  %v9445_v12 = vsel %vm2321_vm3, %v9422_v8, %v9444_v21 }
 0x7b1   :  { %v9328_v44 = vsel %vm2327_vm6, %v9314_v58, %v9327_v22  ;;  %v9446_v29 = vsel %vm2323_vm4, %v9426_v18, %v9445_v12 }
 0x7b2   :  { %v9331_v31 = vadd.f32 %v9328_v44, %v17777_v4  ;;  %v9447_v51 = vsel %vm2325_vm5, %v9430_v54, %v9446_v29 }
 0x7b3   :  { %v9448_v1 = vsel %vm2327_vm6, %v9434_v6, %v9447_v51 }
 0x7b4   :  { %v9332_v9 = vrot.slane %v9331_v31, 4  ;;  %v9451_v57 = vadd.f32 %v9448_v1, %v9441_v23  ;;  %v9065_v23 = vld [vmem:[%s18387_s8 + $0x1] sm:$0x1] }
 0x7b6   :  { %v9333_v60 = vadd.f32 %v9332_v9, %v9331_v31  ;;  %v9452_v52 = vrot.slane %v9451_v57, 4 }
 0x7b8   :  { %v9334_v48 = vrot.slane %v9333_v60, 2  ;;  %v9453_v35 = vadd.f32 %v9452_v52, %v9451_v57 }
 0x7ba   :  { %v9335_v28 = vadd.f32 %v9334_v48, %v9333_v60  ;;  %v9454_v43 = vrot.slane %v9453_v35, 2 }
 0x7bc   :  { %v9336_v11 = vrot.slane %v9335_v28, 1  ;;  %v9455_v41 = vadd.f32 %v9454_v43, %v9453_v35 }
 0x7be   :  { %v9337_v25 = vadd.f32 %v9336_v11, %v9335_v28  ;;  %v9456_v39 = vrot.slane %v9455_v41, 1 }
 0x7c0   :  { %v9338_v14 = vmul.f32 0.0625, %v9337_v25  ;;  %v9457_v13 = vadd.f32 %v9456_v39, %v9455_v41 }
 0x7c2   :  { %v9458_v0 = vmul.f32 0.0625, %v9457_v13  ;;  %v9459_v4 = vmul.f32 %v9338_v14, %v9338_v14 }
 0x7c4   :  { %v9460_v55 = vsub.f32 %v9458_v0, %v9459_v4 }
 0x7c6   :  { %v9461_v20 = vadd.f32 1e-05, %v9460_v55 }
 0x7c8   :  { %12934 = vrsqrt.f32 %v9461_v20 }
 0x7d2   :  { %v12935_v27 = vpop.eup %12934 }
 0x7d3   :  { %v9463_v17 = vmul.f32 %v12935_v27, %v9065_v23 }
 0x7d5   :  { %v9464_v42 = vmul.f32 %v9463_v17, %v9338_v14  ;;  %v9469_v36 = vrot.slane %v9463_v17, %v13210_v26 }
 0x7d7   :  { %v9465_v61 = vsub.f32 %v9066_v3, %v9464_v42  ;;  %v9471_v56 = vcombine.high %v9469_v36, %v9469_v36  ;;  %v9478_v7 = vrot.slane %v9469_v36, %v18850_v2 }
 0x7d9   :  { %v9485_v47 = vrot.slane %v9471_v56, %v18850_v2  ;;  %v9486_v8 = vcombine.high %v9478_v7, %v9478_v7  ;;  %v9488_v63 = vrot.slane %v9478_v7, 1  ;;  %v9500_v19 = vmul.f32 %v9478_v7, %v17718_v16 }
 0x7da   :  { %v9508_v58 = vmul.f32 %v9478_v7, %v17790_v38  ;;  %v9519_v18 = vrot.slane %v9465_v61, %v13210_v26 }
 0x7db   :  { %v9487_v50 = vcombine.high %v9485_v47, %v9485_v47  ;;  %v9489_v21 = vrot.slane %v9486_v8, 1  ;;  %v9490_v54 = vrot.slane %v9485_v47, 1  ;;  %v9501_v22 = vmul.f32 %v9488_v63, %v17720_v62 }
 0x7dc   :  { %v9502_v12 = vmul.f32 %v9486_v8, %v17722_v46  ;;  %v9504_v6 = vmul.f32 %v9485_v47, %v17712_v33  ;;  %v9509_v44 = vmul.f32 %v9488_v63, %v17798_v45  ;;  %v9510_v29 = vmul.f32 %v9486_v8, %v17802_v30 }
 0x7dd   :  { %v9491_v31 = vrot.slane %v9487_v50, 1  ;;  %v9503_v16 = vmul.f32 %v9489_v21, %v17732_v37  ;;  %v9505_v38 = vmul.f32 %v9490_v54, %v17714_v32  ;;  %v9506_v51 = vmul.f32 %v9487_v50, %v17716_v5 }
 0x7de   :  { %v9511_v1 = vmul.f32 %v9489_v21, %v17804_v59  ;;  %v9512_v9 = vmul.f32 %v9485_v47, %v17788_v10  ;;  %v9513_v62 = vmul.f32 %v9490_v54, %v17792_v49  ;;  %v9514_v46 = vmul.f32 %v9487_v50, %v17794_v15 }
 0x7df   :  { %v9507_v33 = vmul.f32 %v9491_v31, %v17726_v34  ;;  %v9515_v45 = vmul.f32 %v9491_v31, %v17808_v53  ;;  %v9521_v30 = vcombine.high %v9519_v18, %v9519_v18  ;;  %v9528_v57 = vrot.slane %v9519_v18, %v18850_v2 }
 0x7e1   :  { %v9535_v37 = vrot.slane %v9521_v30, %v18850_v2  ;;  %v9536_v32 = vcombine.high %v9528_v57, %v9528_v57  ;;  %v9538_v60 = vrot.slane %v9528_v57, 1  ;;  %v9550_v5 = vadd.f32 %v9528_v57, %v9500_v19 }
 0x7e2   :  { %v9558_v52 = vadd.f32 %v9528_v57, %v9508_v58 }
 0x7e3   :  { %v9537_v59 = vcombine.high %v9535_v37, %v9535_v37  ;;  %v9539_v48 = vrot.slane %v9536_v32, 1  ;;  %v9540_v10 = vrot.slane %v9535_v37, 1  ;;  %v9551_v35 = vadd.f32 %v9538_v60, %v9501_v22 }
 0x7e4   :  { %v9552_v49 = vadd.f32 %v9536_v32, %v9502_v12  ;;  %v9554_v28 = vadd.f32 %v9535_v37, %v9504_v6  ;;  %v9559_v15 = vadd.f32 %v9538_v60, %v9509_v44  ;;  %v9560_v43 = vadd.f32 %v9536_v32, %v9510_v29 }
 0x7e5   :  { %v9541_v34 = vrot.slane %v9537_v59, 1  ;;  %v9553_v11 = vadd.f32 %v9539_v48, %v9503_v16  ;;  %v9555_v53 = vadd.f32 %v9540_v10, %v9505_v38  ;;  %v9556_v41 = vadd.f32 %v9537_v59, %v9506_v51 }
 0x7e6   :  { %v9561_v25 = vadd.f32 %v9539_v48, %v9511_v1  ;;  %v9562_v39 = vadd.f32 %v9535_v37, %v9512_v9  ;;  %v9563_v14 = vadd.f32 %v9540_v10, %v9513_v62  ;;  %v9564_v13 = vadd.f32 %v9537_v59, %v9514_v46 }
 0x7e7   :  { %v9557_v0 = vadd.f32 %v9541_v34, %v9507_v33  ;;  %v9565_v4 = vadd.f32 %v9541_v34, %v9515_v45  ;;  %v9589_v55 = vrot.slane %v9551_v35, %v13210_v26  ;;  %v9593_v20 = vrot.slane %v9552_v49, %v13210_v26 }
 0x7e8   :  { %v9585_v23 = vrot.slane %v9550_v5, %v13210_v26  ;;  %v9597_v27 = vrot.slane %v9553_v11, %v13210_v26  ;;  %v9617_v17 = vrot.slane %v9558_v52, %v13210_v26  ;;  %v9621_v3 = vrot.slane %v9559_v15, %v13210_v26 }
 0x7e9   :  { %v9625_v42 = vrot.slane %v9560_v43, %v13210_v26  ;;  %v9629_v36 = vrot.slane %v9561_v25, %v13210_v26  ;;  %v9601_v7 = vrot.slane %v9554_v28, %v13210_v26  ;;  %v9633_v47 = vrot.slane %v9562_v39, %v13210_v26  ;;  %v9702_v25 = vld [vmem:[%s18388_s9 + $0x10] sm:$0xff]  ;;  %v9703_v39 = vld [vmem:[%s18388_s9 + $0x18] sm:$0xff] }
 0x7ea   :  { %v9646_v61 = vsel %vm2315_vm0, %v9589_v55, %v9585_v23  ;;  %v9653_v56 = vsel %vm2315_vm0, %v9621_v3, %v9617_v17  ;;  %v9605_v19 = vrot.slane %v9555_v53, %v13210_v26  ;;  %v9637_v58 = vrot.slane %v9563_v14, %v13210_v26  ;;  %v9704_v23 = vld [vmem:[%s18388_s9 + $0x20] sm:$0xff]  ;;  %v9706_v3 = vld [vmem:[%s18388_s9 + $0x30] sm:$0xff] }
 0x7eb   :  { %v9647_v8 = vsel %vm2317_vm1, %v9593_v20, %v9646_v61  ;;  %v9654_v63 = vsel %vm2317_vm1, %v9625_v42, %v9653_v56  ;;  %v9609_v21 = vrot.slane %v9556_v41, %v13210_v26  ;;  %v9641_v54 = vrot.slane %v9564_v13, %v13210_v26  ;;  %v9707_v42 = vld [vmem:[%s18388_s9 + $0x38] sm:$0xff]  ;;  %v9708_v61 = vld [vmem:[%s18388_s9 + $0x40] sm:$0xff] }
 0x7ec   :  { %v9648_v18 = vsel %vm2319_vm2, %v9597_v27, %v9647_v8  ;;  %v9655_v50 = vsel %vm2319_vm2, %v9629_v36, %v9654_v63  ;;  %v9613_v6 = vrot.slane %v9557_v0, %v13210_v26  ;;  %v9645_v44 = vrot.slane %v9565_v4, %v13210_v26  ;;  %v9705_v27 = vld [vmem:[%s18388_s9 + $0x28] sm:$0xff] }
 0x7ed   :  { %v9649_v22 = vsel %vm2321_vm3, %v9601_v7, %v9648_v18  ;;  %v9656_v12 = vsel %vm2321_vm3, %v9633_v47, %v9655_v50  ;;  %v12696_v55 = vpack.c.bf16 %v9703_v39, %v9702_v25  ;;  %v12700_v17 = vpack.c.bf16 %v9705_v27, %v9704_v23  ;;  %v9710_v7 = vld [vmem:[%s18388_s9 + $0x50] sm:$0xff]  ;;  %v9711_v47 = vld [vmem:[%s18388_s9 + $0x58] sm:$0xff]  ;;  %v11158_v25 = vld [vmem:[%s18388_s9 + $0x160] sm:$0xff] }
 0x7ee   :  { %v9650_v29 = vsel %vm2323_vm4, %v9605_v19, %v9649_v22  ;;  %v9657_v31 = vsel %vm2323_vm4, %v9637_v58, %v9656_v12  ;;  %v12704_v36 = vpack.c.bf16 %v9707_v42, %v9706_v3  ;;  %v12712_v63 = vpack.c.bf16 %v9711_v47, %v9710_v7  ;;  %v9712_v19 = vld [vmem:[%s18388_s9 + $0x60] sm:$0xff]  ;;  %v9713_v58 = vld [vmem:[%s18388_s9 + $0x68] sm:$0xff]  ;;  %v9714_v12 = vld [vmem:[%s18388_s9 + $0x70] sm:$0xff] }
 0x7ef   :  { %v9651_v16 = vsel %vm2325_vm5, %v9609_v21, %v9650_v29  ;;  %v9658_v38 = vsel %vm2325_vm5, %v9641_v54, %v9657_v31  ;;  %v12716_v54 = vpack.c.bf16 %v9713_v58, %v9712_v19  ;;  %v11159_v39 = vld [vmem:[%s18388_s9 + $0x168] sm:$0xff]  ;;  %v10377_v3 = vld [vmem:[%s18390_s11] sm:$0xff]  ;;  %v10383_v19 = vld [vmem:[%s18390_s11 + $0x30] sm:$0xff] }
 0x7f0   :  { %v9652_v51 = vsel %vm2327_vm6, %v9613_v6, %v9651_v16  ;;  %v9659_v1 = vsel %vm2327_vm6, %v9645_v44, %v9658_v38  ;;  %v9715_v6 = vld [vmem:[%s18388_s9 + $0x78] sm:$0xff]  ;;  %v10378_v42 = vld [vmem:[%s18390_s11 + $0x8] sm:$0xff]  ;;  %v10381_v47 = vld [vmem:[%s18390_s11 + $0x20] sm:$0xff] }
 0x7f1   :  { %9662 = vst [vmem:[#allocation2] sm:$0xff] %v9652_v51  ;;  %9663 = vst [vmem:[#allocation2 + $0x48] sm:$0xff] %v9659_v1  ;;  %v12720_v16 = vpack.c.bf16 %v9715_v6, %v9714_v12  ;;  %v11146_v1 = vld [vmem:[%s18388_s9 + $0x100] sm:$0xff]  ;;  %v10384_v58 = vld [vmem:[%s18390_s11 + $0x38] sm:$0xff] }
 0x7f2   :  { %v10388_v12 = vld [vmem:[%s18390_s11 + $0x58] sm:$0xff] }
 0x7f8   :  { %v9716_v9 = vld [vmem:[#allocation2 + $0x1] sm:$0x3f]  ;;  %v9717_v62 = vld [vmem:[#allocation2 + $0x49] sm:$0x3f] }
 0x7f9   :  { %v9664_v46 = vld [vmem:[#allocation2] sm:$0x3f]  ;;  %v9720_v33 = vcombine.high %v9716_v9, %v9716_v9  ;;  %v9727_v45 = vrot.slane %v9716_v9, %v18850_v2  ;;  %v9736_v30 = vcombine.high %v9717_v62, %v9717_v62  ;;  %v9743_v57 = vrot.slane %v9717_v62, %v18850_v2  ;;  %v17919_v37 = vld [vmem:[#allocation2 + $0x48] sm:$0x3f] }
 0x7fa   :  { %v9668_v32 = vcombine.high %v9664_v46, %v9664_v46  ;;  %v9675_v60 = vrot.slane %v9664_v46, %v18850_v2  ;;  %v17927_v49 = vrot.slane %v17919_v37, %v18850_v2  ;;  %v9973_v8 = vld [vmem:[#allocation2 + $0x2] sm:$0x3f]  ;;  %v9684_v21 = vcombine.high %v17919_v37, %v17919_v37  ;;  %v9974_v22 = vld [vmem:[#allocation2 + $0x4a] sm:$0x3f]  ;;  %v11148_v37 = vld [vmem:[%s18388_s9 + $0x110] sm:$0xff] }
 0x7fb   :  { %v9734_v5 = vrot.slane %v9720_v33, %v18850_v2  ;;  %v9735_v52 = vcombine.high %v9727_v45, %v9727_v45  ;;  %v9750_v59 = vrot.slane %v9736_v30, %v18850_v2  ;;  %v9751_v48 = vcombine.high %v9743_v57, %v9743_v57  ;;  %v11147_v9 = vld [vmem:[%s18388_s9 + $0x108] sm:$0xff] }
 0x7fc   :  { %v9682_v10 = vrot.slane %v9668_v32, %v18850_v2  ;;  %v9683_v35 = vcombine.high %v9675_v60, %v9675_v60  ;;  %v9977_v18 = vcombine.high %v9973_v8, %v9973_v8  ;;  %v9984_v50 = vrot.slane %v9973_v8, %v18850_v2  ;;  %v11149_v32 = vld [vmem:[%s18388_s9 + $0x118] sm:$0xff]  ;;  %v10382_v8 = vld [vmem:[%s18390_s11 + $0x28] sm:$0xff] }
 0x7fd   :  { %v9769_v28 = vcombine.low %v9727_v45, %v9735_v52  ;;  %v9770_v15 = vcombine.low %v9734_v5, %v9743_v57  ;;  %v9786_v43 = vcombine.low %v9751_v48, %v9750_v59  ;;  %v10000_v31 = vrot.slane %v9974_v22, %v18850_v2  ;;  %v11150_v59 = vld [vmem:[%s18388_s9 + $0x120] sm:$0xff]  ;;  %v11151_v48 = vld [vmem:[%s18388_s9 + $0x128] sm:$0xff] }
 0x7fe   :  { %v9871_v34 = vcombine.low %v9675_v60, %v9683_v35  ;;  %v9872_v11 = vcombine.low %v9682_v10, %v17927_v49  ;;  %v9991_v44 = vrot.slane %v9977_v18, %v18850_v2  ;;  %v9992_v29 = vcombine.high %v9984_v50, %v9984_v50  ;;  %v11152_v35 = vld [vmem:[%s18388_s9 + $0x130] sm:$0xff] }
 0x7ff   :  { %v9777_v53 = vrot.slane %v9769_v28, %v18850_v2  ;;  %v9784_v41 = vrot.slane %v9770_v15, %v18850_v2  ;;  %v9793_v4 = vrot.slane %v9786_v43, %v18850_v2  ;;  %v9698_v38 = vrot.slane %v9684_v21, %v18850_v2  ;;  %v11154_v15 = vld [vmem:[%s18388_s9 + $0x140] sm:$0xff]  ;;  %v11155_v43 = vld [vmem:[%s18388_s9 + $0x148] sm:$0xff] }
 0x800   :  { %v9879_v14 = vrot.slane %v9871_v34, %v18850_v2  ;;  %v9886_v13 = vrot.slane %v9872_v11, %v18850_v2  ;;  %v9699_v51 = vcombine.high %v17927_v49, %v17927_v49  ;;  %v10026_v62 = vcombine.low %v9984_v50, %v9992_v29  ;;  %v11153_v49 = vld [vmem:[%s18388_s9 + $0x138] sm:$0xff]  ;;  %v11156_v11 = vld [vmem:[%s18388_s9 + $0x150] sm:$0xff]  ;;  %v10385_v50 = vld [vmem:[%s18390_s11 + $0x40] sm:$0xff] }
 0x801   :  { %v9785_v0 = vcombine.low %v9777_v53, %v9784_v41  ;;  %v10027_v46 = vcombine.low %v9991_v44, %v10000_v31  ;;  %v12724_v45 = vpack.c.bf16 %v11147_v9, %v11146_v1  ;;  %v12728_v5 = vpack.c.bf16 %v11149_v32, %v11148_v37  ;;  %v11157_v53 = vld [vmem:[%s18388_s9 + $0x158] sm:$0xff]  ;;  %v10386_v21 = vld [vmem:[%s18390_s11 + $0x48] sm:$0xff]  ;;  %v10389_v44 = vld [vmem:[%s18390_s11 + $0x60] sm:$0xff] }
 0x802   :  { %v9887_v20 = vcombine.low %v9879_v14, %v9886_v13  ;;  %v9888_v33 = vcombine.low %v9699_v51, %v9698_v38  ;;  %v10034_v30 = vrot.slane %v10026_v62, %v18850_v2  ;;  %v12732_v10 = vpack.c.bf16 %v11151_v48, %v11150_v59  ;;  %v10390_v29 = vld [vmem:[%s18390_s11 + $0x68] sm:$0xff]  ;;  %v10392_v38 = vld [vmem:[%s18390_s11 + $0x78] sm:$0xff]  ;;  %v11162_v1 = vld [vmem:[%s18389_s10] ss:$0 sm:$0xff] }
 0x803   :  { %12127 = vmatprep.mubr.f32.mxu0 %v9785_v0  ;;  %v10041_v57 = vrot.slane %v10027_v46, %v18850_v2  ;;  %v12736_v28 = vpack.c.bf16 %v11153_v49, %v11152_v35  ;;  %v12740_v34 = vpack.c.bf16 %v11155_v43, %v11154_v15  ;;  %v12744_v41 = vpack.c.bf16 %v11157_v53, %v11156_v11  ;;  %v11160_v0 = vld [vmem:[%s18388_s9 + $0x170] sm:$0xff]  ;;  %v10682_v15 = vld [vmem:[%s18392_s13] sm:$0xff]  ;;  %v10683_v43 = vld [vmem:[%s18392_s13 + $0x8] sm:$0xff] }
 0x804   :  { %12128 = vmatmul.mubr.f32.vlgmr.msra.gmra.mrb[40].mxu0 %v9793_v4  ;;  %v9895_v60 = vrot.slane %v9888_v33, %v18850_v2  ;;  %v9993_v14 = vcombine.high %v9974_v22, %v9974_v22  ;;  %v12748_v13 = vpack.c.bf16 %v11159_v39, %v11158_v25  ;;  %v11161_v4 = vld [vmem:[%s18388_s9 + $0x178] sm:$0xff]  ;;  %v10008_v23 = vcombine.high %v10000_v31, %v10000_v31  ;;  %v10387_v22 = vld [vmem:[%s18390_s11 + $0x50] sm:$0xff] }
 0x805   :  { %12695 = vmatpush3.bf16.msra.mxu0 %v17705_v40  ;;  %12162 = vmatprep.mubr.f32.mxu0 %v9887_v20  ;;  %v9709_v40 = vld [vmem:[%s18388_s9 + $0x48] sm:$0xff]  ;;  %v10042_v52 = vcombine.low %v10034_v30, %v10041_v57  ;;  %v12766_v18 = vpack.c.bf16 %v10384_v58, %v10383_v19  ;;  %v12772_v6 = vpack.c.bf16 %v10388_v12, %v10387_v22  ;;  %v10685_v25 = vld [vmem:[%s18392_s13 + $0x18] sm:$0xff]  ;;  %v10688_v12 = vld [vmem:[%s18392_s13 + $0x30] sm:$0xff] }
 0x806   :  { %12697 = vmatprep.subr.bf16.mxu0 %v12696_v55  ;;  %v12708_v56 = vpack.c.bf16 %v9709_v40, %v9708_v61  ;;  %v10007_v20 = vrot.slane %v9993_v14, %v18850_v2  ;;  %v12966_v61 = vmov 0.0|0.0   ;;  %v10379_v40 = vld [vmem:[%s18390_s11 + $0x10] sm:$0xff]  ;;  %v12775_v31 = vpack.c.bf16 %v10390_v29, %v10389_v44 }
 0x807   :  { %12756 = vmatprep.subr.bf16.mxu1 %v12966_v61 }
 0x808   :  { %v10043_v27 = vcombine.low %v10008_v23, %v10007_v20 }
 0x809   :  { %12699 = vmatpush3.bf16.msra.mxu0 %v12696_v55  ;;  %v12752_v55 = vpack.c.bf16 %v11161_v4, %v11160_v0 }
 0x80a   :  { %12701 = vmatprep.subr.bf16.mxu0 %v12700_v17 }
 0x80d   :  { %12703 = vmatpush3.bf16.msra.mxu0 %v12700_v17  ;;  %v10050_v17 = vrot.slane %v10043_v27, %v18850_v2 }
 0x80e   :  { %12705 = vmatprep.subr.bf16.mxu0 %v12704_v36 }
 0x811   :  { %12707 = vmatpush3.bf16.msra.mxu0 %v12704_v36  ;;  %v12757_v36 = vpack.c.bf16 %v10378_v42, %v10377_v3  ;;  %v10687_v3 = vld [vmem:[%s18392_s13 + $0x28] sm:$0xff] }
 0x812   :  { %12709 = vmatprep.subr.bf16.mxu0 %v12708_v56 }
 0x813   :  { %12758 = vmatpush3.bf16.msra.mxu1 %v12757_v36 }
 0x814   :  { %12759 = vmatprep.subr.bf16.mxu1 %v12966_v61 }
 0x815   :  { %12711 = vmatpush3.bf16.msra.mxu0 %v12708_v56  ;;  %v10380_v56 = vld [vmem:[%s18390_s11 + $0x18] sm:$0xff] }
 0x816   :  { %12713 = vmatprep.subr.bf16.mxu0 %v12712_v63  ;;  %v12760_v7 = vpack.c.bf16 %v10380_v56, %v10379_v40 }
 0x818   :  { %12761 = vmatpush3.bf16.msra.mxu1 %v12760_v7 }
 0x819   :  { %12715 = vmatpush3.bf16.msra.mxu0 %v12712_v63  ;;  %12762 = vmatprep.subr.bf16.mxu1 %v12966_v61  ;;  %v12763_v63 = vpack.c.bf16 %v10382_v8, %v10381_v47 }
 0x81a   :  { %12717 = vmatprep.subr.bf16.mxu0 %v12716_v54 }
 0x81c   :  { %12764 = vmatpush3.bf16.msra.mxu1 %v12763_v63 }
 0x81d   :  { %12719 = vmatpush3.bf16.msra.mxu0 %v12716_v54  ;;  %12765 = vmatprep.subr.bf16.mxu1 %v12966_v61  ;;  %v12769_v54 = vpack.c.bf16 %v10386_v21, %v10385_v50 }
 0x81e   :  { %12721 = vmatprep.subr.bf16.mxu0 %v12720_v16 }
 0x820   :  { %12767 = vmatpush3.bf16.msra.mxu1 %v12766_v18 }
 0x821   :  { %12723 = vmatpush3.bf16.msra.mxu0 %v12720_v16  ;;  %12768 = vmatprep.subr.bf16.mxu1 %v12966_v61  ;;  %v10391_v16 = vld [vmem:[%s18390_s11 + $0x70] sm:$0xff] }
 0x822   :  { %12725 = vmatprep.subr.bf16.mxu0 %v12724_v45  ;;  %v12778_v51 = vpack.c.bf16 %v10392_v38, %v10391_v16 }
 0x824   :  { %12163 = vmatmul.mubr.f32.vlgmr.msra.gmra.mrb[40].mxu0 %v9895_v60  ;;  %12770 = vmatpush3.bf16.msra.mxu1 %v12769_v54 }
 0x825   :  { %12727 = vmatpush3.bf16.msra.mxu0 %v12724_v45  ;;  %12197 = vmatprep.mubr.f32.mxu0 %v10042_v52 }
 0x826   :  { %12729 = vmatprep.subr.bf16.mxu0 %v12728_v5  ;;  %12771 = vmatprep.subr.bf16.mxu1 %v12966_v61 }
 0x828   :  { %12773 = vmatpush3.bf16.msra.mxu1 %v12772_v6  ;;  %v10689_v6 = vld [vmem:[%s18392_s13 + $0x38] sm:$0xff] }
 0x829   :  { %12731 = vmatpush3.bf16.msra.mxu0 %v12728_v5  ;;  %12774 = vmatprep.subr.bf16.mxu1 %v12966_v61 }
 0x82a   :  { %12733 = vmatprep.subr.bf16.mxu0 %v12732_v10 }
 0x82c   :  { %12776 = vmatpush3.bf16.msra.mxu1 %v12775_v31 }
 0x82d   :  { %12735 = vmatpush3.bf16.msra.mxu0 %v12732_v10  ;;  %12777 = vmatprep.subr.bf16.mxu1 %v12966_v61 }
 0x82e   :  { %12737 = vmatprep.subr.bf16.mxu0 %v12736_v28 }
 0x830   :  { %12779 = vmatpush3.bf16.msra.mxu1 %v12778_v51 }
 0x831   :  { %12739 = vmatpush3.bf16.msra.mxu0 %v12736_v28  ;;  %12780 = vmatprep.subr.bf16.mxu1 %v12966_v61 }
 0x832   :  { %12741 = vmatprep.subr.bf16.mxu0 %v12740_v34 }
 0x835   :  { %12743 = vmatpush3.bf16.msra.mxu0 %v12740_v34  ;;  %v10684_v34 = vld [vmem:[%s18392_s13 + $0x10] sm:$0xff] }
 0x836   :  { %12745 = vmatprep.subr.bf16.mxu0 %v12744_v41 }
 0x839   :  { %12747 = vmatpush3.bf16.msra.mxu0 %v12744_v41  ;;  %v12829_v41 = vpack.c.bf16 %v10683_v43, %v10682_v15  ;;  %v10693_v15 = vld [vmem:[%s18392_s13 + $0x58] sm:$0xff] }
 0x83a   :  { %12749 = vmatprep.subr.bf16.mxu0 %v12748_v13 }
 0x83d   :  { %12751 = vmatpush3.bf16.msra.mxu0 %v12748_v13 }
 0x83e   :  { %12753 = vmatprep.subr.bf16.mxu0 %v12752_v55 }
 0x841   :  { %12755 = vmatpush3.bf16.msra.mxu0 %v12752_v55  ;;  %v12832_v55 = vpack.c.bf16 %v10685_v25, %v10684_v34 }
 0x842   :  { %12828 = vmatprep.subr.bf16.mxu0 %v12966_v61 }
 0x844   :  { %12198 = vmatmul.mubr.f32.vlgmr.msra.gmra.mrb[40].mxu0 %v10050_v17  ;;  %v10686_v17 = vld [vmem:[%s18392_s13 + $0x20] sm:$0xff] }
 0x845   :  { %12337 = vmatprep.mubr.msk.f32.mxu0 %vm12967_vm7, %v18822_v24  ;;  %12830 = vmatpush3.bf16.msra.mxu0 %v12829_v41  ;;  %v12835_v18 = vpack.c.bf16 %v10687_v3, %v10686_v17 }
 0x846   :  { %12831 = vmatprep.subr.bf16.mxu0 %v12966_v61 }
 0x849   :  { %12833 = vmatpush3.bf16.msra.mxu0 %v12832_v55 }
 0x84a   :  { %12834 = vmatprep.subr.bf16.mxu0 %v12966_v61 }
 0x84d   :  { %12836 = vmatpush3.bf16.msra.mxu0 %v12835_v18  ;;  %v10138_v18 = vld [vmem:[%s18389_s10 + $0x2] sm:$0x1] }
 0x84e   :  { %12837 = vmatprep.subr.bf16.mxu0 %v12966_v61 }
 0x917   :  { %v12199_v9 = vpop.f32.mrb[40].mxu0 }
 0x918   :  { %v10136_v62 = vadd.f32 %v12199_v9, %v11162_v1  ;;  %v10119_v46 = vpop.f32.mrb[41].mxu0 }
 0x919   :  { %v10135_v33 = vadd.f32 %v11162_v1, %v10119_v46 }
 0x91a   :  { %v10164_v45 = vrot.slane %v10136_v62, %v18850_v2 }
 0x91b   :  { %v10141_v30 = vcombine.high %v10135_v33, %v10135_v33  ;;  %v10148_v57 = vrot.slane %v10135_v33, %v18850_v2  ;;  %v12838_v33 = vpack.c.bf16 %v10689_v6, %v10688_v12 }
 0x91c   :  { %v10165_v37 = vcombine.high %v10164_v45, %v10164_v45  ;;  %v11167_v32 = vrot.slane %v10164_v45, 9 }
 0x91d   :  { %v10155_v60 = vrot.slane %v10141_v30, %v18850_v2  ;;  %v10156_v5 = vcombine.high %v10148_v57, %v10148_v57  ;;  %v11163_v52 = vrot.slane %v10148_v57, 9  ;;  %12839 = vmatpush3.bf16.msra.mxu0 %v12838_v33 }
 0x91e   :  { %v11168_v59 = vrot.slane %v10165_v37, 9  ;;  %v10194_v48 = vmax.f32 %v10164_v45, %v11167_v32  ;;  %v10691_v32 = vld [vmem:[%s18392_s13 + $0x48] sm:$0xff]  ;;  %12840 = vmatprep.subr.bf16.mxu0 %v12966_v61 }
 0x91f   :  { %v10157_v10 = vcombine.high %v10155_v60, %v10155_v60  ;;  %v11164_v35 = vrot.slane %v10156_v5, 9  ;;  %v11165_v49 = vrot.slane %v10155_v60, 9  ;;  %v10190_v28 = vmax.f32 %v10148_v57, %v11163_v52 }
 0x920   :  { %v10195_v11 = vmax.f32 %v10165_v37, %v11168_v59  ;;  %v18116_v53 = vmax.f32 %v10194_v48, 0.0  ;;  %v10690_v37 = vld [vmem:[%s18392_s13 + $0x40] sm:$0xff] }
 0x921   :  { %v11166_v39 = vrot.slane %v10157_v10, 9  ;;  %v10191_v14 = vmax.f32 %v10156_v5, %v11164_v35  ;;  %v10192_v13 = vmax.f32 %v10155_v60, %v11165_v49  ;;  %v18121_v0 = vmax.f32 %v10190_v28, 0.0  ;;  %v10692_v28 = vld [vmem:[%s18392_s13 + $0x50] sm:$0xff] }
 0x922   :  { %v18123_v4 = vmax.f32 %v10195_v11, 0.0  ;;  %v10251_v42 = vmul.f32 %v18116_v53, %v18116_v53  ;;  %v10227_v44 = vrot.slane %v18116_v53, %v13210_v26  ;;  %v12844_v11 = vpack.c.bf16 %v10693_v15, %v10692_v28 }
 0x923   :  { %v10193_v20 = vmax.f32 %v10157_v10, %v11166_v39  ;;  %v18125_v23 = vmax.f32 %v10191_v14, 0.0  ;;  %v18127_v27 = vmax.f32 %v10192_v13, 0.0  ;;  %v10211_v36 = vrot.slane %v18121_v0, %v13210_v26  ;;  %v10694_v39 = vld [vmem:[%s18392_s13 + $0x60] sm:$0xff]  ;;  %v10695_v14 = vld [vmem:[%s18392_s13 + $0x68] sm:$0xff] }
 0x924   :  { %v10247_v40 = vmul.f32 %v18121_v0, %v18121_v0  ;;  %v10252_v63 = vmul.f32 %v18123_v4, %v18123_v4  ;;  %v10231_v16 = vrot.slane %v18123_v4, %v13210_v26  ;;  %v10278_v9 = vrot.slane %v10251_v42, %v13210_v26 }
 0x925   :  { %v18142_v56 = vmax.f32 %v10193_v20, 0.0  ;;  %v10215_v7 = vrot.slane %v18125_v23, %v13210_v26  ;;  %v10219_v47 = vrot.slane %v18127_v27, %v13210_v26  ;;  %v10248_v8 = vmul.f32 %v18125_v23, %v18125_v23 }
 0x926   :  { %v10249_v19 = vmul.f32 %v18127_v27, %v18127_v27  ;;  %v10262_v58 = vrot.slane %v10247_v40, %v13210_v26  ;;  %v10282_v45 = vrot.slane %v10252_v63, %v13210_v26  ;;  %v12841_v10 = vpack.c.bf16 %v10691_v32, %v10690_v37  ;;  %v10137_v63 = vld [vmem:[%s18389_s10 + $0x1] sm:$0x1] }
 0x927   :  { %v10223_v50 = vrot.slane %v18142_v56, %v13210_v26  ;;  %v10232_v21 = vsel %vm2315_vm0, %v10215_v7, %v10211_v36  ;;  %v10250_v54 = vmul.f32 %v18142_v56, %v18142_v56  ;;  %v10266_v22 = vrot.slane %v10248_v8, %v13210_v26 }
 0x928   :  { %v10233_v29 = vsel %vm2317_vm1, %v10219_v47, %v10232_v21  ;;  %v10270_v31 = vrot.slane %v10249_v19, %v13210_v26  ;;  %12842 = vmatpush3.bf16.msra.mxu0 %v12841_v10  ;;  %v12847_v20 = vpack.c.bf16 %v10695_v14, %v10694_v39  ;;  %v11175_v14 = vld [vmem:[%s18390_s11 + $0xa8] sm:$0xff] }
 0x929   :  { %v10234_v38 = vsel %vm2319_vm2, %v10223_v50, %v10233_v29  ;;  %v10274_v51 = vrot.slane %v10250_v54, %v13210_v26  ;;  %v10283_v1 = vsel %vm2315_vm0, %v10266_v22, %v10262_v58  ;;  %12843 = vmatprep.subr.bf16.mxu0 %v12966_v61 }
 0x92a   :  { %v10235_v62 = vsel %vm2321_vm3, %v10227_v44, %v10234_v38  ;;  %v10284_v46 = vsel %vm2317_vm1, %v10270_v31, %v10283_v1 }
 0x92b   :  { %v10236_v30 = vsel %vm2323_vm4, %v10231_v16, %v10235_v62  ;;  %v10285_v57 = vsel %vm2319_vm2, %v10274_v51, %v10284_v46 }
 0x92c   :  { %v10239_v60 = vsel %vm10238_vm8, %v10236_v30, 0.0  ;;  %v10286_v5 = vsel %vm2321_vm3, %v10278_v9, %v10285_v57  ;;  %12845 = vmatpush3.bf16.msra.mxu0 %v12844_v11 }
 0x92d   :  { %v10240_v52 = vrot.slane %v10239_v60, 4  ;;  %v10287_v59 = vsel %vm2323_vm4, %v10282_v45, %v10286_v5  ;;  %12846 = vmatprep.subr.bf16.mxu0 %v12966_v61 }
 0x92e   :  { %v10289_v48 = vsel %vm10238_vm8, %v10287_v59, 0.0 }
 0x92f   :  { %v10241_v35 = vadd.f32 %v10240_v52, %v10239_v60  ;;  %v10290_v49 = vrot.slane %v10289_v48, 4 }
 0x930   :  { %12848 = vmatpush3.bf16.msra.mxu0 %v12847_v20  ;;  %v11177_v20 = vld [vmem:[%s18390_s11 + $0xb8] sm:$0xff] }
 0x931   :  { %v10242_v43 = vrot.slane %v10241_v35, 2  ;;  %v10291_v34 = vadd.f32 %v10290_v49, %v10289_v48  ;;  %12849 = vmatprep.subr.bf16.mxu0 %v12966_v61 }
 0x933   :  { %v10243_v41 = vadd.f32 %v10242_v43, %v10241_v35  ;;  %v10292_v25 = vrot.slane %v10291_v34, 2  ;;  %v11172_v43 = vld [vmem:[%s18390_s11 + $0x90] sm:$0xff] }
 0x935   :  { %v10244_v13 = vrot.slane %v10243_v41, 1  ;;  %v10293_v55 = vadd.f32 %v10292_v25, %v10291_v34  ;;  %v11173_v34 = vld [vmem:[%s18390_s11 + $0x98] sm:$0xff] }
 0x936   :  { %v12784_v39 = vpack.c.bf16 %v11173_v34, %v11172_v43 }
 0x937   :  { %v10245_v17 = vadd.f32 %v10244_v13, %v10243_v41  ;;  %v10294_v3 = vrot.slane %v10293_v55, 1 }
 0x939   :  { %v10246_v42 = vmul.f32 0.16666667, %v10245_v17  ;;  %v10295_v36 = vadd.f32 %v10294_v3, %v10293_v55  ;;  %v11176_v55 = vld [vmem:[%s18390_s11 + $0xb0] sm:$0xff]  ;;  %v11178_v3 = vld [vmem:[%s18390_s11 + $0xc0] sm:$0xff] }
 0x93a   :  { %v12790_v17 = vpack.c.bf16 %v11177_v20, %v11176_v55 }
 0x93b   :  { %v10296_v40 = vmul.f32 0.16666667, %v10295_v36  ;;  %v10297_v7 = vmul.f32 %v10246_v42, %v10246_v42 }
 0x93d   :  { %v10298_v47 = vsub.f32 %v10296_v40, %v10297_v7  ;;  %v11180_v40 = vld [vmem:[%s18390_s11 + $0xd0] sm:$0xff]  ;;  %v11181_v7 = vld [vmem:[%s18390_s11 + $0xd8] sm:$0xff] }
 0x93f   :  { %v10299_v8 = vadd.f32 1e-05, %v10298_v47  ;;  %v12796_v47 = vpack.c.bf16 %v11181_v7, %v11180_v40 }
 0x941   :  { %12936 = vrsqrt.f32 %v10299_v8  ;;  %v11182_v8 = vld [vmem:[%s18390_s11 + $0xe0] sm:$0xff] }
 0x94b   :  { %v12937_v19 = vpop.eup %12936 }
 0x94c   :  { %v10301_v58 = vmul.f32 %v12937_v19, %v10137_v63  ;;  %v11183_v63 = vld [vmem:[%s18390_s11 + $0xe8] sm:$0xff] }
 0x94d   :  { %v12799_v19 = vpack.c.bf16 %v11183_v63, %v11182_v8 }
 0x94e   :  { %v10302_v50 = vmul.f32 %v10301_v58, %v10246_v42  ;;  %v10307_v21 = vrot.slane %v10301_v58, %v13210_v26  ;;  %v11179_v42 = vld [vmem:[%s18390_s11 + $0xc8] sm:$0xff]  ;;  %v11184_v58 = vld [vmem:[%s18390_s11 + $0xf0] sm:$0xff] }
 0x94f   :  { %v12793_v36 = vpack.c.bf16 %v11179_v42, %v11178_v3 }
 0x950   :  { %v10316_v54 = vrot.slane %v10307_v21, %v18850_v2  ;;  %v10303_v22 = vsub.f32 %v10138_v18, %v10302_v50  ;;  %v10309_v12 = vcombine.high %v10307_v21, %v10307_v21  ;;  %v11185_v18 = vld [vmem:[%s18390_s11 + $0xf8] sm:$0xff]  ;;  %v11186_v21 = vld [vmem:[%s18390_s11 + $0x100] sm:$0xff] }
 0x951   :  { %v12802_v50 = vpack.c.bf16 %v11185_v18, %v11184_v58 }
 0x952   :  { %v10334_v6 = vmul.f32 %v10316_v54, %v18121_v0  ;;  %v10324_v44 = vcombine.high %v10316_v54, %v10316_v54  ;;  %v10343_v29 = vrot.slane %v10303_v22, %v13210_v26  ;;  %v10323_v31 = vrot.slane %v10309_v12, %v18850_v2  ;;  %v11188_v12 = vld [vmem:[%s18390_s11 + $0x110] sm:$0xff] }
 0x953   :  { %v10325_v16 = vrot.slane %v10316_v54, 1  ;;  %v11187_v54 = vld [vmem:[%s18390_s11 + $0x108] sm:$0xff] }
 0x954   :  { %v10326_v38 = vrot.slane %v10324_v44, 1  ;;  %v10352_v51 = vrot.slane %v10343_v29, %v18850_v2  ;;  %v10338_v1 = vmul.f32 %v10323_v31, %v18116_v53  ;;  %v10345_v9 = vcombine.high %v10343_v29, %v10343_v29  ;;  %v11170_v53 = vld [vmem:[%s18390_s11 + $0x80] sm:$0xff] }
 0x955   :  { %v10335_v62 = vmul.f32 %v10325_v16, %v18125_v23  ;;  %v10327_v46 = vrot.slane %v10323_v31, 1  ;;  %v10336_v33 = vmul.f32 %v10324_v44, %v18127_v27  ;;  %v11171_v23 = vld [vmem:[%s18390_s11 + $0x88] sm:$0xff]  ;;  %v12805_v22 = vpack.c.bf16 %v11187_v54, %v11186_v21  ;;  %v11190_v29 = vld [vmem:[%s18390_s11 + $0x120] sm:$0xff] }
 0x956   :  { %v10337_v45 = vmul.f32 %v10326_v38, %v18142_v56  ;;  %v10360_v0 = vcombine.high %v10352_v51, %v10352_v51  ;;  %v10370_v30 = vadd.f32 %v10352_v51, %v10334_v6  ;;  %v10359_v57 = vrot.slane %v10345_v9, %v18850_v2  ;;  %v11189_v6 = vld [vmem:[%s18390_s11 + $0x118] sm:$0xff]  ;;  %v11191_v31 = vld [vmem:[%s18390_s11 + $0x128] sm:$0xff]  ;;  %v11192_v38 = vld [vmem:[%s18390_s11 + $0x130] sm:$0xff] }
 0x957   :  { %v10361_v37 = vrot.slane %v10352_v51, 1  ;;  %v10339_v32 = vmul.f32 %v10327_v46, %v18123_v4  ;;  %v12781_v10 = vpack.c.bf16 %v11171_v23, %v11170_v53  ;;  %v12808_v44 = vpack.c.bf16 %v11189_v6, %v11188_v12  ;;  %v11195_v9 = vld [vmem:[%s18390_s11 + $0x148] sm:$0xff]  ;;  %v11196_v46 = vld [vmem:[%s18390_s11 + $0x150] sm:$0xff]  ;;  %v10697_v23 = vld [vmem:[%s18392_s13 + $0x78] sm:$0xff] }
 0x958   :  { %v10362_v60 = vrot.slane %v10360_v0, 1  ;;  %v10374_v5 = vadd.f32 %v10359_v57, %v10338_v1  ;;  %v10363_v27 = vrot.slane %v10359_v57, 1  ;;  %v10372_v56 = vadd.f32 %v10360_v0, %v10336_v33  ;;  %v11194_v1 = vld [vmem:[%s18390_s11 + $0x140] sm:$0xff]  ;;  %v11197_v33 = vld [vmem:[%s18390_s11 + $0x158] sm:$0xff]  ;;  %v10696_v53 = vld [vmem:[%s18392_s13 + $0x70] sm:$0xff]  ;;  %s12940_s13 = scalar_lea.vmem %s10783_s28, 32 }
 0x959   :  { %v10371_v52 = vadd.f32 %v10361_v37, %v10335_v62  ;;  %v10398_v35 = vrot.slane %v10370_v30, %v13210_v26  ;;  %v12811_v16 = vpack.c.bf16 %v11191_v31, %v11190_v29  ;;  %v12817_v62 = vpack.c.bf16 %v11195_v9, %v11194_v1  ;;  %v11198_v0 = vld [vmem:[%s18390_s11 + $0x160] sm:$0xff]  ;;  %v11199_v30 = vld [vmem:[%s18390_s11 + $0x168] sm:$0xff]  ;;  %v11200_v37 = vld [vmem:[%s18390_s11 + $0x170] sm:$0xff]  ;;  %p12941_p0 = scmp.ne.s32.totalorder %s10783_s28, %s12940_s13  ;;  %p12946_p2 = scmp.lt.s32.totalorder %s12940_s13, %s12940_s13 }
 0x95a   :  { %v10373_v59 = vadd.f32 %v10362_v60, %v10337_v45  ;;  %v10508_v48 = vrot.slane %v10374_v5, %v13210_v26  ;;  %v10375_v2 = vadd.f32 %v10363_v27, %v10339_v32  ;;  %v10604_v28 = vrot.slane %v10372_v56, %v13210_v26  ;;  %v11201_v32 = vld [vmem:[%s18390_s11 + $0x178] sm:$0xff]  ;;  %v11169_v27 = vld [vmem:[%s18391_s12] ss:$0 sm:$0xff] }
 0x95b   :  { %v10504_v4 = vrot.slane %v10371_v52, %v13210_v26  ;;  %v12820_v45 = vpack.c.bf16 %v11197_v33, %v11196_v46  ;;  %v12823_v57 = vpack.c.bf16 %v11199_v30, %v11198_v0  ;;  %v12826_v60 = vpack.c.bf16 %v11201_v32, %v11200_v37  ;;  %p12947_p3 = por %p12946_p2, %p12945_p1 }
 0x95c   :  { %v10402_v49 = vrot.slane %v10373_v59, %v13210_v26  ;;  %v10608_v15 = vrot.slane %v10375_v2, %v13210_v26  ;;  %v11174_v26 = vld [vmem:[%s18390_s11 + $0xa0] sm:$0xff]  ;;  %v12850_v5 = vpack.c.bf16 %v10697_v23, %v10696_v53 }
 0x95d   :  { %v10509_v11 = vsel %vm2315_vm0, %v10508_v48, %v10504_v4  ;;  %v12787_v13 = vpack.c.bf16 %v11175_v14, %v11174_v26  ;;  %v11202_v59 = vld [vmem:[%s18393_s14] ss:$0 sm:$0xff]  ;;  %p12948_p4 = pnand %p12947_p3, %p12941_p0 }
 0x95e   :  { %v10403_v41 = vsel %vm2315_vm0, %v10402_v49, %v10398_v35  ;;  %v18249_v25 = vsel %vm2315_vm0, %v10608_v15, %v10604_v28  ;;  %12851 = vmatpush3.bf16.msra.mxu0 %v12850_v5 }
 0x95f   :  { %12233 = vmatmul.mubr.f32.vlgmr.msra.gmra.mrb[20].mxu1 %v10403_v41 }
 0x960   :  { %12782 = vmatpush3.bf16.msra.mxu1 %v12781_v10  ;;  %12267 = vmatprep.mubr.msk.f32.mxu1 %vm12967_vm7, %v18822_v24 }
 0x961   :  { %12783 = vmatprep.subr.bf16.mxu1 %v12966_v61 }
 0x964   :  { %12785 = vmatpush3.bf16.msra.mxu1 %v12784_v39 }
 0x965   :  { %12786 = vmatprep.subr.bf16.mxu1 %v12966_v61 }
 0x968   :  { %12788 = vmatpush3.bf16.msra.mxu1 %v12787_v13 }
 0x969   :  { %12789 = vmatprep.subr.bf16.mxu1 %v12966_v61 }
 0x96c   :  { %12791 = vmatpush3.bf16.msra.mxu1 %v12790_v17 }
 0x96d   :  { %12792 = vmatprep.subr.bf16.mxu1 %v12966_v61 }
 0x970   :  { %12794 = vmatpush3.bf16.msra.mxu1 %v12793_v36 }
 0x971   :  { %12795 = vmatprep.subr.bf16.mxu1 %v12966_v61 }
 0x974   :  { %12797 = vmatpush3.bf16.msra.mxu1 %v12796_v47 }
 0x975   :  { %12798 = vmatprep.subr.bf16.mxu1 %v12966_v61 }
 0x978   :  { %12800 = vmatpush3.bf16.msra.mxu1 %v12799_v19 }
 0x979   :  { %12801 = vmatprep.subr.bf16.mxu1 %v12966_v61 }
 0x97c   :  { %12803 = vmatpush3.bf16.msra.mxu1 %v12802_v50 }
 0x97d   :  { %12804 = vmatprep.subr.bf16.mxu1 %v12966_v61 }
 0x97f   :  { %12268 = vmatmul.mubr.f32.vlgmr.msra.gmra.mrb[20].mxu1 %v10509_v11 }
 0x980   :  { %12806 = vmatpush3.bf16.msra.mxu1 %v12805_v22  ;;  %12302 = vmatprep.mubr.msk.f32.mxu1 %vm12967_vm7, %v18822_v24  ;;  %v11193_v24 = vld [vmem:[%s18390_s11 + $0x138] sm:$0xff] }
 0x981   :  { %12807 = vmatprep.subr.bf16.mxu1 %v12966_v61  ;;  %v12814_v51 = vpack.c.bf16 %v11193_v24, %v11192_v38 }
 0x984   :  { %12809 = vmatpush3.bf16.msra.mxu1 %v12808_v44 }
 0x985   :  { %12810 = vmatprep.subr.bf16.mxu1 %v12966_v61 }
 0x988   :  { %12812 = vmatpush3.bf16.msra.mxu1 %v12811_v16 }
 0x989   :  { %12813 = vmatprep.subr.bf16.mxu1 %v12966_v61 }
 0x98c   :  { %12815 = vmatpush3.bf16.msra.mxu1 %v12814_v51 }
 0x98d   :  { %12816 = vmatprep.subr.bf16.mxu1 %v12966_v61 }
 0x990   :  { %12818 = vmatpush3.bf16.msra.mxu1 %v12817_v62 }
 0x991   :  { %12819 = vmatprep.subr.bf16.mxu1 %v12966_v61 }
 0x994   :  { %12821 = vmatpush3.bf16.msra.mxu1 %v12820_v45 }
 0x995   :  { %12822 = vmatprep.subr.bf16.mxu1 %v12966_v61 }
 0x998   :  { %12824 = vmatpush3.bf16.msra.mxu1 %v12823_v57 }
 0x999   :  { %12825 = vmatprep.subr.bf16.mxu1 %v12966_v61 }
 0x99c   :  { %12827 = vmatpush3.bf16.msra.mxu1 %v12826_v60 }
 0x99f   :  { %12303 = vmatmul.mubr.f32.vlgmr.msra.gmra.mrb[20].mxu1 %v18249_v25 }
 0xa72   :  { %v10677_v52 = vpop.f32.mrb[20].mxu1 }
 0xa73   :  { %v12852_v56 = vadd.f32 %v11169_v27, %v10677_v52  ;;  %v12304_v61 = vpop.f32.mrb[21].mxu1 }
 0xa75   :  { %12338 = vmatmul.mubr.f32.vlgmr.msra.gmra.mrb[42].mxu0 %v12852_v56 }
 0xb48   :  { %v10771_v48 = vpop.f32.mrb[42].mxu0 }
 0xb49   :  { %v10772_v2 = vadd.f32 %v11202_v59, %v10771_v48  ;;  %v12339_v10 = vpop.f32.mrb[43].mxu0 }
 0xb4b   :  { %10775 = vst [vmem:[#allocation3] sm:$0x3] %v10772_v2 }
 0xb4c   :  { %12951 = shalt.err (!%p12948_p4)
}
 0xb4d   :  { %s12952_s30 = scalar_lea.hbm %s18394_s15, 32 }
 0xb4e   :  { %p12953_p5 = scmp.ne.s32.totalorder %s18394_s15, %s12952_s30  ;;  %p12956_p6 = scmp.lt.u32.totalorder %s12952_s30, %s18394_s15 }
 0xb50   :  { %p12958_p7 = pnand %p12956_p6, %p12953_p5 }
 0xb52   :  { %12961 = shalt.err (!%p12958_p7)
}
 0xb53   :  { %10785 = dma.vmem_to_hbm [thread:$0]  %s10783_s28, 32, %s18394_s15, [#allocation4]  }
 0xb54   :  { %12962 = dma.done.wait [#allocation4], 32  }
 0xb55   :  { %12963 = vsyncadd [#allocation4], 4294967264 }
 0xb56   :  { %10789 = vsyncpa [#allocation4], 1 }

</bundles_post_ra>
